<compile_context>
chip_gen: v7x
topology: tpu7x:2x2x1
jax: 0.10.0
libtpu: 0.0.40
codegen_flags: <defaults>
</compile_context>

<pallas_src>
import functools

import jax
import jax.numpy as jnp
from jax.experimental import pallas as pl
from jax.experimental.pallas import tpu as pltpu


# ----------------------------------------------------------------------------- kernels


def _upsample_flat_kernel(x_ref, o_ref, *, H, W, s):
    """Lane-dense path. x_ref: (BC, H*W), o_ref: (BC, H*s*W*s)."""
    bc = x_ref.shape[0]
    # (BC, H*W) -> (BC, H, 1, W, 1) -> broadcast to (BC, H, s, W, s) -> flatten back to lanes.
    # Elementwise-free pixel repeat; the reshapes are in-VMEM relayouts which have plenty of
    # slack since this kernel is HBM-bandwidth bound.
    x = x_ref[...].reshape(bc, H, 1, W, 1)
    y = jnp.broadcast_to(x, (bc, H, s, W, s))
    o_ref[...] = y.reshape(bc, H * s * W * s)


def _upsample_planar_kernel(x_ref, o_ref, *, H, W, s):
    """Fallback path (same minor-dim pattern as the previously-validated kernel).
    x_ref: (BC, H, W), o_ref: (BC, H*s, W*s)."""
    bc = x_ref.shape[0]
    x = x_ref[...][:, :, None, :, None]              # (BC, H, 1, W, 1)
    y = jnp.broadcast_to(x, (bc, H, s, W, s))
    o_ref[...] = y.reshape(bc, H * s, W * s)


# ----------------------------------------------------------------------------- tiling


def _pick_block_planes(nc, plane_in_bytes, plane_out_bytes, itemsize):
    """How many (H, W) planes to process per grid step.

    Sized from the output side (output tile is s^2 x the input tile). Single-copy working set
    is kept around 4 MiB so the double-buffered pipeline plus relayout scratch stays well under
    the 32 MiB scoped-VMEM limit on every TPU generation (v7x included).
    """
    budget = 4 * 1024 * 1024
    per_plane = plane_in_bytes + plane_out_bytes
    bc = max(1, budget // per_plane)
    bc = min(bc, nc)

    # Sublane tile for this dtype (f32: 8, bf16: 16, int8: 32).
    sub = 8 * max(1, 4 // max(1, itemsize))

    # Keep >= ~4 parallel grid steps when there are enough planes (v7x has 2 TensorCores).
    if nc >= 4 * sub:
        bc = min(bc, -(-nc // 4))

    # Second-minor block dim must be a multiple of the sublane tile or equal the full dim.
    if bc != nc:
        if bc >= sub:
            bc -= bc % sub
        else:
            bc = min(nc, sub)
    return int(bc)


# ----------------------------------------------------------------------------- wrapper


def interpolate_nearest(x, scale):
    """x: (N, C, H, W) -> (N, C, H*scale, W*scale), nearest-neighbor upsampling.

    Matches torch.nn.functional.interpolate(x, scale_factor=scale, mode='nearest')
    for integer scale factors.
    """
    # TODO(synk): non-integer scale factors (PyTorch's floor(dst*in/out) indexing) not implemented.
    s = int(scale)
    assert s == scale and s >= 1, "only integer scale factors supported"

    N, C, H, W = x.shape
    Ho, Wo = H * s, W * s
    if s == 1:
        return x

    nc = N * C
    itemsize = jnp.dtype(x.dtype).itemsize
    bc = _pick_block_planes(nc, H * W * itemsize, Ho * Wo * itemsize, itemsize)

    cparams = pltpu.CompilerParams(
        dimension_semantics=("parallel",),
        vmem_limit_bytes=32 * 1024 * 1024,
    )

    def run_flat():
        kern = functools.partial(_upsample_flat_kernel, H=H, W=W, s=s)
        out_flat = pl.pallas_call(
            kern,
            out_shape=jax.ShapeDtypeStruct((nc, Ho * Wo), x.dtype),
            grid_spec=pltpu.PrefetchScalarGridSpec(
                num_scalar_prefetch=0,
                grid=(pl.cdiv(nc, bc),),
                in_specs=[pl.BlockSpec((bc, H * W), lambda i: (i, 0))],
                out_specs=pl.BlockSpec((bc, Ho * Wo), lambda i: (i, 0)),
            ),
            compiler_params=cparams,
        )(x.reshape(nc, H * W))               # contiguous (free) reshape
        return out_flat.reshape(N, C, Ho, Wo)  # contiguous (free) reshape

    def run_planar(bcp):
        kern = functools.partial(_upsample_planar_kernel, H=H, W=W, s=s)
        out3 = pl.pallas_call(
            kern,
            out_shape=jax.ShapeDtypeStruct((nc, Ho, Wo), x.dtype),
            grid_spec=pltpu.PrefetchScalarGridSpec(
                num_scalar_prefetch=0,
                grid=(pl.cdiv(nc, bcp),),
                in_specs=[pl.BlockSpec((bcp, H, W), lambda i: (i, 0, 0))],
                out_specs=pl.BlockSpec((bcp, Ho, Wo), lambda i: (i, 0, 0)),
            ),
            compiler_params=cparams,
        )(x.reshape(nc, H, W))
        return out3.reshape(N, C, Ho, Wo)

    try:
        return run_flat()
    except Exception:
        # Mosaic on this jax version could not lower the in-kernel flatten/unflatten reshapes;
        # fall back to the planar-tile variant (previously validated), still batched over planes.
        try:
            return run_planar(bc)
        except Exception:
            return run_planar(1)


def _reference_nearest(x, scale):
    s = int(scale)
    return jnp.repeat(jnp.repeat(x, s, axis=2), s, axis=3)


if __name__ == "__main__":
    key = jax.random.PRNGKey(0)
    N, C, H, W = 2, 4, 16, 16
    scale = 2

    x = jax.random.normal(key, (N, C, H, W), dtype=jnp.float32)

    out = interpolate_nearest(x, scale)
    out = jax.block_until_ready(out)

    ref = _reference_nearest(x, scale)
    assert out.shape == (N, C, H * scale, W * scale), out.shape
    assert jnp.allclose(out, ref), "mismatch vs reference nearest upsample"

    print("KERNEL_OK")
</pallas_src>

<mosaic_0001>
module attributes {stable_mosaic.version = 11 : i64} {
  func.func @_upsample_flat_kernel(%arg0: i32, %arg1: memref<8x256xf32, #tpu.memory_space<vmem>>, %arg2: memref<8x1024xf32, #tpu.memory_space<vmem>>) attributes {dimension_semantics = [#tpu.dimension_semantics<parallel>], iteration_bounds = array<i64: 1>, scalar_prefetch = 0 : i64, scratch_operands = 0 : i64, tpu.core_type = #tpu.core_type<tc>, window_params = [{transform_indices = @transform_0, window_bounds = array<i64: 8, 256>}, {transform_indices = @transform_1, window_bounds = array<i64: 8, 1024>}]} {
    %c0 = arith.constant 0 : index
    %c0_0 = arith.constant 0 : index
    %0 = vector.load %arg1[%c0, %c0_0] : memref<8x256xf32, #tpu.memory_space<vmem>>, vector<8x256xf32>
    %1 = vector.shape_cast %0 : vector<8x256xf32> to vector<8x16x1x16x1xf32>
    %2 = vector.shape_cast %1 : vector<8x16x1x16x1xf32> to vector<8x16x1x16x1xf32>
    %3 = vector.broadcast %2 : vector<8x16x1x16x1xf32> to vector<8x16x2x16x2xf32>
    %4 = vector.shape_cast %3 : vector<8x16x2x16x2xf32> to vector<8x1024xf32>
    %c0_1 = arith.constant 0 : index
    %c0_2 = arith.constant 0 : index
    %5 = vector.load %arg2[%c0_1, %c0_2] : memref<8x1024xf32, #tpu.memory_space<vmem>>, vector<8x1024xf32>
    tpu.vector_store %arg2[%c0_1, %c0_2], %4 {strides = array<i32>} : memref<8x1024xf32, #tpu.memory_space<vmem>>, vector<8x1024xf32>,
    return
  }
  func.func @transform_0(%arg0: i32) -> (i32, i32) {
    %c0_i32 = arith.constant 0 : i32
    %c0_i32_0 = arith.constant 0 : i32
    return %arg0, %c0_i32 : i32, i32
  }
  func.func @transform_1(%arg0: i32) -> (i32, i32) {
    %c0_i32 = arith.constant 0 : i32
    %c0_i32_0 = arith.constant 0 : i32
    return %arg0, %c0_i32 : i32, i32
  }
}

module attributes {stable_mosaic.version = 11 : i64} {
  func.func @_upsample_planar_kernel(%arg0: i32, %arg1: memref<8x16x16xf32, #tpu.memory_space<vmem>>, %arg2: memref<8x32x32xf32, #tpu.memory_space<vmem>>) attributes {dimension_semantics = [#tpu.dimension_semantics<parallel>], iteration_bounds = array<i64: 1>, scalar_prefetch = 0 : i64, scratch_operands = 0 : i64, tpu.core_type = #tpu.core_type<tc>, window_params = [{transform_indices = @transform_0, window_bounds = array<i64: 8, 16, 16>}, {transform_indices = @transform_1, window_bounds = array<i64: 8, 32, 32>}]} {
    %c0 = arith.constant 0 : index
    %c0_0 = arith.constant 0 : index
    %c0_1 = arith.constant 0 : index
    %0 = vector.load %arg1[%c0, %c0_0, %c0_1] : memref<8x16x16xf32, #tpu.memory_space<vmem>>, vector<8x16x16xf32>
    %1 = vector.shape_cast %0 : vector<8x16x16xf32> to vector<8x16x1x16x1xf32>
    %2 = vector.shape_cast %1 : vector<8x16x1x16x1xf32> to vector<8x16x1x16x1xf32>
    %3 = vector.broadcast %2 : vector<8x16x1x16x1xf32> to vector<8x16x2x16x2xf32>
    %4 = vector.shape_cast %3 : vector<8x16x2x16x2xf32> to vector<8x32x32xf32>
    %c0_2 = arith.constant 0 : index
    %c0_3 = arith.constant 0 : index
    %c0_4 = arith.constant 0 : index
    %5 = vector.load %arg2[%c0_2, %c0_3, %c0_4] : memref<8x32x32xf32, #tpu.memory_space<vmem>>, vector<8x32x32xf32>
    tpu.vector_store %arg2[%c0_2, %c0_3, %c0_4], %4 {strides = array<i32>} : memref<8x32x32xf32, #tpu.memory_space<vmem>>, vector<8x32x32xf32>,
    return
  }
  func.func @transform_0(%arg0: i32) -> (i32, i32, i32) {
    %c0_i32 = arith.constant 0 : i32
    %c0_i32_0 = arith.constant 0 : i32
    %c0_i32_1 = arith.constant 0 : i32
    return %arg0, %c0_i32, %c0_i32_0 : i32, i32, i32
  }
  func.func @transform_1(%arg0: i32) -> (i32, i32, i32) {
    %c0_i32 = arith.constant 0 : i32
    %c0_i32_0 = arith.constant 0 : i32
    %c0_i32_1 = arith.constant 0 : i32
    return %arg0, %c0_i32, %c0_i32_0 : i32, i32, i32
  }
}

module attributes {stable_mosaic.version = 11 : i64} {
  func.func @_upsample_planar_kernel(%arg0: i32, %arg1: memref<1x16x16xf32, #tpu.memory_space<vmem>>, %arg2: memref<1x32x32xf32, #tpu.memory_space<vmem>>) attributes {dimension_semantics = [#tpu.dimension_semantics<parallel>], iteration_bounds = array<i64: 8>, scalar_prefetch = 0 : i64, scratch_operands = 0 : i64, tpu.core_type = #tpu.core_type<tc>, window_params = [{transform_indices = @transform_0, window_bounds = array<i64: 1, 16, 16>}, {transform_indices = @transform_1, window_bounds = array<i64: 1, 32, 32>}]} {
    %c0 = arith.constant 0 : index
    %c0_0 = arith.constant 0 : index
    %c0_1 = arith.constant 0 : index
    %0 = vector.load %arg1[%c0, %c0_0, %c0_1] : memref<1x16x16xf32, #tpu.memory_space<vmem>>, vector<1x16x16xf32>
    %1 = vector.shape_cast %0 : vector<1x16x16xf32> to vector<1x16x1x16x1xf32>
    %2 = vector.shape_cast %1 : vector<1x16x1x16x1xf32> to vector<1x16x1x16x1xf32>
    %3 = vector.broadcast %2 : vector<1x16x1x16x1xf32> to vector<1x16x2x16x2xf32>
    %4 = vector.shape_cast %3 : vector<1x16x2x16x2xf32> to vector<1x32x32xf32>
    %c0_2 = arith.constant 0 : index
    %c0_3 = arith.constant 0 : index
    %c0_4 = arith.constant 0 : index
    %5 = vector.load %arg2[%c0_2, %c0_3, %c0_4] : memref<1x32x32xf32, #tpu.memory_space<vmem>>, vector<1x32x32xf32>
    tpu.vector_store %arg2[%c0_2, %c0_3, %c0_4], %4 {strides = array<i32>} : memref<1x32x32xf32, #tpu.memory_space<vmem>>, vector<1x32x32xf32>,
    return
  }
  func.func @transform_0(%arg0: i32) -> (i32, i32, i32) {
    %c0_i32 = arith.constant 0 : i32
    %c0_i32_0 = arith.constant 0 : i32
    %c0_i32_1 = arith.constant 0 : i32
    return %arg0, %c0_i32, %c0_i32_0 : i32, i32, i32
  }
  func.func @transform_1(%arg0: i32) -> (i32, i32, i32) {
    %c0_i32 = arith.constant 0 : i32
    %c0_i32_0 = arith.constant 0 : i32
    %c0_i32_1 = arith.constant 0 : i32
    return %arg0, %c0_i32, %c0_i32_0 : i32, i32, i32
  }
}

</mosaic_0001>

<bundles_post_ra>
// kernel: tpu_custom_call.1
= control target key start
LH: loop header
LB: loop body
LE: loop exit
PB: predicated region body
PF: predicated region fallthrough
CT: control target
= control target key end

     0   :  { %6 = vsyncpa [#allocation3], 0  ;;  %s18296_s0 = inlined_call_operand.hbm [shape: f32[8,16,16], index: 0, kind: input, shape index: {}]   ;;  %s18297_s1 = inlined_call_operand.hbm [shape: f32[8,32,32], index: 1, kind: output, shape index: {}]  }
   0x1   :  { %7 = vsyncpa [#allocation4], 0  ;;  %s10636_s6 = smov [#allocation2]   ;;  %s10588_s10 = scalar_lea.hbm %s18296_s0, 2048 }
   0x2   :  { %s13_s7 = sshll.u32 %s10636_s6, 4  ;;  %p10589_p0 = scmp.ne.s32.totalorder %s18296_s0, %s10588_s10  ;;  %s14_s7 = int_to_ptr.vmem [resolvable:$true] %s13_s7 }
   0x3   :  { %p10592_p1 = scmp.lt.u32.totalorder %s10588_s10, %s18296_s0 }
   0x5   :  { %p10594_p2 = pnand %p10592_p1, %p10589_p0 }
   0x7   :  { %10597 = shalt.err (!%p10594_p2)
}
   0x8   :  { %s10598_s15 = scalar_lea.vmem %s14_s7, 2048  ;;  %p10603_p4 = scmp.lt.s32.totalorder %s14_s7, %s14_s7 }
   0x9   :  { %p10599_p3 = scmp.ne.s32.totalorder %s14_s7, %s10598_s15  ;;  %p10604_p5 = scmp.lt.s32.totalorder %s10598_s15, %s10598_s15 }
   0xb   :  { %p10605_p6 = por %p10604_p5, %p10603_p4 }
   0xd   :  { %p10606_p7 = pnand %p10605_p6, %p10599_p3 }
   0xf   :  { %10609 = shalt.err (!%p10606_p7)
}
  0x10   :  { %s10637_s16 = smov 128   ;;  %s10638_s17 = smov 8  }
  0x11   :  { %19 = dma.hbm_to_vmem [thread:$0]  %s18296_s0, 2048, %s14_s7, [#allocation3], %s10637_s16, %s10637_s16, %s10638_s17  }
  0x12   :  { %10632 = dma.done.wait [#allocation3], 2048  }
  0x13   :  { %10633 = vsyncadd [#allocation3], 4294965248  ;;  %v39_v0 = vlaneseq  ;;  %v23_v4 = vld [vmem:[#allocation2] sm:$0xff]  ;;  %v24_v19 = vld [vmem:[#allocation2 + $0x8] sm:$0xff]  ;;  %v10639_v43 = vmov 1983009808  }
  0x14   :  { %v25_v28 = vld [vmem:[#allocation2 + $0x10] sm:$0xff]  ;;  %v26_v37 = vld [vmem:[#allocation2 + $0x18] sm:$0xff]  ;;  %v1450_v44 = vunpack.c.l.s4 %v10639_v43  ;;  %v10640_v50 = vmov 1934713408   ;;  %v10742_v57 = vld [vmem:[#allocation2 + $0x20] sm:$0xff]  ;;  %s10641_s0 = smov 2  }
  0x15   :  { %v10681_v1 = vshrl.u32 %v39_v0, 7  ;;  %v1482_v51 = vunpack.c.l.s4 %v10640_v50  ;;  %s10642_s20 = smov 4   ;;  %s10643_s21 = smov 6   ;;  %vm10023_vm0 = vcmask 15360   ;;  %vm10056_vm1 = vcmask 31744  }
  0x16   :  { %v1451_v48 = vunpack.c.0.s8 %v1450_v44  ;;  %s10644_s22 = smov 10   ;;  %s10645_s23 = smov 12   ;;  %vm10089_vm2 = vcmask 48128   ;;  %vm10122_vm3 = vcmask 64512   ;;  %vm10155_vm4 = vcmask 80896  }
  0x17   :  { %v10684_v2 = vsub.s32 1, %v10681_v1  ;;  %v10687_v3 = vsub.s32 0, %v10681_v1  ;;  %v10692_v7 = vsub.s32 2, %v10681_v1  ;;  %v10696_v9 = vsub.s32 3, %v10681_v1  ;;  %s10646_s24 = smov 14   ;;  %s10647_s25 = smov 16  }
  0x18   :  { %v10700_v11 = vsub.s32 4, %v10681_v1  ;;  %v10704_v13 = vsub.s32 5, %v10681_v1  ;;  %v10708_v15 = vsub.s32 6, %v10681_v1  ;;  %v10712_v17 = vsub.s32 7, %v10681_v1  ;;  %s10648_s26 = smov 18   ;;  %s10649_s27 = smov 20  }
  0x19   :  { %v53_v5 = vrot.slane %v23_v4, %v10684_v2  ;;  %v42_v6 = vrot.slane %v23_v4, %v10687_v3  ;;  %v64_v8 = vrot.slane %v23_v4, %v10692_v7  ;;  %v75_v10 = vrot.slane %v23_v4, %v10696_v9  ;;  %s10650_s28 = smov 22   ;;  %s10651_s29 = smov 24  }
  0x1a   :  { %v86_v12 = vrot.slane %v23_v4, %v10700_v11  ;;  %v97_v14 = vrot.slane %v23_v4, %v10704_v13  ;;  %v108_v16 = vrot.slane %v23_v4, %v10708_v15  ;;  %v119_v18 = vrot.slane %v23_v4, %v10712_v17  ;;  %s10652_s30 = smov 26   ;;  %s10653_s2 = smov 28  }
  0x1b   :  { %55 = vbcast.lane.b32.xlu1 %v53_v5, 256  ;;  %44 = vbcast.lane.b32.xlu0 %v42_v6, 256  ;;  %v130_v20 = vrot.slane %v24_v19, %v10687_v3  ;;  %v141_v21 = vrot.slane %v24_v19, %v10684_v2  ;;  %v152_v22 = vrot.slane %v24_v19, %v10692_v7  ;;  %v1483_v58 = vunpack.c.0.s8 %v1482_v51  ;;  %v10887_v51 = vld [vmem:[#allocation2 + $0x28] sm:$0xff]  ;;  %s10654_s3 = smov 30   ;;  %s10655_s4 = smov [#allocation5]  }
  0x1c   :  { %v163_v23 = vrot.slane %v24_v19, %v10696_v9  ;;  %v174_v24 = vrot.slane %v24_v19, %v10700_v11  ;;  %v185_v25 = vrot.slane %v24_v19, %v10704_v13  ;;  %v196_v26 = vrot.slane %v24_v19, %v10708_v15  ;;  %s10556_s5 = sshll.u32 %s10655_s4, 4  ;;  %s10557_s5 = int_to_ptr.vmem [resolvable:$true] %s10556_s5 }
  0x1d   :  { %v207_v27 = vrot.slane %v24_v19, %v10712_v17  ;;  %v218_v29 = vrot.slane %v25_v28, %v10687_v3  ;;  %v229_v30 = vrot.slane %v25_v28, %v10684_v2  ;;  %v240_v31 = vrot.slane %v25_v28, %v10692_v7  ;;  %s10610_s6 = scalar_lea.vmem %s10557_s5, 4096  ;;  %p10615_p9 = scmp.lt.s32.totalorder %s10557_s5, %s10557_s5 }
  0x1e   :  { %v251_v32 = vrot.slane %v25_v28, %v10696_v9  ;;  %v262_v33 = vrot.slane %v25_v28, %v10700_v11  ;;  %v273_v34 = vrot.slane %v25_v28, %v10704_v13  ;;  %v284_v35 = vrot.slane %v25_v28, %v10708_v15  ;;  %p10611_p8 = scmp.ne.s32.totalorder %s10557_s5, %s10610_s6  ;;  %p10616_p10 = scmp.lt.s32.totalorder %s10610_s6, %s10610_s6 }
  0x1f   :  { %59 = vbcast.lane.b32.xlu1 %v53_v5, 264  ;;  %48 = vbcast.lane.b32.xlu0 %v42_v6, 264  ;;  %v295_v36 = vrot.slane %v25_v28, %v10712_v17  ;;  %v306_v38 = vrot.slane %v26_v37, %v10687_v3  ;;  %v317_v39 = vrot.slane %v26_v37, %v10684_v2  ;;  %vm10188_vm5 = vcmask 97280  }
  0x20   :  { %v328_v40 = vrot.slane %v26_v37, %v10692_v7  ;;  %v339_v41 = vrot.slane %v26_v37, %v10696_v9  ;;  %v350_v42 = vrot.slane %v26_v37, %v10700_v11  ;;  %v361_v45 = vrot.slane %v26_v37, %v10704_v13  ;;  %p10617_p11 = por %p10616_p10, %p10615_p9 }
  0x21   :  { %v372_v49 = vrot.slane %v26_v37, %v10708_v15  ;;  %v10739_v54 = vsub.s32 %v1451_v48, %v10681_v1  ;;  %v383_v56 = vrot.slane %v26_v37, %v10712_v17  ;;  %v394_v63 = vrot.slane %v10742_v57, %v10687_v3 }
  0x22   :  { %v10748_v0 = vsub.s32 %v1483_v58, %v10681_v1  ;;  %v405_v19 = vrot.slane %v10742_v57, %v10684_v2  ;;  %vm10221_vm6 = vcmask 113664   ;;  %vm10254_vm7 = vcmask 130048   ;;  %p10618_p12 = pnand %p10617_p11, %p10611_p8 }
  0x23   :  { %70 = vbcast.lane.b32.xlu1 %v64_v8, 264  ;;  %66 = vbcast.lane.b32.xlu0 %v64_v8, 256  ;;  %19347 = vst [vmem:[#allocation8_spill] sm:$0xff] %v10739_v54  ;;  %vm10287_vm8 = vcmask 146432   ;;  %vm10320_vm9 = vcmask 162816   ;;  %vm10353_vm10 = vcmask 179200  }
  0x24   :  { %19348 = vst [vmem:[#allocation9_spill] sm:$0xff] %v10748_v0  ;;  %vm10386_vm11 = vcmask 195584   ;;  %vm10419_vm12 = vcmask 211968   ;;  %vm10452_vm13 = vcmask 228352   ;;  %vm10485_vm14 = vcmask 244736  }
  0x25   :  { %vm10518_vm15 = vcmask 261120  }
  0x27   :  { %81 = vbcast.lane.b32.xlu1 %v75_v10, 264  ;;  %77 = vbcast.lane.b32.xlu0 %v75_v10, 256 }
  0x2b   :  { %92 = vbcast.lane.b32.xlu1 %v86_v12, 264  ;;  %88 = vbcast.lane.b32.xlu0 %v86_v12, 256 }
  0x2f   :  { %103 = vbcast.lane.b32.xlu1 %v97_v14, 264  ;;  %99 = vbcast.lane.b32.xlu0 %v97_v14, 256 }
  0x33   :  { %114 = vbcast.lane.b32.xlu1 %v108_v16, 264  ;;  %110 = vbcast.lane.b32.xlu0 %v108_v16, 256 }
  0x37   :  { %125 = vbcast.lane.b32.xlu1 %v119_v18, 264  ;;  %121 = vbcast.lane.b32.xlu0 %v119_v18, 256 }
  0x3b   :  { %136 = vbcast.lane.b32.xlu1 %v130_v20, 264  ;;  %132 = vbcast.lane.b32.xlu0 %v130_v20, 256 }
  0x3f   :  { %147 = vbcast.lane.b32.xlu1 %v141_v21, 264  ;;  %143 = vbcast.lane.b32.xlu0 %v141_v21, 256 }
  0x43   :  { %158 = vbcast.lane.b32.xlu1 %v152_v22, 264  ;;  %154 = vbcast.lane.b32.xlu0 %v152_v22, 256 }
  0x47   :  { %169 = vbcast.lane.b32.xlu1 %v163_v23, 264  ;;  %165 = vbcast.lane.b32.xlu0 %v163_v23, 256 }
  0x4b   :  { %180 = vbcast.lane.b32.xlu1 %v174_v24, 264  ;;  %176 = vbcast.lane.b32.xlu0 %v174_v24, 256 }
  0x4f   :  { %191 = vbcast.lane.b32.xlu1 %v185_v25, 264  ;;  %187 = vbcast.lane.b32.xlu0 %v185_v25, 256  ;;  %v416_v25 = vrot.slane %v10742_v57, %v10692_v7 }
  0x53   :  { %202 = vbcast.lane.b32.xlu1 %v196_v26, 264  ;;  %198 = vbcast.lane.b32.xlu0 %v196_v26, 256 }
  0x57   :  { %213 = vbcast.lane.b32.xlu1 %v207_v27, 264  ;;  %209 = vbcast.lane.b32.xlu0 %v207_v27, 256 }
  0x5b   :  { %224 = vbcast.lane.b32.xlu1 %v218_v29, 264  ;;  %220 = vbcast.lane.b32.xlu0 %v218_v29, 256 }
  0x5f   :  { %235 = vbcast.lane.b32.xlu1 %v229_v30, 264  ;;  %231 = vbcast.lane.b32.xlu0 %v229_v30, 256 }
  0x63   :  { %246 = vbcast.lane.b32.xlu1 %v240_v31, 264  ;;  %242 = vbcast.lane.b32.xlu0 %v240_v31, 256 }
  0x67   :  { %257 = vbcast.lane.b32.xlu1 %v251_v32, 264  ;;  %253 = vbcast.lane.b32.xlu0 %v251_v32, 256 }
  0x6b   :  { %268 = vbcast.lane.b32.xlu1 %v262_v33, 264  ;;  %264 = vbcast.lane.b32.xlu0 %v262_v33, 256 }
  0x6f   :  { %279 = vbcast.lane.b32.xlu1 %v273_v34, 264  ;;  %275 = vbcast.lane.b32.xlu0 %v273_v34, 256 }
  0x73   :  { %290 = vbcast.lane.b32.xlu1 %v284_v35, 264  ;;  %286 = vbcast.lane.b32.xlu0 %v284_v35, 256 }
  0x77   :  { %301 = vbcast.lane.b32.xlu1 %v295_v36, 264  ;;  %297 = vbcast.lane.b32.xlu0 %v295_v36, 256 }
  0x7b   :  { %312 = vbcast.lane.b32.xlu1 %v306_v38, 264  ;;  %308 = vbcast.lane.b32.xlu0 %v306_v38, 256 }
  0x7f   :  { %323 = vbcast.lane.b32.xlu1 %v317_v39, 264  ;;  %319 = vbcast.lane.b32.xlu0 %v317_v39, 256 }
  0x83   :  { %334 = vbcast.lane.b32.xlu1 %v328_v40, 264  ;;  %330 = vbcast.lane.b32.xlu0 %v328_v40, 256 }
  0x87   :  { %345 = vbcast.lane.b32.xlu1 %v339_v41, 264  ;;  %341 = vbcast.lane.b32.xlu0 %v339_v41, 256 }
  0x8b   :  { %356 = vbcast.lane.b32.xlu1 %v350_v42, 264  ;;  %352 = vbcast.lane.b32.xlu0 %v350_v42, 256 }
  0x8d   :  { %v56_v46 = vpop.permute.xlu1 %55  ;;  %v45_v47 = vpop.permute.xlu0 %44 }
  0x8e   :  { %v1447_v55 = vcombine.low %v45_v47, %v56_v46  ;;  %v1448_v59 = vcombine.high %v45_v47, %v56_v46 }
  0x8f   :  { %367 = vbcast.lane.b32.xlu1 %v361_v45, 264  ;;  %363 = vbcast.lane.b32.xlu0 %v361_v45, 256  ;;  %v427_v45 = vrot.slane %v10742_v57, %v10696_v9 }
  0x90   :  { %v1455_v62 = vrot.slane %v1447_v55, %v10739_v54  ;;  %v1462_v4 = vrot.slane %v1448_v59, %v10739_v54 }
  0x91   :  { %v60_v52 = vpop.permute.xlu1 %59  ;;  %v49_v53 = vpop.permute.xlu0 %48 }
  0x92   :  { %v1479_v8 = vcombine.low %v1455_v62, %v1455_v62  ;;  %v1480_v16 = vcombine.high %v1455_v62, %v1455_v62  ;;  %v1863_v18 = vcombine.low %v49_v53, %v60_v52  ;;  %v1864_v20 = vcombine.high %v49_v53, %v60_v52 }
  0x93   :  { %378 = vbcast.lane.b32.xlu1 %v372_v49, 264  ;;  %374 = vbcast.lane.b32.xlu0 %v372_v49, 256  ;;  %v1495_v26 = vcombine.low %v1462_v4, %v1462_v4  ;;  %v1496_v27 = vcombine.high %v1462_v4, %v1462_v4  ;;  %v438_v4 = vrot.slane %v10742_v57, %v10700_v11 }
  0x94   :  { %v10761_v29 = vrot.slane %v1479_v8, %v10748_v0  ;;  %v1871_v34 = vrot.slane %v1863_v18, %v10739_v54  ;;  %v10765_v35 = vrot.slane %v1864_v20, %v10739_v54  ;;  %v10771_v37 = vrot.slane %v1480_v16, %v10748_v0 }
  0x95   :  { %v71_v60 = vpop.permute.xlu1 %70  ;;  %v67_v61 = vpop.permute.xlu0 %66  ;;  %v10790_v46 = vrot.slane %v1495_v26, %v10748_v0  ;;  %v10793_v47 = vrot.slane %v1496_v27, %v10748_v0 }
  0x96   :  { %19349 = vst [vmem:[#allocation10_spill] sm:$0xff] %v10761_v29  ;;  %19350 = vst [vmem:[#allocation11_spill] sm:$0xff] %v10771_v37  ;;  %v1895_v52 = vcombine.low %v1871_v34, %v1871_v34  ;;  %v1896_v53 = vcombine.high %v1871_v34, %v1871_v34  ;;  %v1911_v55 = vcombine.low %v10765_v35, %v10765_v35 }
  0x97   :  { %389 = vbcast.lane.b32.xlu1 %v383_v56, 264  ;;  %385 = vbcast.lane.b32.xlu0 %v383_v56, 256  ;;  %19355 = vst [vmem:[#allocation16_spill] sm:$0xff] %v10790_v46  ;;  %19356 = vst [vmem:[#allocation17_spill] sm:$0xff] %v10793_v47 }
  0x98   :  { %v10825_v16 = vrot.slane %v1895_v52, %v10748_v0 }
  0x99   :  { %v82_v5 = vpop.permute.xlu1 %81  ;;  %v78_v6 = vpop.permute.xlu0 %77 }
  0x9a   :  { %v1879_v10 = vcombine.low %v71_v60, %v82_v5  ;;  %v1463_v12 = vcombine.low %v67_v61, %v78_v6  ;;  %v1464_v14 = vcombine.high %v67_v61, %v78_v6  ;;  %v1880_v21 = vcombine.high %v71_v60, %v82_v5  ;;  %19359 = vst [vmem:[#allocation20_spill] sm:$0xff] %v10825_v16 }
  0x9b   :  { %400 = vbcast.lane.b32.xlu1 %v394_v63, 264  ;;  %396 = vbcast.lane.b32.xlu0 %v394_v63, 256  ;;  %v493_v61 = vrot.slane %v10887_v51, %v10684_v2 }
  0x9c   :  { %v1471_v22 = vrot.slane %v1463_v12, %v10739_v54  ;;  %v1478_v1 = vrot.slane %v1464_v14, %v10739_v54  ;;  %v1887_v28 = vrot.slane %v1879_v10, %v10739_v54  ;;  %v10768_v36 = vrot.slane %v1880_v21, %v10739_v54 }
  0x9d   :  { %v10755_v23 = vpop.permute.xlu1 %92  ;;  %v89_v24 = vpop.permute.xlu0 %88  ;;  %v449_v12 = vrot.slane %v10742_v57, %v10704_v13  ;;  %v10830_v21 = vrot.slane %v1896_v53, %v10748_v0 }
  0x9e   :  { %v1511_v30 = vcombine.low %v1471_v22, %v1471_v22  ;;  %v1512_v31 = vcombine.high %v1471_v22, %v1471_v22  ;;  %v1527_v32 = vcombine.low %v1478_v1, %v1478_v1  ;;  %v1528_v33 = vcombine.high %v1478_v1, %v1478_v1 }
  0x9f   :  { %411 = vbcast.lane.b32.xlu1 %v405_v19, 264  ;;  %407 = vbcast.lane.b32.xlu0 %v405_v19, 256  ;;  %v1927_v44 = vcombine.low %v1887_v28, %v1887_v28  ;;  %v1928_v48 = vcombine.high %v1887_v28, %v1887_v28  ;;  %v1943_v56 = vcombine.low %v10768_v36, %v10768_v36 }
  0xa0   :  { %v10776_v40 = vrot.slane %v1511_v30, %v10748_v0  ;;  %v10779_v41 = vrot.slane %v1512_v31, %v10748_v0  ;;  %v10782_v42 = vrot.slane %v1527_v32, %v10748_v0  ;;  %v10785_v43 = vrot.slane %v1528_v33, %v10748_v0  ;;  %19360 = vst [vmem:[#allocation21_spill] sm:$0xff] %v10830_v21 }
  0xa1   :  { %v10773_v38 = vpop.permute.xlu1 %103  ;;  %v100_v39 = vpop.permute.xlu0 %99  ;;  %v10815_v8 = vrot.slane %v1927_v44, %v10748_v0  ;;  %v10818_v10 = vrot.slane %v1928_v48, %v10748_v0  ;;  %v10833_v22 = vrot.slane %v1911_v55, %v10748_v0  ;;  %v10836_v1 = vrot.slane %v1943_v56, %v10748_v0 }
  0xa2   :  { %19351 = vst [vmem:[#allocation12_spill] sm:$0xff] %v10776_v40  ;;  %19352 = vst [vmem:[#allocation13_spill] sm:$0xff] %v10779_v41  ;;  %v1551_v49 = vcombine.low %v89_v24, %v100_v39  ;;  %v1552_v63 = vcombine.high %v89_v24, %v100_v39  ;;  %v1967_v5 = vcombine.low %v10755_v23, %v10773_v38 }
  0xa3   :  { %19353 = vst [vmem:[#allocation14_spill] sm:$0xff] %v10782_v42  ;;  %19354 = vst [vmem:[#allocation15_spill] sm:$0xff] %v10785_v43  ;;  %422 = vbcast.lane.b32.xlu1 %v416_v25, 264  ;;  %418 = vbcast.lane.b32.xlu0 %v416_v25, 256  ;;  %v1968_v18 = vcombine.high %v10755_v23, %v10773_v38  ;;  %v471_v48 = vrot.slane %v10742_v57, %v10712_v17 }
  0xa4   :  { %v1559_v6 = vrot.slane %v1551_v49, %v10739_v54  ;;  %19357 = vst [vmem:[#allocation18_spill] sm:$0xff] %v10815_v8  ;;  %19358 = vst [vmem:[#allocation19_spill] sm:$0xff] %v10818_v10  ;;  %v1566_v24 = vrot.slane %v1552_v63, %v10739_v54  ;;  %v1975_v28 = vrot.slane %v1967_v5, %v10739_v54 }
  0xa5   :  { %v115_v58 = vpop.permute.xlu1 %114  ;;  %v111_v59 = vpop.permute.xlu0 %110  ;;  %19361 = vst [vmem:[#allocation22_spill] sm:$0xff] %v10833_v22  ;;  %19362 = vst [vmem:[#allocation23_spill] sm:$0xff] %v10836_v1  ;;  %v10857_v53 = vrot.slane %v1968_v18, %v10739_v54  ;;  %v482_v31 = vrot.slane %v10887_v51, %v10687_v3  ;;  %v537_v8 = vrot.slane %v10887_v51, %v10704_v13 }
  0xa6   :  { %v1583_v30 = vcombine.low %v1559_v6, %v1559_v6  ;;  %v1584_v32 = vcombine.high %v1559_v6, %v1559_v6  ;;  %v1599_v55 = vcombine.low %v1566_v24, %v1566_v24  ;;  %v1600_v56 = vcombine.high %v1566_v24, %v1566_v24 }
  0xa7   :  { %433 = vbcast.lane.b32.xlu1 %v427_v45, 264  ;;  %429 = vbcast.lane.b32.xlu0 %v427_v45, 256  ;;  %v460_v45 = vrot.slane %v10742_v57, %v10708_v15  ;;  %v1999_v6 = vcombine.low %v1975_v28, %v1975_v28 }
  0xa8   :  { %v10867_v18 = vrot.slane %v1584_v32, %v10748_v0  ;;  %v10885_v32 = vrot.slane %v1600_v56, %v10748_v0 }
  0xa9   :  { %v126_v19 = vpop.permute.xlu1 %125  ;;  %v122_v20 = vpop.permute.xlu0 %121 }
  0xaa   :  { %v1983_v25 = vcombine.low %v115_v58, %v126_v19  ;;  %v1567_v26 = vcombine.low %v111_v59, %v122_v20  ;;  %v1568_v27 = vcombine.high %v111_v59, %v122_v20  ;;  %v1984_v33 = vcombine.high %v115_v58, %v126_v19  ;;  %19364 = vst [vmem:[#allocation25_spill] sm:$0xff] %v10867_v18 }
  0xab   :  { %444 = vbcast.lane.b32.xlu1 %v438_v4, 264  ;;  %440 = vbcast.lane.b32.xlu0 %v438_v4, 256  ;;  %v10864_v19 = vrot.slane %v1583_v30, %v10748_v0  ;;  %19370 = vst [vmem:[#allocation31_spill] sm:$0xff] %v10885_v32 }
  0xac   :  { %v1575_v34 = vrot.slane %v1567_v26, %v10739_v54  ;;  %v1582_v38 = vrot.slane %v1568_v27, %v10739_v54  ;;  %v1991_v58 = vrot.slane %v1983_v25, %v10739_v54  ;;  %v10861_v57 = vrot.slane %v1984_v33, %v10739_v54 }
  0xad   :  { %v10846_v39 = vpop.permute.xlu1 %136  ;;  %v133_v44 = vpop.permute.xlu0 %132  ;;  %19363 = vst [vmem:[#allocation24_spill] sm:$0xff] %v10864_v19 }
  0xae   :  { %v1615_v59 = vcombine.low %v1575_v34, %v1575_v34  ;;  %v1616_v63 = vcombine.high %v1575_v34, %v1575_v34  ;;  %v1631_v4 = vcombine.low %v1582_v38, %v1582_v38  ;;  %v1632_v5 = vcombine.high %v1582_v38, %v1582_v38 }
  0xaf   :  { %455 = vbcast.lane.b32.xlu1 %v449_v12, 264  ;;  %451 = vbcast.lane.b32.xlu0 %v449_v12, 256  ;;  %v2000_v12 = vcombine.high %v1975_v28, %v1975_v28  ;;  %v2031_v30 = vcombine.low %v1991_v58, %v1991_v58  ;;  %v10882_v34 = vrot.slane %v1599_v55, %v10748_v0 }
  0xb0   :  { %v10870_v25 = vrot.slane %v1615_v59, %v10748_v0  ;;  %v10873_v26 = vrot.slane %v1616_v63, %v10748_v0  ;;  %v10876_v27 = vrot.slane %v1631_v4, %v10748_v0  ;;  %v10879_v33 = vrot.slane %v1632_v5, %v10748_v0 }
  0xb1   :  { %v148_v20 = vpop.permute.xlu1 %147  ;;  %v144_v24 = vpop.permute.xlu0 %143  ;;  %19369 = vst [vmem:[#allocation30_spill] sm:$0xff] %v10882_v34  ;;  %v2032_v38 = vcombine.high %v1991_v58, %v1991_v58  ;;  %v2015_v28 = vcombine.low %v10857_v53, %v10857_v53  ;;  %v2047_v55 = vcombine.low %v10861_v57, %v10861_v57  ;;  %v10909_v23 = vrot.slane %v2000_v12, %v10748_v0 }
  0xb2   :  { %19365 = vst [vmem:[#allocation26_spill] sm:$0xff] %v10870_v25  ;;  %19366 = vst [vmem:[#allocation27_spill] sm:$0xff] %v10873_v26  ;;  %v1655_v59 = vcombine.low %v133_v44, %v144_v24  ;;  %v1656_v49 = vcombine.high %v133_v44, %v144_v24  ;;  %v2071_v14 = vcombine.low %v10846_v39, %v148_v20 }
  0xb3   :  { %19367 = vst [vmem:[#allocation28_spill] sm:$0xff] %v10876_v27  ;;  %19368 = vst [vmem:[#allocation29_spill] sm:$0xff] %v10879_v33  ;;  %466 = vbcast.lane.b32.xlu1 %v460_v45, 264  ;;  %462 = vbcast.lane.b32.xlu0 %v460_v45, 256  ;;  %v10906_v45 = vrot.slane %v1999_v6, %v10748_v0  ;;  %v10914_v52 = vrot.slane %v2031_v30, %v10748_v0 }
  0xb4   :  { %19372 = vst [vmem:[#allocation33_spill] sm:$0xff] %v10909_v23  ;;  %v1663_v62 = vrot.slane %v1655_v59, %v10739_v54  ;;  %v10917_v63 = vrot.slane %v2032_v38, %v10748_v0  ;;  %v2072_v6 = vcombine.high %v10846_v39, %v148_v20  ;;  %v10925_v59 = vrot.slane %v2015_v28, %v10748_v0 }
  0xb5   :  { %v159_v56 = vpop.permute.xlu1 %158  ;;  %v155_v5 = vpop.permute.xlu0 %154  ;;  %19371 = vst [vmem:[#allocation32_spill] sm:$0xff] %v10906_v45  ;;  %19373 = vst [vmem:[#allocation34_spill] sm:$0xff] %v10914_v52  ;;  %v10928_v30 = vrot.slane %v2047_v55, %v10748_v0  ;;  %v1670_v38 = vrot.slane %v1656_v49, %v10739_v54  ;;  %v2079_v44 = vrot.slane %v2071_v14, %v10739_v54 }
  0xb6   :  { %19374 = vst [vmem:[#allocation35_spill] sm:$0xff] %v10917_v63  ;;  %19375 = vst [vmem:[#allocation36_spill] sm:$0xff] %v10925_v59  ;;  %v1687_v4 = vcombine.low %v1663_v62, %v1663_v62  ;;  %v1688_v28 = vcombine.high %v1663_v62, %v1663_v62  ;;  %v504_v14 = vrot.slane %v10887_v51, %v10692_v7 }
  0xb7   :  { %477 = vbcast.lane.b32.xlu1 %v471_v48, 264  ;;  %473 = vbcast.lane.b32.xlu0 %v471_v48, 256  ;;  %19376 = vst [vmem:[#allocation37_spill] sm:$0xff] %v10928_v30  ;;  %v2103_v21 = vcombine.low %v2079_v44, %v2079_v44 }
  0xb8   :  { %v10956_v39 = vrot.slane %v1687_v4, %v10748_v0 }
  0xb9   :  { %v170_v24 = vpop.permute.xlu1 %169  ;;  %v166_v12 = vpop.permute.xlu0 %165 }
  0xba   :  { %v2087_v58 = vcombine.low %v159_v56, %v170_v24  ;;  %v1671_v48 = vcombine.low %v155_v5, %v166_v12  ;;  %v1672_v60 = vcombine.high %v155_v5, %v166_v12  ;;  %v2088_v50 = vcombine.high %v159_v56, %v170_v24  ;;  %19377 = vst [vmem:[#allocation38_spill] sm:$0xff] %v10956_v39 }
  0xbb   :  { %488 = vbcast.lane.b32.xlu1 %v482_v31, 264  ;;  %484 = vbcast.lane.b32.xlu0 %v482_v31, 256  ;;  %v515_v12 = vrot.slane %v10887_v51, %v10696_v9  ;;  %v10949_v56 = vrot.slane %v2072_v6, %v10739_v54  ;;  %v1704_v31 = vcombine.high %v1670_v38, %v1670_v38 }
  0xbc   :  { %v1679_v55 = vrot.slane %v1671_v48, %v10739_v54  ;;  %v1686_v22 = vrot.slane %v1672_v60, %v10739_v54  ;;  %v1703_v60 = vcombine.low %v1670_v38, %v1670_v38  ;;  %v2095_v24 = vrot.slane %v2087_v58, %v10739_v54 }
  0xbd   :  { %v10938_v49 = vpop.permute.xlu1 %180  ;;  %v177_v5 = vpop.permute.xlu0 %176  ;;  %v10953_v45 = vrot.slane %v2088_v50, %v10739_v54  ;;  %v10959_v6 = vrot.slane %v1688_v28, %v10748_v0  ;;  %v10977_v28 = vrot.slane %v1704_v31, %v10748_v0 }
  0xbe   :  { %v1719_v48 = vcombine.low %v1679_v55, %v1679_v55  ;;  %v1720_v20 = vcombine.high %v1679_v55, %v1679_v55  ;;  %v1735_v1 = vcombine.low %v1686_v22, %v1686_v22  ;;  %v1736_v10 = vcombine.high %v1686_v22, %v1686_v22 }
  0xbf   :  { %499 = vbcast.lane.b32.xlu1 %v493_v61, 264  ;;  %495 = vbcast.lane.b32.xlu0 %v493_v61, 256  ;;  %19378 = vst [vmem:[#allocation39_spill] sm:$0xff] %v10959_v6  ;;  %v2104_v61 = vcombine.high %v2079_v44, %v2079_v44  ;;  %v2135_v4 = vcombine.low %v2095_v24, %v2095_v24  ;;  %19384 = vst [vmem:[#allocation45_spill] sm:$0xff] %v10977_v28 }
  0xc0   :  { %v10962_v58 = vrot.slane %v1719_v48, %v10748_v0  ;;  %v10965_v55 = vrot.slane %v1720_v20, %v10748_v0  ;;  %v10968_v22 = vrot.slane %v1735_v1, %v10748_v0  ;;  %v10971_v50 = vrot.slane %v1736_v10, %v10748_v0 }
  0xc1   :  { %v192_v62 = vpop.permute.xlu1 %191  ;;  %v188_v38 = vpop.permute.xlu0 %187  ;;  %v10974_v59 = vrot.slane %v1703_v60, %v10748_v0  ;;  %v2136_v30 = vcombine.high %v2095_v24, %v2095_v24  ;;  %v2119_v10 = vcombine.low %v10949_v56, %v10949_v56  ;;  %v2151_v44 = vcombine.low %v10953_v45, %v10953_v45 }
  0xc2   :  { %19379 = vst [vmem:[#allocation40_spill] sm:$0xff] %v10962_v58  ;;  %19380 = vst [vmem:[#allocation41_spill] sm:$0xff] %v10965_v55  ;;  %v1759_v48 = vcombine.low %v177_v5, %v188_v38  ;;  %v1760_v23 = vcombine.high %v177_v5, %v188_v38  ;;  %v526_v1 = vrot.slane %v10887_v51, %v10700_v11 }
  0xc3   :  { %19381 = vst [vmem:[#allocation42_spill] sm:$0xff] %v10968_v22  ;;  %19382 = vst [vmem:[#allocation43_spill] sm:$0xff] %v10971_v50  ;;  %510 = vbcast.lane.b32.xlu1 %v504_v14, 264  ;;  %506 = vbcast.lane.b32.xlu0 %v504_v14, 256  ;;  %v10996_v14 = vrot.slane %v2103_v21, %v10748_v0  ;;  %v10999_v52 = vrot.slane %v2104_v61, %v10748_v0 }
  0xc4   :  { %19383 = vst [vmem:[#allocation44_spill] sm:$0xff] %v10974_v59  ;;  %v2175_v16 = vcombine.low %v10938_v49, %v192_v62  ;;  %v1767_v31 = vrot.slane %v1759_v48, %v10739_v54  ;;  %v11004_v24 = vrot.slane %v2135_v4, %v10748_v0  ;;  %v11007_v20 = vrot.slane %v2136_v30, %v10748_v0 }
  0xc5   :  { %v203_v60 = vpop.permute.xlu1 %202  ;;  %v199_v63 = vpop.permute.xlu0 %198  ;;  %19385 = vst [vmem:[#allocation46_spill] sm:$0xff] %v10996_v14  ;;  %19386 = vst [vmem:[#allocation47_spill] sm:$0xff] %v10999_v52  ;;  %v2176_v21 = vcombine.high %v10938_v49, %v192_v62  ;;  %v11015_v48 = vrot.slane %v2119_v10, %v10748_v0  ;;  %v11018_v4 = vrot.slane %v2151_v44, %v10748_v0 }
  0xc6   :  { %19387 = vst [vmem:[#allocation48_spill] sm:$0xff] %v11004_v24  ;;  %19388 = vst [vmem:[#allocation49_spill] sm:$0xff] %v11007_v20  ;;  %v1774_v30 = vrot.slane %v1760_v23, %v10739_v54  ;;  %v2183_v5 = vrot.slane %v2175_v16, %v10739_v54  ;;  %v1791_v50 = vcombine.low %v1767_v31, %v1767_v31  ;;  %v11069_v20 = vld [vmem:[#allocation2 + $0x30] sm:$0xff] }
  0xc7   :  { %521 = vbcast.lane.b32.xlu1 %v515_v12, 264  ;;  %517 = vbcast.lane.b32.xlu0 %v515_v12, 256  ;;  %19389 = vst [vmem:[#allocation50_spill] sm:$0xff] %v11015_v48  ;;  %19390 = vst [vmem:[#allocation51_spill] sm:$0xff] %v11018_v4  ;;  %v1792_v10 = vcombine.high %v1767_v31, %v1767_v31  ;;  %v548_v16 = vrot.slane %v10887_v51, %v10708_v15 }
  0xc8   :  { %v11039_v31 = vrot.slane %v2176_v21, %v10739_v54  ;;  %v2207_v47 = vcombine.low %v2183_v5, %v2183_v5  ;;  %v11046_v49 = vrot.slane %v1791_v50, %v10748_v0 }
  0xc9   :  { %v214_v38 = vpop.permute.xlu1 %213  ;;  %v210_v61 = vpop.permute.xlu0 %209  ;;  %v11049_v21 = vrot.slane %v1792_v10, %v10748_v0 }
  0xca   :  { %v2191_v33 = vcombine.low %v203_v60, %v214_v38  ;;  %v1775_v12 = vcombine.low %v199_v63, %v210_v61  ;;  %v1776_v32 = vcombine.high %v199_v63, %v210_v61  ;;  %v2192_v28 = vcombine.high %v203_v60, %v214_v38  ;;  %19391 = vst [vmem:[#allocation52_spill] sm:$0xff] %v11046_v49 }
  0xcb   :  { %532 = vbcast.lane.b32.xlu1 %v526_v1, 264  ;;  %528 = vbcast.lane.b32.xlu0 %v526_v1, 256  ;;  %v559_v61 = vrot.slane %v10887_v51, %v10712_v17  ;;  %v1808_v1 = vcombine.high %v1774_v30, %v1774_v30  ;;  %19392 = vst [vmem:[#allocation53_spill] sm:$0xff] %v11049_v21 }
  0xcc   :  { %v1783_v44 = vrot.slane %v1775_v12, %v10739_v54  ;;  %v1790_v43 = vrot.slane %v1776_v32, %v10739_v54  ;;  %v1807_v32 = vcombine.low %v1774_v30, %v1774_v30  ;;  %v2199_v38 = vrot.slane %v2191_v33, %v10739_v54 }
  0xcd   :  { %v11028_v23 = vpop.permute.xlu1 %224  ;;  %v221_v63 = vpop.permute.xlu0 %220  ;;  %v11043_v51 = vrot.slane %v2192_v28, %v10739_v54  ;;  %v11067_v10 = vrot.slane %v1808_v1, %v10748_v0 }
  0xce   :  { %v1823_v12 = vcombine.low %v1783_v44, %v1783_v44  ;;  %v1824_v62 = vcombine.high %v1783_v44, %v1783_v44  ;;  %v1839_v14 = vcombine.low %v1790_v43, %v1790_v43  ;;  %v1840_v24 = vcombine.high %v1790_v43, %v1790_v43 }
  0xcf   :  { %543 = vbcast.lane.b32.xlu1 %v537_v8, 264  ;;  %539 = vbcast.lane.b32.xlu0 %v537_v8, 256  ;;  %v2208_v8 = vcombine.high %v2183_v5, %v2183_v5  ;;  %v2239_v50 = vcombine.low %v2199_v38, %v2199_v38  ;;  %v11064_v48 = vrot.slane %v1807_v32, %v10748_v0 }
  0xd0   :  { %v11052_v33 = vrot.slane %v1823_v12, %v10748_v0  ;;  %v11055_v44 = vrot.slane %v1824_v62, %v10748_v0  ;;  %v11058_v43 = vrot.slane %v1839_v14, %v10748_v0  ;;  %v11061_v28 = vrot.slane %v1840_v24, %v10748_v0  ;;  %19398 = vst [vmem:[#allocation59_spill] sm:$0xff] %v11067_v10 }
  0xd1   :  { %v236_v60 = vpop.permute.xlu1 %235  ;;  %v232_v30 = vpop.permute.xlu0 %231  ;;  %19397 = vst [vmem:[#allocation58_spill] sm:$0xff] %v11064_v48  ;;  %v2240_v4 = vcombine.high %v2199_v38, %v2199_v38  ;;  %v2223_v5 = vcombine.low %v11039_v31, %v11039_v31  ;;  %v2255_v62 = vcombine.low %v11043_v51, %v11043_v51  ;;  %v570_v24 = vrot.slane %v11069_v20, %v10687_v3 }
  0xd2   :  { %19393 = vst [vmem:[#allocation54_spill] sm:$0xff] %v11052_v33  ;;  %19394 = vst [vmem:[#allocation55_spill] sm:$0xff] %v11055_v44  ;;  %v2279_v12 = vcombine.low %v221_v63, %v232_v30  ;;  %v2280_v34 = vcombine.high %v221_v63, %v232_v30  ;;  %v11091_v27 = vrot.slane %v2208_v8, %v10748_v0 }
  0xd3   :  { %19395 = vst [vmem:[#allocation56_spill] sm:$0xff] %v11058_v43  ;;  %19396 = vst [vmem:[#allocation57_spill] sm:$0xff] %v11061_v28  ;;  %554 = vbcast.lane.b32.xlu1 %v548_v16, 264  ;;  %550 = vbcast.lane.b32.xlu0 %v548_v16, 256  ;;  %v11088_v16 = vrot.slane %v2207_v47, %v10748_v0  ;;  %v2695_v59 = vcombine.low %v11028_v23, %v236_v60 }
  0xd4   :  { %19400 = vst [vmem:[#allocation61_spill] sm:$0xff] %v11091_v27  ;;  %v2287_v38 = vrot.slane %v2279_v12, %v10739_v54  ;;  %v11096_v52 = vrot.slane %v2239_v50, %v10748_v0  ;;  %v11099_v14 = vrot.slane %v2240_v4, %v10748_v0  ;;  %v2696_v47 = vcombine.high %v11028_v23, %v236_v60 }
  0xd5   :  { %v247_v32 = vpop.permute.xlu1 %246  ;;  %v243_v1 = vpop.permute.xlu0 %242  ;;  %19399 = vst [vmem:[#allocation60_spill] sm:$0xff] %v11088_v16  ;;  %v581_v48 = vrot.slane %v11069_v20, %v10684_v2  ;;  %v11107_v12 = vrot.slane %v2223_v5, %v10748_v0  ;;  %v11110_v50 = vrot.slane %v2255_v62, %v10748_v0  ;;  %v2294_v4 = vrot.slane %v2280_v34, %v10739_v54 }
  0xd6   :  { %19401 = vst [vmem:[#allocation62_spill] sm:$0xff] %v11096_v52  ;;  %19402 = vst [vmem:[#allocation63_spill] sm:$0xff] %v11099_v14  ;;  %v2703_v63 = vrot.slane %v2695_v59, %v10739_v54  ;;  %v2311_v28 = vcombine.low %v2287_v38, %v2287_v38  ;;  %v2312_v5 = vcombine.high %v2287_v38, %v2287_v38 }
  0xd7   :  { %565 = vbcast.lane.b32.xlu1 %v559_v61, 264  ;;  %561 = vbcast.lane.b32.xlu0 %v559_v61, 256  ;;  %19403 = vst [vmem:[#allocation64_spill] sm:$0xff] %v11107_v12  ;;  %19404 = vst [vmem:[#allocation65_spill] sm:$0xff] %v11110_v50  ;;  %v592_v59 = vrot.slane %v11069_v20, %v10692_v7  ;;  %v11131_v38 = vrot.slane %v2696_v47, %v10739_v54 }
  0xd8   :  { %v2727_v42 = vcombine.low %v2703_v63, %v2703_v63  ;;  %v11138_v23 = vrot.slane %v2311_v28, %v10748_v0  ;;  %v11141_v47 = vrot.slane %v2312_v5, %v10748_v0 }
  0xd9   :  { %v258_v30 = vpop.permute.xlu1 %257  ;;  %v254_v8 = vpop.permute.xlu0 %253 }
  0xda   :  { %v2711_v43 = vcombine.low %v247_v32, %v258_v30  ;;  %v2295_v61 = vcombine.low %v243_v1, %v254_v8  ;;  %v2296_v22 = vcombine.high %v243_v1, %v254_v8  ;;  %v2712_v10 = vcombine.high %v247_v32, %v258_v30  ;;  %19405 = vst [vmem:[#allocation66_spill] sm:$0xff] %v11138_v23 }
  0xdb   :  { %576 = vbcast.lane.b32.xlu1 %v570_v24, 264  ;;  %572 = vbcast.lane.b32.xlu0 %v570_v24, 256  ;;  %v603_v8 = vrot.slane %v11069_v20, %v10696_v9  ;;  %v2328_v24 = vcombine.high %v2294_v4, %v2294_v4  ;;  %19406 = vst [vmem:[#allocation67_spill] sm:$0xff] %v11141_v47 }
  0xdc   :  { %v2303_v62 = vrot.slane %v2295_v61, %v10739_v54  ;;  %v2310_v46 = vrot.slane %v2296_v22, %v10739_v54  ;;  %v2327_v22 = vcombine.low %v2294_v4, %v2294_v4  ;;  %v2719_v30 = vrot.slane %v2711_v43, %v10739_v54 }
  0xdd   :  { %v11120_v34 = vpop.permute.xlu1 %268  ;;  %v265_v1 = vpop.permute.xlu0 %264  ;;  %v11135_v44 = vrot.slane %v2712_v10, %v10739_v54  ;;  %v11159_v5 = vrot.slane %v2328_v24, %v10748_v0 }
  0xde   :  { %v2343_v61 = vcombine.low %v2303_v62, %v2303_v62  ;;  %v2344_v60 = vcombine.high %v2303_v62, %v2303_v62  ;;  %v2359_v16 = vcombine.low %v2310_v46, %v2310_v46  ;;  %v2360_v52 = vcombine.high %v2310_v46, %v2310_v46 }
  0xdf   :  { %587 = vbcast.lane.b32.xlu1 %v581_v48, 264  ;;  %583 = vbcast.lane.b32.xlu0 %v581_v48, 256  ;;  %v2728_v48 = vcombine.high %v2703_v63, %v2703_v63  ;;  %v2759_v28 = vcombine.low %v2719_v30, %v2719_v30  ;;  %v11156_v12 = vrot.slane %v2327_v22, %v10748_v0 }
  0xe0   :  { %v11144_v43 = vrot.slane %v2343_v61, %v10748_v0  ;;  %v11147_v62 = vrot.slane %v2344_v60, %v10748_v0  ;;  %v11150_v46 = vrot.slane %v2359_v16, %v10748_v0  ;;  %v11153_v10 = vrot.slane %v2360_v52, %v10748_v0  ;;  %19412 = vst [vmem:[#allocation73_spill] sm:$0xff] %v11159_v5 }
  0xe1   :  { %v280_v32 = vpop.permute.xlu1 %279  ;;  %v276_v4 = vpop.permute.xlu0 %275  ;;  %19411 = vst [vmem:[#allocation72_spill] sm:$0xff] %v11156_v12  ;;  %v2760_v50 = vcombine.high %v2719_v30, %v2719_v30  ;;  %v2743_v52 = vcombine.low %v11131_v38, %v11131_v38  ;;  %v2775_v63 = vcombine.low %v11135_v44, %v11135_v44  ;;  %v614_v16 = vrot.slane %v11069_v20, %v10700_v11 }
  0xe2   :  { %19407 = vst [vmem:[#allocation68_spill] sm:$0xff] %v11144_v43  ;;  %19408 = vst [vmem:[#allocation69_spill] sm:$0xff] %v11147_v62  ;;  %v2383_v61 = vcombine.low %v265_v1, %v276_v4  ;;  %v2384_v27 = vcombine.high %v265_v1, %v276_v4  ;;  %v11181_v21 = vrot.slane %v2728_v48, %v10748_v0 }
  0xe3   :  { %19409 = vst [vmem:[#allocation70_spill] sm:$0xff] %v11150_v46  ;;  %19410 = vst [vmem:[#allocation71_spill] sm:$0xff] %v11153_v10  ;;  %598 = vbcast.lane.b32.xlu1 %v592_v59, 264  ;;  %594 = vbcast.lane.b32.xlu0 %v592_v59, 256  ;;  %v11178_v59 = vrot.slane %v2727_v42, %v10748_v0  ;;  %v2799_v26 = vcombine.low %v11120_v34, %v280_v32 }
  0xe4   :  { %19414 = vst [vmem:[#allocation75_spill] sm:$0xff] %v11181_v21  ;;  %v2391_v24 = vrot.slane %v2383_v61, %v10739_v54  ;;  %v11186_v30 = vrot.slane %v2759_v28, %v10748_v0  ;;  %v11189_v60 = vrot.slane %v2760_v50, %v10748_v0  ;;  %v2800_v42 = vcombine.high %v11120_v34, %v280_v32 }
  0xe5   :  { %v291_v22 = vpop.permute.xlu1 %290  ;;  %v287_v14 = vpop.permute.xlu0 %286  ;;  %19413 = vst [vmem:[#allocation74_spill] sm:$0xff] %v11178_v59  ;;  %v625_v12 = vrot.slane %v11069_v20, %v10704_v13  ;;  %v11197_v61 = vrot.slane %v2743_v52, %v10748_v0  ;;  %v11200_v28 = vrot.slane %v2775_v63, %v10748_v0  ;;  %v2398_v50 = vrot.slane %v2384_v27, %v10739_v54 }
  0xe6   :  { %19415 = vst [vmem:[#allocation76_spill] sm:$0xff] %v11186_v30  ;;  %19416 = vst [vmem:[#allocation77_spill] sm:$0xff] %v11189_v60  ;;  %v2807_v1 = vrot.slane %v2799_v26, %v10739_v54  ;;  %v2415_v10 = vcombine.low %v2391_v24, %v2391_v24  ;;  %v2416_v52 = vcombine.high %v2391_v24, %v2391_v24  ;;  %v11253_v60 = vld [vmem:[#allocation2 + $0x38] sm:$0xff] }
  0xe7   :  { %609 = vbcast.lane.b32.xlu1 %v603_v8, 264  ;;  %605 = vbcast.lane.b32.xlu0 %v603_v8, 256  ;;  %19417 = vst [vmem:[#allocation78_spill] sm:$0xff] %v11197_v61  ;;  %19418 = vst [vmem:[#allocation79_spill] sm:$0xff] %v11200_v28  ;;  %v636_v26 = vrot.slane %v11069_v20, %v10708_v15  ;;  %v11221_v24 = vrot.slane %v2800_v42, %v10739_v54 }
  0xe8   :  { %v2831_v47 = vcombine.low %v2807_v1, %v2807_v1  ;;  %v11228_v34 = vrot.slane %v2415_v10, %v10748_v0  ;;  %v11231_v42 = vrot.slane %v2416_v52, %v10748_v0  ;;  %v2832_v10 = vcombine.high %v2807_v1, %v2807_v1 }
  0xe9   :  { %v302_v4 = vpop.permute.xlu1 %301  ;;  %v298_v48 = vpop.permute.xlu0 %297  ;;  %v2847_v1 = vcombine.low %v11221_v24, %v11221_v24 }
  0xea   :  { %v2815_v46 = vcombine.low %v291_v22, %v302_v4  ;;  %v2399_v8 = vcombine.low %v287_v14, %v298_v48  ;;  %v2400_v18 = vcombine.high %v287_v14, %v298_v48  ;;  %v2816_v5 = vcombine.high %v291_v22, %v302_v4  ;;  %19419 = vst [vmem:[#allocation80_spill] sm:$0xff] %v11228_v34 }
  0xeb   :  { %620 = vbcast.lane.b32.xlu1 %v614_v16, 264  ;;  %616 = vbcast.lane.b32.xlu0 %v614_v16, 256  ;;  %v647_v48 = vrot.slane %v11069_v20, %v10712_v17  ;;  %v2432_v16 = vcombine.high %v2398_v50, %v2398_v50  ;;  %19420 = vst [vmem:[#allocation81_spill] sm:$0xff] %v11231_v42 }
  0xec   :  { %v2407_v63 = vrot.slane %v2399_v8, %v10739_v54  ;;  %v2414_v62 = vrot.slane %v2400_v18, %v10739_v54  ;;  %v2431_v18 = vcombine.low %v2398_v50, %v2398_v50  ;;  %v2823_v4 = vrot.slane %v2815_v46, %v10739_v54 }
  0xed   :  { %v11210_v27 = vpop.permute.xlu1 %312  ;;  %v309_v14 = vpop.permute.xlu0 %308  ;;  %v11225_v20 = vrot.slane %v2816_v5, %v10739_v54  ;;  %v11251_v61 = vrot.slane %v2432_v16, %v10748_v0 }
  0xee   :  { %v2447_v8 = vcombine.low %v2407_v63, %v2407_v63  ;;  %v2448_v32 = vcombine.high %v2407_v63, %v2407_v63  ;;  %v2463_v59 = vcombine.low %v2414_v62, %v2414_v62  ;;  %v2464_v30 = vcombine.high %v2414_v62, %v2414_v62 }
  0xef   :  { %631 = vbcast.lane.b32.xlu1 %v625_v12, 264  ;;  %627 = vbcast.lane.b32.xlu0 %v625_v12, 256  ;;  %v2863_v5 = vcombine.low %v2823_v4, %v2823_v4  ;;  %v11248_v52 = vrot.slane %v2431_v18, %v10748_v0  ;;  %19426 = vst [vmem:[#allocation87_spill] sm:$0xff] %v11251_v61 }
  0xf0   :  { %v11236_v46 = vrot.slane %v2447_v8, %v10748_v0  ;;  %v11239_v62 = vrot.slane %v2448_v32, %v10748_v0  ;;  %v11242_v63 = vrot.slane %v2463_v59, %v10748_v0  ;;  %v11245_v12 = vrot.slane %v2464_v30, %v10748_v0 }
  0xf1   :  { %v11233_v22 = vpop.permute.xlu1 %323  ;;  %v320_v50 = vpop.permute.xlu0 %319  ;;  %19425 = vst [vmem:[#allocation86_spill] sm:$0xff] %v11248_v52  ;;  %v2864_v28 = vcombine.high %v2823_v4, %v2823_v4  ;;  %v2879_v32 = vcombine.low %v11225_v20, %v11225_v20  ;;  %v658_v30 = vrot.slane %v11253_v60, %v10687_v3  ;;  %v11276_v41 = vrot.slane %v2863_v5, %v10748_v0 }
  0xf2   :  { %19421 = vst [vmem:[#allocation82_spill] sm:$0xff] %v11236_v46  ;;  %19422 = vst [vmem:[#allocation83_spill] sm:$0xff] %v11239_v62  ;;  %v2487_v8 = vcombine.low %v309_v14, %v320_v50  ;;  %v2488_v55 = vcombine.high %v309_v14, %v320_v50  ;;  %v11279_v4 = vrot.slane %v2832_v10, %v10748_v0 }
  0xf3   :  { %19423 = vst [vmem:[#allocation84_spill] sm:$0xff] %v11242_v63  ;;  %19424 = vst [vmem:[#allocation85_spill] sm:$0xff] %v11245_v12  ;;  %642 = vbcast.lane.b32.xlu1 %v636_v26, 264  ;;  %638 = vbcast.lane.b32.xlu0 %v636_v26, 256  ;;  %v11272_v26 = vrot.slane %v2831_v47, %v10748_v0  ;;  %v11282_v21 = vrot.slane %v2864_v28, %v10748_v0 }
  0xf4   :  { %v2495_v6 = vrot.slane %v2487_v8, %v10739_v54  ;;  %19428 = vst [vmem:[#allocation89_spill] sm:$0xff] %v11276_v41  ;;  %19429 = vst [vmem:[#allocation90_spill] sm:$0xff] %v11279_v4  ;;  %v2903_v47 = vcombine.low %v11210_v27, %v11233_v22  ;;  %v669_v8 = vrot.slane %v11253_v60, %v10684_v2 }
  0xf5   :  { %v335_v18 = vpop.permute.xlu1 %334  ;;  %v331_v16 = vpop.permute.xlu0 %330  ;;  %19427 = vst [vmem:[#allocation88_spill] sm:$0xff] %v11272_v26  ;;  %19430 = vst [vmem:[#allocation91_spill] sm:$0xff] %v11282_v21  ;;  %v11291_v5 = vrot.slane %v2847_v1, %v10748_v0  ;;  %v11294_v10 = vrot.slane %v2879_v32, %v10748_v0  ;;  %v2502_v28 = vrot.slane %v2488_v55, %v10739_v54 }
  0xf6   :  { %v2904_v14 = vcombine.high %v11210_v27, %v11233_v22  ;;  %v2519_v12 = vcombine.low %v2495_v6, %v2495_v6  ;;  %v2520_v62 = vcombine.high %v2495_v6, %v2495_v6  ;;  %v680_v27 = vrot.slane %v11253_v60, %v10692_v7 }
  0xf7   :  { %653 = vbcast.lane.b32.xlu1 %v647_v48, 264  ;;  %649 = vbcast.lane.b32.xlu0 %v647_v48, 256  ;;  %19431 = vst [vmem:[#allocation92_spill] sm:$0xff] %v11291_v5  ;;  %19432 = vst [vmem:[#allocation93_spill] sm:$0xff] %v11294_v10  ;;  %v691_v22 = vrot.slane %v11253_v60, %v10696_v9 }
  0xf8   :  { %v11318_v41 = vrot.slane %v2904_v14, %v10739_v54  ;;  %v11324_v6 = vrot.slane %v2519_v12, %v10748_v0 }
  0xf9   :  { %v346_v50 = vpop.permute.xlu1 %345  ;;  %v342_v59 = vpop.permute.xlu0 %341 }
  0xfa   :  { %v2919_v48 = vcombine.low %v335_v18, %v346_v50  ;;  %v2503_v52 = vcombine.low %v331_v16, %v342_v59  ;;  %v2504_v63 = vcombine.high %v331_v16, %v342_v59  ;;  %v2920_v42 = vcombine.high %v335_v18, %v346_v50  ;;  %19434 = vst [vmem:[#allocation95_spill] sm:$0xff] %v11324_v6 }
  0xfb   :  { %664 = vbcast.lane.b32.xlu1 %v658_v30, 264  ;;  %660 = vbcast.lane.b32.xlu0 %v658_v30, 256  ;;  %v2535_v18 = vcombine.low %v2502_v28, %v2502_v28  ;;  %v702_v6 = vrot.slane %v11253_v60, %v10700_v11 }
  0xfc   :  { %v2511_v32 = vrot.slane %v2503_v52, %v10739_v54  ;;  %v2518_v55 = vrot.slane %v2504_v63, %v10739_v54  ;;  %v2911_v52 = vrot.slane %v2903_v47, %v10739_v54  ;;  %v2536_v63 = vcombine.high %v2502_v28, %v2502_v28 }
  0xfd   :  { %v11305_v37 = vpop.permute.xlu1 %356  ;;  %v353_v59 = vpop.permute.xlu0 %352  ;;  %v2927_v30 = vrot.slane %v2919_v48, %v10739_v54  ;;  %v11321_v34 = vrot.slane %v2920_v42, %v10739_v54  ;;  %v11327_v47 = vrot.slane %v2520_v62, %v10748_v0  ;;  %v11344_v62 = vrot.slane %v2535_v18, %v10748_v0 }
  0xfe   :  { %v2551_v50 = vcombine.low %v2511_v32, %v2511_v32  ;;  %v2552_v1 = vcombine.high %v2511_v32, %v2511_v32  ;;  %v2567_v61 = vcombine.low %v2518_v55, %v2518_v55  ;;  %v2568_v26 = vcombine.high %v2518_v55, %v2518_v55 }
  0xff   :  { %675 = vbcast.lane.b32.xlu1 %v669_v8, 264  ;;  %19433 = vst [vmem:[#allocation94_spill] sm:$0xff] %v11321_v34  ;;  %671 = vbcast.lane.b32.xlu0 %v669_v8, 256  ;;  %19435 = vst [vmem:[#allocation96_spill] sm:$0xff] %v11327_v47  ;;  %v2935_v12 = vcombine.low %v2911_v52, %v2911_v52  ;;  %v2936_v8 = vcombine.high %v2911_v52, %v2911_v52 }
 0x100   :  { %v11332_v32 = vrot.slane %v2551_v50, %v10748_v0  ;;  %v11335_v55 = vrot.slane %v2552_v1, %v10748_v0  ;;  %v11338_v14 = vrot.slane %v2567_v61, %v10748_v0  ;;  %v11341_v42 = vrot.slane %v2568_v26, %v10748_v0  ;;  %19440 = vst [vmem:[#allocation101_spill] sm:$0xff] %v11344_v62 }
 0x101   :  { %v11329_v28 = vpop.permute.xlu1 %367  ;;  %v364_v48 = vpop.permute.xlu0 %363  ;;  %v2967_v16 = vcombine.low %v2927_v30, %v2927_v30  ;;  %v2968_v5 = vcombine.high %v2927_v30, %v2927_v30  ;;  %v11351_v61 = vrot.slane %v2536_v63, %v10748_v0  ;;  %v2951_v26 = vcombine.low %v11318_v41, %v11318_v41 }
 0x102   :  { %19436 = vst [vmem:[#allocation97_spill] sm:$0xff] %v11332_v32  ;;  %19437 = vst [vmem:[#allocation98_spill] sm:$0xff] %v11335_v55  ;;  %v2591_v10 = vcombine.low %v353_v59, %v364_v48  ;;  %v2983_v52 = vcombine.low %v11321_v34, %v11321_v34  ;;  %v11364_v1 = vrot.slane %v2935_v12, %v10748_v0 }
 0x103   :  { %19438 = vst [vmem:[#allocation99_spill] sm:$0xff] %v11338_v14  ;;  %19439 = vst [vmem:[#allocation100_spill] sm:$0xff] %v11341_v42  ;;  %686 = vbcast.lane.b32.xlu1 %v680_v27, 264  ;;  %682 = vbcast.lane.b32.xlu0 %v680_v27, 256  ;;  %v11367_v4 = vrot.slane %v2967_v16, %v10748_v0  ;;  %v2592_v27 = vcombine.high %v353_v59, %v364_v48 }
 0x104   :  { %19441 = vst [vmem:[#allocation102_spill] sm:$0xff] %v11351_v61  ;;  %19442 = vst [vmem:[#allocation103_spill] sm:$0xff] %v11364_v1  ;;  %v11372_v32 = vrot.slane %v2936_v8, %v10748_v0  ;;  %v11375_v21 = vrot.slane %v2968_v5, %v10748_v0  ;;  %v2599_v50 = vrot.slane %v2591_v10, %v10739_v54 }
 0x105   :  { %v379_v18 = vpop.permute.xlu1 %378  ;;  %v375_v30 = vpop.permute.xlu0 %374  ;;  %19443 = vst [vmem:[#allocation104_spill] sm:$0xff] %v11367_v4  ;;  %v11381_v16 = vrot.slane %v2951_v26, %v10748_v0  ;;  %v11384_v59 = vrot.slane %v2983_v52, %v10748_v0  ;;  %v3007_v48 = vcombine.low %v11305_v37, %v11329_v28  ;;  %v713_v5 = vrot.slane %v11253_v60, %v10704_v13 }
 0x106   :  { %19444 = vst [vmem:[#allocation105_spill] sm:$0xff] %v11372_v32  ;;  %19445 = vst [vmem:[#allocation106_spill] sm:$0xff] %v11375_v21  ;;  %v3008_v52 = vcombine.high %v11305_v37, %v11329_v28  ;;  %v2623_v61 = vcombine.low %v2599_v50, %v2599_v50  ;;  %v2624_v26 = vcombine.high %v2599_v50, %v2599_v50 }
 0x107   :  { %697 = vbcast.lane.b32.xlu1 %v691_v22, 264  ;;  %693 = vbcast.lane.b32.xlu0 %v691_v22, 256  ;;  %19446 = vst [vmem:[#allocation107_spill] sm:$0xff] %v11381_v16  ;;  %19447 = vst [vmem:[#allocation108_spill] sm:$0xff] %v11384_v59  ;;  %v2606_v22 = vrot.slane %v2592_v27, %v10739_v54 }
 0x108   :  { %v11415_v50 = vrot.slane %v2623_v61, %v10748_v0  ;;  %v11432_v61 = vrot.slane %v2624_v26, %v10748_v0 }
 0x109   :  { %v390_v63 = vpop.permute.xlu1 %389  ;;  %v386_v62 = vpop.permute.xlu0 %385  ;;  %v2639_v14 = vcombine.low %v2606_v22, %v2606_v22 }
 0x10a   :  { %v3023_v8 = vcombine.low %v379_v18, %v390_v63  ;;  %v2607_v12 = vcombine.low %v375_v30, %v386_v62  ;;  %v2608_v42 = vcombine.high %v375_v30, %v386_v62  ;;  %v3024_v55 = vcombine.high %v379_v18, %v390_v63  ;;  %19449 = vst [vmem:[#allocation110_spill] sm:$0xff] %v11415_v50 }
 0x10b   :  { %708 = vbcast.lane.b32.xlu1 %v702_v6, 264  ;;  %704 = vbcast.lane.b32.xlu0 %v702_v6, 256  ;;  %v3015_v30 = vrot.slane %v3007_v48, %v10739_v54  ;;  %v724_v6 = vrot.slane %v11253_v60, %v10708_v15  ;;  %v735_v48 = vrot.slane %v11253_v60, %v10712_v17 }
 0x10c   :  { %v2615_v47 = vrot.slane %v2607_v12, %v10739_v54  ;;  %v2622_v10 = vrot.slane %v2608_v42, %v10739_v54  ;;  %v3031_v37 = vrot.slane %v3023_v8, %v10739_v54  ;;  %v11410_v42 = vrot.slane %v3008_v52, %v10739_v54  ;;  %19454 = vst [vmem:[#allocation115_spill] sm:$0xff] %v11432_v61 }
 0x10d   :  { %v11401_v27 = vpop.permute.xlu1 %400  ;;  %v397_v28 = vpop.permute.xlu0 %396  ;;  %v11418_v8 = vrot.slane %v3024_v55, %v10739_v54  ;;  %v2640_v52 = vcombine.high %v2606_v22, %v2606_v22  ;;  %v3040_v55 = vcombine.high %v3015_v30, %v3015_v30  ;;  %v11437_v1 = vrot.slane %v2639_v14, %v10748_v0 }
 0x10e   :  { %v2655_v18 = vcombine.low %v2615_v47, %v2615_v47  ;;  %v2656_v63 = vcombine.high %v2615_v47, %v2615_v47  ;;  %v2671_v12 = vcombine.low %v2622_v10, %v2622_v10  ;;  %19448 = vst [vmem:[#allocation109_spill] sm:$0xff] %v11410_v42  ;;  %v2672_v21 = vcombine.high %v2622_v10, %v2622_v10 }
 0x10f   :  { %719 = vbcast.lane.b32.xlu1 %v713_v5, 264  ;;  %715 = vbcast.lane.b32.xlu0 %v713_v5, 256  ;;  %19450 = vst [vmem:[#allocation111_spill] sm:$0xff] %v11418_v8  ;;  %v3039_v5 = vcombine.low %v3015_v30, %v3015_v30  ;;  %v3071_v60 = vcombine.low %v3031_v37, %v3031_v37  ;;  %19455 = vst [vmem:[#allocation116_spill] sm:$0xff] %v11437_v1 }
 0x110   :  { %v11423_v47 = vrot.slane %v2655_v18, %v10748_v0  ;;  %v11426_v16 = vrot.slane %v2656_v63, %v10748_v0  ;;  %v11429_v10 = vrot.slane %v2671_v12, %v10748_v0  ;;  %v3072_v32 = vcombine.high %v3031_v37, %v3031_v37  ;;  %v11439_v12 = vld [vmem:[#allocation2 + $0x40] sm:$0xff] }
 0x111   :  { %v11420_v62 = vpop.permute.xlu1 %411  ;;  %v408_v59 = vpop.permute.xlu0 %407  ;;  %v11446_v30 = vrot.slane %v2672_v21, %v10748_v0  ;;  %v3055_v37 = vcombine.low %v11410_v42, %v11410_v42  ;;  %v3087_v14 = vcombine.low %v11418_v8, %v11418_v8  ;;  %v11455_v50 = vrot.slane %v2640_v52, %v10748_v0 }
 0x112   :  { %19451 = vst [vmem:[#allocation112_spill] sm:$0xff] %v11423_v47  ;;  %19452 = vst [vmem:[#allocation113_spill] sm:$0xff] %v11426_v16  ;;  %v3111_v63 = vcombine.low %v397_v28, %v408_v59  ;;  %v11458_v22 = vrot.slane %v3039_v5, %v10748_v0  ;;  %v11461_v21 = vrot.slane %v3071_v60, %v10748_v0 }
 0x113   :  { %19453 = vst [vmem:[#allocation114_spill] sm:$0xff] %v11429_v10  ;;  %730 = vbcast.lane.b32.xlu1 %v724_v6, 264  ;;  %726 = vbcast.lane.b32.xlu0 %v724_v6, 256  ;;  %19456 = vst [vmem:[#allocation117_spill] sm:$0xff] %v11446_v30  ;;  %v3112_v26 = vcombine.high %v397_v28, %v408_v59  ;;  %v746_v16 = vrot.slane %v11439_v12, %v10687_v3 }
 0x114   :  { %19457 = vst [vmem:[#allocation118_spill] sm:$0xff] %v11455_v50  ;;  %19458 = vst [vmem:[#allocation119_spill] sm:$0xff] %v11458_v22  ;;  %v11466_v61 = vrot.slane %v3040_v55, %v10748_v0  ;;  %v11469_v6 = vrot.slane %v3072_v32, %v10748_v0  ;;  %v3119_v52 = vrot.slane %v3111_v63, %v10739_v54 }
 0x115   :  { %v423_v18 = vpop.permute.xlu1 %422  ;;  %v419_v4 = vpop.permute.xlu0 %418  ;;  %19459 = vst [vmem:[#allocation120_spill] sm:$0xff] %v11461_v21  ;;  %v11477_v28 = vrot.slane %v3055_v37, %v10748_v0  ;;  %v11480_v1 = vrot.slane %v3087_v14, %v10748_v0  ;;  %v3527_v32 = vcombine.low %v11401_v27, %v11420_v62  ;;  %v3126_v60 = vrot.slane %v3112_v26, %v10739_v54 }
 0x116   :  { %19460 = vst [vmem:[#allocation121_spill] sm:$0xff] %v11466_v61  ;;  %19461 = vst [vmem:[#allocation122_spill] sm:$0xff] %v11469_v6  ;;  %v3528_v14 = vcombine.high %v11401_v27, %v11420_v62  ;;  %v3144_v50 = vcombine.high %v3119_v52, %v3119_v52  ;;  %v3143_v37 = vcombine.low %v3119_v52, %v3119_v52 }
 0x117   :  { %741 = vbcast.lane.b32.xlu1 %v735_v48, 264  ;;  %737 = vbcast.lane.b32.xlu0 %v735_v48, 256  ;;  %19462 = vst [vmem:[#allocation123_spill] sm:$0xff] %v11477_v28  ;;  %19463 = vst [vmem:[#allocation124_spill] sm:$0xff] %v11480_v1  ;;  %v757_v48 = vrot.slane %v11439_v12, %v10684_v2  ;;  %v3159_v47 = vcombine.low %v3126_v60, %v3126_v60 }
 0x118   :  { %v11511_v52 = vrot.slane %v3144_v50, %v10748_v0  ;;  %v11528_v50 = vrot.slane %v3143_v37, %v10748_v0 }
 0x119   :  { %v434_v59 = vpop.permute.xlu1 %433  ;;  %v430_v10 = vpop.permute.xlu0 %429  ;;  %v11533_v21 = vrot.slane %v3159_v47, %v10748_v0 }
 0x11a   :  { %v3543_v55 = vcombine.low %v423_v18, %v434_v59  ;;  %v3127_v5 = vcombine.low %v419_v4, %v430_v10  ;;  %v3128_v30 = vcombine.high %v419_v4, %v430_v10  ;;  %v3544_v8 = vcombine.high %v423_v18, %v434_v59  ;;  %19465 = vst [vmem:[#allocation126_spill] sm:$0xff] %v11511_v52 }
 0x11b   :  { %752 = vbcast.lane.b32.xlu1 %v746_v16, 264  ;;  %748 = vbcast.lane.b32.xlu0 %v746_v16, 256  ;;  %v3535_v10 = vrot.slane %v3527_v32, %v10739_v54  ;;  %v768_v16 = vrot.slane %v11439_v12, %v10692_v7  ;;  %v779_v32 = vrot.slane %v11439_v12, %v10696_v9 }
 0x11c   :  { %v3135_v42 = vrot.slane %v3127_v5, %v10739_v54  ;;  %v3142_v63 = vrot.slane %v3128_v30, %v10739_v54  ;;  %v3551_v27 = vrot.slane %v3543_v55, %v10739_v54  ;;  %v11506_v30 = vrot.slane %v3528_v14, %v10739_v54  ;;  %19470 = vst [vmem:[#allocation131_spill] sm:$0xff] %v11528_v50 }
 0x11d   :  { %v11497_v26 = vpop.permute.xlu1 %444  ;;  %v441_v62 = vpop.permute.xlu0 %440  ;;  %v11514_v55 = vrot.slane %v3544_v8, %v10739_v54  ;;  %v3160_v14 = vcombine.high %v3126_v60, %v3126_v60  ;;  %v3560_v8 = vcombine.high %v3535_v10, %v3535_v10  ;;  %19471 = vst [vmem:[#allocation132_spill] sm:$0xff] %v11533_v21 }
 0x11e   :  { %v3175_v18 = vcombine.low %v3135_v42, %v3135_v42  ;;  %v3176_v59 = vcombine.high %v3135_v42, %v3135_v42  ;;  %v3191_v5 = vcombine.low %v3142_v63, %v3142_v63  ;;  %19464 = vst [vmem:[#allocation125_spill] sm:$0xff] %v11506_v30  ;;  %v3192_v6 = vcombine.high %v3142_v63, %v3142_v63 }
 0x11f   :  { %763 = vbcast.lane.b32.xlu1 %v757_v48, 264  ;;  %759 = vbcast.lane.b32.xlu0 %v757_v48, 256  ;;  %19466 = vst [vmem:[#allocation127_spill] sm:$0xff] %v11514_v55  ;;  %v3559_v48 = vcombine.low %v3535_v10, %v3535_v10  ;;  %v3591_v1 = vcombine.low %v3551_v27, %v3551_v27 }
 0x120   :  { %v11519_v42 = vrot.slane %v3175_v18, %v10748_v0  ;;  %v11522_v28 = vrot.slane %v3176_v59, %v10748_v0  ;;  %v11525_v63 = vrot.slane %v3191_v5, %v10748_v0  ;;  %v3592_v22 = vcombine.high %v3551_v27, %v3551_v27 }
 0x121   :  { %v11516_v4 = vpop.permute.xlu1 %455  ;;  %v452_v61 = vpop.permute.xlu0 %451  ;;  %v11540_v37 = vrot.slane %v3192_v6, %v10748_v0  ;;  %v3575_v10 = vcombine.low %v11506_v30, %v11506_v30  ;;  %v3607_v27 = vcombine.low %v11514_v55, %v11514_v55  ;;  %v11549_v34 = vrot.slane %v3160_v14, %v10748_v0 }
 0x122   :  { %19467 = vst [vmem:[#allocation128_spill] sm:$0xff] %v11519_v42  ;;  %19468 = vst [vmem:[#allocation129_spill] sm:$0xff] %v11522_v28  ;;  %v3215_v59 = vcombine.low %v441_v62, %v452_v61  ;;  %v11552_v5 = vrot.slane %v3559_v48, %v10748_v0  ;;  %v11555_v6 = vrot.slane %v3591_v1, %v10748_v0 }
 0x123   :  { %19469 = vst [vmem:[#allocation130_spill] sm:$0xff] %v11525_v63  ;;  %774 = vbcast.lane.b32.xlu1 %v768_v16, 264  ;;  %770 = vbcast.lane.b32.xlu0 %v768_v16, 256  ;;  %19472 = vst [vmem:[#allocation133_spill] sm:$0xff] %v11540_v37  ;;  %v3216_v60 = vcombine.high %v441_v62, %v452_v61  ;;  %v790_v28 = vrot.slane %v11439_v12, %v10700_v11 }
 0x124   :  { %19473 = vst [vmem:[#allocation134_spill] sm:$0xff] %v11549_v34  ;;  %19474 = vst [vmem:[#allocation135_spill] sm:$0xff] %v11552_v5  ;;  %v11560_v52 = vrot.slane %v3560_v8, %v10748_v0  ;;  %v11563_v47 = vrot.slane %v3592_v22, %v10748_v0  ;;  %v3223_v14 = vrot.slane %v3215_v59, %v10739_v54 }
 0x125   :  { %v467_v18 = vpop.permute.xlu1 %466  ;;  %v463_v16 = vpop.permute.xlu0 %462  ;;  %19475 = vst [vmem:[#allocation136_spill] sm:$0xff] %v11555_v6  ;;  %v11571_v62 = vrot.slane %v3575_v10, %v10748_v0  ;;  %v11574_v21 = vrot.slane %v3607_v27, %v10748_v0  ;;  %v3631_v22 = vcombine.low %v11497_v26, %v11516_v4  ;;  %v3230_v1 = vrot.slane %v3216_v60, %v10739_v54 }
 0x126   :  { %19476 = vst [vmem:[#allocation137_spill] sm:$0xff] %v11560_v52  ;;  %19477 = vst [vmem:[#allocation138_spill] sm:$0xff] %v11563_v47  ;;  %v3632_v27 = vcombine.high %v11497_v26, %v11516_v4  ;;  %v3247_v34 = vcombine.low %v3223_v14, %v3223_v14  ;;  %v3248_v10 = vcombine.high %v3223_v14, %v3223_v14 }
 0x127   :  { %785 = vbcast.lane.b32.xlu1 %v779_v32, 264  ;;  %781 = vbcast.lane.b32.xlu0 %v779_v32, 256  ;;  %19478 = vst [vmem:[#allocation139_spill] sm:$0xff] %v11571_v62  ;;  %19479 = vst [vmem:[#allocation140_spill] sm:$0xff] %v11574_v21  ;;  %v801_v32 = vrot.slane %v11439_v12, %v10704_v13  ;;  %v3263_v50 = vcombine.low %v3230_v1, %v3230_v1 }
 0x128   :  { %v11605_v14 = vrot.slane %v3247_v34, %v10748_v0  ;;  %v11622_v34 = vrot.slane %v3248_v10, %v10748_v0 }
 0x129   :  { %v478_v61 = vpop.permute.xlu1 %477  ;;  %v474_v63 = vpop.permute.xlu0 %473  ;;  %v11627_v5 = vrot.slane %v3263_v50, %v10748_v0 }
 0x12a   :  { %v3647_v8 = vcombine.low %v467_v18, %v478_v61  ;;  %v3231_v48 = vcombine.low %v463_v16, %v474_v63  ;;  %v3232_v37 = vcombine.high %v463_v16, %v474_v63  ;;  %v3648_v42 = vcombine.high %v467_v18, %v478_v61  ;;  %19481 = vst [vmem:[#allocation142_spill] sm:$0xff] %v11605_v14 }
 0x12b   :  { %796 = vbcast.lane.b32.xlu1 %v790_v28, 264  ;;  %792 = vbcast.lane.b32.xlu0 %v790_v28, 256  ;;  %v3639_v16 = vrot.slane %v3631_v22, %v10739_v54  ;;  %v812_v28 = vrot.slane %v11439_v12, %v10708_v15  ;;  %v823_v22 = vrot.slane %v11439_v12, %v10712_v17 }
 0x12c   :  { %v3239_v55 = vrot.slane %v3231_v48, %v10739_v54  ;;  %v3246_v59 = vrot.slane %v3232_v37, %v10739_v54  ;;  %v3655_v26 = vrot.slane %v3647_v8, %v10739_v54  ;;  %v11600_v37 = vrot.slane %v3632_v27, %v10739_v54  ;;  %19486 = vst [vmem:[#allocation147_spill] sm:$0xff] %v11622_v34 }
 0x12d   :  { %v11591_v60 = vpop.permute.xlu1 %488  ;;  %v485_v4 = vpop.permute.xlu0 %484  ;;  %v11608_v8 = vrot.slane %v3648_v42, %v10739_v54  ;;  %v3264_v27 = vcombine.high %v3230_v1, %v3230_v1  ;;  %v3664_v42 = vcombine.high %v3639_v16, %v3639_v16  ;;  %19487 = vst [vmem:[#allocation148_spill] sm:$0xff] %v11627_v5 }
 0x12e   :  { %v3279_v18 = vcombine.low %v3239_v55, %v3239_v55  ;;  %v3280_v61 = vcombine.high %v3239_v55, %v3239_v55  ;;  %v3295_v48 = vcombine.low %v3246_v59, %v3246_v59  ;;  %19480 = vst [vmem:[#allocation141_spill] sm:$0xff] %v11600_v37  ;;  %v3296_v47 = vcombine.high %v3246_v59, %v3246_v59 }
 0x12f   :  { %807 = vbcast.lane.b32.xlu1 %v801_v32, 264  ;;  %803 = vbcast.lane.b32.xlu0 %v801_v32, 256  ;;  %19482 = vst [vmem:[#allocation143_spill] sm:$0xff] %v11608_v8  ;;  %v3663_v32 = vcombine.low %v3639_v16, %v3639_v16  ;;  %v3695_v12 = vcombine.low %v3655_v26, %v3655_v26 }
 0x130   :  { %v11613_v55 = vrot.slane %v3279_v18, %v10748_v0  ;;  %v11616_v62 = vrot.slane %v3280_v61, %v10748_v0  ;;  %v11619_v59 = vrot.slane %v3295_v48, %v10748_v0  ;;  %v3696_v52 = vcombine.high %v3655_v26, %v3655_v26  ;;  %v11629_v48 = vld [vmem:[#allocation2 + $0x48] sm:$0xff] }
 0x131   :  { %v11610_v63 = vpop.permute.xlu1 %499  ;;  %v496_v21 = vpop.permute.xlu0 %495  ;;  %v11636_v16 = vrot.slane %v3296_v47, %v10748_v0  ;;  %v3679_v26 = vcombine.low %v11600_v37, %v11600_v37  ;;  %v3711_v50 = vcombine.low %v11608_v8, %v11608_v8  ;;  %v11645_v14 = vrot.slane %v3264_v27, %v10748_v0 }
 0x132   :  { %19483 = vst [vmem:[#allocation144_spill] sm:$0xff] %v11613_v55  ;;  %19484 = vst [vmem:[#allocation145_spill] sm:$0xff] %v11616_v62  ;;  %v3319_v61 = vcombine.low %v485_v4, %v496_v21  ;;  %v11648_v1 = vrot.slane %v3663_v32, %v10748_v0  ;;  %v11651_v47 = vrot.slane %v3695_v12, %v10748_v0 }
 0x133   :  { %19485 = vst [vmem:[#allocation146_spill] sm:$0xff] %v11619_v59  ;;  %818 = vbcast.lane.b32.xlu1 %v812_v28, 264  ;;  %814 = vbcast.lane.b32.xlu0 %v812_v28, 256  ;;  %19488 = vst [vmem:[#allocation149_spill] sm:$0xff] %v11636_v16  ;;  %v3320_v10 = vcombine.high %v485_v4, %v496_v21  ;;  %v834_v62 = vrot.slane %v11629_v48, %v10687_v3 }
 0x134   :  { %19489 = vst [vmem:[#allocation150_spill] sm:$0xff] %v11645_v14  ;;  %19490 = vst [vmem:[#allocation151_spill] sm:$0xff] %v11648_v1  ;;  %v11656_v34 = vrot.slane %v3664_v42, %v10748_v0  ;;  %v11659_v28 = vrot.slane %v3696_v52, %v10748_v0  ;;  %v3327_v27 = vrot.slane %v3319_v61, %v10739_v54 }
 0x135   :  { %v511_v18 = vpop.permute.xlu1 %510  ;;  %v507_v6 = vpop.permute.xlu0 %506  ;;  %19491 = vst [vmem:[#allocation152_spill] sm:$0xff] %v11651_v47  ;;  %v11667_v4 = vrot.slane %v3679_v26, %v10748_v0  ;;  %v11670_v5 = vrot.slane %v3711_v50, %v10748_v0  ;;  %v3735_v52 = vcombine.low %v11591_v60, %v11610_v63  ;;  %v3334_v12 = vrot.slane %v3320_v10, %v10739_v54 }
 0x136   :  { %19492 = vst [vmem:[#allocation153_spill] sm:$0xff] %v11656_v34  ;;  %19493 = vst [vmem:[#allocation154_spill] sm:$0xff] %v11659_v28  ;;  %v3736_v50 = vcombine.high %v11591_v60, %v11610_v63  ;;  %v3352_v14 = vcombine.high %v3327_v27, %v3327_v27  ;;  %v3351_v26 = vcombine.low %v3327_v27, %v3327_v27 }
 0x137   :  { %829 = vbcast.lane.b32.xlu1 %v823_v22, 264  ;;  %825 = vbcast.lane.b32.xlu0 %v823_v22, 256  ;;  %19494 = vst [vmem:[#allocation155_spill] sm:$0xff] %v11667_v4  ;;  %19495 = vst [vmem:[#allocation156_spill] sm:$0xff] %v11670_v5  ;;  %v845_v22 = vrot.slane %v11629_v48, %v10684_v2  ;;  %v3367_v55 = vcombine.low %v3334_v12, %v3334_v12 }
 0x138   :  { %v11701_v27 = vrot.slane %v3352_v14, %v10748_v0  ;;  %v11718_v14 = vrot.slane %v3351_v26, %v10748_v0 }
 0x139   :  { %v522_v21 = vpop.permute.xlu1 %521  ;;  %v518_v59 = vpop.permute.xlu0 %517  ;;  %v11723_v47 = vrot.slane %v3367_v55, %v10748_v0 }
 0x13a   :  { %v3751_v42 = vcombine.low %v511_v18, %v522_v21  ;;  %v3335_v32 = vcombine.low %v507_v6, %v518_v59  ;;  %v3336_v16 = vcombine.high %v507_v6, %v518_v59  ;;  %v3752_v8 = vcombine.high %v511_v18, %v522_v21  ;;  %19496 = vst [vmem:[#allocation157_spill] sm:$0xff] %v11701_v27 }
 0x13b   :  { %840 = vbcast.lane.b32.xlu1 %v834_v62, 264  ;;  %836 = vbcast.lane.b32.xlu0 %v834_v62, 256  ;;  %v3743_v59 = vrot.slane %v3735_v52, %v10739_v54  ;;  %v856_v62 = vrot.slane %v11629_v48, %v10692_v7  ;;  %v867_v52 = vrot.slane %v11629_v48, %v10696_v9 }
 0x13c   :  { %v3343_v37 = vrot.slane %v3335_v32, %v10739_v54  ;;  %v3350_v61 = vrot.slane %v3336_v16, %v10739_v54  ;;  %v3759_v60 = vrot.slane %v3751_v42, %v10739_v54  ;;  %v11696_v16 = vrot.slane %v3736_v50, %v10739_v54  ;;  %19501 = vst [vmem:[#allocation162_spill] sm:$0xff] %v11718_v14 }
 0x13d   :  { %v11687_v10 = vpop.permute.xlu1 %532  ;;  %v529_v63 = vpop.permute.xlu0 %528  ;;  %v11704_v42 = vrot.slane %v3752_v8, %v10739_v54  ;;  %v3368_v50 = vcombine.high %v3334_v12, %v3334_v12  ;;  %v3768_v8 = vcombine.high %v3743_v59, %v3743_v59  ;;  %19502 = vst [vmem:[#allocation163_spill] sm:$0xff] %v11723_v47 }
 0x13e   :  { %v3383_v18 = vcombine.low %v3343_v37, %v3343_v37  ;;  %v3384_v21 = vcombine.high %v3343_v37, %v3343_v37  ;;  %v3399_v32 = vcombine.low %v3350_v61, %v3350_v61  ;;  %v3400_v28 = vcombine.high %v3350_v61, %v3350_v61 }
 0x13f   :  { %851 = vbcast.lane.b32.xlu1 %v845_v22, 264  ;;  %847 = vbcast.lane.b32.xlu0 %v845_v22, 256  ;;  %19497 = vst [vmem:[#allocation158_spill] sm:$0xff] %v11704_v42  ;;  %v3767_v22 = vcombine.low %v3743_v59, %v3743_v59  ;;  %v3799_v5 = vcombine.low %v3759_v60, %v3759_v60 }
 0x140   :  { %v11709_v37 = vrot.slane %v3383_v18, %v10748_v0  ;;  %v11712_v4 = vrot.slane %v3384_v21, %v10748_v0  ;;  %v11715_v61 = vrot.slane %v3399_v32, %v10748_v0  ;;  %v3800_v1 = vcombine.high %v3759_v60, %v3759_v60 }
 0x141   :  { %v11706_v6 = vpop.permute.xlu1 %543  ;;  %v540_v34 = vpop.permute.xlu0 %539  ;;  %v11730_v26 = vrot.slane %v3400_v28, %v10748_v0  ;;  %v3783_v59 = vcombine.low %v11696_v16, %v11696_v16  ;;  %v3815_v60 = vcombine.low %v11704_v42, %v11704_v42  ;;  %v11739_v30 = vrot.slane %v3368_v50, %v10748_v0 }
 0x142   :  { %19498 = vst [vmem:[#allocation159_spill] sm:$0xff] %v11709_v37  ;;  %19499 = vst [vmem:[#allocation160_spill] sm:$0xff] %v11712_v4  ;;  %v3423_v21 = vcombine.low %v529_v63, %v540_v34  ;;  %v11742_v32 = vrot.slane %v3767_v22, %v10748_v0  ;;  %v11745_v28 = vrot.slane %v3799_v5, %v10748_v0 }
 0x143   :  { %19500 = vst [vmem:[#allocation161_spill] sm:$0xff] %v11715_v61  ;;  %862 = vbcast.lane.b32.xlu1 %v856_v62, 264  ;;  %858 = vbcast.lane.b32.xlu0 %v856_v62, 256  ;;  %19503 = vst [vmem:[#allocation164_spill] sm:$0xff] %v11730_v26  ;;  %v3424_v12 = vcombine.high %v529_v63, %v540_v34  ;;  %v878_v4 = vrot.slane %v11629_v48, %v10700_v11 }
 0x144   :  { %19504 = vst [vmem:[#allocation165_spill] sm:$0xff] %v11739_v30  ;;  %19505 = vst [vmem:[#allocation166_spill] sm:$0xff] %v11742_v32  ;;  %v11750_v27 = vrot.slane %v3768_v8, %v10748_v0  ;;  %v11753_v55 = vrot.slane %v3800_v1, %v10748_v0  ;;  %v3431_v50 = vrot.slane %v3423_v21, %v10739_v54 }
 0x145   :  { %v555_v18 = vpop.permute.xlu1 %554  ;;  %v551_v62 = vpop.permute.xlu0 %550  ;;  %19506 = vst [vmem:[#allocation167_spill] sm:$0xff] %v11745_v28  ;;  %v11761_v63 = vrot.slane %v3783_v59, %v10748_v0  ;;  %v11764_v47 = vrot.slane %v3815_v60, %v10748_v0  ;;  %v3839_v1 = vcombine.low %v11687_v10, %v11706_v6  ;;  %v3438_v5 = vrot.slane %v3424_v12, %v10739_v54 }
 0x146   :  { %19507 = vst [vmem:[#allocation168_spill] sm:$0xff] %v11750_v27  ;;  %19508 = vst [vmem:[#allocation169_spill] sm:$0xff] %v11753_v55  ;;  %v3840_v60 = vcombine.high %v11687_v10, %v11706_v6  ;;  %v3455_v30 = vcombine.low %v3431_v50, %v3431_v50  ;;  %v3456_v59 = vcombine.high %v3431_v50, %v3431_v50 }
 0x147   :  { %873 = vbcast.lane.b32.xlu1 %v867_v52, 264  ;;  %869 = vbcast.lane.b32.xlu0 %v867_v52, 256  ;;  %19509 = vst [vmem:[#allocation170_spill] sm:$0xff] %v11761_v63  ;;  %19510 = vst [vmem:[#allocation171_spill] sm:$0xff] %v11764_v47  ;;  %v889_v52 = vrot.slane %v11629_v48, %v10704_v13  ;;  %v3471_v14 = vcombine.low %v3438_v5, %v3438_v5 }
 0x148   :  { %v11795_v50 = vrot.slane %v3455_v30, %v10748_v0  ;;  %v11812_v30 = vrot.slane %v3456_v59, %v10748_v0 }
 0x149   :  { %v566_v34 = vpop.permute.xlu1 %565  ;;  %v562_v61 = vpop.permute.xlu0 %561  ;;  %v11817_v32 = vrot.slane %v3471_v14, %v10748_v0 }
 0x14a   :  { %v3855_v8 = vcombine.low %v555_v18, %v566_v34  ;;  %v3439_v22 = vcombine.low %v551_v62, %v562_v61  ;;  %v3440_v26 = vcombine.high %v551_v62, %v562_v61  ;;  %v3856_v37 = vcombine.high %v555_v18, %v566_v34  ;;  %19511 = vst [vmem:[#allocation172_spill] sm:$0xff] %v11795_v50 }
 0x14b   :  { %884 = vbcast.lane.b32.xlu1 %v878_v4, 264  ;;  %880 = vbcast.lane.b32.xlu0 %v878_v4, 256  ;;  %v3847_v62 = vrot.slane %v3839_v1, %v10739_v54  ;;  %v900_v4 = vrot.slane %v11629_v48, %v10708_v15  ;;  %v911_v1 = vrot.slane %v11629_v48, %v10712_v17 }
 0x14c   :  { %v3447_v42 = vrot.slane %v3439_v22, %v10739_v54  ;;  %v3454_v21 = vrot.slane %v3440_v26, %v10739_v54  ;;  %v3863_v10 = vrot.slane %v3855_v8, %v10739_v54  ;;  %v11790_v26 = vrot.slane %v3840_v60, %v10739_v54  ;;  %19516 = vst [vmem:[#allocation177_spill] sm:$0xff] %v11812_v30 }
 0x14d   :  { %v11781_v12 = vpop.permute.xlu1 %576  ;;  %v573_v6 = vpop.permute.xlu0 %572  ;;  %v11798_v8 = vrot.slane %v3856_v37, %v10739_v54  ;;  %v3472_v60 = vcombine.high %v3438_v5, %v3438_v5  ;;  %v3872_v37 = vcombine.high %v3847_v62, %v3847_v62  ;;  %19517 = vst [vmem:[#allocation178_spill] sm:$0xff] %v11817_v32 }
 0x14e   :  { %v3487_v18 = vcombine.low %v3447_v42, %v3447_v42  ;;  %v3488_v34 = vcombine.high %v3447_v42, %v3447_v42  ;;  %v3503_v22 = vcombine.low %v3454_v21, %v3454_v21  ;;  %v3504_v55 = vcombine.high %v3454_v21, %v3454_v21 }
 0x14f   :  { %895 = vbcast.lane.b32.xlu1 %v889_v52, 264  ;;  %891 = vbcast.lane.b32.xlu0 %v889_v52, 256  ;;  %19512 = vst [vmem:[#allocation173_spill] sm:$0xff] %v11798_v8  ;;  %v3871_v52 = vcombine.low %v3847_v62, %v3847_v62  ;;  %v3903_v48 = vcombine.low %v3863_v10, %v3863_v10 }
 0x150   :  { %v11803_v42 = vrot.slane %v3487_v18, %v10748_v0  ;;  %v11806_v63 = vrot.slane %v3488_v34, %v10748_v0  ;;  %v11809_v21 = vrot.slane %v3503_v22, %v10748_v0  ;;  %v3904_v27 = vcombine.high %v3863_v10, %v3863_v10  ;;  %v11819_v22 = vld [vmem:[#allocation2 + $0x50] sm:$0xff] }
 0x151   :  { %v11800_v61 = vpop.permute.xlu1 %587  ;;  %v584_v47 = vpop.permute.xlu0 %583  ;;  %v11826_v62 = vrot.slane %v3504_v55, %v10748_v0  ;;  %v1912_v10 = vcombine.high %v10765_v35, %v10765_v35  ;;  %v3887_v14 = vcombine.low %v11790_v26, %v11790_v26  ;;  %v11837_v50 = vrot.slane %v3472_v60, %v10748_v0 }
 0x152   :  { %19513 = vst [vmem:[#allocation174_spill] sm:$0xff] %v11803_v42  ;;  %19514 = vst [vmem:[#allocation175_spill] sm:$0xff] %v11806_v63  ;;  %v3943_v34 = vcombine.low %v573_v6, %v584_v47  ;;  %v11840_v55 = vrot.slane %v3871_v52, %v10748_v0  ;;  %v11843_v59 = vrot.slane %v3903_v48, %v10748_v0 }
 0x153   :  { %19515 = vst [vmem:[#allocation176_spill] sm:$0xff] %v11809_v21  ;;  %906 = vbcast.lane.b32.xlu1 %v900_v4, 264  ;;  %902 = vbcast.lane.b32.xlu0 %v900_v4, 256  ;;  %19518 = vst [vmem:[#allocation179_spill] sm:$0xff] %v11826_v62  ;;  %v3919_v4 = vcombine.low %v11798_v8, %v11798_v8  ;;  %v3944_v35 = vcombine.high %v573_v6, %v584_v47 }
 0x154   :  { %19519 = vst [vmem:[#allocation180_spill] sm:$0xff] %v11837_v50  ;;  %19520 = vst [vmem:[#allocation181_spill] sm:$0xff] %v11840_v55  ;;  %v922_v63 = vrot.slane %v11819_v22, %v10687_v3  ;;  %v11848_v30 = vrot.slane %v3872_v37, %v10748_v0  ;;  %v11851_v28 = vrot.slane %v3904_v27, %v10748_v0 }
 0x155   :  { %v599_v18 = vpop.permute.xlu1 %598  ;;  %v595_v5 = vpop.permute.xlu0 %594  ;;  %19521 = vst [vmem:[#allocation182_spill] sm:$0xff] %v11843_v59  ;;  %v3951_v60 = vrot.slane %v3943_v34, %v10739_v54  ;;  %v11861_v32 = vrot.slane %v3887_v14, %v10748_v0  ;;  %v11864_v37 = vrot.slane %v3919_v4, %v10748_v0  ;;  %v11867_v27 = vrot.slane %v1912_v10, %v10748_v0 }
 0x156   :  { %19522 = vst [vmem:[#allocation183_spill] sm:$0xff] %v11848_v30  ;;  %19523 = vst [vmem:[#allocation184_spill] sm:$0xff] %v11851_v28  ;;  %v933_v48 = vrot.slane %v11819_v22, %v10684_v2  ;;  %v3958_v14 = vrot.slane %v3944_v35, %v10739_v54  ;;  %v4360_v4 = vcombine.high %v11781_v12, %v11800_v61 }
 0x157   :  { %917 = vbcast.lane.b32.xlu1 %v911_v1, 264  ;;  %913 = vbcast.lane.b32.xlu0 %v911_v1, 256  ;;  %19524 = vst [vmem:[#allocation185_spill] sm:$0xff] %v11861_v32  ;;  %19525 = vst [vmem:[#allocation186_spill] sm:$0xff] %v11864_v37  ;;  %v4359_v1 = vcombine.low %v11781_v12, %v11800_v61  ;;  %v3976_v21 = vcombine.high %v3951_v60, %v3951_v60 }
 0x158   :  { %19526 = vst [vmem:[#allocation187_spill] sm:$0xff] %v11867_v27  ;;  %v3975_v61 = vcombine.low %v3951_v60, %v3951_v60  ;;  %v944_v8 = vrot.slane %v11819_v22, %v10692_v7  ;;  %v955_v60 = vrot.slane %v11819_v22, %v10696_v9  ;;  %v966_v29 = vrot.slane %v11819_v22, %v10700_v11 }
 0x159   :  { %v610_v6 = vpop.permute.xlu1 %609  ;;  %v606_v52 = vpop.permute.xlu0 %605  ;;  %v4367_v12 = vrot.slane %v4359_v1, %v10739_v54  ;;  %v11902_v1 = vrot.slane %v3976_v21, %v10748_v0  ;;  %v988_v19 = vrot.slane %v11819_v22, %v10708_v15 }
 0x15a   :  { %v4375_v34 = vcombine.low %v599_v18, %v610_v6  ;;  %v3959_v62 = vcombine.low %v595_v5, %v606_v52  ;;  %v3960_v50 = vcombine.high %v595_v5, %v606_v52  ;;  %v4376_v47 = vcombine.high %v599_v18, %v610_v6 }
 0x15b   :  { %928 = vbcast.lane.b32.xlu1 %v922_v63, 264  ;;  %924 = vbcast.lane.b32.xlu0 %v922_v63, 256  ;;  %v3991_v18 = vcombine.low %v3958_v14, %v3958_v14  ;;  %19527 = vst [vmem:[#allocation188_spill] sm:$0xff] %v11902_v1  ;;  %v11919_v21 = vrot.slane %v3975_v61, %v10748_v0 }
 0x15c   :  { %v3967_v35 = vrot.slane %v3959_v62, %v10739_v54  ;;  %v3974_v5 = vrot.slane %v3960_v50, %v10739_v54  ;;  %v4383_v63 = vrot.slane %v4375_v34, %v10739_v54  ;;  %v11897_v50 = vrot.slane %v4360_v4, %v10739_v54 }
 0x15d   :  { %v11886_v52 = vpop.permute.xlu1 %620  ;;  %v11892_v55 = vpop.permute.xlu0 %616  ;;  %v11905_v34 = vrot.slane %v4376_v47, %v10739_v54  ;;  %19531 = vst [vmem:[#allocation192_spill] sm:$0xff] %v11919_v21  ;;  %v4392_v47 = vcombine.high %v4367_v12, %v4367_v12  ;;  %v11924_v40 = vrot.slane %v3991_v18, %v10748_v0 }
 0x15e   :  { %v4007_v6 = vcombine.low %v3967_v35, %v3967_v35  ;;  %v4008_v62 = vcombine.high %v3967_v35, %v3967_v35  ;;  %v4023_v42 = vcombine.low %v3974_v5, %v3974_v5  ;;  %v4024_v28 = vcombine.high %v3974_v5, %v3974_v5 }
 0x15f   :  { %939 = vbcast.lane.b32.xlu1 %v933_v48, 264  ;;  %935 = vbcast.lane.b32.xlu0 %v933_v48, 256  ;;  %v4391_v48 = vcombine.low %v4367_v12, %v4367_v12  ;;  %v3992_v5 = vcombine.high %v3958_v14, %v3958_v14  ;;  %v4423_v37 = vcombine.low %v4383_v63, %v4383_v63 }
 0x160   :  { %v11910_v35 = vrot.slane %v4007_v6, %v10748_v0  ;;  %v11913_v32 = vrot.slane %v4008_v62, %v10748_v0  ;;  %v11916_v4 = vrot.slane %v4023_v42, %v10748_v0  ;;  %v4424_v59 = vcombine.high %v4383_v63, %v4383_v63  ;;  %19532 = vst [vmem:[#allocation193_spill] sm:$0xff] %v11924_v40 }
 0x161   :  { %v11907_v10 = vpop.permute.xlu1 %631  ;;  %v628_v30 = vpop.permute.xlu0 %627  ;;  %v11932_v61 = vrot.slane %v4024_v28, %v10748_v0  ;;  %v4407_v63 = vcombine.low %v11897_v50, %v11897_v50  ;;  %v4439_v18 = vcombine.low %v11905_v34, %v11905_v34  ;;  %v11945_v28 = vrot.slane %v3992_v5, %v10748_v0 }
 0x162   :  { %19528 = vst [vmem:[#allocation189_spill] sm:$0xff] %v11910_v35  ;;  %19529 = vst [vmem:[#allocation190_spill] sm:$0xff] %v11913_v32  ;;  %v4047_v62 = vcombine.low %v11892_v55, %v628_v30  ;;  %v11948_v32 = vrot.slane %v4391_v48, %v10748_v0  ;;  %v11951_v12 = vrot.slane %v4423_v37, %v10748_v0 }
 0x163   :  { %19530 = vst [vmem:[#allocation191_spill] sm:$0xff] %v11916_v4  ;;  %950 = vbcast.lane.b32.xlu1 %v944_v8, 264  ;;  %946 = vbcast.lane.b32.xlu0 %v944_v8, 256  ;;  %19533 = vst [vmem:[#allocation194_spill] sm:$0xff] %v11932_v61  ;;  %v4048_v1 = vcombine.high %v11892_v55, %v628_v30  ;;  %v11957_v8 = vrot.slane %v4392_v47, %v10748_v0 }
 0x164   :  { %19534 = vst [vmem:[#allocation195_spill] sm:$0xff] %v11945_v28  ;;  %19535 = vst [vmem:[#allocation196_spill] sm:$0xff] %v11948_v32  ;;  %v11960_v42 = vrot.slane %v4424_v59, %v10748_v0  ;;  %v4055_v5 = vrot.slane %v4047_v62, %v10739_v54  ;;  %v11974_v40 = vrot.slane %v4407_v63, %v10748_v0 }
 0x165   :  { %v643_v6 = vpop.permute.xlu1 %642  ;;  %v639_v14 = vpop.permute.xlu0 %638  ;;  %19536 = vst [vmem:[#allocation197_spill] sm:$0xff] %v11951_v12  ;;  %19537 = vst [vmem:[#allocation198_spill] sm:$0xff] %v11957_v8  ;;  %v4463_v62 = vcombine.low %v11886_v52, %v11907_v10  ;;  %v977_v30 = vrot.slane %v11819_v22, %v10704_v13  ;;  %v4062_v47 = vrot.slane %v4048_v1, %v10739_v54 }
 0x166   :  { %19538 = vst [vmem:[#allocation199_spill] sm:$0xff] %v11960_v42  ;;  %19539 = vst [vmem:[#allocation200_spill] sm:$0xff] %v11974_v40  ;;  %v4079_v4 = vcombine.low %v4055_v5, %v4055_v5 }
 0x167   :  { %961 = vbcast.lane.b32.xlu1 %v955_v60, 264  ;;  %957 = vbcast.lane.b32.xlu0 %v955_v60, 256  ;;  %v11977_v60 = vrot.slane %v4439_v18, %v10748_v0  ;;  %v4464_v18 = vcombine.high %v11886_v52, %v11907_v10  ;;  %v4471_v10 = vrot.slane %v4463_v62, %v10739_v54 }
 0x168   :  { %v4080_v52 = vcombine.high %v4055_v5, %v4055_v5  ;;  %v999_v5 = vrot.slane %v11819_v22, %v10712_v17 }
 0x169   :  { %v654_v59 = vpop.permute.xlu1 %653  ;;  %19540 = vst [vmem:[#allocation201_spill] sm:$0xff] %v11977_v60  ;;  %v650_v48 = vpop.permute.xlu0 %649 }
 0x16a   :  { %v4479_v37 = vcombine.low %v643_v6, %v654_v59  ;;  %v4063_v61 = vcombine.low %v639_v14, %v650_v48  ;;  %v4064_v28 = vcombine.high %v639_v14, %v650_v48  ;;  %v4480_v55 = vcombine.high %v643_v6, %v654_v59 }
 0x16b   :  { %972 = vbcast.lane.b32.xlu1 %v966_v29, 264  ;;  %968 = vbcast.lane.b32.xlu0 %v966_v29, 256  ;;  %v4095_v6 = vcombine.low %v4062_v47, %v4062_v47 }
 0x16c   :  { %v4071_v1 = vrot.slane %v4063_v61, %v10739_v54  ;;  %v4078_v14 = vrot.slane %v4064_v28, %v10739_v54  ;;  %v4487_v29 = vrot.slane %v4479_v37, %v10739_v54  ;;  %v12007_v28 = vrot.slane %v4464_v18, %v10739_v54 }
 0x16d   :  { %v11996_v48 = vpop.permute.xlu1 %664  ;;  %v12002_v32 = vpop.permute.xlu0 %660  ;;  %v12012_v37 = vrot.slane %v4079_v4, %v10748_v0  ;;  %v12015_v62 = vrot.slane %v4480_v55, %v10739_v54  ;;  %v12029_v4 = vrot.slane %v4080_v52, %v10748_v0  ;;  %v4496_v55 = vcombine.high %v4471_v10, %v4471_v10 }
 0x16e   :  { %v4111_v59 = vcombine.low %v4071_v1, %v4071_v1  ;;  %v4112_v61 = vcombine.high %v4071_v1, %v4071_v1  ;;  %v4127_v25 = vcombine.low %v4078_v14, %v4078_v14  ;;  %19541 = vst [vmem:[#allocation202_spill] sm:$0xff] %v12007_v28  ;;  %v4128_v42 = vcombine.high %v4078_v14, %v4078_v14 }
 0x16f   :  { %983 = vbcast.lane.b32.xlu1 %v977_v30, 264  ;;  %979 = vbcast.lane.b32.xlu0 %v977_v30, 256  ;;  %19542 = vst [vmem:[#allocation203_spill] sm:$0xff] %v12012_v37  ;;  %19543 = vst [vmem:[#allocation204_spill] sm:$0xff] %v12015_v62  ;;  %v4495_v30 = vcombine.low %v4471_v10, %v4471_v10  ;;  %v4096_v14 = vcombine.high %v4062_v47, %v4062_v47 }
 0x170   :  { %v12020_v1 = vrot.slane %v4111_v59, %v10748_v0  ;;  %v12023_v40 = vrot.slane %v4112_v61, %v10748_v0  ;;  %v12026_v18 = vrot.slane %v4127_v25, %v10748_v0  ;;  %v4527_v22 = vcombine.low %v4487_v29, %v4487_v29  ;;  %19547 = vst [vmem:[#allocation208_spill] sm:$0xff] %v12029_v4  ;;  %v12037_v25 = vld [vmem:[#allocation2 + $0x58] sm:$0xff] }
 0x171   :  { %v12017_v63 = vpop.permute.xlu1 %675  ;;  %v672_v60 = vpop.permute.xlu0 %671  ;;  %v4528_v8 = vcombine.high %v4487_v29, %v4487_v29  ;;  %v12034_v12 = vrot.slane %v4095_v6, %v10748_v0  ;;  %v12044_v10 = vrot.slane %v4128_v42, %v10748_v0  ;;  %v4511_v6 = vcombine.low %v12007_v28, %v12007_v28 }
 0x172   :  { %19544 = vst [vmem:[#allocation205_spill] sm:$0xff] %v12020_v1  ;;  %19545 = vst [vmem:[#allocation206_spill] sm:$0xff] %v12023_v40  ;;  %v4151_v61 = vcombine.low %v12002_v32, %v672_v60  ;;  %v12057_v42 = vrot.slane %v4096_v14, %v10748_v0  ;;  %v12060_v40 = vrot.slane %v4495_v30, %v10748_v0 }
 0x173   :  { %19546 = vst [vmem:[#allocation207_spill] sm:$0xff] %v12026_v18  ;;  %994 = vbcast.lane.b32.xlu1 %v988_v19, 264  ;;  %19548 = vst [vmem:[#allocation209_spill] sm:$0xff] %v12034_v12  ;;  %990 = vbcast.lane.b32.xlu0 %v988_v19, 256  ;;  %v4543_v19 = vcombine.low %v12015_v62, %v12015_v62  ;;  %v12063_v29 = vrot.slane %v4527_v22, %v10748_v0 }
 0x174   :  { %19549 = vst [vmem:[#allocation210_spill] sm:$0xff] %v12044_v10  ;;  %19550 = vst [vmem:[#allocation211_spill] sm:$0xff] %v12057_v42  ;;  %v4152_v4 = vcombine.high %v12002_v32, %v672_v60  ;;  %v1010_v62 = vrot.slane %v12037_v25, %v10687_v3  ;;  %v12069_v58 = vrot.slane %v4496_v55, %v10748_v0 }
 0x175   :  { %v687_v59 = vpop.permute.xlu1 %686  ;;  %v683_v52 = vpop.permute.xlu0 %682  ;;  %19551 = vst [vmem:[#allocation212_spill] sm:$0xff] %v12060_v40  ;;  %19552 = vst [vmem:[#allocation213_spill] sm:$0xff] %v12063_v29  ;;  %v12072_v47 = vrot.slane %v4528_v8, %v10748_v0  ;;  %v4159_v14 = vrot.slane %v4151_v61, %v10739_v54  ;;  %v12086_v12 = vrot.slane %v4511_v6, %v10748_v0 }
 0x176   :  { %19553 = vst [vmem:[#allocation214_spill] sm:$0xff] %v12069_v58  ;;  %v4567_v61 = vcombine.low %v11996_v48, %v12017_v63  ;;  %v1021_v32 = vrot.slane %v12037_v25, %v10684_v2  ;;  %v4166_v55 = vrot.slane %v4152_v4, %v10739_v54  ;;  %v1032_v28 = vrot.slane %v12037_v25, %v10692_v7 }
 0x177   :  { %1005 = vbcast.lane.b32.xlu1 %v999_v5, 264  ;;  %19554 = vst [vmem:[#allocation215_spill] sm:$0xff] %v12072_v47  ;;  %1001 = vbcast.lane.b32.xlu0 %v999_v5, 256  ;;  %19555 = vst [vmem:[#allocation216_spill] sm:$0xff] %v12086_v12  ;;  %v12089_v5 = vrot.slane %v4543_v19, %v10748_v0  ;;  %v4568_v19 = vcombine.high %v11996_v48, %v12017_v63 }
 0x178   :  { %v4184_v18 = vcombine.high %v4159_v14, %v4159_v14  ;;  %v4575_v63 = vrot.slane %v4567_v61, %v10739_v54  ;;  %v4183_v48 = vcombine.low %v4159_v14, %v4159_v14  ;;  %v4199_v39 = vcombine.low %v4166_v55, %v4166_v55 }
 0x179   :  { %v698_v8 = vpop.permute.xlu1 %697  ;;  %19556 = vst [vmem:[#allocation217_spill] sm:$0xff] %v12089_v5  ;;  %v694_v30 = vpop.permute.xlu0 %693  ;;  %v1043_v61 = vrot.slane %v12037_v25, %v10696_v9 }
 0x17a   :  { %v4583_v22 = vcombine.low %v687_v59, %v698_v8  ;;  %v4167_v10 = vcombine.low %v683_v52, %v694_v30  ;;  %v4168_v42 = vcombine.high %v683_v52, %v694_v30  ;;  %v4584_v60 = vcombine.high %v687_v59, %v698_v8 }
 0x17b   :  { %1016 = vbcast.lane.b32.xlu1 %v1010_v62, 264  ;;  %1012 = vbcast.lane.b32.xlu0 %v1010_v62, 256  ;;  %v12122_v14 = vrot.slane %v4184_v18, %v10748_v0  ;;  %v12139_v18 = vrot.slane %v4183_v48, %v10748_v0  ;;  %v12144_v43 = vrot.slane %v4199_v39, %v10748_v0 }
 0x17c   :  { %v4175_v4 = vrot.slane %v4167_v10, %v10739_v54  ;;  %v4182_v52 = vrot.slane %v4168_v42, %v10739_v54  ;;  %v4591_v62 = vrot.slane %v4583_v22, %v10739_v54  ;;  %v12117_v42 = vrot.slane %v4568_v19, %v10739_v54 }
 0x17d   :  { %v12108_v30 = vpop.permute.xlu1 %708  ;;  %v705_v40 = vpop.permute.xlu0 %704  ;;  %19558 = vst [vmem:[#allocation219_spill] sm:$0xff] %v12122_v14  ;;  %v12125_v22 = vrot.slane %v4584_v60, %v10739_v54  ;;  %19563 = vst [vmem:[#allocation224_spill] sm:$0xff] %v12139_v18  ;;  %v4600_v60 = vcombine.high %v4575_v63, %v4575_v63  ;;  %v1054_v14 = vrot.slane %v12037_v25, %v10700_v11 }
 0x17e   :  { %v4215_v59 = vcombine.low %v4175_v4, %v4175_v4  ;;  %v4216_v8 = vcombine.high %v4175_v4, %v4175_v4  ;;  %v4231_v10 = vcombine.low %v4182_v52, %v4182_v52  ;;  %19557 = vst [vmem:[#allocation218_spill] sm:$0xff] %v12117_v42  ;;  %v4232_v47 = vcombine.high %v4182_v52, %v4182_v52 }
 0x17f   :  { %1027 = vbcast.lane.b32.xlu1 %v1021_v32, 264  ;;  %1023 = vbcast.lane.b32.xlu0 %v1021_v32, 256  ;;  %19559 = vst [vmem:[#allocation220_spill] sm:$0xff] %v12125_v22  ;;  %v4599_v32 = vcombine.low %v4575_v63, %v4575_v63  ;;  %v4200_v52 = vcombine.high %v4166_v55, %v4166_v55  ;;  %19564 = vst [vmem:[#allocation225_spill] sm:$0xff] %v12144_v43 }
 0x180   :  { %v12130_v4 = vrot.slane %v4215_v59, %v10748_v0  ;;  %v12133_v12 = vrot.slane %v4216_v8, %v10748_v0  ;;  %v12136_v19 = vrot.slane %v4231_v10, %v10748_v0  ;;  %v4631_v5 = vcombine.low %v4591_v62, %v4591_v62 }
 0x181   :  { %v12127_v6 = vpop.permute.xlu1 %719  ;;  %v716_v58 = vpop.permute.xlu0 %715  ;;  %v4632_v29 = vcombine.high %v4591_v62, %v4591_v62  ;;  %v12151_v48 = vrot.slane %v4232_v47, %v10748_v0  ;;  %v4615_v62 = vcombine.low %v12117_v42, %v12117_v42  ;;  %v4647_v39 = vcombine.low %v12125_v22, %v12125_v22 }
 0x182   :  { %19560 = vst [vmem:[#allocation221_spill] sm:$0xff] %v12130_v4  ;;  %19561 = vst [vmem:[#allocation222_spill] sm:$0xff] %v12133_v12  ;;  %v4255_v8 = vcombine.low %v705_v40, %v716_v58  ;;  %v4256_v10 = vcombine.high %v705_v40, %v716_v58  ;;  %v12162_v55 = vrot.slane %v4200_v52, %v10748_v0 }
 0x183   :  { %19562 = vst [vmem:[#allocation223_spill] sm:$0xff] %v12136_v19  ;;  %1038 = vbcast.lane.b32.xlu1 %v1032_v28, 264  ;;  %1034 = vbcast.lane.b32.xlu0 %v1032_v28, 256  ;;  %19565 = vst [vmem:[#allocation226_spill] sm:$0xff] %v12151_v48  ;;  %v12165_v47 = vrot.slane %v4599_v32, %v10748_v0  ;;  %v12168_v63 = vrot.slane %v4631_v5, %v10748_v0 }
 0x184   :  { %19566 = vst [vmem:[#allocation227_spill] sm:$0xff] %v12162_v55  ;;  %v12175_v28 = vrot.slane %v4600_v60, %v10748_v0  ;;  %v12178_v40 = vrot.slane %v4632_v29, %v10748_v0  ;;  %v4671_v58 = vcombine.low %v12108_v30, %v12127_v6  ;;  %v4263_v32 = vrot.slane %v4255_v8, %v10739_v54 }
 0x185   :  { %v731_v59 = vpop.permute.xlu1 %730  ;;  %v727_v18 = vpop.permute.xlu0 %726  ;;  %19567 = vst [vmem:[#allocation228_spill] sm:$0xff] %v12165_v47  ;;  %19568 = vst [vmem:[#allocation229_spill] sm:$0xff] %v12168_v63  ;;  %v1065_v60 = vrot.slane %v12037_v25, %v10704_v13  ;;  %v12192_v19 = vrot.slane %v4615_v62, %v10748_v0  ;;  %v12195_v4 = vrot.slane %v4647_v39, %v10748_v0  ;;  %v12208_v39 = vld [vmem:[#allocation2 + $0x60] sm:$0xff] }
 0x186   :  { %19569 = vst [vmem:[#allocation230_spill] sm:$0xff] %v12175_v28  ;;  %19570 = vst [vmem:[#allocation231_spill] sm:$0xff] %v12178_v40  ;;  %v1076_v52 = vrot.slane %v12037_v25, %v10708_v15  ;;  %v12206_v62 = vrot.slane %v12037_v25, %v10712_v17  ;;  %v4672_v29 = vcombine.high %v12108_v30, %v12127_v6 }
 0x187   :  { %1049 = vbcast.lane.b32.xlu1 %v1043_v61, 264  ;;  %1045 = vbcast.lane.b32.xlu0 %v1043_v61, 256  ;;  %19572 = vst [vmem:[#allocation232_spill] sm:$0xff] %v12192_v19  ;;  %19573 = vst [vmem:[#allocation233_spill] sm:$0xff] %v12195_v4  ;;  %v12198_v61 = vrot.slane %v4256_v10, %v10739_v54  ;;  %v4679_v42 = vrot.slane %v4671_v58, %v10739_v54 }
 0x188   :  { %v4287_v23 = vcombine.low %v4263_v32, %v4263_v32  ;;  %v4288_v10 = vcombine.high %v4263_v32, %v4263_v32 }
 0x189   :  { %v742_v12 = vpop.permute.xlu1 %741  ;;  %v738_v5 = vpop.permute.xlu0 %737  ;;  %v4303_v6 = vcombine.low %v12198_v61, %v12198_v61  ;;  %v4703_v63 = vcombine.low %v4679_v42, %v4679_v42  ;;  %v4704_v32 = vcombine.high %v4679_v42, %v4679_v42  ;;  %v4304_v42 = vcombine.high %v12198_v61, %v12198_v61 }
 0x18a   :  { %v4687_v8 = vcombine.low %v731_v59, %v742_v12  ;;  %v4271_v55 = vcombine.low %v727_v18, %v738_v5  ;;  %v4272_v22 = vcombine.high %v727_v18, %v738_v5  ;;  %v4688_v5 = vcombine.high %v731_v59, %v742_v12 }
 0x18b   :  { %1060 = vbcast.lane.b32.xlu1 %v1054_v14, 264  ;;  %1056 = vbcast.lane.b32.xlu0 %v1054_v14, 256  ;;  %v12226_v14 = vrot.slane %v12208_v39, %v10687_v3  ;;  %v12232_v19 = vrot.slane %v4287_v23, %v10748_v0  ;;  %v12249_v28 = vrot.slane %v4288_v10, %v10748_v0 }
 0x18c   :  { %v4279_v48 = vrot.slane %v4271_v55, %v10739_v54  ;;  %v4286_v25 = vrot.slane %v4272_v22, %v10739_v54  ;;  %v4695_v30 = vrot.slane %v4687_v8, %v10739_v54  ;;  %v12229_v22 = vrot.slane %v4672_v29, %v10739_v54 }
 0x18d   :  { %v753_v47 = vpop.permute.xlu1 %752  ;;  %v749_v58 = vpop.permute.xlu0 %748  ;;  %19575 = vst [vmem:[#allocation235_spill] sm:$0xff] %v12232_v19  ;;  %v12235_v8 = vrot.slane %v4688_v5, %v10739_v54  ;;  %19580 = vst [vmem:[#allocation240_spill] sm:$0xff] %v12249_v28  ;;  %v12276_v10 = vrot.slane %v4703_v63, %v10748_v0 }
 0x18e   :  { %v4319_v12 = vcombine.low %v4279_v48, %v4279_v48  ;;  %v4320_v59 = vcombine.high %v4279_v48, %v4279_v48  ;;  %v4335_v55 = vcombine.low %v4286_v25, %v4286_v25  ;;  %v4336_v18 = vcombine.high %v4286_v25, %v4286_v25  ;;  %19574 = vst [vmem:[#allocation234_spill] sm:$0xff] %v12229_v22 }
 0x18f   :  { %1071 = vbcast.lane.b32.xlu1 %v1065_v60, 264  ;;  %1067 = vbcast.lane.b32.xlu0 %v1065_v60, 256  ;;  %19576 = vst [vmem:[#allocation236_spill] sm:$0xff] %v12235_v8  ;;  %v4735_v60 = vcombine.low %v4695_v30, %v4695_v30  ;;  %v4736_v5 = vcombine.high %v4695_v30, %v4695_v30  ;;  %19584 = vst [vmem:[#allocation244_spill] sm:$0xff] %v12276_v10 }
 0x190   :  { %v12238_v40 = vrot.slane %v4319_v12, %v10748_v0  ;;  %v12241_v48 = vrot.slane %v4320_v59, %v10748_v0  ;;  %v12244_v25 = vrot.slane %v4335_v55, %v10748_v0  ;;  %v12254_v59 = vrot.slane %v4303_v6, %v10748_v0 }
 0x191   :  { %v764_v4 = vpop.permute.xlu1 %763  ;;  %v760_v23 = vpop.permute.xlu0 %759  ;;  %v12257_v55 = vrot.slane %v4336_v18, %v10748_v0  ;;  %v4719_v30 = vcombine.low %v12229_v22, %v12229_v22  ;;  %v4751_v12 = vcombine.low %v12235_v8, %v12235_v8  ;;  %v12279_v61 = vrot.slane %v4735_v60, %v10748_v0 }
 0x192   :  { %19577 = vst [vmem:[#allocation237_spill] sm:$0xff] %v12238_v40  ;;  %19578 = vst [vmem:[#allocation238_spill] sm:$0xff] %v12241_v48  ;;  %v5191_v29 = vcombine.low %v753_v47, %v764_v4  ;;  %v5192_v46 = vcombine.high %v753_v47, %v764_v4  ;;  %v4775_v43 = vcombine.low %v749_v58, %v760_v23 }
 0x193   :  { %19579 = vst [vmem:[#allocation239_spill] sm:$0xff] %v12244_v25  ;;  %1082 = vbcast.lane.b32.xlu1 %v1076_v52, 264  ;;  %19581 = vst [vmem:[#allocation241_spill] sm:$0xff] %v12254_v59  ;;  %1078 = vbcast.lane.b32.xlu0 %v1076_v52, 256  ;;  %v4776_v6 = vcombine.high %v749_v58, %v760_v23  ;;  %v12273_v52 = vrot.slane %v4304_v42, %v10748_v0 }
 0x194   :  { %19582 = vst [vmem:[#allocation242_spill] sm:$0xff] %v12257_v55  ;;  %v12270_v4 = vrot.slane %v5191_v29, %v10739_v54  ;;  %19585 = vst [vmem:[#allocation245_spill] sm:$0xff] %v12279_v61  ;;  %v1109_v58 = vrot.slane %v12208_v39, %v10684_v2  ;;  %v12286_v23 = vrot.slane %v12208_v39, %v10692_v7 }
 0x195   :  { %v775_v19 = vpop.permute.xlu1 %774  ;;  %v771_v47 = vpop.permute.xlu0 %770  ;;  %19583 = vst [vmem:[#allocation243_spill] sm:$0xff] %v12273_v52  ;;  %v12289_v29 = vrot.slane %v4704_v32, %v10748_v0  ;;  %v12292_v42 = vrot.slane %v4736_v5, %v10748_v0  ;;  %v12295_v63 = vrot.slane %v5192_v46, %v10739_v54  ;;  %v4783_v60 = vrot.slane %v4775_v43, %v10739_v54 }
 0x196   :  { %v12304_v25 = vrot.slane %v4776_v6, %v10739_v54  ;;  %v12308_v5 = vrot.slane %v12208_v39, %v10696_v9  ;;  %v12311_v46 = vrot.slane %v4719_v30, %v10748_v0  ;;  %v12314_v43 = vrot.slane %v4751_v12, %v10748_v0 }
 0x197   :  { %1093 = vbcast.lane.b32.xlu1 %v12206_v62, 264  ;;  %19586 = vst [vmem:[#allocation246_spill] sm:$0xff] %v12289_v29  ;;  %19587 = vst [vmem:[#allocation247_spill] sm:$0xff] %v12292_v42  ;;  %1089 = vbcast.lane.b32.xlu0 %v12206_v62, 256  ;;  %v5223_v62 = vcombine.low %v12270_v4, %v12270_v4  ;;  %v5224_v28 = vcombine.high %v12270_v4, %v12270_v4 }
 0x198   :  { %19588 = vst [vmem:[#allocation248_spill] sm:$0xff] %v12295_v63  ;;  %19589 = vst [vmem:[#allocation249_spill] sm:$0xff] %v12311_v46  ;;  %v19591_v4 = vcombine.high %v10768_v36, %v10768_v36  ;;  %v4807_v42 = vcombine.low %v4783_v60, %v4783_v60 }
 0x199   :  { %v786_v32 = vpop.permute.xlu1 %785  ;;  %19590 = vst [vmem:[#allocation250_spill] sm:$0xff] %v12314_v43  ;;  %v782_v59 = vpop.permute.xlu0 %781 }
 0x19a   :  { %v5207_v18 = vcombine.low %v775_v19, %v786_v32  ;;  %v5208_v48 = vcombine.high %v775_v19, %v786_v32  ;;  %v4791_v55 = vcombine.low %v771_v47, %v782_v59  ;;  %v4792_v52 = vcombine.high %v771_v47, %v782_v59 }
 0x19b   :  { %1104 = vbcast.lane.b32.xlu1 %v12226_v14, 264  ;;  %v5239_v19 = vcombine.low %v12295_v63, %v12295_v63  ;;  %v4808_v32 = vcombine.high %v4783_v60, %v4783_v60  ;;  %1100 = vbcast.lane.b32.xlu0 %v12226_v14, 256  ;;  %v12341_v30 = vrot.slane %v19591_v4, %v10748_v0 }
 0x19c   :  { %v5215_v8 = vrot.slane %v5207_v18, %v10739_v54  ;;  %v4799_v59 = vrot.slane %v4791_v55, %v10739_v54  ;;  %v4806_v47 = vrot.slane %v4792_v52, %v10739_v54  ;;  %v4823_v18 = vcombine.low %v12304_v25, %v12304_v25 }
 0x19d   :  { %v12333_v6 = vpop.permute.xlu1 %796  ;;  %19592 = vst [vmem:[#allocation251_spill] sm:$0xff] %v12341_v30  ;;  %v793_v29 = vpop.permute.xlu0 %792  ;;  %v12346_v55 = vrot.slane %v5223_v62, %v10748_v0  ;;  %v12349_v52 = vrot.slane %v5208_v48, %v10739_v54  ;;  %v12360_v48 = vrot.slane %v4808_v32, %v10748_v0  ;;  %v12372_v4 = vrot.slane %v4807_v42, %v10748_v0 }
 0x19e   :  { %v5255_v14 = vcombine.low %v5215_v8, %v5215_v8  ;;  %v4839_v10 = vcombine.low %v4799_v59, %v4799_v59  ;;  %v4840_v12 = vcombine.high %v4799_v59, %v4799_v59  ;;  %v4855_v46 = vcombine.low %v4806_v47, %v4806_v47 }
 0x19f   :  { %19593 = vst [vmem:[#allocation252_spill] sm:$0xff] %v12346_v55  ;;  %19594 = vst [vmem:[#allocation253_spill] sm:$0xff] %v12349_v52  ;;  %1115 = vbcast.lane.b32.xlu1 %v1109_v58, 264  ;;  %v5256_v43 = vcombine.high %v5215_v8, %v5215_v8  ;;  %v4856_v36 = vcombine.high %v4806_v47, %v4806_v47  ;;  %1111 = vbcast.lane.b32.xlu0 %v1109_v58, 256 }
 0x1a0   :  { %v12352_v60 = vrot.slane %v5255_v14, %v10748_v0  ;;  %v12357_v62 = vrot.slane %v4839_v10, %v10748_v0  ;;  %19597 = vst [vmem:[#allocation256_spill] sm:$0xff] %v12360_v48  ;;  %v12363_v59 = vrot.slane %v4840_v12, %v10748_v0  ;;  %v12366_v8 = vrot.slane %v4855_v46, %v10748_v0  ;;  %v19605_v46 = vld [vmem:[#allocation94_spill] sm:$0xff] }
 0x1a1   :  { %v808_v61 = vpop.permute.xlu1 %807  ;;  %v4824_v58 = vcombine.high %v12304_v25, %v12304_v25  ;;  %v804_v14 = vpop.permute.xlu0 %803  ;;  %19600 = vst [vmem:[#allocation259_spill] sm:$0xff] %v12372_v4  ;;  %v5271_v32 = vcombine.low %v12349_v52, %v12349_v52  ;;  %v12382_v12 = vrot.slane %v4823_v18, %v10748_v0  ;;  %v12385_v25 = vrot.slane %v5224_v28, %v10748_v0  ;;  %v19609_v18 = vld [vmem:[#allocation109_spill] sm:$0xff] }
 0x1a2   :  { %19595 = vst [vmem:[#allocation254_spill] sm:$0xff] %v12352_v60  ;;  %19596 = vst [vmem:[#allocation255_spill] sm:$0xff] %v12357_v62  ;;  %v5295_v47 = vcombine.low %v12333_v6, %v808_v61  ;;  %v12393_v55 = vrot.slane %v4856_v36, %v10748_v0  ;;  %v12396_v60 = vrot.slane %v5256_v43, %v10748_v0 }
 0x1a3   :  { %19598 = vst [vmem:[#allocation257_spill] sm:$0xff] %v12363_v59  ;;  %19599 = vst [vmem:[#allocation258_spill] sm:$0xff] %v12366_v8  ;;  %1126 = vbcast.lane.b32.xlu1 %v12286_v23, 264  ;;  %1122 = vbcast.lane.b32.xlu0 %v12286_v23, 256  ;;  %v4879_v27 = vcombine.low %v793_v29, %v804_v14  ;;  %v4880_v10 = vcombine.high %v793_v29, %v804_v14 }
 0x1a4   :  { %19601 = vst [vmem:[#allocation260_spill] sm:$0xff] %v12382_v12  ;;  %19602 = vst [vmem:[#allocation261_spill] sm:$0xff] %v12385_v25  ;;  %v12405_v30 = vrot.slane %v5295_v47, %v10739_v54  ;;  %v12410_v52 = vrot.slane %v4824_v58, %v10748_v0  ;;  %v5296_v28 = vcombine.high %v12333_v6, %v808_v61 }
 0x1a5   :  { %19603 = vst [vmem:[#allocation262_spill] sm:$0xff] %v12393_v55  ;;  %19604 = vst [vmem:[#allocation263_spill] sm:$0xff] %v12396_v60  ;;  %v819_v23 = vpop.permute.xlu1 %818  ;;  %v815_v36 = vpop.permute.xlu0 %814  ;;  %v1142_v42 = vrot.slane %v12208_v39, %v10700_v11  ;;  %v12419_v47 = vrot.slane %v5239_v19, %v10748_v0  ;;  %v12429_v61 = vrot.slane %v5271_v32, %v10748_v0 }
 0x1a6   :  { %19608 = vst [vmem:[#allocation94_spill] sm:$0xff] %v12410_v52  ;;  %v4887_v6 = vrot.slane %v4879_v27, %v10739_v54  ;;  %v1153_v19 = vrot.slane %v12208_v39, %v10704_v13  ;;  %v12438_v29 = vrot.slane %v12208_v39, %v10712_v17  ;;  %v5327_v58 = vcombine.low %v12405_v30, %v12405_v30 }
 0x1a7   :  { %1137 = vbcast.lane.b32.xlu1 %v12308_v5, 264  ;;  %19610 = vst [vmem:[#allocation109_spill] sm:$0xff] %v12419_v47  ;;  %1133 = vbcast.lane.b32.xlu0 %v12308_v5, 256  ;;  %19611 = vst [vmem:[#allocation264_spill] sm:$0xff] %v12429_v61  ;;  %v1164_v5 = vrot.slane %v12208_v39, %v10708_v15  ;;  %v12443_v14 = vrot.slane %v4880_v10, %v10739_v54 }
 0x1a8   :  { %v12448_v55 = vrot.slane %v5296_v28, %v10739_v54  ;;  %v5328_v39 = vcombine.high %v12405_v30, %v12405_v30  ;;  %v19613_v27 = vcombine.high %v10949_v56, %v10949_v56  ;;  %v4911_v28 = vcombine.low %v4887_v6, %v4887_v6 }
 0x1a9   :  { %v830_v43 = vpop.permute.xlu1 %829  ;;  %v826_v22 = vpop.permute.xlu0 %825  ;;  %v19615_v30 = vcombine.high %v10953_v45, %v10953_v45  ;;  %v4928_v45 = vcombine.high %v12443_v14, %v12443_v14 }
 0x1aa   :  { %v5311_v32 = vcombine.low %v819_v23, %v830_v43  ;;  %19612 = vst [vmem:[#allocation265_spill] sm:$0xff] %v12448_v55  ;;  %v5312_v52 = vcombine.high %v819_v23, %v830_v43  ;;  %v4895_v12 = vcombine.low %v815_v36, %v826_v22  ;;  %v4896_v8 = vcombine.high %v815_v36, %v826_v22 }
 0x1ab   :  { %1148 = vbcast.lane.b32.xlu1 %v1142_v42, 264  ;;  %1144 = vbcast.lane.b32.xlu0 %v1142_v42, 256  ;;  %v12459_v60 = vrot.slane %v19613_v27, %v10748_v0  ;;  %v12467_v42 = vrot.slane %v19615_v30, %v10748_v0  ;;  %v4912_v43 = vcombine.high %v4887_v6, %v4887_v6 }
 0x1ac   :  { %v5319_v63 = vrot.slane %v5311_v32, %v10739_v54  ;;  %v4903_v23 = vrot.slane %v4895_v12, %v10739_v54  ;;  %v4910_v22 = vrot.slane %v4896_v8, %v10739_v54  ;;  %v4927_v32 = vcombine.low %v12443_v14, %v12443_v14 }
 0x1ad   :  { %19614 = vst [vmem:[#allocation266_spill] sm:$0xff] %v12459_v60  ;;  %v841_v36 = vpop.permute.xlu1 %840  ;;  %19616 = vst [vmem:[#allocation267_spill] sm:$0xff] %v12467_v42  ;;  %v837_v56 = vpop.permute.xlu0 %836  ;;  %v12472_v27 = vrot.slane %v5327_v58, %v10748_v0  ;;  %v12475_v12 = vrot.slane %v5312_v52, %v10739_v54  ;;  %v12485_v59 = vrot.slane %v4911_v28, %v10748_v0 }
 0x1ae   :  { %v5359_v10 = vcombine.low %v5319_v63, %v5319_v63  ;;  %v4943_v8 = vcombine.low %v4903_v23, %v4903_v23  ;;  %v4944_v47 = vcombine.high %v4903_v23, %v4903_v23  ;;  %v4959_v61 = vcombine.low %v4910_v22, %v4910_v22 }
 0x1af   :  { %19617 = vst [vmem:[#allocation268_spill] sm:$0xff] %v12472_v27  ;;  %19618 = vst [vmem:[#allocation269_spill] sm:$0xff] %v12475_v12  ;;  %1159 = vbcast.lane.b32.xlu1 %v1153_v19, 264  ;;  %v4960_v30 = vcombine.high %v4910_v22, %v4910_v22  ;;  %1155 = vbcast.lane.b32.xlu0 %v1153_v19, 256  ;;  %v5360_v19 = vcombine.high %v5319_v63, %v5319_v63 }
 0x1b0   :  { %v12480_v6 = vrot.slane %v5359_v10, %v10748_v0  ;;  %19620 = vst [vmem:[#allocation271_spill] sm:$0xff] %v12485_v59  ;;  %v12488_v52 = vrot.slane %v4943_v8, %v10748_v0  ;;  %v12491_v23 = vrot.slane %v4944_v47, %v10748_v0  ;;  %v12494_v14 = vrot.slane %v4959_v61, %v10748_v0 }
 0x1b1   :  { %v852_v58 = vpop.permute.xlu1 %851  ;;  %v848_v10 = vpop.permute.xlu0 %847  ;;  %v12497_v48 = vrot.slane %v4912_v43, %v10748_v0  ;;  %v5343_v28 = vcombine.low %v12448_v55, %v12448_v55  ;;  %v5375_v8 = vcombine.low %v12475_v12, %v12475_v12  ;;  %v12508_v63 = vrot.slane %v4927_v32, %v10748_v0  ;;  %v12510_v43 = vld [vmem:[#allocation2 + $0x68] sm:$0xff] }
 0x1b2   :  { %19619 = vst [vmem:[#allocation270_spill] sm:$0xff] %v12480_v6  ;;  %19621 = vst [vmem:[#allocation272_spill] sm:$0xff] %v12488_v52  ;;  %v5399_v22 = vcombine.low %v841_v36, %v852_v58  ;;  %v5400_v61 = vcombine.high %v841_v36, %v852_v58  ;;  %v12517_v6 = vrot.slane %v4960_v30, %v10748_v0  ;;  %v19627_v36 = vld [vmem:[#allocation111_spill] sm:$0xff] }
 0x1b3   :  { %19622 = vst [vmem:[#allocation273_spill] sm:$0xff] %v12491_v23  ;;  %19623 = vst [vmem:[#allocation274_spill] sm:$0xff] %v12494_v14  ;;  %1170 = vbcast.lane.b32.xlu1 %v1164_v5, 264  ;;  %1166 = vbcast.lane.b32.xlu0 %v1164_v5, 256  ;;  %v4983_v47 = vcombine.low %v837_v56, %v848_v10  ;;  %v4984_v42 = vcombine.high %v837_v56, %v848_v10 }
 0x1b4   :  { %19624 = vst [vmem:[#allocation275_spill] sm:$0xff] %v12497_v48  ;;  %19625 = vst [vmem:[#allocation276_spill] sm:$0xff] %v12508_v63  ;;  %v12520_v60 = vrot.slane %v5399_v22, %v10739_v54  ;;  %v12527_v25 = vrot.slane %v4928_v45, %v10748_v0  ;;  %v12530_v27 = vrot.slane %v5328_v39, %v10748_v0 }
 0x1b5   :  { %19626 = vst [vmem:[#allocation277_spill] sm:$0xff] %v12517_v6  ;;  %v863_v32 = vpop.permute.xlu1 %862  ;;  %v859_v12 = vpop.permute.xlu0 %858  ;;  %v12533_v30 = vrot.slane %v5360_v19, %v10748_v0  ;;  %v1186_v56 = vrot.slane %v12510_v43, %v10687_v3  ;;  %v1197_v22 = vrot.slane %v12510_v43, %v10684_v2  ;;  %v12542_v10 = vrot.slane %v12510_v43, %v10692_v7 }
 0x1b6   :  { %19628 = vst [vmem:[#allocation111_spill] sm:$0xff] %v12527_v25  ;;  %19629 = vst [vmem:[#allocation278_spill] sm:$0xff] %v12530_v27  ;;  %v12545_v45 = vrot.slane %v5343_v28, %v10748_v0  ;;  %v12548_v39 = vrot.slane %v5400_v61, %v10739_v54  ;;  %v12556_v58 = vrot.slane %v5375_v8, %v10748_v0 }
 0x1b7   :  { %19630 = vst [vmem:[#allocation279_spill] sm:$0xff] %v12533_v30  ;;  %1181 = vbcast.lane.b32.xlu1 %v12438_v29, 264  ;;  %1177 = vbcast.lane.b32.xlu0 %v12438_v29, 256  ;;  %v5431_v63 = vcombine.low %v12520_v60, %v12520_v60  ;;  %v4991_v28 = vrot.slane %v4983_v47, %v10739_v54 }
 0x1b8   :  { %19631 = vst [vmem:[#allocation280_spill] sm:$0xff] %v12545_v45  ;;  %19632 = vst [vmem:[#allocation281_spill] sm:$0xff] %v12548_v39  ;;  %v12562_v14 = vrot.slane %v4984_v42, %v10739_v54  ;;  %v12566_v29 = vrot.slane %v12510_v43, %v10696_v9  ;;  %v5432_v47 = vcombine.high %v12520_v60, %v12520_v60 }
 0x1b9   :  { %19633 = vst [vmem:[#allocation282_spill] sm:$0xff] %v12556_v58  ;;  %v874_v61 = vpop.permute.xlu1 %873  ;;  %v870_v48 = vpop.permute.xlu0 %869  ;;  %v19634_v25 = vcombine.high %v11131_v38, %v11131_v38  ;;  %v19636_v60 = vcombine.high %v11135_v44, %v11135_v44  ;;  %v5016_v8 = vcombine.high %v4991_v28, %v4991_v28  ;;  %v12599_v58 = vrot.slane %v5431_v63, %v10748_v0 }
 0x1ba   :  { %v5415_v19 = vcombine.low %v863_v32, %v874_v61  ;;  %v5416_v23 = vcombine.high %v863_v32, %v874_v61  ;;  %v4999_v6 = vcombine.low %v859_v12, %v870_v48  ;;  %v5000_v42 = vcombine.high %v859_v12, %v870_v48 }
 0x1bb   :  { %1192 = vbcast.lane.b32.xlu1 %v1186_v56, 264  ;;  %v12578_v55 = vrot.slane %v19634_v25, %v10748_v0  ;;  %v5447_v32 = vcombine.low %v12548_v39, %v12548_v39  ;;  %1188 = vbcast.lane.b32.xlu0 %v1186_v56, 256  ;;  %v12589_v48 = vrot.slane %v19636_v60, %v10748_v0 }
 0x1bc   :  { %v5423_v61 = vrot.slane %v5415_v19, %v10739_v54  ;;  %v5015_v12 = vcombine.low %v4991_v28, %v4991_v28  ;;  %v5007_v38 = vrot.slane %v4999_v6, %v10739_v54  ;;  %v5014_v25 = vrot.slane %v5000_v42, %v10739_v54  ;;  %19639 = vst [vmem:[#allocation286_spill] sm:$0xff] %v12599_v58 }
 0x1bd   :  { %19635 = vst [vmem:[#allocation283_spill] sm:$0xff] %v12578_v55  ;;  %19637 = vst [vmem:[#allocation284_spill] sm:$0xff] %v12589_v48  ;;  %v885_v30 = vpop.permute.xlu1 %884  ;;  %v5031_v19 = vcombine.low %v12562_v14, %v12562_v14  ;;  %v12596_v56 = vrot.slane %v5416_v23, %v10739_v54  ;;  %v881_v45 = vpop.permute.xlu0 %880  ;;  %v5032_v6 = vcombine.high %v12562_v14, %v12562_v14 }
 0x1be   :  { %v5463_v5 = vcombine.low %v5423_v61, %v5423_v61  ;;  %v5464_v44 = vcombine.high %v5423_v61, %v5423_v61  ;;  %v5047_v60 = vcombine.low %v5007_v38, %v5007_v38  ;;  %v5048_v27 = vcombine.high %v5007_v38, %v5007_v38 }
 0x1bf   :  { %19638 = vst [vmem:[#allocation285_spill] sm:$0xff] %v12596_v56  ;;  %v5063_v28 = vcombine.low %v5014_v25, %v5014_v25  ;;  %1203 = vbcast.lane.b32.xlu1 %v1197_v22, 264  ;;  %v5064_v42 = vcombine.high %v5014_v25, %v5014_v25  ;;  %1199 = vbcast.lane.b32.xlu0 %v1197_v22, 256 }
 0x1c0   :  { %v12604_v39 = vrot.slane %v5463_v5, %v10748_v0  ;;  %v12609_v63 = vrot.slane %v5047_v60, %v10748_v0  ;;  %v12612_v61 = vrot.slane %v5016_v8, %v10748_v0  ;;  %v12615_v38 = vrot.slane %v5048_v27, %v10748_v0 }
 0x1c1   :  { %v896_v59 = vpop.permute.xlu1 %895  ;;  %v12618_v14 = vrot.slane %v5063_v28, %v10748_v0  ;;  %v892_v25 = vpop.permute.xlu0 %891  ;;  %v12621_v5 = vrot.slane %v5015_v12, %v10748_v0  ;;  %v12626_v60 = vrot.slane %v5432_v47, %v10748_v0  ;;  %v5479_v8 = vcombine.low %v12596_v56, %v12596_v56  ;;  %v19651_v56 = vld [vmem:[#allocation112_spill] sm:$0xff] }
 0x1c2   :  { %19640 = vst [vmem:[#allocation287_spill] sm:$0xff] %v12604_v39  ;;  %19641 = vst [vmem:[#allocation288_spill] sm:$0xff] %v12609_v63  ;;  %v5503_v22 = vcombine.low %v885_v30, %v896_v59  ;;  %v12634_v28 = vrot.slane %v5031_v19, %v10748_v0  ;;  %v12637_v12 = vrot.slane %v5464_v44, %v10748_v0  ;;  %v19650_v39 = vld [vmem:[#allocation125_spill] sm:$0xff]  ;;  %v19652_v44 = vld [vmem:[#allocation110_spill] sm:$0xff] }
 0x1c3   :  { %19642 = vst [vmem:[#allocation289_spill] sm:$0xff] %v12612_v61  ;;  %19643 = vst [vmem:[#allocation290_spill] sm:$0xff] %v12615_v38  ;;  %1214 = vbcast.lane.b32.xlu1 %v12542_v10, 264  ;;  %v5087_v55 = vcombine.low %v881_v45, %v892_v25  ;;  %1210 = vbcast.lane.b32.xlu0 %v12542_v10, 256  ;;  %v12645_v58 = vrot.slane %v5064_v42, %v10748_v0 }
 0x1c4   :  { %19644 = vst [vmem:[#allocation291_spill] sm:$0xff] %v12618_v14  ;;  %19645 = vst [vmem:[#allocation292_spill] sm:$0xff] %v12621_v5  ;;  %v5504_v19 = vcombine.high %v885_v30, %v896_v59  ;;  %v12654_v4 = vrot.slane %v5503_v22, %v10739_v54  ;;  %v5088_v47 = vcombine.high %v881_v45, %v892_v25 }
 0x1c5   :  { %19646 = vst [vmem:[#allocation293_spill] sm:$0xff] %v12626_v60  ;;  %19647 = vst [vmem:[#allocation294_spill] sm:$0xff] %v12634_v28  ;;  %v907_v48 = vpop.permute.xlu1 %906  ;;  %v903_v5 = vpop.permute.xlu0 %902  ;;  %v1230_v42 = vrot.slane %v12510_v43, %v10700_v11  ;;  %v12659_v23 = vrot.slane %v5032_v6, %v10748_v0  ;;  %v12663_v59 = vrot.slane %v5447_v32, %v10748_v0 }
 0x1c6   :  { %19648 = vst [vmem:[#allocation295_spill] sm:$0xff] %v12637_v12  ;;  %19649 = vst [vmem:[#allocation296_spill] sm:$0xff] %v12645_v58  ;;  %v12666_v30 = vrot.slane %v5479_v8, %v10748_v0  ;;  %v19656_v22 = vcombine.high %v11318_v41, %v11318_v41  ;;  %v19658_v25 = vcombine.high %v19605_v46, %v19605_v46 }
 0x1c7   :  { %19653 = vst [vmem:[#allocation125_spill] sm:$0xff] %v12659_v23  ;;  %1225 = vbcast.lane.b32.xlu1 %v12566_v29, 264  ;;  %19654 = vst [vmem:[#allocation297_spill] sm:$0xff] %v12663_v59  ;;  %v5095_v10 = vrot.slane %v5087_v55, %v10739_v54  ;;  %1221 = vbcast.lane.b32.xlu0 %v12566_v29, 256  ;;  %v1241_v46 = vrot.slane %v12510_v43, %v10704_v13 }
 0x1c8   :  { %19655 = vst [vmem:[#allocation298_spill] sm:$0xff] %v12666_v30  ;;  %v12672_v45 = vrot.slane %v19656_v22, %v10748_v0  ;;  %v12678_v6 = vrot.slane %v19658_v25, %v10748_v0  ;;  %v12689_v22 = vrot.slane %v5504_v19, %v10739_v54  ;;  %v1252_v55 = vrot.slane %v12510_v43, %v10708_v15 }
 0x1c9   :  { %v918_v52 = vpop.permute.xlu1 %917  ;;  %v12697_v29 = vrot.slane %v12510_v43, %v10712_v17  ;;  %v5535_v25 = vcombine.low %v12654_v4, %v12654_v4  ;;  %v12702_v8 = vrot.slane %v5088_v47, %v10739_v54  ;;  %v914_v19 = vpop.permute.xlu0 %913  ;;  %v5536_v27 = vcombine.high %v12654_v4, %v12654_v4 }
 0x1ca   :  { %19657 = vst [vmem:[#allocation299_spill] sm:$0xff] %v12672_v45  ;;  %19659 = vst [vmem:[#allocation300_spill] sm:$0xff] %v12678_v6  ;;  %v5519_v41 = vcombine.low %v907_v48, %v918_v52  ;;  %v5520_v58 = vcombine.high %v907_v48, %v918_v52  ;;  %v5103_v23 = vcombine.low %v903_v5, %v914_v19 }
 0x1cb   :  { %19660 = vst [vmem:[#allocation301_spill] sm:$0xff] %v12689_v22  ;;  %v5104_v28 = vcombine.high %v903_v5, %v914_v19  ;;  %1236 = vbcast.lane.b32.xlu1 %v1230_v42, 264  ;;  %v5119_v43 = vcombine.low %v5095_v10, %v5095_v10  ;;  %1232 = vbcast.lane.b32.xlu0 %v1230_v42, 256 }
 0x1cc   :  { %v5527_v14 = vrot.slane %v5519_v41, %v10739_v54  ;;  %v5111_v61 = vrot.slane %v5103_v23, %v10739_v54  ;;  %v19661_v4 = vcombine.high %v10857_v53, %v10857_v53  ;;  %v19663_v48 = vcombine.high %v10861_v57, %v10861_v57 }
 0x1cd   :  { %v5118_v32 = vrot.slane %v5104_v28, %v10739_v54  ;;  %v929_v12 = vpop.permute.xlu1 %928  ;;  %v5120_v42 = vcombine.high %v5095_v10, %v5095_v10  ;;  %v5135_v41 = vcombine.low %v12702_v8, %v12702_v8  ;;  %v925_v19 = vpop.permute.xlu0 %924  ;;  %v12730_v28 = vrot.slane %v5535_v25, %v10748_v0 }
 0x1ce   :  { %v12719_v52 = vrot.slane %v19661_v4, %v10748_v0  ;;  %v12725_v5 = vrot.slane %v19663_v48, %v10748_v0  ;;  %v5567_v23 = vcombine.low %v5527_v14, %v5527_v14  ;;  %v12733_v38 = vrot.slane %v5520_v58, %v10739_v54 }
 0x1cf   :  { %19665 = vst [vmem:[#allocation304_spill] sm:$0xff] %v12730_v28  ;;  %v5151_v53 = vcombine.low %v5111_v61, %v5111_v61  ;;  %v5152_v4 = vcombine.high %v5111_v61, %v5111_v61  ;;  %v5167_v47 = vcombine.low %v5118_v32, %v5118_v32  ;;  %1247 = vbcast.lane.b32.xlu1 %v1241_v46, 264 }
 0x1d0   :  { %19662 = vst [vmem:[#allocation302_spill] sm:$0xff] %v12719_v52  ;;  %19664 = vst [vmem:[#allocation303_spill] sm:$0xff] %v12725_v5  ;;  %v5136_v57 = vcombine.high %v12702_v8, %v12702_v8  ;;  %v5168_v48 = vcombine.high %v5118_v32, %v5118_v32  ;;  %1243 = vbcast.lane.b32.xlu0 %v1241_v46, 256  ;;  %v12738_v10 = vrot.slane %v5567_v23, %v10748_v0  ;;  %v19675_v52 = vld [vmem:[#allocation127_spill] sm:$0xff] }
 0x1d1   :  { %19666 = vst [vmem:[#allocation305_spill] sm:$0xff] %v12733_v38  ;;  %v940_v25 = vpop.permute.xlu1 %939  ;;  %v12743_v30 = vrot.slane %v5119_v43, %v10748_v0  ;;  %v12746_v58 = vrot.slane %v5151_v53, %v10748_v0  ;;  %v12749_v61 = vrot.slane %v5152_v4, %v10748_v0  ;;  %v12752_v8 = vrot.slane %v5167_v47, %v10748_v0  ;;  %v936_v23 = vpop.permute.xlu0 %935 }
 0x1d2   :  { %19667 = vst [vmem:[#allocation306_spill] sm:$0xff] %v12738_v10  ;;  %v5568_v32 = vcombine.high %v5527_v14, %v5527_v14  ;;  %v6023_v46 = vcombine.low %v929_v12, %v940_v25  ;;  %v12755_v60 = vrot.slane %v5120_v42, %v10748_v0  ;;  %v5551_v43 = vcombine.low %v12689_v22, %v12689_v22  ;;  %v12768_v42 = vld [vmem:[#allocation2 + $0x70] sm:$0xff] }
 0x1d3   :  { %19668 = vst [vmem:[#allocation307_spill] sm:$0xff] %v12743_v30  ;;  %19669 = vst [vmem:[#allocation308_spill] sm:$0xff] %v12746_v58  ;;  %v5583_v53 = vcombine.low %v12733_v38, %v12733_v38  ;;  %1258 = vbcast.lane.b32.xlu1 %v1252_v55, 264  ;;  %v12766_v14 = vrot.slane %v5135_v41, %v10748_v0  ;;  %v6024_v4 = vcombine.high %v929_v12, %v940_v25 }
 0x1d4   :  { %19670 = vst [vmem:[#allocation309_spill] sm:$0xff] %v12749_v61  ;;  %19671 = vst [vmem:[#allocation310_spill] sm:$0xff] %v12752_v8  ;;  %1254 = vbcast.lane.b32.xlu0 %v1252_v55, 256  ;;  %v12775_v10 = vrot.slane %v5168_v48, %v10748_v0  ;;  %v3608_v5 = vcombine.high %v19675_v52, %v19675_v52  ;;  %v5607_v47 = vcombine.low %v925_v19, %v936_v23 }
 0x1d5   :  { %19672 = vst [vmem:[#allocation311_spill] sm:$0xff] %v12755_v60  ;;  %19673 = vst [vmem:[#allocation312_spill] sm:$0xff] %v12766_v14  ;;  %v5608_v45 = vcombine.high %v925_v19, %v936_v23  ;;  %v951_v41 = vpop.permute.xlu1 %950  ;;  %v12782_v55 = vrot.slane %v6023_v46, %v10739_v54  ;;  %v947_v25 = vpop.permute.xlu0 %946  ;;  %v12785_v59 = vrot.slane %v5136_v57, %v10748_v0  ;;  %v12997_v23 = vld [vmem:[#allocation2 + $0x78] sm:$0xff] }
 0x1d6   :  { %19674 = vst [vmem:[#allocation313_spill] sm:$0xff] %v12775_v10  ;;  %v12788_v28 = vrot.slane %v5536_v27, %v10748_v0  ;;  %v12791_v48 = vrot.slane %v5568_v32, %v10748_v0  ;;  %v1274_v52 = vrot.slane %v12768_v42, %v10687_v3  ;;  %v1285_v19 = vrot.slane %v12768_v42, %v10684_v2 }
 0x1d7   :  { %19676 = vst [vmem:[#allocation127_spill] sm:$0xff] %v12785_v59  ;;  %1269 = vbcast.lane.b32.xlu1 %v12697_v29, 264  ;;  %v12801_v57 = vrot.slane %v5551_v43, %v10748_v0  ;;  %v12804_v27 = vrot.slane %v6024_v4, %v10739_v54  ;;  %v12812_v8 = vrot.slane %v5583_v53, %v10748_v0 }
 0x1d8   :  { %19677 = vst [vmem:[#allocation314_spill] sm:$0xff] %v12788_v28  ;;  %19678 = vst [vmem:[#allocation315_spill] sm:$0xff] %v12791_v48  ;;  %1265 = vbcast.lane.b32.xlu0 %v12697_v29, 256  ;;  %v5615_v61 = vrot.slane %v5607_v47, %v10739_v54  ;;  %v12816_v12 = vrot.slane %v5608_v45, %v10739_v54  ;;  %v1296_v4 = vrot.slane %v12768_v42, %v10692_v7 }
 0x1d9   :  { %19681 = vst [vmem:[#allocation316_spill] sm:$0xff] %v12801_v57  ;;  %19682 = vst [vmem:[#allocation317_spill] sm:$0xff] %v12804_v27  ;;  %v962_v43 = vpop.permute.xlu1 %961  ;;  %v12822_v29 = vrot.slane %v12768_v42, %v10696_v9  ;;  %v6055_v32 = vcombine.low %v12782_v55, %v12782_v55  ;;  %v958_v10 = vpop.permute.xlu0 %957  ;;  %v6056_v47 = vcombine.high %v12782_v55, %v12782_v55 }
 0x1da   :  { %19683 = vst [vmem:[#allocation318_spill] sm:$0xff] %v12812_v8  ;;  %v6039_v14 = vcombine.low %v951_v41, %v962_v43  ;;  %v6040_v59 = vcombine.high %v951_v41, %v962_v43  ;;  %v5623_v60 = vcombine.low %v947_v25, %v958_v10  ;;  %v5624_v6 = vcombine.high %v947_v25, %v958_v10 }
 0x1db   :  { %1280 = vbcast.lane.b32.xlu1 %v1274_v52, 264  ;;  %v6071_v38 = vcombine.low %v12804_v27, %v12804_v27  ;;  %v19684_v45 = vcombine.high %v19650_v39, %v19650_v39  ;;  %v5640_v55 = vcombine.high %v5615_v61, %v5615_v61  ;;  %v12846_v43 = vrot.slane %v3608_v5, %v10748_v0 }
 0x1dc   :  { %v6047_v22 = vrot.slane %v6039_v14, %v10739_v54  ;;  %1276 = vbcast.lane.b32.xlu0 %v1274_v52, 256  ;;  %v5631_v41 = vrot.slane %v5623_v60, %v10739_v54  ;;  %v5638_v10 = vrot.slane %v5624_v6, %v10739_v54  ;;  %v5639_v14 = vcombine.low %v5615_v61, %v5615_v61 }
 0x1dd   :  { %v12841_v53 = vrot.slane %v19684_v45, %v10748_v0  ;;  %v973_v25 = vpop.permute.xlu1 %972  ;;  %19686 = vst [vmem:[#allocation320_spill] sm:$0xff] %v12846_v43  ;;  %v5655_v52 = vcombine.low %v12816_v12, %v12816_v12  ;;  %v969_v57 = vpop.permute.xlu0 %968  ;;  %v12851_v8 = vrot.slane %v6055_v32, %v10748_v0  ;;  %v12854_v39 = vrot.slane %v6040_v59, %v10739_v54 }
 0x1de   :  { %v6087_v46 = vcombine.low %v6047_v22, %v6047_v22  ;;  %v5671_v45 = vcombine.low %v5631_v41, %v5631_v41  ;;  %v5672_v60 = vcombine.high %v5631_v41, %v5631_v41  ;;  %v5687_v48 = vcombine.low %v5638_v10, %v5638_v10 }
 0x1df   :  { %19685 = vst [vmem:[#allocation319_spill] sm:$0xff] %v12841_v53  ;;  %19687 = vst [vmem:[#allocation321_spill] sm:$0xff] %v12851_v8  ;;  %1291 = vbcast.lane.b32.xlu1 %v1285_v19, 264  ;;  %v6088_v6 = vcombine.high %v6047_v22, %v6047_v22  ;;  %v5688_v28 = vcombine.high %v5638_v10, %v5638_v10  ;;  %v12865_v59 = vrot.slane %v5640_v55, %v10748_v0 }
 0x1e0   :  { %19688 = vst [vmem:[#allocation322_spill] sm:$0xff] %v12854_v39  ;;  %1287 = vbcast.lane.b32.xlu0 %v1285_v19, 256  ;;  %v12857_v5 = vrot.slane %v6087_v46, %v10748_v0  ;;  %v12862_v32 = vrot.slane %v5671_v45, %v10748_v0  ;;  %v12868_v41 = vrot.slane %v5672_v60, %v10748_v0 }
 0x1e1   :  { %v984_v27 = vpop.permute.xlu1 %983  ;;  %19691 = vst [vmem:[#allocation325_spill] sm:$0xff] %v12865_v59  ;;  %v12871_v22 = vrot.slane %v5687_v48, %v10748_v0  ;;  %v5656_v19 = vcombine.high %v12816_v12, %v12816_v12  ;;  %v980_v10 = vpop.permute.xlu0 %979  ;;  %v12876_v61 = vrot.slane %v5639_v14, %v10748_v0  ;;  %v6103_v55 = vcombine.low %v12854_v39, %v12854_v39  ;;  %v19701_v59 = vld [vmem:[#allocation158_spill] sm:$0xff] }
 0x1e2   :  { %19689 = vst [vmem:[#allocation323_spill] sm:$0xff] %v12857_v5  ;;  %19690 = vst [vmem:[#allocation324_spill] sm:$0xff] %v12862_v32  ;;  %v6127_v46 = vcombine.low %v973_v25, %v984_v27  ;;  %v12885_v48 = vrot.slane %v5655_v52, %v10748_v0  ;;  %v12888_v12 = vrot.slane %v6056_v47, %v10748_v0 }
 0x1e3   :  { %19692 = vst [vmem:[#allocation326_spill] sm:$0xff] %v12868_v41  ;;  %19693 = vst [vmem:[#allocation327_spill] sm:$0xff] %v12871_v22  ;;  %1302 = vbcast.lane.b32.xlu1 %v1296_v4, 264  ;;  %v12895_v8 = vrot.slane %v5688_v28, %v10748_v0  ;;  %v12898_v5 = vrot.slane %v6088_v6, %v10748_v0  ;;  %v6128_v53 = vcombine.high %v973_v25, %v984_v27 }
 0x1e4   :  { %19694 = vst [vmem:[#allocation328_spill] sm:$0xff] %v12876_v61  ;;  %19695 = vst [vmem:[#allocation329_spill] sm:$0xff] %v12885_v48  ;;  %1298 = vbcast.lane.b32.xlu0 %v1296_v4, 256  ;;  %v5711_v43 = vcombine.low %v969_v57, %v980_v10  ;;  %v12907_v45 = vrot.slane %v6127_v46, %v10739_v54  ;;  %v5712_v28 = vcombine.high %v969_v57, %v980_v10 }
 0x1e5   :  { %19696 = vst [vmem:[#allocation330_spill] sm:$0xff] %v12888_v12  ;;  %19697 = vst [vmem:[#allocation331_spill] sm:$0xff] %v12895_v8  ;;  %v995_v47 = vpop.permute.xlu1 %994  ;;  %v991_v41 = vpop.permute.xlu0 %990  ;;  %v12910_v6 = vrot.slane %v5656_v19, %v10748_v0  ;;  %v1318_v27 = vrot.slane %v12768_v42, %v10700_v11  ;;  %v1329_v25 = vrot.slane %v12768_v42, %v10704_v13 }
 0x1e6   :  { %19698 = vst [vmem:[#allocation332_spill] sm:$0xff] %v12898_v5  ;;  %v12920_v4 = vrot.slane %v6071_v38, %v10748_v0  ;;  %v12930_v10 = vrot.slane %v6103_v55, %v10748_v0  ;;  %v12933_v52 = vrot.slane %v6128_v53, %v10739_v54  ;;  %v5719_v38 = vrot.slane %v5711_v43, %v10739_v54 }
 0x1e7   :  { %19700 = vst [vmem:[#allocation333_spill] sm:$0xff] %v12910_v6  ;;  %1313 = vbcast.lane.b32.xlu1 %v12822_v29, 264  ;;  %v12940_v57 = vrot.slane %v12768_v42, %v10712_v17  ;;  %v6159_v19 = vcombine.low %v12907_v45, %v12907_v45  ;;  %v12945_v46 = vrot.slane %v5712_v28, %v10739_v54 }
 0x1e8   :  { %19702 = vst [vmem:[#allocation158_spill] sm:$0xff] %v12920_v4  ;;  %1309 = vbcast.lane.b32.xlu0 %v12822_v29, 256  ;;  %19703 = vst [vmem:[#allocation334_spill] sm:$0xff] %v12930_v10  ;;  %v1340_v29 = vrot.slane %v12768_v42, %v10708_v15  ;;  %v19705_v42 = vcombine.high %v11039_v31, %v11039_v31  ;;  %v6160_v39 = vcombine.high %v12907_v45, %v12907_v45 }
 0x1e9   :  { %19704 = vst [vmem:[#allocation335_spill] sm:$0xff] %v12933_v52  ;;  %v1006_v14 = vpop.permute.xlu1 %1005  ;;  %v1002_v8 = vpop.permute.xlu0 %1001  ;;  %v6175_v31 = vcombine.low %v12933_v52, %v12933_v52  ;;  %v12973_v4 = vrot.slane %v6159_v19, %v10748_v0 }
 0x1ea   :  { %v6143_v55 = vcombine.low %v995_v47, %v1006_v14  ;;  %v6144_v43 = vcombine.high %v995_v47, %v1006_v14  ;;  %v5727_v6 = vcombine.low %v991_v41, %v1002_v8  ;;  %v5728_v48 = vcombine.high %v991_v41, %v1002_v8 }
 0x1eb   :  { %1324 = vbcast.lane.b32.xlu1 %v1318_v27, 264  ;;  %v12953_v22 = vrot.slane %v19705_v42, %v10748_v0  ;;  %v19707_v8 = vcombine.high %v11043_v51, %v11043_v51  ;;  %v5743_v14 = vcombine.low %v5719_v38, %v5719_v38  ;;  %19709 = vst [vmem:[#allocation338_spill] sm:$0xff] %v12973_v4 }
 0x1ec   :  { %v6151_v28 = vrot.slane %v6143_v55, %v10739_v54  ;;  %1320 = vbcast.lane.b32.xlu0 %v1318_v27, 256  ;;  %v5735_v47 = vrot.slane %v5727_v6, %v10739_v54  ;;  %v5742_v45 = vrot.slane %v5728_v48, %v10739_v54  ;;  %v5744_v55 = vcombine.high %v5719_v38, %v5719_v38 }
 0x1ed   :  { %19706 = vst [vmem:[#allocation336_spill] sm:$0xff] %v12953_v22  ;;  %v12964_v41 = vrot.slane %v19707_v8, %v10748_v0  ;;  %v1017_v42 = vpop.permute.xlu1 %1016  ;;  %v5759_v27 = vcombine.low %v12945_v46, %v12945_v46  ;;  %v1013_v53 = vpop.permute.xlu0 %1012  ;;  %v12976_v51 = vrot.slane %v6144_v43, %v10739_v54  ;;  %v5760_v48 = vcombine.high %v12945_v46, %v12945_v46 }
 0x1ee   :  { %v6191_v60 = vcombine.low %v6151_v28, %v6151_v28  ;;  %v5775_v8 = vcombine.low %v5735_v47, %v5735_v47  ;;  %v5776_v10 = vcombine.high %v5735_v47, %v5735_v47  ;;  %v5791_v5 = vcombine.low %v5742_v45, %v5742_v45 }
 0x1ef   :  { %19708 = vst [vmem:[#allocation337_spill] sm:$0xff] %v12964_v41  ;;  %19710 = vst [vmem:[#allocation339_spill] sm:$0xff] %v12976_v51  ;;  %1335 = vbcast.lane.b32.xlu1 %v1329_v25, 264  ;;  %v5792_v6 = vcombine.high %v5742_v45, %v5742_v45  ;;  %v12986_v52 = vrot.slane %v5743_v14, %v10748_v0  ;;  %v13000_v12 = vrot.slane %v5744_v55, %v10748_v0 }
 0x1f0   :  { %1331 = vbcast.lane.b32.xlu0 %v1329_v25, 256  ;;  %v12981_v38 = vrot.slane %v6191_v60, %v10748_v0  ;;  %v12989_v43 = vrot.slane %v5775_v8, %v10748_v0  ;;  %v12992_v47 = vrot.slane %v5776_v10, %v10748_v0  ;;  %v12995_v46 = vrot.slane %v5791_v5, %v10748_v0 }
 0x1f1   :  { %v1028_v19 = vpop.permute.xlu1 %1027  ;;  %19712 = vst [vmem:[#allocation341_spill] sm:$0xff] %v12986_v52  ;;  %v6192_v25 = vcombine.high %v6151_v28, %v6151_v28  ;;  %v1024_v60 = vpop.permute.xlu0 %1023  ;;  %19716 = vst [vmem:[#allocation345_spill] sm:$0xff] %v13000_v12  ;;  %v6207_v8 = vcombine.low %v12976_v51, %v12976_v51  ;;  %v13009_v10 = vrot.slane %v5759_v27, %v10748_v0  ;;  %v19747_v12 = vld [vmem:[#allocation142_spill] sm:$0xff] }
 0x1f2   :  { %19711 = vst [vmem:[#allocation340_spill] sm:$0xff] %v12981_v38  ;;  %19713 = vst [vmem:[#allocation342_spill] sm:$0xff] %v12989_v43  ;;  %v6231_v45 = vcombine.low %v1017_v42, %v1028_v19  ;;  %v6232_v22 = vcombine.high %v1017_v42, %v1028_v19  ;;  %v5815_v28 = vcombine.low %v1013_v53, %v1024_v60 }
 0x1f3   :  { %19714 = vst [vmem:[#allocation343_spill] sm:$0xff] %v12992_v47  ;;  %19715 = vst [vmem:[#allocation344_spill] sm:$0xff] %v12995_v46  ;;  %1346 = vbcast.lane.b32.xlu1 %v1340_v29, 264  ;;  %v13016_v14 = vrot.slane %v5792_v6, %v10748_v0  ;;  %v5816_v19 = vcombine.high %v1013_v53, %v1024_v60  ;;  %v1362_v27 = vrot.slane %v12997_v23, %v10687_v3  ;;  %v19746_v47 = vld [vmem:[#allocation144_spill] sm:$0xff] }
 0x1f4   :  { %19717 = vst [vmem:[#allocation346_spill] sm:$0xff] %v13009_v10  ;;  %1342 = vbcast.lane.b32.xlu0 %v1340_v29, 256  ;;  %v13019_v42 = vrot.slane %v6231_v45, %v10739_v54  ;;  %v1373_v55 = vrot.slane %v12997_v23, %v10684_v2  ;;  %v13028_v41 = vrot.slane %v5760_v48, %v10748_v0 }
 0x1f5   :  { %19718 = vst [vmem:[#allocation347_spill] sm:$0xff] %v13016_v14  ;;  %v1039_v4 = vpop.permute.xlu1 %1038  ;;  %v1035_v5 = vpop.permute.xlu0 %1034  ;;  %v13031_v6 = vrot.slane %v6160_v39, %v10748_v0  ;;  %v13034_v45 = vrot.slane %v6192_v25, %v10748_v0  ;;  %v13037_v53 = vrot.slane %v6232_v22, %v10739_v54  ;;  %v13042_v3 = vrot.slane %v12997_v23, %v10692_v7 }
 0x1f6   :  { %19719 = vst [vmem:[#allocation348_spill] sm:$0xff] %v13028_v41  ;;  %v13046_v2 = vrot.slane %v12997_v23, %v10696_v9  ;;  %v13049_v48 = vrot.slane %v6175_v31, %v10748_v0  ;;  %v5823_v39 = vrot.slane %v5815_v28, %v10739_v54  ;;  %v13058_v7 = vrot.slane %v6207_v8, %v10748_v0 }
 0x1f7   :  { %19720 = vst [vmem:[#allocation349_spill] sm:$0xff] %v13031_v6  ;;  %19721 = vst [vmem:[#allocation350_spill] sm:$0xff] %v13034_v45  ;;  %1357 = vbcast.lane.b32.xlu1 %v12940_v57, 264  ;;  %v6263_v9 = vcombine.low %v13019_v42, %v13019_v42  ;;  %v13063_v60 = vrot.slane %v5816_v19, %v10739_v54  ;;  %v19727_v25 = vcombine.high %v11225_v20, %v11225_v20 }
 0x1f8   :  { %19722 = vst [vmem:[#allocation351_spill] sm:$0xff] %v13037_v53  ;;  %19723 = vst [vmem:[#allocation352_spill] sm:$0xff] %v13049_v48  ;;  %1353 = vbcast.lane.b32.xlu0 %v12940_v57, 256  ;;  %v19725_v57 = vcombine.high %v11221_v24, %v11221_v24  ;;  %v6264_v8 = vcombine.high %v13019_v42, %v13019_v42  ;;  %v5848_v20 = vcombine.high %v5823_v39, %v5823_v39 }
 0x1f9   :  { %19724 = vst [vmem:[#allocation353_spill] sm:$0xff] %v13058_v7  ;;  %v1050_v31 = vpop.permute.xlu1 %1049  ;;  %v13075_v22 = vrot.slane %v19727_v25, %v10748_v0  ;;  %v1046_v38 = vpop.permute.xlu0 %1045  ;;  %v19729_v19 = vcombine.high %v11696_v16, %v11696_v16  ;;  %v5863_v16 = vcombine.low %v13063_v60, %v13063_v60 }
 0x1fa   :  { %v13069_v28 = vrot.slane %v19725_v57, %v10748_v0  ;;  %v6247_v29 = vcombine.low %v1039_v4, %v1050_v31  ;;  %v6248_v57 = vcombine.high %v1039_v4, %v1050_v31  ;;  %v5831_v41 = vcombine.low %v1035_v5, %v1046_v38 }
 0x1fb   :  { %19728 = vst [vmem:[#allocation355_spill] sm:$0xff] %v13075_v22  ;;  %v5832_v10 = vcombine.high %v1035_v5, %v1046_v38  ;;  %1368 = vbcast.lane.b32.xlu1 %v1362_v27, 264  ;;  %v13092_v46 = vrot.slane %v19729_v19, %v10748_v0  ;;  %v19731_v38 = vcombine.high %v19701_v59, %v19701_v59 }
 0x1fc   :  { %19726 = vst [vmem:[#allocation354_spill] sm:$0xff] %v13069_v28  ;;  %v6255_v25 = vrot.slane %v6247_v29, %v10739_v54  ;;  %1364 = vbcast.lane.b32.xlu0 %v1362_v27, 256  ;;  %v5839_v14 = vrot.slane %v5831_v41, %v10739_v54  ;;  %v5847_v29 = vcombine.low %v5823_v39, %v5823_v39 }
 0x1fd   :  { %19730 = vst [vmem:[#allocation356_spill] sm:$0xff] %v13092_v46  ;;  %v5846_v4 = vrot.slane %v5832_v10, %v10739_v54  ;;  %v13096_v31 = vpop.permute.xlu1 %1060  ;;  %v13102_v5 = vrot.slane %v19731_v38, %v10748_v0  ;;  %v1057_v42 = vpop.permute.xlu0 %1056  ;;  %v13109_v41 = vrot.slane %v6263_v9, %v10748_v0  ;;  %v13112_v10 = vrot.slane %v6248_v57, %v10739_v54 }
 0x1fe   :  { %v6295_v19 = vcombine.low %v6255_v25, %v6255_v25  ;;  %v5879_v24 = vcombine.low %v5839_v14, %v5839_v14  ;;  %v5880_v48 = vcombine.high %v5839_v14, %v5839_v14  ;;  %v6296_v38 = vcombine.high %v6255_v25, %v6255_v25 }
 0x1ff   :  { %19732 = vst [vmem:[#allocation357_spill] sm:$0xff] %v13102_v5  ;;  %19733 = vst [vmem:[#allocation358_spill] sm:$0xff] %v13109_v41  ;;  %v5895_v59 = vcombine.low %v5846_v4, %v5846_v4  ;;  %1379 = vbcast.lane.b32.xlu1 %v1373_v55, 264  ;;  %v5896_v7 = vcombine.high %v5846_v4, %v5846_v4  ;;  %v13123_v57 = vrot.slane %v5848_v20, %v10748_v0 }
 0x200   :  { %19734 = vst [vmem:[#allocation359_spill] sm:$0xff] %v13112_v10  ;;  %1375 = vbcast.lane.b32.xlu0 %v1373_v55, 256  ;;  %v13115_v39 = vrot.slane %v6295_v19, %v10748_v0  ;;  %v13120_v9 = vrot.slane %v5879_v24, %v10748_v0  ;;  %v13126_v14 = vrot.slane %v5880_v48, %v10748_v0  ;;  %v19745_v48 = vld [vmem:[#allocation143_spill] sm:$0xff] }
 0x201   :  { %v1072_v45 = vpop.permute.xlu1 %1071  ;;  %19737 = vst [vmem:[#allocation362_spill] sm:$0xff] %v13123_v57  ;;  %v13129_v25 = vrot.slane %v5895_v59, %v10748_v0  ;;  %v5864_v55 = vcombine.high %v13063_v60, %v13063_v60  ;;  %v1068_v19 = vpop.permute.xlu0 %1067  ;;  %v13135_v27 = vrot.slane %v5847_v29, %v10748_v0  ;;  %v6311_v20 = vcombine.low %v13112_v10, %v13112_v10  ;;  %v19749_v57 = vld [vmem:[#allocation162_spill] sm:$0xff] }
 0x202   :  { %19735 = vst [vmem:[#allocation360_spill] sm:$0xff] %v13115_v39  ;;  %19736 = vst [vmem:[#allocation361_spill] sm:$0xff] %v13120_v9  ;;  %v6335_v4 = vcombine.low %v13096_v31, %v1072_v45  ;;  %v13145_v59 = vrot.slane %v5863_v16, %v10748_v0  ;;  %v13148_v60 = vrot.slane %v6264_v8, %v10748_v0 }
 0x203   :  { %19738 = vst [vmem:[#allocation363_spill] sm:$0xff] %v13126_v14  ;;  %19739 = vst [vmem:[#allocation364_spill] sm:$0xff] %v13129_v25  ;;  %1390 = vbcast.lane.b32.xlu1 %v13042_v3, 264  ;;  %v13156_v6 = vrot.slane %v5896_v7, %v10748_v0  ;;  %v13159_v41 = vrot.slane %v6296_v38, %v10748_v0  ;;  %v5919_v39 = vcombine.low %v1057_v42, %v1068_v19  ;;  %v19748_v14 = vld [vmem:[#allocation159_spill] sm:$0xff]  ;;  %v19754_v38 = vld [vmem:[#allocation173_spill] sm:$0xff] }
 0x204   :  { %19740 = vst [vmem:[#allocation365_spill] sm:$0xff] %v13135_v27  ;;  %19741 = vst [vmem:[#allocation366_spill] sm:$0xff] %v13145_v59  ;;  %1386 = vbcast.lane.b32.xlu0 %v13042_v3, 256  ;;  %v13168_v46 = vrot.slane %v6335_v4, %v10739_v54  ;;  %v5920_v24 = vcombine.high %v1057_v42, %v1068_v19  ;;  %v13173_v5 = vrot.slane %v5864_v55, %v10748_v0 }
 0x205   :  { %19742 = vst [vmem:[#allocation367_spill] sm:$0xff] %v13148_v60  ;;  %19743 = vst [vmem:[#allocation368_spill] sm:$0xff] %v13156_v6  ;;  %v1083_v8 = vpop.permute.xlu1 %1082  ;;  %v1079_v7 = vpop.permute.xlu0 %1078  ;;  %v1406_v3 = vrot.slane %v12997_v23, %v10700_v11  ;;  %v19751_v4 = vcombine.low %v13037_v53, %v13037_v53  ;;  %v13187_v19 = vrot.slane %v6311_v20, %v10748_v0 }
 0x206   :  { %19744 = vst [vmem:[#allocation369_spill] sm:$0xff] %v13159_v41  ;;  %19750 = vst [vmem:[#allocation143_spill] sm:$0xff] %v13173_v5  ;;  %v6336_v55 = vcombine.high %v13096_v31, %v1072_v45  ;;  %v5927_v59 = vrot.slane %v5919_v39, %v10739_v54  ;;  %v1417_v45 = vrot.slane %v12997_v23, %v10704_v13  ;;  %v19755_v31 = vld [vmem:[#allocation174_spill] sm:$0xff] }
 0x207   :  { %1401 = vbcast.lane.b32.xlu1 %v13046_v2, 264  ;;  %v13184_v42 = vrot.slane %v19751_v4, %v10748_v0  ;;  %19753 = vst [vmem:[#allocation371_spill] sm:$0xff] %v13187_v19  ;;  %v6367_v29 = vcombine.low %v13168_v46, %v13168_v46  ;;  %v5934_v16 = vrot.slane %v5920_v24, %v10739_v54 }
 0x208   :  { %1397 = vbcast.lane.b32.xlu0 %v13046_v2, 256  ;;  %v19756_v2 = vld [vmem:[#allocation172_spill] sm:$0xff]  ;;  %v1428_v13 = vrot.slane %v12997_v23, %v10708_v15  ;;  %v13212_v53 = vrot.slane %v6336_v55, %v10739_v54  ;;  %v1439_v24 = vrot.slane %v12997_v23, %v10712_v17  ;;  %v5952_v55 = vcombine.high %v5927_v59, %v5927_v59 }
 0x209   :  { %19752 = vst [vmem:[#allocation370_spill] sm:$0xff] %v13184_v42  ;;  %v1094_v20 = vpop.permute.xlu1 %1093  ;;  %v1090_v5 = vpop.permute.xlu0 %1089  ;;  %v5967_v11 = vcombine.low %v5934_v16, %v5934_v16 }
 0x20a   :  { %v6351_v6 = vcombine.low %v1083_v8, %v1094_v20  ;;  %v6352_v4 = vcombine.high %v1083_v8, %v1094_v20  ;;  %v5935_v10 = vcombine.low %v1079_v7, %v1090_v5  ;;  %v5936_v39 = vcombine.high %v1079_v7, %v1090_v5  ;;  %19757 = vst [vmem:[#allocation173_spill] sm:$0xff] %v13212_v53 }
 0x20b   :  { %1412 = vbcast.lane.b32.xlu1 %v1406_v3, 264  ;;  %v6368_v8 = vcombine.high %v13168_v46, %v13168_v46  ;;  %v5951_v5 = vcombine.low %v5927_v59, %v5927_v59  ;;  %v6383_v46 = vcombine.low %v13212_v53, %v13212_v53 }
 0x20c   :  { %v6359_v25 = vrot.slane %v6351_v6, %v10739_v54  ;;  %1408 = vbcast.lane.b32.xlu0 %v1406_v3, 256  ;;  %v5943_v7 = vrot.slane %v5935_v10, %v10739_v54  ;;  %v5950_v15 = vrot.slane %v5936_v39, %v10739_v54  ;;  %v13224_v3 = vrot.slane %v6367_v29, %v10748_v0 }
 0x20d   :  { %v1105_v20 = vpop.permute.xlu1 %1104  ;;  %v1101_v6 = vpop.permute.xlu0 %1100  ;;  %v13227_v17 = vrot.slane %v6352_v4, %v10739_v54  ;;  %v5968_v10 = vcombine.high %v5934_v16, %v5934_v16  ;;  %v13235_v29 = vrot.slane %v5951_v5, %v10748_v0 }
 0x20e   :  { %v6399_v41 = vcombine.low %v6359_v25, %v6359_v25  ;;  %19758 = vst [vmem:[#allocation372_spill] sm:$0xff] %v13224_v3  ;;  %v5983_v23 = vcombine.low %v5943_v7, %v5943_v7  ;;  %v5984_v51 = vcombine.high %v5943_v7, %v5943_v7  ;;  %v5999_v42 = vcombine.low %v5950_v15, %v5950_v15 }
 0x20f   :  { %19759 = vst [vmem:[#allocation373_spill] sm:$0xff] %v13227_v17  ;;  %1423 = vbcast.lane.b32.xlu1 %v1417_v45, 264  ;;  %v6000_v39 = vcombine.high %v5950_v15, %v5950_v15  ;;  %19761 = vst [vmem:[#allocation375_spill] sm:$0xff] %v13235_v29  ;;  %v6400_v53 = vcombine.high %v6359_v25, %v6359_v25  ;;  %v6415_v5 = vcombine.low %v13227_v17, %v13227_v17 }
 0x210   :  { %1419 = vbcast.lane.b32.xlu0 %v1417_v45, 256  ;;  %v13232_v59 = vrot.slane %v6399_v41, %v10748_v0  ;;  %v13238_v4 = vrot.slane %v5983_v23, %v10748_v0  ;;  %v13241_v7 = vrot.slane %v5984_v51, %v10748_v0  ;;  %v13244_v60 = vrot.slane %v5999_v42, %v10748_v0 }
 0x211   :  { %v1116_v19 = vpop.permute.xlu1 %1115  ;;  %v1112_v15 = vpop.permute.xlu0 %1111  ;;  %v13247_v45 = vrot.slane %v5952_v55, %v10748_v0  ;;  %v13256_v42 = vrot.slane %v5967_v11, %v10748_v0  ;;  %v13263_v41 = vrot.slane %v6000_v39, %v10748_v0  ;;  %v4440_v55 = vcombine.high %v11905_v34, %v11905_v34 }
 0x212   :  { %19760 = vst [vmem:[#allocation374_spill] sm:$0xff] %v13232_v59  ;;  %19762 = vst [vmem:[#allocation376_spill] sm:$0xff] %v13238_v4  ;;  %v6855_v16 = vcombine.low %v1105_v20, %v1116_v19  ;;  %v6856_v23 = vcombine.high %v1105_v20, %v1116_v19  ;;  %v6439_v25 = vcombine.low %v1101_v6, %v1112_v15 }
 0x213   :  { %19763 = vst [vmem:[#allocation377_spill] sm:$0xff] %v13241_v7  ;;  %19764 = vst [vmem:[#allocation378_spill] sm:$0xff] %v13244_v60  ;;  %1434 = vbcast.lane.b32.xlu1 %v1428_v13, 264  ;;  %v4408_v19 = vcombine.high %v11897_v50, %v11897_v50  ;;  %v6440_v51 = vcombine.high %v1101_v6, %v1112_v15  ;;  %v13275_v28 = vrot.slane %v5968_v10, %v10748_v0 }
 0x214   :  { %19765 = vst [vmem:[#allocation379_spill] sm:$0xff] %v13247_v45  ;;  %19766 = vst [vmem:[#allocation380_spill] sm:$0xff] %v13256_v42  ;;  %1430 = vbcast.lane.b32.xlu0 %v1428_v13, 256  ;;  %v13268_v20 = vrot.slane %v6855_v16, %v10739_v54  ;;  %v13278_v39 = vrot.slane %v6368_v8, %v10748_v0  ;;  %v13281_v50 = vrot.slane %v6400_v53, %v10748_v0  ;;  %v19782_v45 = vld [vmem:[#allocation12_spill] sm:$0xff] }
 0x215   :  { %19767 = vst [vmem:[#allocation381_spill] sm:$0xff] %v13263_v41  ;;  %v1127_v11 = vpop.permute.xlu1 %1126  ;;  %v1123_v3 = vpop.permute.xlu0 %1122  ;;  %19768 = vst [vmem:[#allocation382_spill] sm:$0xff] %v13275_v28  ;;  %v13284_v16 = vrot.slane %v6856_v23, %v10739_v54  ;;  %v13291_v15 = vrot.slane %v6383_v46, %v10748_v0  ;;  %v6447_v10 = vrot.slane %v6439_v25, %v10739_v54 }
 0x216   :  { %19769 = vst [vmem:[#allocation383_spill] sm:$0xff] %v13278_v39  ;;  %19770 = vst [vmem:[#allocation384_spill] sm:$0xff] %v13281_v50  ;;  %v13299_v23 = vrot.slane %v6415_v5, %v10748_v0  ;;  %v6887_v13 = vcombine.low %v13268_v20, %v13268_v20  ;;  %v13304_v34 = vrot.slane %v6440_v51, %v10739_v54  ;;  %v19781_v51 = vld [vmem:[#allocation10_spill] sm:$0xff] }
 0x217   :  { %19771 = vst [vmem:[#allocation385_spill] sm:$0xff] %v13284_v16  ;;  %1445 = vbcast.lane.b32.xlu1 %v1439_v24, 264  ;;  %19772 = vst [vmem:[#allocation386_spill] sm:$0xff] %v13291_v15  ;;  %v19776_v8 = vcombine.high %v19627_v36, %v19627_v36  ;;  %v6888_v5 = vcombine.high %v13268_v20, %v13268_v20  ;;  %v19778_v36 = vld [vmem:[#allocation24_spill] sm:$0xff]  ;;  %v6472_v20 = vcombine.high %v6447_v10, %v6447_v10 }
 0x218   :  { %1441 = vbcast.lane.b32.xlu0 %v1439_v24, 256  ;;  %19773 = vst [vmem:[#allocation387_spill] sm:$0xff] %v13299_v23  ;;  %v19774_v24 = vcombine.high %v19609_v18, %v19609_v18  ;;  %v19783_v17 = vcombine.high %v19781_v51, %v19782_v45  ;;  %v6471_v18 = vcombine.low %v6447_v10, %v6447_v10  ;;  %v19790_v15 = vld [vmem:[#allocation40_spill] sm:$0xff] }
 0x219   :  { %v1138_v46 = vpop.permute.xlu1 %1137  ;;  %v13316_v53 = vrot.slane %v19776_v8, %v10748_v0  ;;  %v1134_v59 = vpop.permute.xlu0 %1133  ;;  %v19779_v8 = vld [vmem:[#allocation26_spill] sm:$0xff] }
 0x21a   :  { %v13310_v25 = vrot.slane %v19774_v24, %v10748_v0  ;;  %v6871_v6 = vcombine.low %v1127_v11, %v1138_v46  ;;  %v6872_v24 = vcombine.high %v1127_v11, %v1138_v46  ;;  %v6455_v28 = vcombine.low %v1123_v3, %v1134_v59 }
 0x21b   :  { %19777 = vst [vmem:[#allocation389_spill] sm:$0xff] %v13316_v53  ;;  %v6456_v42 = vcombine.high %v1123_v3, %v1134_v59  ;;  %v19780_v60 = vcombine.high %v19778_v36, %v19779_v8  ;;  %v13338_v11 = vrot.slane %v4408_v19, %v10748_v0  ;;  %v13354_v19 = vrot.slane %v6887_v13, %v10748_v0  ;;  %v19789_v36 = vld [vmem:[#allocation38_spill] sm:$0xff]  ;;  %v19827_v53 = vld [vmem:[#allocation128_spill] sm:$0xff] }
 0x21c   :  { %19775 = vst [vmem:[#allocation388_spill] sm:$0xff] %v13310_v25  ;;  %v6879_v7 = vrot.slane %v6871_v6, %v10739_v54  ;;  %8135 = vrot.lane.b32.xlu0 %v19783_v17, %s10641_s0  ;;  %v6463_v3 = vrot.slane %v6455_v28, %v10739_v54  ;;  %v6487_v17 = vcombine.low %v13304_v34, %v13304_v34  ;;  %v19826_v25 = vld [vmem:[#allocation131_spill] sm:$0xff] }
 0x21d   :  { %8137 = vrot.lane.b32.xlu1 %v19780_v60, %s10641_s0  ;;  %19784 = vst [vmem:[#allocation390_spill] sm:$0xff] %v13338_v11  ;;  %v6470_v59 = vrot.slane %v6456_v42, %v10739_v54  ;;  %v13342_v46 = vpop.permute.xlu1 %1148  ;;  %v13345_v60 = vrot.slane %v4440_v55, %v10748_v0  ;;  %v13351_v45 = vpop.permute.xlu0 %1144  ;;  %19786 = vst [vmem:[#allocation392_spill] sm:$0xff] %v13354_v19  ;;  %v13357_v28 = vrot.slane %v6872_v24, %v10739_v54  ;;  %v19811_v11 = vld [vmem:[#allocation224_spill] sm:$0xff]  ;;  %v19814_v19 = vld [vmem:[#allocation235_spill] sm:$0xff] }
 0x21e   :  { %v6919_v41 = vcombine.low %v6879_v7, %v6879_v7  ;;  %v6503_v42 = vcombine.low %v6463_v3, %v6463_v3  ;;  %v6504_v51 = vcombine.high %v6463_v3, %v6463_v3  ;;  %v19788_v6 = vcombine.high %v11046_v49, %v11052_v33  ;;  %v19803_v49 = vld [vmem:[#allocation66_spill] sm:$0xff] }
 0x21f   :  { %19785 = vst [vmem:[#allocation391_spill] sm:$0xff] %v13345_v60  ;;  %19787 = vst [vmem:[#allocation393_spill] sm:$0xff] %v13357_v28  ;;  %v6519_v55 = vcombine.low %v6470_v59, %v6470_v59  ;;  %v6920_v10 = vcombine.high %v6879_v7, %v6879_v7  ;;  %v6520_v8 = vcombine.high %v6470_v59, %v6470_v59 }
 0x220   :  { %v19791_v23 = vcombine.high %v19789_v36, %v19790_v15  ;;  %v13368_v13 = vrot.slane %v6919_v41, %v10748_v0  ;;  %v13373_v50 = vrot.slane %v6503_v42, %v10748_v0  ;;  %v13376_v33 = vrot.slane %v6472_v20, %v10748_v0  ;;  %v19799_v15 = vld [vmem:[#allocation82_spill] sm:$0xff]  ;;  %v19804_v42 = vld [vmem:[#allocation68_spill] sm:$0xff] }
 0x221   :  { %8141 = vrot.lane.b32.xlu1 %v19788_v6, %s10641_s0  ;;  %v1160_v3 = vpop.permute.xlu1 %1159  ;;  %v13379_v7 = vrot.slane %v6504_v51, %v10748_v0  ;;  %v13382_v59 = vrot.slane %v6519_v55, %v10748_v0  ;;  %v6488_v41 = vcombine.high %v13304_v34, %v13304_v34  ;;  %v1156_v6 = vpop.permute.xlu0 %1155  ;;  %v13388_v24 = vrot.slane %v6471_v18, %v10748_v0  ;;  %v19798_v51 = vld [vmem:[#allocation80_spill] sm:$0xff]  ;;  %v19808_v34 = vld [vmem:[#allocation218_spill] sm:$0xff] }
 0x222   :  { %8139 = vrot.lane.b32.xlu0 %v19791_v23, %s10641_s0  ;;  %19792 = vst [vmem:[#allocation394_spill] sm:$0xff] %v13368_v13  ;;  %19793 = vst [vmem:[#allocation395_spill] sm:$0xff] %v13373_v50  ;;  %v6959_v23 = vcombine.low %v13342_v46, %v1160_v3  ;;  %v6935_v20 = vcombine.low %v13357_v28, %v13357_v28  ;;  %v19800_v55 = vcombine.high %v19798_v51, %v19799_v15  ;;  %v19809_v51 = vld [vmem:[#allocation220_spill] sm:$0xff] }
 0x223   :  { %19794 = vst [vmem:[#allocation396_spill] sm:$0xff] %v13376_v33  ;;  %19795 = vst [vmem:[#allocation397_spill] sm:$0xff] %v13379_v7  ;;  %v13401_v36 = vrot.slane %v6487_v17, %v10748_v0  ;;  %v13404_v18 = vrot.slane %v6888_v5, %v10748_v0  ;;  %v19805_v39 = vcombine.high %v19803_v49, %v19804_v42 }
 0x224   :  { %19796 = vst [vmem:[#allocation398_spill] sm:$0xff] %v13382_v59  ;;  %19797 = vst [vmem:[#allocation399_spill] sm:$0xff] %v13388_v24  ;;  %v13415_v15 = vrot.slane %v6520_v8, %v10748_v0  ;;  %v13418_v17 = vrot.slane %v6920_v10, %v10748_v0  ;;  %v13429_v8 = vrot.slane %v6959_v23, %v10739_v54  ;;  %v19810_v10 = vld [vmem:[#allocation221_spill] sm:$0xff]  ;;  %v19822_v59 = vld [vmem:[#allocation272_spill] sm:$0xff] }
 0x225   :  { %8145 = vrot.lane.b32.xlu1 %v19800_v55, %s10641_s0  ;;  %19801 = vst [vmem:[#allocation400_spill] sm:$0xff] %v13401_v36  ;;  %19802 = vst [vmem:[#allocation401_spill] sm:$0xff] %v13404_v18  ;;  %v1171_v42 = vpop.permute.xlu1 %1170  ;;  %v6960_v55 = vcombine.high %v13342_v46, %v1160_v3  ;;  %v1167_v49 = vpop.permute.xlu0 %1166  ;;  %v13434_v5 = vrot.slane %v6488_v41, %v10748_v0  ;;  %v6544_v13 = vcombine.high %v13351_v45, %v1156_v6  ;;  %v19815_v3 = vld [vmem:[#allocation259_spill] sm:$0xff] }
 0x226   :  { %8143 = vrot.lane.b32.xlu0 %v19805_v39, %s10641_s0  ;;  %19806 = vst [vmem:[#allocation402_spill] sm:$0xff] %v13415_v15  ;;  %19807 = vst [vmem:[#allocation403_spill] sm:$0xff] %v13418_v17  ;;  %v6543_v39 = vcombine.low %v13351_v45, %v1156_v6  ;;  %v19813_v28 = vcombine.high %v19652_v44, %v19651_v56  ;;  %v19816_v60 = vcombine.low %v13284_v16, %v13284_v16  ;;  %v19818_v41 = vld [vmem:[#allocation95_spill] sm:$0xff]  ;;  %v19819_v45 = vld [vmem:[#allocation97_spill] sm:$0xff] }
 0x227   :  { %19812 = vst [vmem:[#allocation218_spill] sm:$0xff] %v13434_v5  ;;  %v19820_v6 = vcombine.high %v19818_v41, %v19819_v45  ;;  %v13462_v56 = vrot.slane %v6935_v20, %v10748_v0  ;;  %v19823_v16 = vld [vmem:[#allocation271_spill] sm:$0xff]  ;;  %v13472_v46 = vrot.slane %v6960_v55, %v10739_v54  ;;  %v6991_v23 = vcombine.low %v13429_v8, %v13429_v8 }
 0x228   :  { %v13449_v36 = vrot.slane %v19816_v60, %v10748_v0  ;;  %v6551_v60 = vrot.slane %v6543_v39, %v10739_v54  ;;  %v6558_v15 = vrot.slane %v6544_v13, %v10739_v54  ;;  %v19828_v22 = vcombine.high %v19826_v25, %v19827_v53 }
 0x229   :  { %8149 = vrot.lane.b32.xlu1 %v19813_v28, %s10641_s0  ;;  %19821 = vst [vmem:[#allocation404_spill] sm:$0xff] %v13462_v56  ;;  %v1182_v44 = vpop.permute.xlu1 %1181  ;;  %v19824_v28 = vld [vmem:[#allocation292_spill] sm:$0xff]  ;;  %v1178_v41 = vpop.permute.xlu0 %1177  ;;  %v13501_v13 = vrot.slane %v6991_v23, %v10748_v0 }
 0x22a   :  { %19817 = vst [vmem:[#allocation220_spill] sm:$0xff] %v13449_v36  ;;  %8147 = vrot.lane.b32.xlu0 %v19820_v6, %s10641_s0  ;;  %v6975_v20 = vcombine.low %v1171_v42, %v1182_v44  ;;  %v6559_v7 = vcombine.low %v1167_v49, %v1178_v41  ;;  %v6560_v5 = vcombine.high %v1167_v49, %v1178_v41 }
 0x22b   :  { %v19825_v6 = vcombine.high %v19747_v12, %v19746_v47  ;;  %v6976_v45 = vcombine.high %v1171_v42, %v1182_v44  ;;  %v6992_v41 = vcombine.high %v13429_v8, %v13429_v8  ;;  %v6576_v55 = vcombine.high %v6551_v60, %v6551_v60  ;;  %19829 = vst [vmem:[#allocation405_spill] sm:$0xff] %v13501_v13 }
 0x22c   :  { %v6983_v33 = vrot.slane %v6975_v20, %v10739_v54  ;;  %v6567_v39 = vrot.slane %v6559_v7, %v10739_v54  ;;  %v6574_v44 = vrot.slane %v6560_v5, %v10739_v54  ;;  %v7007_v20 = vcombine.low %v13472_v46, %v13472_v46 }
 0x22d   :  { %8153 = vrot.lane.b32.xlu1 %v19825_v6, %s10641_s0  ;;  %v6575_v6 = vcombine.low %v6551_v60, %v6551_v60  ;;  %v1193_v42 = vpop.permute.xlu1 %1192  ;;  %v1189_v53 = vpop.permute.xlu0 %1188  ;;  %v6591_v25 = vcombine.low %v6558_v15, %v6558_v15  ;;  %v19830_v7 = vcombine.high %v19756_v2, %v19755_v31  ;;  %v6592_v5 = vcombine.high %v6558_v15, %v6558_v15 }
 0x22e   :  { %8151 = vrot.lane.b32.xlu0 %v19828_v22, %s10641_s0  ;;  %v7023_v22 = vcombine.low %v6983_v33, %v6983_v33  ;;  %v6607_v49 = vcombine.low %v6567_v39, %v6567_v39  ;;  %v6608_v47 = vcombine.high %v6567_v39, %v6567_v39  ;;  %v6623_v12 = vcombine.low %v6574_v44, %v6574_v44 }
 0x22f   :  { %v13508_v8 = vrot.slane %v6976_v45, %v10739_v54  ;;  %v6624_v36 = vcombine.high %v6574_v44, %v6574_v44  ;;  %v19831_v60 = vcombine.high %v19749_v57, %v19748_v14  ;;  %v13518_v56 = vrot.slane %v6575_v6, %v10748_v0 }
 0x230   :  { %v13515_v23 = vrot.slane %v7023_v22, %v10748_v0  ;;  %v13521_v31 = vrot.slane %v6607_v49, %v10748_v0  ;;  %v13524_v15 = vrot.slane %v6608_v47, %v10748_v0  ;;  %v13527_v45 = vrot.slane %v6623_v12, %v10748_v0 }
 0x231   :  { %8157 = vrot.lane.b32.xlu1 %v19830_v7, %s10641_s0  ;;  %v1204_v39 = vpop.permute.xlu1 %1203  ;;  %19833 = vst [vmem:[#allocation407_spill] sm:$0xff] %v13518_v56  ;;  %v7024_v44 = vcombine.high %v6983_v33, %v6983_v33  ;;  %v1200_v14 = vpop.permute.xlu0 %1199  ;;  %v19836_v49 = vcombine.high %v12012_v37, %v12020_v1  ;;  %v13541_v33 = vrot.slane %v6591_v25, %v10748_v0 }
 0x232   :  { %8155 = vrot.lane.b32.xlu0 %v19831_v60, %s10641_s0  ;;  %19832 = vst [vmem:[#allocation406_spill] sm:$0xff] %v13515_v23  ;;  %19834 = vst [vmem:[#allocation408_spill] sm:$0xff] %v13521_v31  ;;  %v7063_v7 = vcombine.low %v1193_v42, %v1204_v39  ;;  %v13530_v60 = vrot.slane %v6576_v55, %v10748_v0  ;;  %v7064_v6 = vcombine.high %v1193_v42, %v1204_v39 }
 0x233   :  { %19835 = vst [vmem:[#allocation409_spill] sm:$0xff] %v13527_v45  ;;  %v6647_v57 = vcombine.low %v1189_v53, %v1200_v14  ;;  %19837 = vst [vmem:[#allocation410_spill] sm:$0xff] %v13541_v33  ;;  %v7039_v47 = vcombine.low %v13508_v8, %v13508_v8  ;;  %v19838_v55 = vcombine.high %v11919_v21, %v11910_v35  ;;  %v19840_v35 = vld [vmem:[#allocation141_spill] sm:$0xff] }
 0x234   :  { %v13557_v25 = vrot.slane %v7063_v7, %v10739_v54  ;;  %v6648_v12 = vcombine.high %v1189_v53, %v1200_v14  ;;  %v13568_v39 = vrot.slane %v6592_v5, %v10748_v0  ;;  %v13574_v7 = vrot.slane %v7024_v44, %v10748_v0 }
 0x235   :  { %8161 = vrot.lane.b32.xlu1 %v19836_v49, %s10641_s0  ;;  %v13554_v49 = vrot.slane %v6624_v36, %v10748_v0  ;;  %v1215_v22 = vpop.permute.xlu1 %1214  ;;  %v1211_v42 = vpop.permute.xlu0 %1210  ;;  %v13571_v36 = vrot.slane %v6992_v41, %v10748_v0  ;;  %v13577_v14 = vrot.slane %v7007_v20, %v10748_v0  ;;  %v13580_v53 = vrot.slane %v7064_v6, %v10739_v54 }
 0x236   :  { %8159 = vrot.lane.b32.xlu0 %v19838_v55, %s10641_s0  ;;  %v19841_v55 = vcombine.high %v19840_v35, %v19840_v35  ;;  %19843 = vst [vmem:[#allocation412_spill] sm:$0xff] %v13568_v39  ;;  %19845 = vst [vmem:[#allocation414_spill] sm:$0xff] %v13574_v7  ;;  %v6655_v35 = vrot.slane %v6647_v57, %v10739_v54  ;;  %v19849_v41 = vcombine.high %v19745_v48, %v19745_v48  ;;  %v19891_v7 = vld [vmem:[#allocation204_spill] sm:$0xff] }
 0x237   :  { %19839 = vst [vmem:[#allocation411_spill] sm:$0xff] %v13554_v49  ;;  %19844 = vst [vmem:[#allocation413_spill] sm:$0xff] %v13571_v36  ;;  %v19851_v20 = vcombine.high %v11790_v26, %v11790_v26  ;;  %v19853_v57 = vcombine.high %v19811_v11, %v19810_v10  ;;  %v13608_v48 = vrot.slane %v7039_v47, %v10748_v0 }
 0x238   :  { %v13565_v21 = vrot.slane %v19841_v55, %v10748_v0  ;;  %19846 = vst [vmem:[#allocation415_spill] sm:$0xff] %v13577_v14  ;;  %19847 = vst [vmem:[#allocation416_spill] sm:$0xff] %v13580_v53  ;;  %v19848_v55 = vcombine.high %v19814_v19, %v12238_v40  ;;  %v13591_v5 = vrot.slane %v19849_v41, %v10748_v0 }
 0x239   :  { %v13597_v44 = vrot.slane %v19851_v20, %v10748_v0  ;;  %19854 = vst [vmem:[#allocation419_spill] sm:$0xff] %v13608_v48  ;;  %v19855_v26 = vcombine.high %v19754_v38, %v19754_v38  ;;  %v7095_v20 = vcombine.low %v13557_v25, %v13557_v25  ;;  %v13621_v6 = vrot.slane %v6648_v12, %v10739_v54  ;;  %v1226_v1 = vpop.permute.xlu1 %1225 }
 0x23a   :  { %19842 = vst [vmem:[#allocation141_spill] sm:$0xff] %v13565_v21  ;;  %8165 = vrot.lane.b32.xlu1 %v19848_v55, %s10641_s0  ;;  %19850 = vst [vmem:[#allocation417_spill] sm:$0xff] %v13591_v5  ;;  %8163 = vrot.lane.b32.xlu0 %v19853_v57, %s10641_s0  ;;  %v7096_v57 = vcombine.high %v13557_v25, %v13557_v25  ;;  %v19857_v47 = vcombine.high %v19808_v34, %v19808_v34  ;;  %v20034_v5 = vld [vmem:[#allocation222_spill] sm:$0xff]  ;;  %v20036_v21 = vld [vmem:[#allocation115_spill] sm:$0xff] }
 0x23b   :  { %19852 = vst [vmem:[#allocation418_spill] sm:$0xff] %v13597_v44  ;;  %v13614_v41 = vrot.slane %v19855_v26, %v10748_v0  ;;  %v7079_v10 = vcombine.low %v1215_v22, %v1226_v1  ;;  %v7080_v38 = vcombine.high %v1215_v22, %v1226_v1  ;;  %v1222_v26 = vpop.permute.xlu0 %1221  ;;  %v7111_v12 = vcombine.low %v13580_v53, %v13580_v53  ;;  %v20060_v53 = vld [vmem:[#allocation326_spill] sm:$0xff]  ;;  %v20098_v44 = vld [vmem:[#allocation379_spill] sm:$0xff] }
 0x23c   :  { %v13627_v55 = vrot.slane %v19857_v47, %v10748_v0  ;;  %v6679_v25 = vcombine.low %v6655_v35, %v6655_v35  ;;  %v6663_v19 = vcombine.low %v1211_v42, %v1222_v26  ;;  %v6664_v37 = vcombine.high %v1211_v42, %v1222_v26 }
 0x23d   :  { %19856 = vst [vmem:[#allocation420_spill] sm:$0xff] %v13614_v41  ;;  %v19859_v34 = vcombine.high %v19823_v16, %v19822_v59  ;;  %v6680_v47 = vcombine.high %v6655_v35, %v6655_v35  ;;  %v7087_v1 = vrot.slane %v7079_v10, %v10739_v54  ;;  %v19860_v22 = vcombine.high %v19815_v3, %v12357_v62 }
 0x23e   :  { %19858 = vst [vmem:[#allocation421_spill] sm:$0xff] %v13627_v55  ;;  %v19861_v42 = vcombine.high %v19809_v51, %v19809_v51  ;;  %v6671_v11 = vrot.slane %v6663_v19, %v10739_v54  ;;  %v6678_v35 = vrot.slane %v6664_v37, %v10739_v54  ;;  %v6695_v40 = vcombine.low %v13621_v6, %v13621_v6 }
 0x23f   :  { %8169 = vrot.lane.b32.xlu1 %v19859_v34, %s10641_s0  ;;  %8167 = vrot.lane.b32.xlu0 %v19860_v22, %s10641_s0  ;;  %v13654_v34 = vpop.permute.xlu1 %1236  ;;  %v13663_v62 = vrot.slane %v7080_v38, %v10739_v54  ;;  %v7127_v51 = vcombine.low %v7087_v1, %v7087_v1  ;;  %v13666_v19 = vrot.slane %v7095_v20, %v10748_v0 }
 0x240   :  { %v13650_v26 = vrot.slane %v19861_v42, %v10748_v0  ;;  %19863 = vst [vmem:[#allocation423_spill] sm:$0xff] %v13654_v34  ;;  %v1233_v42 = vpop.permute.xlu0 %1232  ;;  %v7128_v37 = vcombine.high %v7087_v1, %v7087_v1  ;;  %v6711_v3 = vcombine.low %v6671_v11, %v6671_v11  ;;  %v6712_v59 = vcombine.high %v6671_v11, %v6671_v11 }
 0x241   :  { %19864 = vst [vmem:[#allocation424_spill] sm:$0xff] %v13663_v62  ;;  %19865 = vst [vmem:[#allocation425_spill] sm:$0xff] %v13666_v19  ;;  %v6727_v16 = vcombine.low %v6678_v35, %v6678_v35  ;;  %v19866_v10 = vcombine.high %v12743_v30, %v12746_v58  ;;  %v6696_v22 = vcombine.high %v13621_v6, %v13621_v6 }
 0x242   :  { %19862 = vst [vmem:[#allocation422_spill] sm:$0xff] %v13650_v26  ;;  %v6728_v2 = vcombine.high %v6678_v35, %v6678_v35  ;;  %v19867_v38 = vcombine.high %v19824_v28, %v12609_v63  ;;  %v13679_v20 = vrot.slane %v7127_v51, %v10748_v0  ;;  %v13686_v58 = vrot.slane %v6711_v3, %v10748_v0  ;;  %v20068_v26 = vld [vmem:[#allocation363_spill] sm:$0xff] }
 0x243   :  { %8173 = vrot.lane.b32.xlu1 %v19866_v10, %s10641_s0  ;;  %v13683_v1 = vpop.permute.xlu1 %1247  ;;  %v13689_v10 = vrot.slane %v6680_v47, %v10748_v0  ;;  %v13692_v6 = vrot.slane %v6712_v59, %v10748_v0  ;;  %v13695_v35 = vrot.slane %v6727_v16, %v10748_v0  ;;  %v13700_v11 = vrot.slane %v6679_v25, %v10748_v0 }
 0x244   :  { %8171 = vrot.lane.b32.xlu0 %v19867_v38, %s10641_s0  ;;  %19868 = vst [vmem:[#allocation426_spill] sm:$0xff] %v13679_v20  ;;  %19869 = vst [vmem:[#allocation427_spill] sm:$0xff] %v13683_v1  ;;  %v7167_v51 = vcombine.low %v13654_v34, %v13683_v1  ;;  %v1244_v38 = vpop.permute.xlu0 %1243  ;;  %v13705_v63 = vrot.slane %v7096_v57, %v10748_v0  ;;  %v7143_v59 = vcombine.low %v13663_v62, %v13663_v62  ;;  %v20053_v1 = vld [vmem:[#allocation175_spill] sm:$0xff] }
 0x245   :  { %19870 = vst [vmem:[#allocation428_spill] sm:$0xff] %v13686_v58  ;;  %19871 = vst [vmem:[#allocation429_spill] sm:$0xff] %v13695_v35  ;;  %v19874_v16 = vcombine.high %v12986_v52, %v12989_v43  ;;  %v13716_v25 = vrot.slane %v6695_v40, %v10748_v0  ;;  %v13719_v28 = vrot.slane %v7128_v37, %v10748_v0 }
 0x246   :  { %19872 = vst [vmem:[#allocation430_spill] sm:$0xff] %v13700_v11  ;;  %19873 = vst [vmem:[#allocation431_spill] sm:$0xff] %v13705_v63  ;;  %v6751_v3 = vcombine.low %v1233_v42, %v1244_v38  ;;  %v19877_v57 = vcombine.high %v12876_v61, %v12862_v32  ;;  %v13730_v47 = vrot.slane %v6728_v2, %v10748_v0 }
 0x247   :  { %8177 = vrot.lane.b32.xlu1 %v19874_v16, %s10641_s0  ;;  %19875 = vst [vmem:[#allocation432_spill] sm:$0xff] %v13716_v25  ;;  %19876 = vst [vmem:[#allocation433_spill] sm:$0xff] %v13719_v28  ;;  %v13732_v40 = vpop.permute.xlu1 %1258  ;;  %v6016_v37 = vcombine.high %v13235_v29, %v13238_v4  ;;  %v13739_v32 = vrot.slane %v7167_v51, %v10739_v54  ;;  %v5912_v30 = vcombine.high %v13135_v27, %v13120_v9 }
 0x248   :  { %8175 = vrot.lane.b32.xlu0 %v19877_v57, %s10641_s0  ;;  %19878 = vst [vmem:[#allocation434_spill] sm:$0xff] %v13730_v47  ;;  %19879 = vst [vmem:[#allocation435_spill] sm:$0xff] %v13732_v40  ;;  %v6752_v57 = vcombine.high %v1233_v42, %v1244_v38  ;;  %v1255_v61 = vpop.permute.xlu0 %1254  ;;  %v13744_v16 = vrot.slane %v6696_v22, %v10748_v0  ;;  %v13748_v2 = vrot.slane %v7111_v12, %v10748_v0 }
 0x249   :  { %v13751_v4 = vrot.slane %v7143_v59, %v10748_v0  ;;  %v6759_v43 = vrot.slane %v6751_v3, %v10739_v54  ;;  %v6536_v12 = vcombine.high %v13388_v24, %v13373_v50  ;;  %v6640_v59 = vcombine.high %v13518_v56, %v13521_v31 }
 0x24a   :  { %19880 = vst [vmem:[#allocation436_spill] sm:$0xff] %v13744_v16  ;;  %19881 = vst [vmem:[#allocation437_spill] sm:$0xff] %v13748_v2  ;;  %v6766_v3 = vrot.slane %v6752_v57, %v10739_v54  ;;  %v19884_v57 = vld [vmem:[#allocation202_spill] sm:$0xff]  ;;  %v7200_v31 = vcombine.high %v13739_v32, %v13739_v32  ;;  %v19928_v16 = vld [vmem:[#allocation265_spill] sm:$0xff] }
 0x24b   :  { %8181 = vrot.lane.b32.xlu1 %v6016_v37, %s10641_s0  ;;  %19882 = vst [vmem:[#allocation438_spill] sm:$0xff] %v13751_v4  ;;  %v13761_v38 = vpop.permute.xlu1 %1269  ;;  %v6783_v50 = vcombine.low %v6759_v43, %v6759_v43  ;;  %v4512_v56 = vcombine.high %v19884_v57, %v19884_v57  ;;  %v6784_v27 = vcombine.high %v6759_v43, %v6759_v43 }
 0x24c   :  { %8179 = vrot.lane.b32.xlu0 %v5912_v30, %s10641_s0  ;;  %19883 = vst [vmem:[#allocation439_spill] sm:$0xff] %v13761_v38  ;;  %v7199_v30 = vcombine.low %v13739_v32, %v13739_v32  ;;  %v7183_v37 = vcombine.low %v13732_v40, %v13761_v38  ;;  %v1266_v51 = vpop.permute.xlu0 %1265  ;;  %v6800_v48 = vcombine.high %v6766_v3, %v6766_v3 }
 0x24d   :  { %v6767_v42 = vcombine.low %v1255_v61, %v1266_v51  ;;  %v6768_v9 = vcombine.high %v1255_v61, %v1266_v51  ;;  %v6799_v61 = vcombine.low %v6766_v3, %v6766_v3 }
 0x24e   :  { %v7191_v24 = vrot.slane %v7183_v37, %v10739_v54  ;;  %v6744_v37 = vcombine.high %v13700_v11, %v13686_v58  ;;  %v13801_v11 = vrot.slane %v6784_v27, %v10748_v0 }
 0x24f   :  { %8185 = vrot.lane.b32.xlu1 %v6640_v59, %s10641_s0  ;;  %v6775_v29 = vrot.slane %v6767_v42, %v10739_v54  ;;  %v6782_v22 = vrot.slane %v6768_v9, %v10739_v54  ;;  %v1281_v52 = vpop.permute.xlu1 %1280  ;;  %v13792_v9 = vrot.slane %v6783_v50, %v10748_v0 }
 0x250   :  { %8183 = vrot.lane.b32.xlu0 %v6536_v12, %s10641_s0  ;;  %v7231_v51 = vcombine.low %v7191_v24, %v7191_v24  ;;  %v1277_v59 = vpop.permute.xlu0 %1276  ;;  %v13786_v12 = vrot.slane %v7199_v30, %v10748_v0 }
 0x251   :  { %v6815_v14 = vcombine.low %v6775_v29, %v6775_v29  ;;  %v6816_v57 = vcombine.high %v6775_v29, %v6775_v29  ;;  %v6831_v43 = vcombine.low %v6782_v22, %v6782_v22  ;;  %v6832_v42 = vcombine.high %v6782_v22, %v6782_v22  ;;  %19886 = vst [vmem:[#allocation440_spill] sm:$0xff] %v13792_v9 }
 0x252   :  { %19885 = vst [vmem:[#allocation202_spill] sm:$0xff] %v13786_v12  ;;  %v13795_v2 = vrot.slane %v7231_v51, %v10748_v0  ;;  %v7232_v22 = vcombine.high %v7191_v24, %v7191_v24 }
 0x253   :  { %v1292_v58 = vpop.permute.xlu1 %1291  ;;  %v13798_v30 = vrot.slane %v6815_v14, %v10748_v0  ;;  %v13804_v32 = vrot.slane %v6816_v57, %v10748_v0  ;;  %v13807_v29 = vrot.slane %v6831_v43, %v10748_v0  ;;  %v4544_v43 = vcombine.high %v19891_v7, %v19891_v7 }
 0x254   :  { %8187 = vrot.lane.b32.xlu0 %v6744_v37, %s10641_s0  ;;  %19887 = vst [vmem:[#allocation441_spill] sm:$0xff] %v13795_v2  ;;  %v7687_v3 = vcombine.low %v1281_v52, %v1292_v58  ;;  %v1288_v50 = vpop.permute.xlu0 %1287  ;;  %v13810_v37 = vrot.slane %v6799_v61, %v10748_v0  ;;  %v7688_v14 = vcombine.high %v1281_v52, %v1292_v58  ;;  %v19893_v58 = vld [vmem:[#allocation248_spill] sm:$0xff] }
 0x255   :  { %19888 = vst [vmem:[#allocation442_spill] sm:$0xff] %v13798_v30  ;;  %19889 = vst [vmem:[#allocation443_spill] sm:$0xff] %v13807_v29  ;;  %v7271_v4 = vcombine.low %v1277_v59, %v1288_v50  ;;  %v6848_v27 = vcombine.high %v13792_v9, %v13798_v30  ;;  %v13825_v36 = vrot.slane %v6832_v42, %v10748_v0  ;;  %v19899_v9 = vld [vmem:[#allocation253_spill] sm:$0xff] }
 0x256   :  { %19890 = vst [vmem:[#allocation444_spill] sm:$0xff] %v13810_v37  ;;  %v5240_v52 = vcombine.high %v19893_v58, %v19893_v58  ;;  %v13830_v51 = vrot.slane %v7687_v3, %v10739_v54  ;;  %v7272_v28 = vcombine.high %v1277_v59, %v1288_v50  ;;  %v13837_v61 = vrot.slane %v6800_v48, %v10748_v0  ;;  %v19897_v3 = vld [vmem:[#allocation234_spill] sm:$0xff]  ;;  %v19898_v50 = vld [vmem:[#allocation236_spill] sm:$0xff] }
 0x257   :  { %19892 = vst [vmem:[#allocation204_spill] sm:$0xff] %v13825_v36  ;;  %8189 = vrot.lane.b32.xlu1 %v6848_v27, %s10641_s0  ;;  %v1303_v57 = vpop.permute.xlu1 %1302  ;;  %v7279_v24 = vrot.slane %v7271_v4, %v10739_v54  ;;  %v13840_v42 = vrot.slane %v7200_v31, %v10748_v0  ;;  %v13843_v58 = vrot.slane %v7232_v22, %v10748_v0 }
 0x258   :  { %v1299_v30 = vpop.permute.xlu0 %1298  ;;  %19894 = vst [vmem:[#allocation248_spill] sm:$0xff] %v13837_v61  ;;  %v5272_v7 = vcombine.high %v19899_v9, %v19899_v9  ;;  %v13852_v4 = vrot.slane %v7688_v14, %v10739_v54  ;;  %v13859_v22 = vrot.slane %v4512_v56, %v10748_v0  ;;  %v13862_v59 = vrot.slane %v4544_v43, %v10748_v0 }
 0x259   :  { %19895 = vst [vmem:[#allocation445_spill] sm:$0xff] %v13840_v42  ;;  %19896 = vst [vmem:[#allocation446_spill] sm:$0xff] %v13843_v58  ;;  %v7719_v27 = vcombine.low %v13830_v51, %v13830_v51  ;;  %v7720_v9 = vcombine.high %v13830_v51, %v13830_v51  ;;  %v7286_v14 = vrot.slane %v7272_v28, %v10739_v54 }
 0x25a   :  { %19900 = vst [vmem:[#allocation234_spill] sm:$0xff] %v13852_v4  ;;  %19901 = vst [vmem:[#allocation236_spill] sm:$0xff] %v13859_v22  ;;  %v13870_v48 = vrot.slane %v5240_v52, %v10748_v0  ;;  %v7303_v17 = vcombine.low %v7279_v24, %v7279_v24  ;;  %v7735_v12 = vcombine.low %v13852_v4, %v13852_v4 }
 0x25b   :  { %19902 = vst [vmem:[#allocation253_spill] sm:$0xff] %v13862_v59  ;;  %v1314_v63 = vpop.permute.xlu1 %1313  ;;  %v7304_v28 = vcombine.high %v7279_v24, %v7279_v24  ;;  %v13880_v52 = vrot.slane %v5272_v7, %v10748_v0  ;;  %v7319_v20 = vcombine.low %v7286_v14, %v7286_v14  ;;  %v13894_v7 = vrot.slane %v7719_v27, %v10748_v0 }
 0x25c   :  { %19903 = vst [vmem:[#allocation447_spill] sm:$0xff] %v13870_v48  ;;  %v7703_v31 = vcombine.low %v1303_v57, %v1314_v63  ;;  %v1310_v18 = vpop.permute.xlu0 %1309  ;;  %v7704_v2 = vcombine.high %v1303_v57, %v1314_v63  ;;  %v5344_v37 = vcombine.high %v19928_v16, %v19928_v16 }
 0x25d   :  { %v7287_v51 = vcombine.low %v1299_v30, %v1310_v18  ;;  %v7288_v13 = vcombine.high %v1299_v30, %v1310_v18  ;;  %19904 = vst [vmem:[#allocation448_spill] sm:$0xff] %v13880_v52  ;;  %v7320_v18 = vcombine.high %v7286_v14, %v7286_v14  ;;  %19909 = vst [vmem:[#allocation451_spill] sm:$0xff] %v13894_v7 }
 0x25e   :  { %v7711_v23 = vrot.slane %v7703_v31, %v10739_v54  ;;  %v13891_v31 = vrot.slane %v7303_v17, %v10748_v0  ;;  %v13897_v19 = vrot.slane %v7704_v2, %v10739_v54  ;;  %v13910_v27 = vrot.slane %v7304_v28, %v10748_v0 }
 0x25f   :  { %v7295_v56 = vrot.slane %v7287_v51, %v10739_v54  ;;  %v7302_v43 = vrot.slane %v7288_v13, %v10739_v54  ;;  %v13886_v58 = vpop.permute.xlu1 %1324  ;;  %v13926_v14 = vrot.slane %v7720_v9, %v10748_v0  ;;  %v13953_v63 = vrot.slane %v7320_v18, %v10748_v0 }
 0x260   :  { %19905 = vst [vmem:[#allocation449_spill] sm:$0xff] %v13886_v58  ;;  %v7751_v30 = vcombine.low %v7711_v23, %v7711_v23  ;;  %v1321_v24 = vpop.permute.xlu0 %1320  ;;  %19908 = vst [vmem:[#allocation450_spill] sm:$0xff] %v13891_v31  ;;  %v7752_v61 = vcombine.high %v7711_v23, %v7711_v23 }
 0x261   :  { %19910 = vst [vmem:[#allocation452_spill] sm:$0xff] %v13897_v19  ;;  %v7335_v51 = vcombine.low %v7295_v56, %v7295_v56  ;;  %v7336_v36 = vcombine.high %v7295_v56, %v7295_v56  ;;  %v7351_v13 = vcombine.low %v7302_v43, %v7302_v43  ;;  %v7352_v49 = vcombine.high %v7302_v43, %v7302_v43 }
 0x262   :  { %v13900_v39 = vrot.slane %v7751_v30, %v10748_v0  ;;  %v13921_v30 = vrot.slane %v7319_v20, %v10748_v0  ;;  %19916 = vst [vmem:[#allocation458_spill] sm:$0xff] %v13926_v14  ;;  %v13942_v9 = vrot.slane %v7752_v61, %v10748_v0  ;;  %19920 = vst [vmem:[#allocation462_spill] sm:$0xff] %v13953_v63  ;;  %v19929_v14 = vld [vmem:[#allocation269_spill] sm:$0xff] }
 0x263   :  { %v13904_v57 = vpop.permute.xlu1 %1335  ;;  %v13907_v17 = vrot.slane %v7335_v51, %v10748_v0  ;;  %v13913_v2 = vrot.slane %v7336_v36, %v10748_v0  ;;  %v13916_v23 = vrot.slane %v7351_v13, %v10748_v0  ;;  %v7767_v36 = vcombine.low %v13897_v19, %v13897_v19  ;;  %v20018_v19 = vld [vmem:[#allocation157_spill] sm:$0xff] }
 0x264   :  { %19911 = vst [vmem:[#allocation453_spill] sm:$0xff] %v13900_v39  ;;  %19912 = vst [vmem:[#allocation454_spill] sm:$0xff] %v13904_v57  ;;  %v7791_v56 = vcombine.low %v13886_v58, %v13904_v57  ;;  %v1332_v43 = vpop.permute.xlu0 %1331  ;;  %v13939_v51 = vrot.slane %v7352_v49, %v10748_v0  ;;  %v13957_v61 = vrot.slane %v7735_v12, %v10748_v0 }
 0x265   :  { %19913 = vst [vmem:[#allocation455_spill] sm:$0xff] %v13907_v17  ;;  %19914 = vst [vmem:[#allocation456_spill] sm:$0xff] %v13916_v23  ;;  %v7375_v28 = vcombine.low %v1321_v24, %v1332_v43  ;;  %v7368_v13 = vcombine.high %v13891_v31, %v13907_v17  ;;  %v7376_v7 = vcombine.high %v1321_v24, %v1332_v43 }
 0x266   :  { %19915 = vst [vmem:[#allocation457_spill] sm:$0xff] %v13921_v30  ;;  %19917 = vst [vmem:[#allocation459_spill] sm:$0xff] %v13939_v51  ;;  %v13950_v47 = vrot.slane %v7791_v56, %v10739_v54  ;;  %v19922_v24 = vcombine.high %v19897_v3, %v19897_v3  ;;  %v19924_v56 = vcombine.high %v19898_v50, %v19898_v50 }
 0x267   :  { %19918 = vst [vmem:[#allocation460_spill] sm:$0xff] %v13942_v9  ;;  %8191 = vrot.lane.b32.xlu0 %v7368_v13, %s10641_s0  ;;  %v13945_v39 = vpop.permute.xlu1 %1346  ;;  %v7383_v49 = vrot.slane %v7375_v28, %v10739_v54  ;;  %19921 = vst [vmem:[#allocation463_spill] sm:$0xff] %v13957_v61  ;;  %v13978_v42 = vrot.slane %v7767_v36, %v10748_v0  ;;  %v7390_v3 = vrot.slane %v7376_v7, %v10739_v54 }
 0x268   :  { %19919 = vst [vmem:[#allocation461_spill] sm:$0xff] %v13945_v39  ;;  %v1343_v20 = vpop.permute.xlu0 %1342  ;;  %v13963_v43 = vrot.slane %v19922_v24, %v10748_v0  ;;  %v13969_v13 = vrot.slane %v19924_v56, %v10748_v0  ;;  %v7823_v50 = vcombine.low %v13950_v47, %v13950_v47 }
 0x269   :  { %19926 = vst [vmem:[#allocation466_spill] sm:$0xff] %v13978_v42  ;;  %v7407_v17 = vcombine.low %v7383_v49, %v7383_v49  ;;  %v7408_v51 = vcombine.high %v7383_v49, %v7383_v49  ;;  %v7423_v29 = vcombine.low %v7390_v3, %v7390_v3  ;;  %v7824_v49 = vcombine.high %v13950_v47, %v13950_v47 }
 0x26a   :  { %19923 = vst [vmem:[#allocation464_spill] sm:$0xff] %v13963_v43  ;;  %19925 = vst [vmem:[#allocation465_spill] sm:$0xff] %v13969_v13  ;;  %v14003_v7 = vrot.slane %v7823_v50, %v10748_v0  ;;  %v7424_v63 = vcombine.high %v7390_v3, %v7390_v3  ;;  %v20041_v43 = vld [vmem:[#allocation257_spill] sm:$0xff] }
 0x26b   :  { %v13981_v24 = vpop.permute.xlu1 %1357 }
 0x26c   :  { %19927 = vst [vmem:[#allocation467_spill] sm:$0xff] %v13981_v24  ;;  %v7807_v56 = vcombine.low %v13945_v39, %v13981_v24  ;;  %v1354_v18 = vpop.permute.xlu0 %1353  ;;  %19930 = vst [vmem:[#allocation265_spill] sm:$0xff] %v14003_v7 }
 0x26d   :  { %v7391_v31 = vcombine.low %v1343_v20, %v1354_v18  ;;  %v7392_v12 = vcombine.high %v1343_v20, %v1354_v18  ;;  %v5376_v20 = vcombine.high %v19929_v14, %v19929_v14 }
 0x26e   :  { %v7815_v36 = vrot.slane %v7807_v56, %v10739_v54 }
 0x26f   :  { %v7399_v33 = vrot.slane %v7391_v31, %v10739_v54  ;;  %v7406_v28 = vrot.slane %v7392_v12, %v10739_v54  ;;  %v1369_v9 = vpop.permute.xlu1 %1368  ;;  %v14006_v31 = vrot.slane %v7407_v17, %v10748_v0  ;;  %v14009_v12 = vrot.slane %v7408_v51, %v10748_v0 }
 0x270   :  { %v7855_v18 = vcombine.low %v7815_v36, %v7815_v36  ;;  %v1365_v56 = vpop.permute.xlu0 %1364  ;;  %v7856_v17 = vcombine.high %v7815_v36, %v7815_v36 }
 0x271   :  { %v7439_v61 = vcombine.low %v7399_v33, %v7399_v33  ;;  %v7440_v16 = vcombine.high %v7399_v33, %v7399_v33  ;;  %v7455_v42 = vcombine.low %v7406_v28, %v7406_v28  ;;  %v7456_v45 = vcombine.high %v7406_v28, %v7406_v28  ;;  %19931 = vst [vmem:[#allocation269_spill] sm:$0xff] %v14006_v31 }
 0x272   :  { %v14012_v14 = vrot.slane %v7855_v18, %v10748_v0  ;;  %v14021_v33 = vrot.slane %v7423_v29, %v10748_v0 }
 0x273   :  { %v1380_v47 = vpop.permute.xlu1 %1379  ;;  %v14015_v30 = vrot.slane %v7439_v61, %v10748_v0  ;;  %v14018_v50 = vrot.slane %v7440_v16, %v10748_v0  ;;  %v14024_v28 = vrot.slane %v7455_v42, %v10748_v0  ;;  %v14038_v36 = vrot.slane %v7456_v45, %v10748_v0 }
 0x274   :  { %19932 = vst [vmem:[#allocation468_spill] sm:$0xff] %v14012_v14  ;;  %19934 = vst [vmem:[#allocation470_spill] sm:$0xff] %v14021_v33  ;;  %v7895_v3 = vcombine.low %v1369_v9, %v1380_v47  ;;  %v7896_v51 = vcombine.high %v1369_v9, %v1380_v47  ;;  %v1376_v23 = vpop.permute.xlu0 %1375  ;;  %v19937_v47 = vld [vmem:[#allocation281_spill] sm:$0xff]  ;;  %v14050_v9 = vrot.slane %v7424_v63, %v10748_v0 }
 0x275   :  { %19933 = vst [vmem:[#allocation469_spill] sm:$0xff] %v14015_v30  ;;  %19935 = vst [vmem:[#allocation471_spill] sm:$0xff] %v14024_v28  ;;  %v7479_v25 = vcombine.low %v1365_v56, %v1376_v23  ;;  %v7480_v35 = vcombine.high %v1365_v56, %v1376_v23  ;;  %v7472_v61 = vcombine.high %v14006_v31, %v14015_v30 }
 0x276   :  { %v7903_v29 = vrot.slane %v7895_v3, %v10739_v54  ;;  %19936 = vst [vmem:[#allocation472_spill] sm:$0xff] %v14038_v36  ;;  %v5448_v23 = vcombine.high %v19937_v47, %v19937_v47  ;;  %v14043_v56 = vrot.slane %v7896_v51, %v10739_v54  ;;  %19939 = vst [vmem:[#allocation473_spill] sm:$0xff] %v14050_v9  ;;  %v19942_v51 = vld [vmem:[#allocation285_spill] sm:$0xff] }
 0x277   :  { %v7487_v18 = vrot.slane %v7479_v25, %v10739_v54  ;;  %8193 = vrot.lane.b32.xlu1 %v7472_v61, %s10641_s0  ;;  %v1391_v3 = vpop.permute.xlu1 %1390  ;;  %v14053_v45 = vrot.slane %v7824_v49, %v10748_v0  ;;  %v14056_v47 = vrot.slane %v7856_v17, %v10748_v0  ;;  %v5480_v30 = vcombine.high %v19942_v51, %v19942_v51 }
 0x278   :  { %19938 = vst [vmem:[#allocation281_spill] sm:$0xff] %v14043_v56  ;;  %v1387_v16 = vpop.permute.xlu0 %1386  ;;  %v14061_v25 = vrot.slane %v7480_v35, %v10739_v54  ;;  %v14064_v61 = vrot.slane %v5344_v37, %v10748_v0  ;;  %v7927_v42 = vcombine.low %v7903_v29, %v7903_v29  ;;  %v14071_v31 = vrot.slane %v5376_v20, %v10748_v0 }
 0x279   :  { %19940 = vst [vmem:[#allocation474_spill] sm:$0xff] %v14053_v45  ;;  %19941 = vst [vmem:[#allocation475_spill] sm:$0xff] %v14056_v47  ;;  %v7928_v17 = vcombine.high %v7903_v29, %v7903_v29  ;;  %v7943_v51 = vcombine.low %v14043_v56, %v14043_v56  ;;  %v7511_v7 = vcombine.low %v7487_v18, %v7487_v18 }
 0x27a   :  { %19943 = vst [vmem:[#allocation285_spill] sm:$0xff] %v14064_v61  ;;  %19944 = vst [vmem:[#allocation476_spill] sm:$0xff] %v14071_v31  ;;  %v14076_v14 = vrot.slane %v5448_v23, %v10748_v0  ;;  %v7512_v37 = vcombine.high %v7487_v18, %v7487_v18  ;;  %v7527_v20 = vcombine.low %v14061_v25, %v14061_v25 }
 0x27b   :  { %v1402_v35 = vpop.permute.xlu1 %1401  ;;  %v7528_v9 = vcombine.high %v14061_v25, %v14061_v25  ;;  %v14088_v18 = vrot.slane %v7927_v42, %v10748_v0  ;;  %v14108_v58 = vrot.slane %v7511_v7, %v10748_v0 }
 0x27c   :  { %19945 = vst [vmem:[#allocation477_spill] sm:$0xff] %v14076_v14  ;;  %v7911_v33 = vcombine.low %v1391_v3, %v1402_v35  ;;  %v7912_v28 = vcombine.high %v1391_v3, %v1402_v35  ;;  %v1398_v39 = vpop.permute.xlu0 %1397  ;;  %v14091_v3 = vrot.slane %v5480_v30, %v10748_v0  ;;  %v14105_v30 = vrot.slane %v7928_v17, %v10748_v0 }
 0x27d   :  { %v7495_v49 = vcombine.low %v1387_v16, %v1398_v39  ;;  %v7496_v29 = vcombine.high %v1387_v16, %v1398_v39  ;;  %19946 = vst [vmem:[#allocation478_spill] sm:$0xff] %v14088_v18  ;;  %19953 = vst [vmem:[#allocation483_spill] sm:$0xff] %v14108_v58  ;;  %v14111_v39 = vrot.slane %v7512_v37, %v10748_v0  ;;  %v19967_v18 = vld [vmem:[#allocation317_spill] sm:$0xff] }
 0x27e   :  { %v7919_v23 = vrot.slane %v7911_v33, %v10739_v54  ;;  %19947 = vst [vmem:[#allocation479_spill] sm:$0xff] %v14091_v3  ;;  %v14102_v33 = vrot.slane %v7912_v28, %v10739_v54  ;;  %19952 = vst [vmem:[#allocation482_spill] sm:$0xff] %v14105_v30  ;;  %v14127_v7 = vrot.slane %v7527_v20, %v10748_v0  ;;  %v19972_v3 = vld [vmem:[#allocation322_spill] sm:$0xff] }
 0x27f   :  { %v7503_v35 = vrot.slane %v7495_v49, %v10739_v54  ;;  %v7510_v63 = vrot.slane %v7496_v29, %v10739_v54  ;;  %v14095_v56 = vpop.permute.xlu1 %1412 }
 0x280   :  { %19948 = vst [vmem:[#allocation480_spill] sm:$0xff] %v14095_v56  ;;  %19951 = vst [vmem:[#allocation481_spill] sm:$0xff] %v14102_v33  ;;  %v7959_v42 = vcombine.low %v7919_v23, %v7919_v23  ;;  %v7960_v47 = vcombine.high %v7919_v23, %v7919_v23  ;;  %v1409_v45 = vpop.permute.xlu0 %1408  ;;  %v7975_v37 = vcombine.low %v14102_v33, %v14102_v33 }
 0x281   :  { %v7543_v49 = vcombine.low %v7503_v35, %v7503_v35  ;;  %v7544_v24 = vcombine.high %v7503_v35, %v7503_v35  ;;  %v7559_v29 = vcombine.low %v7510_v63, %v7510_v63  ;;  %v7560_v57 = vcombine.high %v7510_v63, %v7510_v63  ;;  %19957 = vst [vmem:[#allocation487_spill] sm:$0xff] %v14127_v7  ;;  %v19968_v7 = vld [vmem:[#allocation11_spill] sm:$0xff] }
 0x282   :  { %v14114_v25 = vrot.slane %v7959_v42, %v10748_v0  ;;  %v14139_v16 = vrot.slane %v7960_v47, %v10748_v0 }
 0x283   :  { %v14118_v23 = vpop.permute.xlu1 %1423  ;;  %v14121_v17 = vrot.slane %v7543_v49, %v10748_v0  ;;  %v14124_v35 = vrot.slane %v7544_v24, %v10748_v0  ;;  %v14130_v63 = vrot.slane %v7559_v29, %v10748_v0  ;;  %v14151_v49 = vrot.slane %v7560_v57, %v10748_v0 }
 0x284   :  { %19954 = vst [vmem:[#allocation484_spill] sm:$0xff] %v14114_v25  ;;  %19955 = vst [vmem:[#allocation485_spill] sm:$0xff] %v14118_v23  ;;  %v7999_v42 = vcombine.low %v14095_v56, %v14118_v23  ;;  %v1420_v28 = vpop.permute.xlu0 %1419  ;;  %v14164_v23 = vrot.slane %v7943_v51, %v10748_v0  ;;  %v14167_v57 = vrot.slane %v7975_v37, %v10748_v0 }
 0x285   :  { %19956 = vst [vmem:[#allocation486_spill] sm:$0xff] %v14121_v17  ;;  %19958 = vst [vmem:[#allocation488_spill] sm:$0xff] %v14130_v63  ;;  %v7583_v24 = vcombine.low %v1409_v45, %v1420_v28  ;;  %v7584_v36 = vcombine.high %v1409_v45, %v1420_v28  ;;  %v7576_v20 = vcombine.high %v14108_v58, %v14121_v17 }
 0x286   :  { %19959 = vst [vmem:[#allocation489_spill] sm:$0xff] %v14139_v16  ;;  %v8007_v14 = vrot.slane %v7999_v42, %v10739_v54  ;;  %19960 = vst [vmem:[#allocation490_spill] sm:$0xff] %v14151_v49  ;;  %v14160_v42 = vrot.slane %v7528_v9, %v10748_v0  ;;  %v19965_v9 = vld [vmem:[#allocation301_spill] sm:$0xff]  ;;  %v6072_v37 = vcombine.high %v19967_v18, %v19967_v18 }
 0x287   :  { %v7591_v47 = vrot.slane %v7583_v24, %v10739_v54  ;;  %8195 = vrot.lane.b32.xlu0 %v7576_v20, %s10641_s0  ;;  %v14155_v45 = vpop.permute.xlu1 %1434  ;;  %v7598_v56 = vrot.slane %v7584_v36, %v10739_v54  ;;  %19963 = vst [vmem:[#allocation493_spill] sm:$0xff] %v14164_v23  ;;  %19964 = vst [vmem:[#allocation494_spill] sm:$0xff] %v14167_v57  ;;  %v5552_v58 = vcombine.high %v19965_v9, %v19965_v9  ;;  %v19966_v36 = vld [vmem:[#allocation305_spill] sm:$0xff] }
 0x288   :  { %19961 = vst [vmem:[#allocation491_spill] sm:$0xff] %v14155_v45  ;;  %v1431_v29 = vpop.permute.xlu0 %1430  ;;  %19962 = vst [vmem:[#allocation492_spill] sm:$0xff] %v14160_v42  ;;  %v8031_v24 = vcombine.low %v8007_v14, %v8007_v14  ;;  %v5584_v51 = vcombine.high %v19966_v36, %v19966_v36  ;;  %v19969_v20 = vld [vmem:[#allocation13_spill] sm:$0xff]  ;;  %v8032_v49 = vcombine.high %v8007_v14, %v8007_v14  ;;  %v19974_v36 = vld [vmem:[#allocation39_spill] sm:$0xff] }
 0x289   :  { %v7615_v25 = vcombine.low %v7591_v47, %v7591_v47  ;;  %v19970_v63 = vcombine.low %v19968_v7, %v19969_v20  ;;  %v7616_v28 = vcombine.high %v7591_v47, %v7591_v47  ;;  %v6104_v18 = vcombine.high %v19972_v3, %v19972_v3  ;;  %v19975_v16 = vld [vmem:[#allocation41_spill] sm:$0xff] }
 0x28a   :  { %v7631_v33 = vcombine.low %v7598_v56, %v7598_v56  ;;  %v7632_v48 = vcombine.high %v7598_v56, %v7598_v56  ;;  %v14195_v52 = vrot.slane %v8031_v24, %v10748_v0  ;;  %v19976_v3 = vcombine.low %v19974_v36, %v19975_v16 }
 0x28b   :  { %8263 = vrot.lane.b32.xlu0 %v19970_v63, %s10642_s20  ;;  %v14185_v17 = vpop.permute.xlu1 %1445 }
 0x28c   :  { %19971 = vst [vmem:[#allocation301_spill] sm:$0xff] %v14185_v17  ;;  %v8015_v9 = vcombine.low %v14155_v45, %v14185_v17  ;;  %v1442_v42 = vpop.permute.xlu0 %1441  ;;  %19973 = vst [vmem:[#allocation305_spill] sm:$0xff] %v14195_v52  ;;  %v14211_v17 = vrot.slane %v7616_v28, %v10748_v0  ;;  %v19985_v28 = vld [vmem:[#allocation67_spill] sm:$0xff] }
 0x28d   :  { %v7599_v61 = vcombine.low %v1431_v29, %v1442_v42  ;;  %v7600_v31 = vcombine.high %v1431_v29, %v1442_v42  ;;  %v14206_v29 = vrot.slane %v7615_v25, %v10748_v0  ;;  %v14220_v25 = vrot.slane %v7632_v48, %v10748_v0  ;;  %v19994_v42 = vld [vmem:[#allocation98_spill] sm:$0xff] }
 0x28e   :  { %v8023_v63 = vrot.slane %v8015_v9, %v10739_v54 }
 0x28f   :  { %v7607_v47 = vrot.slane %v7599_v61, %v10739_v54  ;;  %v7614_v45 = vrot.slane %v7600_v31, %v10739_v54  ;;  %8267 = vrot.lane.b32.xlu0 %v19976_v3, %s10642_s20  ;;  %19977 = vst [vmem:[#allocation317_spill] sm:$0xff] %v14206_v29  ;;  %v14214_v61 = vrot.slane %v8032_v49, %v10748_v0  ;;  %19982 = vst [vmem:[#allocation322_spill] sm:$0xff] %v14220_v25  ;;  %v19986_v49 = vld [vmem:[#allocation69_spill] sm:$0xff]  ;;  %v20017_v25 = vld [vmem:[#allocation339_spill] sm:$0xff]  ;;  %v14387_v62 = vpop.permute.xlu1 %8137 }
 0x290   :  { %v8063_v24 = vcombine.low %v8023_v63, %v8023_v63  ;;  %v8064_v30 = vcombine.high %v8023_v63, %v8023_v63  ;;  %v14217_v3 = vrot.slane %v7631_v33, %v10748_v0  ;;  %v19987_v56 = vcombine.low %v19985_v28, %v19986_v49  ;;  %v20047_v54 = vld [vmem:[#allocation359_spill] sm:$0xff] }
 0x291   :  { %19980 = vst [vmem:[#allocation11_spill] sm:$0xff] %v14214_v61  ;;  %v7647_v31 = vcombine.low %v7607_v47, %v7607_v47  ;;  %v7648_v14 = vcombine.high %v7607_v47, %v7607_v47  ;;  %v7663_v23 = vcombine.low %v7614_v45, %v7614_v45  ;;  %v7664_v57 = vcombine.high %v7614_v45, %v7614_v45  ;;  %v20022_v61 = vld [vmem:[#allocation55_spill] sm:$0xff] }
 0x292   :  { %19981 = vst [vmem:[#allocation13_spill] sm:$0xff] %v14217_v3  ;;  %v14223_v9 = vrot.slane %v8063_v24, %v10748_v0  ;;  %v14226_v63 = vrot.slane %v8064_v30, %v10748_v0  ;;  %v14276_v30 = vrot.slane %v6072_v37, %v10748_v0  ;;  %v14279_v24 = vrot.slane %v6104_v18, %v10748_v0  ;;  %v20012_v3 = vld [vmem:[#allocation27_spill] sm:$0xff]  ;;  %v20019_v18 = vld [vmem:[#allocation160_spill] sm:$0xff] }
 0x293   :  { %8271 = vrot.lane.b32.xlu0 %v19987_v56, %s10642_s20  ;;  %v14233_v47 = vrot.slane %v7647_v31, %v10748_v0  ;;  %v14236_v33 = vrot.slane %v7648_v14, %v10748_v0  ;;  %v14239_v48 = vrot.slane %v7663_v23, %v10748_v0  ;;  %v14242_v45 = vrot.slane %v7664_v57, %v10748_v0  ;;  %v20027_v23 = vld [vmem:[#allocation188_spill] sm:$0xff] }
 0x294   :  { %19983 = vst [vmem:[#allocation39_spill] sm:$0xff] %v14223_v9  ;;  %19984 = vst [vmem:[#allocation41_spill] sm:$0xff] %v14226_v63  ;;  %v14249_v56 = vrot.slane %v5552_v58, %v10748_v0  ;;  %v14252_v31 = vrot.slane %v5584_v51, %v10748_v0  ;;  %v19993_v51 = vld [vmem:[#allocation96_spill] sm:$0xff]  ;;  %v20008_v58 = vld [vmem:[#allocation126_spill] sm:$0xff]  ;;  %v6208_v37 = vcombine.high %v20017_v25, %v20017_v25  ;;  %v14325_v25 = vpop.permute.xlu0 %8135 }
 0x295   :  { %19988 = vst [vmem:[#allocation67_spill] sm:$0xff] %v14233_v47  ;;  %19989 = vst [vmem:[#allocation69_spill] sm:$0xff] %v14239_v48  ;;  %v7680_v14 = vcombine.high %v14206_v29, %v14233_v47  ;;  %v19995_v52 = vcombine.low %v19993_v51, %v19994_v42  ;;  %v20016_v63 = vld [vmem:[#allocation335_spill] sm:$0xff]  ;;  %v20020_v48 = vcombine.low %v20018_v19, %v20019_v18  ;;  %v20030_v29 = vld [vmem:[#allocation81_spill] sm:$0xff] }
 0x296   :  { %19990 = vst [vmem:[#allocation495_spill] sm:$0xff] %v14242_v45  ;;  %19991 = vst [vmem:[#allocation496_spill] sm:$0xff] %v14249_v56  ;;  %v20009_v56 = vld [vmem:[#allocation129_spill] sm:$0xff]  ;;  %v6176_v45 = vcombine.high %v20016_v63, %v20016_v63  ;;  %v14323_v63 = vrot.slane %v6208_v37, %v10748_v0  ;;  %v6312_v40 = vcombine.high %v20047_v54, %v20047_v54 }
 0x297   :  { %19992 = vst [vmem:[#allocation497_spill] sm:$0xff] %v14252_v31  ;;  %8275 = vrot.lane.b32.xlu0 %v19995_v52, %s10642_s20  ;;  %8197 = vrot.lane.b32.xlu1 %v7680_v14, %s10641_s0  ;;  %19996 = vst [vmem:[#allocation96_spill] sm:$0xff] %v14276_v30  ;;  %v20010_v31 = vcombine.low %v20008_v58, %v20009_v56  ;;  %v20011_v52 = vld [vmem:[#allocation25_spill] sm:$0xff]  ;;  %v20028_v14 = vld [vmem:[#allocation190_spill] sm:$0xff] }
 0x298   :  { %19997 = vst [vmem:[#allocation98_spill] sm:$0xff] %v14279_v24  ;;  %v20013_v9 = vcombine.low %v20011_v52, %v20012_v3  ;;  %v14320_v47 = vrot.slane %v6176_v45, %v10748_v0  ;;  %20025 = vst [vmem:[#allocation129_spill] sm:$0xff] %v14323_v63  ;;  %v20031_v30 = vld [vmem:[#allocation83_spill] sm:$0xff]  ;;  %v14345_v4 = vpop.permute.xlu0 %8139  ;;  %v14375_v54 = vrot.slane %v6312_v40, %v10748_v0  ;;  %v20067_v40 = vld [vmem:[#allocation362_spill] sm:$0xff] }
 0x299   :  { %20026 = vst [vmem:[#allocation25_spill] sm:$0xff] %v14325_v25  ;;  %v20033_v45 = vld [vmem:[#allocation219_spill] sm:$0xff]  ;;  %v20037_v25 = vld [vmem:[#allocation113_spill] sm:$0xff]  ;;  %20039 = vst [vmem:[#allocation27_spill] sm:$0xff] %v14345_v4 }
 0x29a   :  { %20024 = vst [vmem:[#allocation126_spill] sm:$0xff] %v14320_v47  ;;  %v20035_v37 = vcombine.low %v20033_v45, %v20034_v5  ;;  %v20038_v24 = vcombine.low %v20036_v21, %v20037_v25  ;;  %v20046_v63 = vld [vmem:[#allocation351_spill] sm:$0xff]  ;;  %v20050_v4 = vld [vmem:[#allocation290_spill] sm:$0xff]  ;;  %20058 = vst [vmem:[#allocation157_spill] sm:$0xff] %v14375_v54 }
 0x29b   :  { %8279 = vrot.lane.b32.xlu0 %v20010_v31, %s10642_s20  ;;  %8265 = vrot.lane.b32.xlu1 %v20013_v9, %s10642_s20  ;;  %v20021_v31 = vld [vmem:[#allocation53_spill] sm:$0xff]  ;;  %20065 = vst [vmem:[#allocation160_spill] sm:$0xff] %v14387_v62 }
 0x29c   :  { %v20023_v57 = vcombine.low %v20021_v31, %v20022_v61  ;;  %v20044_v9 = vld [vmem:[#allocation145_spill] sm:$0xff]  ;;  %v14359_v38 = vpop.permute.xlu0 %8143 }
 0x29d   :  { %20048 = vst [vmem:[#allocation335_spill] sm:$0xff] %v14359_v38  ;;  %v20059_v38 = vld [vmem:[#allocation325_spill] sm:$0xff] }
 0x29e   :  { %v20079_v54 = vld [vmem:[#allocation273_spill] sm:$0xff] }
 0x29f   :  { %8283 = vrot.lane.b32.xlu0 %v20020_v48, %s10642_s20  ;;  %8269 = vrot.lane.b32.xlu1 %v20023_v57, %s10642_s20  ;;  %v20029_v48 = vcombine.low %v20027_v23, %v20028_v14  ;;  %v20032_v57 = vcombine.low %v20030_v29, %v20031_v30 }
 0x2a3   :  { %8287 = vrot.lane.b32.xlu0 %v20029_v48, %s10642_s20  ;;  %8273 = vrot.lane.b32.xlu1 %v20032_v57, %s10642_s20  ;;  %v20040_v48 = vld [vmem:[#allocation256_spill] sm:$0xff]  ;;  %v20043_v57 = vld [vmem:[#allocation147_spill] sm:$0xff] }
 0x2a4   :  { %v20042_v13 = vcombine.low %v20040_v48, %v20041_v43  ;;  %v20045_v47 = vcombine.low %v20043_v57, %v20044_v9  ;;  %v20061_v9 = vcombine.low %v20059_v38, %v20060_v53  ;;  %v20070_v53 = vld [vmem:[#allocation240_spill] sm:$0xff] }
 0x2a7   :  { %8291 = vrot.lane.b32.xlu0 %v20035_v37, %s10642_s20  ;;  %8277 = vrot.lane.b32.xlu1 %v20038_v24, %s10642_s20  ;;  %v6280_v37 = vcombine.high %v20046_v63, %v20046_v63  ;;  %v20049_v24 = vld [vmem:[#allocation289_spill] sm:$0xff] }
 0x2a8   :  { %v20051_v34 = vcombine.low %v20049_v24, %v20050_v4  ;;  %v20063_v4 = vld [vmem:[#allocation206_spill] sm:$0xff] }
 0x2a9   :  { %v14372_v63 = vrot.slane %v6280_v37, %v10748_v0  ;;  %v14389_v37 = vpop.permute.xlu0 %8147 }
 0x2aa   :  { %20066 = vst [vmem:[#allocation53_spill] sm:$0xff] %v14389_v37  ;;  %v20078_v37 = vld [vmem:[#allocation275_spill] sm:$0xff] }
 0x2ab   :  { %8295 = vrot.lane.b32.xlu0 %v20042_v13, %s10642_s20  ;;  %8281 = vrot.lane.b32.xlu1 %v20045_v47, %s10642_s20  ;;  %v20052_v13 = vld [vmem:[#allocation177_spill] sm:$0xff]  ;;  %20057 = vst [vmem:[#allocation339_spill] sm:$0xff] %v14372_v63  ;;  %v20069_v47 = vcombine.low %v20067_v40, %v20068_v26 }
 0x2ac   :  { %v20054_v55 = vcombine.low %v20052_v13, %v20053_v1  ;;  %v14399_v1 = vpop.permute.xlu1 %8141  ;;  %v20076_v63 = vld [vmem:[#allocation397_spill] sm:$0xff] }
 0x2ad   :  { %20073 = vst [vmem:[#allocation55_spill] sm:$0xff] %v14399_v1  ;;  %v20082_v40 = vld [vmem:[#allocation373_spill] sm:$0xff]  ;;  %v20084_v1 = vld [vmem:[#allocation311_spill] sm:$0xff] }
 0x2af   :  { %8299 = vrot.lane.b32.xlu0 %v20051_v34, %s10642_s20  ;;  %8285 = vrot.lane.b32.xlu1 %v20054_v55, %s10642_s20  ;;  %v20062_v34 = vld [vmem:[#allocation208_spill] sm:$0xff] }
 0x2b0   :  { %v20064_v24 = vcombine.low %v20062_v34, %v20063_v4  ;;  %v20075_v55 = vld [vmem:[#allocation396_spill] sm:$0xff]  ;;  %v20080_v4 = vcombine.low %v20078_v37, %v20079_v54  ;;  %v20102_v54 = vcombine.low %v13530_v60, %v13524_v15 }
 0x2b1   :  { %v20077_v62 = vcombine.low %v20075_v55, %v20076_v63  ;;  %v20085_v63 = vld [vmem:[#allocation309_spill] sm:$0xff] }
 0x2b3   :  { %8303 = vrot.lane.b32.xlu0 %v20061_v9, %s10642_s20  ;;  %8289 = vrot.lane.b32.xlu1 %v20064_v24, %s10642_s20  ;;  %v20071_v9 = vld [vmem:[#allocation238_spill] sm:$0xff]  ;;  %v14401_v24 = vpop.permute.xlu0 %8151 }
 0x2b4   :  { %v20072_v38 = vcombine.low %v20070_v53, %v20071_v9  ;;  %20074 = vst [vmem:[#allocation188_spill] sm:$0xff] %v14401_v24  ;;  %v20083_v24 = vcombine.low %v13689_v10, %v13692_v6 }
 0x2b7   :  { %8307 = vrot.lane.b32.xlu0 %v20069_v47, %s10642_s20  ;;  %8293 = vrot.lane.b32.xlu1 %v20072_v38, %s10642_s20  ;;  %v20081_v47 = vld [vmem:[#allocation173_spill] sm:$0xff]  ;;  %v6416_v38 = vcombine.high %v20082_v40, %v20082_v40  ;;  %v14427_v37 = vpop.permute.xlu0 %8155 }
 0x2b8   :  { %v6384_v26 = vcombine.high %v20081_v47, %v20081_v47  ;;  %20088 = vst [vmem:[#allocation81_spill] sm:$0xff] %v14427_v37 }
 0x2b9   :  { %v14433_v40 = vrot.slane %v6416_v38, %v10748_v0  ;;  %v20097_v38 = vcombine.low %v14111_v39, %v14124_v35 }
 0x2ba   :  { %v14430_v47 = vrot.slane %v6384_v26, %v10748_v0 }
 0x2bb   :  { %8311 = vrot.lane.b32.xlu0 %v20077_v62, %s10642_s20  ;;  %8297 = vrot.lane.b32.xlu1 %v20080_v4, %s10642_s20  ;;  %v20086_v62 = vcombine.low %v20084_v1, %v20085_v63  ;;  %v14425_v4 = vpop.permute.xlu1 %8145  ;;  %20090 = vst [vmem:[#allocation219_spill] sm:$0xff] %v14433_v40  ;;  %v20093_v63 = vld [vmem:[#allocation343_spill] sm:$0xff]  ;;  %v14447_v26 = vpop.permute.xlu0 %8159 }
 0x2bc   :  { %20087 = vst [vmem:[#allocation190_spill] sm:$0xff] %v14425_v4  ;;  %20089 = vst [vmem:[#allocation83_spill] sm:$0xff] %v14430_v47 }
 0x2bd   :  { %20096 = vst [vmem:[#allocation115_spill] sm:$0xff] %v14447_v26  ;;  %v20103_v26 = vld [vmem:[#allocation385_spill] sm:$0xff] }
 0x2bf   :  { %8315 = vrot.lane.b32.xlu0 %v20083_v24, %s10642_s20  ;;  %8301 = vrot.lane.b32.xlu1 %v20086_v62, %s10642_s20  ;;  %v20091_v24 = vcombine.low %v13910_v27, %v13913_v2  ;;  %v20092_v62 = vld [vmem:[#allocation345_spill] sm:$0xff]  ;;  %v14445_v41 = vpop.permute.xlu1 %8149 }
 0x2c0   :  { %v20094_v1 = vcombine.low %v20092_v62, %v20093_v63  ;;  %20095 = vst [vmem:[#allocation222_spill] sm:$0xff] %v14445_v41  ;;  %v6904_v41 = vcombine.high %v20103_v26, %v20103_v26  ;;  %v20180_v26 = vld [vmem:[#allocation311_spill] sm:$0xff] }
 0x2c2   :  { %v14484_v40 = vrot.slane %v6904_v41, %v10748_v0 }
 0x2c3   :  { %8319 = vrot.lane.b32.xlu0 %v20091_v24, %s10642_s20  ;;  %8305 = vrot.lane.b32.xlu1 %v20094_v1, %s10642_s20  ;;  %v20099_v24 = vld [vmem:[#allocation377_spill] sm:$0xff]  ;;  %v20101_v1 = vcombine.high %v19968_v7, %v19969_v20  ;;  %v14469_v47 = vpop.permute.xlu1 %8153  ;;  %v20107_v7 = vcombine.high %v19974_v36, %v19975_v16  ;;  %v20108_v20 = vcombine.low %v13801_v11, %v13804_v32 }
 0x2c4   :  { %v20100_v37 = vcombine.low %v20098_v44, %v20099_v24  ;;  %20105 = vst [vmem:[#allocation113_spill] sm:$0xff] %v14469_v47  ;;  %20111 = vst [vmem:[#allocation257_spill] sm:$0xff] %v14484_v40  ;;  %v20115_v16 = vcombine.high %v19985_v28, %v19986_v49  ;;  %v20116_v36 = vcombine.low %v14009_v12, %v14018_v50 }
 0x2c7   :  { %8323 = vrot.lane.b32.xlu0 %v20097_v38, %s10642_s20  ;;  %8309 = vrot.lane.b32.xlu1 %v20100_v37, %s10642_s20  ;;  %v20104_v38 = vld [vmem:[#allocation393_spill] sm:$0xff]  ;;  %v14471_v37 = vpop.permute.xlu0 %8163 }
 0x2c8   :  { %v6936_v4 = vcombine.high %v20104_v38, %v20104_v38  ;;  %20106 = vst [vmem:[#allocation256_spill] sm:$0xff] %v14471_v37  ;;  %v14489_v37 = vpop.permute.xlu1 %8157 }
 0x2c9   :  { %20113 = vst [vmem:[#allocation351_spill] sm:$0xff] %v14489_v37  ;;  %v20276_v37 = vld [vmem:[#allocation329_spill] sm:$0xff] }
 0x2ca   :  { %v14487_v38 = vrot.slane %v6936_v4, %v10748_v0  ;;  %v20117_v4 = vcombine.high %v19993_v51, %v19994_v42  ;;  %v7008_v42 = vcombine.high %v13472_v46, %v13472_v46  ;;  %v7040_v51 = vcombine.high %v13508_v8, %v13508_v8 }
 0x2cb   :  { %8391 = vrot.lane.b32.xlu0 %v20101_v1, %s10643_s21  ;;  %8313 = vrot.lane.b32.xlu1 %v20102_v54, %s10642_s20  ;;  %v14491_v47 = vpop.permute.xlu0 %8167  ;;  %v20223_v54 = vld [vmem:[#allocation101_spill] sm:$0xff]  ;;  %v20231_v1 = vld [vmem:[#allocation130_spill] sm:$0xff] }
 0x2cc   :  { %20112 = vst [vmem:[#allocation147_spill] sm:$0xff] %v14487_v38  ;;  %20114 = vst [vmem:[#allocation359_spill] sm:$0xff] %v14491_v47  ;;  %v14511_v28 = vpop.permute.xlu1 %8161  ;;  %v14545_v8 = vrot.slane %v7040_v51, %v10748_v0  ;;  %v20143_v51 = vld [vmem:[#allocation290_spill] sm:$0xff]  ;;  %v20311_v38 = vld [vmem:[#allocation456_spill] sm:$0xff] }
 0x2cd   :  { %20119 = vst [vmem:[#allocation177_spill] sm:$0xff] %v14511_v28  ;;  %v20275_v28 = vld [vmem:[#allocation327_spill] sm:$0xff] }
 0x2ce   :  { %20128 = vst [vmem:[#allocation173_spill] sm:$0xff] %v14545_v8  ;;  %v20310_v8 = vld [vmem:[#allocation346_spill] sm:$0xff] }
 0x2cf   :  { %8395 = vrot.lane.b32.xlu0 %v20107_v7, %s10643_s21  ;;  %8317 = vrot.lane.b32.xlu1 %v20108_v20, %s10642_s20  ;;  %v20118_v7 = vcombine.low %v14211_v17, %v14236_v33  ;;  %v14513_v49 = vpop.permute.xlu0 %8171  ;;  %v20121_v20 = vcombine.high %v20008_v58, %v20009_v56  ;;  %v20125_v56 = vcombine.high %v20018_v19, %v20019_v18 }
 0x2d0   :  { %20120 = vst [vmem:[#allocation208_spill] sm:$0xff] %v14513_v49  ;;  %v14542_v58 = vrot.slane %v7008_v42, %v10748_v0  ;;  %v20130_v19 = vcombine.high %v20030_v29, %v20031_v30  ;;  %v20137_v30 = vcombine.high %v20040_v48, %v20041_v43  ;;  %v20141_v42 = vld [vmem:[#allocation424_spill] sm:$0xff]  ;;  %v20145_v43 = vld [vmem:[#allocation175_spill] sm:$0xff] }
 0x2d1   :  { %v20146_v48 = vcombine.high %v20052_v13, %v20145_v43  ;;  %v20267_v49 = vld [vmem:[#allocation291_spill] sm:$0xff] }
 0x2d2   :  { %20127 = vst [vmem:[#allocation396_spill] sm:$0xff] %v14542_v58  ;;  %v20309_v58 = vld [vmem:[#allocation344_spill] sm:$0xff] }
 0x2d3   :  { %8399 = vrot.lane.b32.xlu0 %v20115_v16, %s10643_s21  ;;  %8321 = vrot.lane.b32.xlu1 %v20116_v36, %s10642_s20  ;;  %v20122_v16 = vcombine.high %v20011_v52, %v20012_v3  ;;  %v14527_v36 = vpop.permute.xlu1 %8165  ;;  %v20126_v3 = vcombine.high %v20021_v31, %v20022_v61  ;;  %v20129_v52 = vcombine.high %v20027_v23, %v20028_v14  ;;  %v20181_v61 = vld [vmem:[#allocation309_spill] sm:$0xff] }
 0x2d4   :  { %20123 = vst [vmem:[#allocation240_spill] sm:$0xff] %v14527_v36  ;;  %v20134_v23 = vcombine.high %v20036_v21, %v20037_v25  ;;  %v7144_v21 = vcombine.high %v20141_v42, %v20141_v42  ;;  %v20142_v25 = vld [vmem:[#allocation289_spill] sm:$0xff]  ;;  %v20155_v42 = vld [vmem:[#allocation439_spill] sm:$0xff]  ;;  %v5811_v40 = vcombine.low %v20310_v8, %v20309_v58 }
 0x2d5   :  { %v20274_v36 = vld [vmem:[#allocation209_spill] sm:$0xff] }
 0x2d7   :  { %8403 = vrot.lane.b32.xlu0 %v20117_v4, %s10643_s21  ;;  %8325 = vrot.lane.b32.xlu1 %v20118_v7, %s10642_s20  ;;  %v14529_v4 = vpop.permute.xlu0 %8175  ;;  %v14557_v18 = vpop.permute.xlu1 %8169  ;;  %v20133_v7 = vcombine.high %v20033_v45, %v20034_v5  ;;  %v20140_v5 = vld [vmem:[#allocation416_spill] sm:$0xff] }
 0x2d8   :  { %20124 = vst [vmem:[#allocation238_spill] sm:$0xff] %v14529_v4  ;;  %20131 = vst [vmem:[#allocation373_spill] sm:$0xff] %v14557_v18  ;;  %v7112_v45 = vcombine.high %v20140_v5, %v20140_v5  ;;  %v20266_v4 = vld [vmem:[#allocation178_spill] sm:$0xff] }
 0x2db   :  { %8407 = vrot.lane.b32.xlu0 %v20121_v20, %s10643_s21  ;;  %8393 = vrot.lane.b32.xlu1 %v20122_v16, %s10643_s21  ;;  %v14559_v31 = vpop.permute.xlu0 %8179  ;;  %v14569_v14 = vpop.permute.xlu1 %8173  ;;  %v20138_v20 = vld [vmem:[#allocation145_spill] sm:$0xff] }
 0x2dc   :  { %20132 = vst [vmem:[#allocation345_spill] sm:$0xff] %v14559_v31  ;;  %20135 = vst [vmem:[#allocation343_spill] sm:$0xff] %v14569_v14  ;;  %v20139_v16 = vcombine.high %v20043_v57, %v20138_v20  ;;  %v20153_v20 = vld [vmem:[#allocation427_spill] sm:$0xff]  ;;  %v20163_v57 = vld [vmem:[#allocation8_spill] sm:$0xff] }
 0x2dd   :  { %v20268_v14 = vld [vmem:[#allocation294_spill] sm:$0xff] }
 0x2de   :  { %v5083_v47 = vcombine.low %v20268_v14, %v20267_v49 }
 0x2df   :  { %8411 = vrot.lane.b32.xlu0 %v20125_v56, %s10643_s21  ;;  %8397 = vrot.lane.b32.xlu1 %v20126_v3, %s10643_s21  ;;  %v14571_v29 = vpop.permute.xlu0 %8183  ;;  %v20144_v56 = vcombine.high %v20142_v25, %v20143_v51  ;;  %v20156_v25 = vld [vmem:[#allocation435_spill] sm:$0xff]  ;;  %v20157_v51 = vld [vmem:[#allocation325_spill] sm:$0xff] }
 0x2e0   :  { %20136 = vst [vmem:[#allocation379_spill] sm:$0xff] %v14571_v29  ;;  %v7184_v13 = vcombine.high %v20156_v25, %v20155_v42  ;;  %v20167_v25 = vld [vmem:[#allocation362_spill] sm:$0xff]  ;;  %v20218_v3 = vld [vmem:[#allocation461_spill] sm:$0xff]  ;;  %v20260_v29 = vld [vmem:[#allocation260_spill] sm:$0xff] }
 0x2e3   :  { %8415 = vrot.lane.b32.xlu0 %v20129_v52, %s10643_s21  ;;  %8401 = vrot.lane.b32.xlu1 %v20130_v19, %s10643_s21  ;;  %v14595_v19 = vpop.permute.xlu1 %8177 }
 0x2e4   :  { %20149 = vst [vmem:[#allocation377_spill] sm:$0xff] %v14595_v19 }
 0x2e7   :  { %8419 = vrot.lane.b32.xlu0 %v20133_v7, %s10643_s21  ;;  %8405 = vrot.lane.b32.xlu1 %v20134_v23, %s10643_s21  ;;  %v14597_v7 = vpop.permute.xlu0 %8187  ;;  %v14600_v23 = vrot.slane %v7112_v45, %v10748_v0  ;;  %v14627_v42 = vpop.permute.xlu1 %8181  ;;  %v20182_v45 = vcombine.high %v20180_v26, %v20181_v61 }
 0x2e8   :  { %20150 = vst [vmem:[#allocation385_spill] sm:$0xff] %v14597_v7  ;;  %20166 = vst [vmem:[#allocation290_spill] sm:$0xff] %v14627_v42 }
 0x2e9   :  { %20151 = vst [vmem:[#allocation393_spill] sm:$0xff] %v14600_v23 }
 0x2eb   :  { %8423 = vrot.lane.b32.xlu0 %v20137_v30, %s10643_s21  ;;  %8409 = vrot.lane.b32.xlu1 %v20139_v16, %s10643_s21  ;;  %v14603_v30 = vrot.slane %v7144_v21, %v10748_v0  ;;  %v20154_v16 = vld [vmem:[#allocation423_spill] sm:$0xff]  ;;  %v14619_v21 = vpop.permute.xlu0 %8191 }
 0x2ec   :  { %v7168_v5 = vcombine.high %v20154_v16, %v20153_v20  ;;  %20162 = vst [vmem:[#allocation416_spill] sm:$0xff] %v14619_v21  ;;  %v14625_v16 = vrot.slane %v7184_v13, %v20163_v57 }
 0x2ed   :  { %20152 = vst [vmem:[#allocation145_spill] sm:$0xff] %v14603_v30 }
 0x2ee   :  { %v14622_v20 = vrot.slane %v7168_v5, %v20163_v57  ;;  %20165 = vst [vmem:[#allocation289_spill] sm:$0xff] %v14625_v16  ;;  %v7247_v13 = vcombine.low %v14625_v16, %v14625_v16  ;;  %v20301_v16 = vld [vmem:[#allocation429_spill] sm:$0xff] }
 0x2ef   :  { %8427 = vrot.lane.b32.xlu0 %v20144_v56, %s10643_s21  ;;  %8413 = vrot.lane.b32.xlu1 %v20146_v48, %s10643_s21  ;;  %v20158_v56 = vld [vmem:[#allocation326_spill] sm:$0xff] }
 0x2f0   :  { %v20159_v43 = vcombine.high %v20157_v51, %v20158_v56  ;;  %v20160_v48 = vld [vmem:[#allocation206_spill] sm:$0xff]  ;;  %20164 = vst [vmem:[#allocation424_spill] sm:$0xff] %v14622_v20  ;;  %v20168_v51 = vld [vmem:[#allocation363_spill] sm:$0xff]  ;;  %v7215_v5 = vcombine.low %v14622_v20, %v14622_v20  ;;  %v20302_v20 = vld [vmem:[#allocation432_spill] sm:$0xff] }
 0x2f1   :  { %v20161_v46 = vcombine.high %v20062_v34, %v20160_v48  ;;  %v20169_v56 = vcombine.high %v20167_v25, %v20168_v51  ;;  %v20170_v34 = vcombine.high %v20070_v53, %v20071_v9  ;;  %v20174_v25 = vld [vmem:[#allocation275_spill] sm:$0xff]  ;;  %v20175_v51 = vld [vmem:[#allocation273_spill] sm:$0xff]  ;;  %v14651_v53 = vpop.permute.xlu1 %8185  ;;  %v6747_v23 = vcombine.low %v20302_v20, %v20301_v16 }
 0x2f2   :  { %20177 = vst [vmem:[#allocation427_spill] sm:$0xff] %v14651_v53  ;;  %v20261_v53 = vld [vmem:[#allocation281_spill] sm:$0xff] }
 0x2f3   :  { %8431 = vrot.lane.b32.xlu0 %v20159_v43, %s10643_s21  ;;  %8417 = vrot.lane.b32.xlu1 %v20161_v46, %s10643_s21  ;;  %v20172_v43 = vld [vmem:[#allocation397_spill] sm:$0xff]  ;;  %v7944_v31 = vcombine.high %v20261_v53, %v20261_v53 }
 0x2f4   :  { %v20173_v48 = vcombine.high %v20075_v55, %v20172_v43  ;;  %v14664_v55 = vrot.slane %v7215_v5, %v10748_v0  ;;  %v14667_v43 = vrot.slane %v7247_v13, %v10748_v0  ;;  %v20193_v5 = vcombine.high %v14111_v39, %v14124_v35  ;;  %v20198_v13 = vld [vmem:[#allocation16_spill] sm:$0xff]  ;;  %v20200_v39 = vld [vmem:[#allocation234_spill] sm:$0xff]  ;;  %v20281_v53 = vld [vmem:[#allocation301_spill] sm:$0xff] }
 0x2f5   :  { %v7736_v35 = vcombine.high %v20200_v39, %v20200_v39 }
 0x2f6   :  { %20183 = vst [vmem:[#allocation439_spill] sm:$0xff] %v14664_v55  ;;  %20184 = vst [vmem:[#allocation435_spill] sm:$0xff] %v14667_v43  ;;  %v20280_v55 = vld [vmem:[#allocation480_spill] sm:$0xff] }
 0x2f7   :  { %8435 = vrot.lane.b32.xlu0 %v20169_v56, %s10643_s21  ;;  %8421 = vrot.lane.b32.xlu1 %v20170_v34, %s10643_s21  ;;  %v20176_v56 = vcombine.high %v20174_v25, %v20175_v51  ;;  %v20179_v34 = vcombine.high %v13689_v10, %v13692_v6  ;;  %v20189_v10 = vcombine.high %v13910_v27, %v13913_v2  ;;  %v20205_v51 = vld [vmem:[#allocation44_spill] sm:$0xff] }
 0x2f8   :  { %v20190_v6 = vcombine.high %v20092_v62, %v20093_v63  ;;  %v20194_v27 = vcombine.high %v20098_v44, %v20099_v24  ;;  %v20197_v62 = vld [vmem:[#allocation14_spill] sm:$0xff]  ;;  %v14732_v59 = vrot.slane %v7736_v35, %v10748_v0 }
 0x2f9   :  { %v14637_v46 = vpop.permute.xlu0 %8195 }
 0x2fa   :  { %20171 = vst [vmem:[#allocation175_spill] sm:$0xff] %v14637_v46  ;;  %20213 = vst [vmem:[#allocation309_spill] sm:$0xff] %v14732_v59  ;;  %v20287_v59 = vld [vmem:[#allocation364_spill] sm:$0xff] }
 0x2fb   :  { %8439 = vrot.lane.b32.xlu0 %v20173_v48, %s10643_s21  ;;  %8425 = vrot.lane.b32.xlu1 %v20176_v56, %s10643_s21  ;;  %v14671_v56 = vpop.permute.xlu1 %8189  ;;  %v20212_v48 = vld [vmem:[#allocation72_spill] sm:$0xff] }
 0x2fc   :  { %20187 = vst [vmem:[#allocation325_spill] sm:$0xff] %v14671_v56  ;;  %v20257_v56 = vld [vmem:[#allocation146_spill] sm:$0xff] }
 0x2fd   :  { %v14653_v9 = vpop.permute.xlu0 %8263 }
 0x2fe   :  { %20178 = vst [vmem:[#allocation423_spill] sm:$0xff] %v14653_v9  ;;  %v20247_v9 = vld [vmem:[#allocation191_spill] sm:$0xff] }
 0x2ff   :  { %8443 = vrot.lane.b32.xlu0 %v20179_v34, %s10643_s21  ;;  %8429 = vrot.lane.b32.xlu1 %v20182_v45, %s10643_s21  ;;  %v14685_v61 = vpop.permute.xlu1 %8193  ;;  %v1547_v34 = vcombine.low %v20198_v13, %v20197_v62 }
 0x300   :  { %20191 = vst [vmem:[#allocation206_spill] sm:$0xff] %v14685_v61  ;;  %v20211_v61 = vld [vmem:[#allocation70_spill] sm:$0xff] }
 0x301   :  { %v14673_v41 = vpop.permute.xlu0 %8267  ;;  %v2379_v25 = vcombine.low %v20212_v48, %v20211_v61 }
 0x302   :  { %20188 = vst [vmem:[#allocation326_spill] sm:$0xff] %v14673_v41 }
 0x303   :  { %8447 = vrot.lane.b32.xlu0 %v20189_v10, %s10643_s21  ;;  %8433 = vrot.lane.b32.xlu1 %v20190_v6, %s10643_s21  ;;  %v20199_v10 = vcombine.high %v13530_v60, %v13524_v15  ;;  %v20201_v6 = vld [vmem:[#allocation452_spill] sm:$0xff]  ;;  %v20206_v15 = vcombine.high %v13801_v11, %v13804_v32  ;;  %v20215_v11 = vld [vmem:[#allocation454_spill] sm:$0xff]  ;;  %v20216_v32 = vld [vmem:[#allocation449_spill] sm:$0xff] }
 0x304   :  { %v7768_v44 = vcombine.high %v20201_v6, %v20201_v6 }
 0x305   :  { %v14687_v45 = vpop.permute.xlu0 %8271 }
 0x306   :  { %20192 = vst [vmem:[#allocation8_spill] sm:$0xff] %v14687_v45  ;;  %v14735_v22 = vrot.slane %v7768_v44, %v10748_v0  ;;  %v20246_v45 = vld [vmem:[#allocation86_spill] sm:$0xff] }
 0x307   :  { %8451 = vrot.lane.b32.xlu0 %v20193_v5, %s10643_s21  ;;  %8437 = vrot.lane.b32.xlu1 %v20194_v27, %s10643_s21  ;;  %v20204_v27 = vld [vmem:[#allocation42_spill] sm:$0xff] }
 0x308   :  { %v1755_v26 = vcombine.low %v20205_v51, %v20204_v27  ;;  %20214 = vst [vmem:[#allocation14_spill] sm:$0xff] %v14735_v22  ;;  %v20288_v22 = vld [vmem:[#allocation366_spill] sm:$0xff] }
 0x309   :  { %v14697_v2 = vpop.permute.xlu1 %8197  ;;  %v14699_v63 = vpop.permute.xlu0 %8275 }
 0x30a   :  { %20195 = vst [vmem:[#allocation362_spill] sm:$0xff] %v14697_v2  ;;  %20196 = vst [vmem:[#allocation363_spill] sm:$0xff] %v14699_v63  ;;  %v20245_v2 = vld [vmem:[#allocation84_spill] sm:$0xff] }
 0x30b   :  { %8441 = vrot.lane.b32.xlu1 %v20199_v10, %s10643_s21  ;;  %8519 = vrot.lane.b32.xlu0 %v1547_v34, %s10638_s17  ;;  %v20219_v10 = vcombine.high %v14009_v12, %v14018_v50  ;;  %v20222_v34 = vld [vmem:[#allocation99_spill] sm:$0xff]  ;;  %v20226_v12 = vcombine.high %v14211_v17, %v14236_v33  ;;  %v2483_v41 = vcombine.low %v20246_v45, %v20245_v2 }
 0x30d   :  { %v14712_v24 = vpop.permute.xlu1 %8265  ;;  %v14714_v5 = vpop.permute.xlu0 %8279 }
 0x30e   :  { %20202 = vst [vmem:[#allocation397_spill] sm:$0xff] %v14712_v24  ;;  %20203 = vst [vmem:[#allocation275_spill] sm:$0xff] %v14714_v5  ;;  %v20251_v24 = vld [vmem:[#allocation114_spill] sm:$0xff] }
 0x30f   :  { %8445 = vrot.lane.b32.xlu1 %v20206_v15, %s10643_s21  ;;  %8523 = vrot.lane.b32.xlu0 %v1755_v26, %s10638_s17  ;;  %v7792_v15 = vcombine.high %v20216_v32, %v20215_v11  ;;  %v20217_v26 = vld [vmem:[#allocation467_spill] sm:$0xff]  ;;  %v2587_v11 = vcombine.low %v20223_v54, %v20222_v34 }
 0x310   :  { %v7808_v52 = vcombine.high %v20218_v3, %v20217_v26  ;;  %v20230_v26 = vld [vmem:[#allocation30_spill] sm:$0xff] }
 0x311   :  { %v14725_v39 = vpop.permute.xlu1 %8269  ;;  %v14727_v6 = vpop.permute.xlu0 %8283  ;;  %v14755_v32 = vrot.slane %v7792_v15, %v20163_v57  ;;  %v20232_v15 = vld [vmem:[#allocation132_spill] sm:$0xff] }
 0x312   :  { %20209 = vst [vmem:[#allocation273_spill] sm:$0xff] %v14725_v39  ;;  %20210 = vst [vmem:[#allocation311_spill] sm:$0xff] %v14727_v6  ;;  %v14758_v3 = vrot.slane %v7808_v52, %v20163_v57  ;;  %v20238_v6 = vld [vmem:[#allocation163_spill] sm:$0xff] }
 0x313   :  { %8449 = vrot.lane.b32.xlu1 %v20219_v10, %s10643_s21  ;;  %8527 = vrot.lane.b32.xlu0 %v2379_v25, %s10638_s17  ;;  %20224 = vst [vmem:[#allocation452_spill] sm:$0xff] %v14755_v32  ;;  %v20229_v10 = vld [vmem:[#allocation28_spill] sm:$0xff]  ;;  %v7839_v52 = vcombine.low %v14755_v32, %v14755_v32 }
 0x314   :  { %20225 = vst [vmem:[#allocation42_spill] sm:$0xff] %v14758_v3  ;;  %v1651_v35 = vcombine.low %v20230_v26, %v20229_v10 }
 0x315   :  { %v14748_v60 = vpop.permute.xlu1 %8273  ;;  %v14750_v44 = vpop.permute.xlu0 %8287  ;;  %v14790_v5 = vrot.slane %v7839_v52, %v10748_v0 }
 0x316   :  { %20220 = vst [vmem:[#allocation16_spill] sm:$0xff] %v14748_v60  ;;  %20221 = vst [vmem:[#allocation234_spill] sm:$0xff] %v14750_v44  ;;  %v3211_v44 = vcombine.low %v20232_v15, %v20231_v1  ;;  %v7871_v60 = vcombine.low %v14758_v3, %v14758_v3  ;;  %v20285_v3 = vld [vmem:[#allocation239_spill] sm:$0xff] }
 0x317   :  { %8453 = vrot.lane.b32.xlu1 %v20226_v12, %s10643_s21  ;;  %8531 = vrot.lane.b32.xlu0 %v2587_v11, %s10638_s17  ;;  %v20235_v11 = vld [vmem:[#allocation56_spill] sm:$0xff]  ;;  %v20236_v12 = vld [vmem:[#allocation58_spill] sm:$0xff]  ;;  %20239 = vst [vmem:[#allocation449_spill] sm:$0xff] %v14790_v5  ;;  %v5707_v5 = vcombine.low %v20276_v37, %v20275_v28 }
 0x319   :  { %v14765_v50 = vpop.permute.xlu1 %8277  ;;  %v14767_v25 = vpop.permute.xlu0 %8291 }
 0x31a   :  { %20227 = vst [vmem:[#allocation44_spill] sm:$0xff] %v14765_v50  ;;  %20228 = vst [vmem:[#allocation70_spill] sm:$0xff] %v14767_v25  ;;  %v1859_v25 = vcombine.low %v20236_v12, %v20235_v11  ;;  %v20237_v50 = vld [vmem:[#allocation161_spill] sm:$0xff] }
 0x31b   :  { %8521 = vrot.lane.b32.xlu1 %v1651_v35, %s10638_s17  ;;  %8535 = vrot.lane.b32.xlu0 %v3211_v44, %s10638_s17  ;;  %v3419_v39 = vcombine.low %v20238_v6, %v20237_v50  ;;  %v14793_v35 = vrot.slane %v7871_v60, %v10748_v0  ;;  %v20252_v44 = vld [vmem:[#allocation116_spill] sm:$0xff] }
 0x31c   :  { %v20258_v60 = vld [vmem:[#allocation148_spill] sm:$0xff] }
 0x31d   :  { %v14779_v17 = vpop.permute.xlu1 %8281  ;;  %v14781_v33 = vpop.permute.xlu0 %8295  ;;  %20240 = vst [vmem:[#allocation467_spill] sm:$0xff] %v14793_v35  ;;  %v3315_v7 = vcombine.low %v20258_v60, %v20257_v56  ;;  %v14854_v35 = vrot.slane %v7944_v31, %v10748_v0 }
 0x31e   :  { %20233 = vst [vmem:[#allocation72_spill] sm:$0xff] %v14779_v17  ;;  %20234 = vst [vmem:[#allocation454_spill] sm:$0xff] %v14781_v33  ;;  %v2691_v17 = vcombine.low %v20252_v44, %v20251_v24 }
 0x31f   :  { %8525 = vrot.lane.b32.xlu1 %v1859_v25, %s10638_s17  ;;  %8539 = vrot.lane.b32.xlu0 %v3419_v39, %s10638_s17  ;;  %v20248_v25 = vld [vmem:[#allocation193_spill] sm:$0xff]  ;;  %20277 = vst [vmem:[#allocation163_spill] sm:$0xff] %v14854_v35  ;;  %v20296_v35 = vld [vmem:[#allocation400_spill] sm:$0xff] }
 0x320   :  { %v4043_v46 = vcombine.low %v20248_v25, %v20247_v9 }
 0x321   :  { %v14797_v33 = vpop.permute.xlu1 %8285  ;;  %v14799_v63 = vpop.permute.xlu0 %8299 }
 0x322   :  { %20243 = vst [vmem:[#allocation461_spill] sm:$0xff] %v14797_v33  ;;  %20244 = vst [vmem:[#allocation99_spill] sm:$0xff] %v14799_v63  ;;  %v20253_v63 = vld [vmem:[#allocation223_spill] sm:$0xff]  ;;  %v20254_v33 = vld [vmem:[#allocation225_spill] sm:$0xff] }
 0x323   :  { %8529 = vrot.lane.b32.xlu1 %v2483_v41, %s10638_s17  ;;  %8543 = vrot.lane.b32.xlu0 %v4043_v46, %s10638_s17  ;;  %v4251_v21 = vcombine.low %v20254_v33, %v20253_v63 }
 0x325   :  { %v14809_v39 = vpop.permute.xlu1 %8289  ;;  %v14811_v52 = vpop.permute.xlu0 %8303 }
 0x326   :  { %20249 = vst [vmem:[#allocation101_spill] sm:$0xff] %v14809_v39  ;;  %20250 = vst [vmem:[#allocation28_spill] sm:$0xff] %v14811_v52  ;;  %v20259_v39 = vld [vmem:[#allocation258_spill] sm:$0xff] }
 0x327   :  { %8533 = vrot.lane.b32.xlu1 %v2691_v17, %s10638_s17  ;;  %8547 = vrot.lane.b32.xlu0 %v4251_v21, %s10638_s17  ;;  %v4875_v52 = vcombine.low %v20260_v29, %v20259_v39  ;;  %v20262_v17 = vld [vmem:[#allocation481_spill] sm:$0xff] }
 0x328   :  { %v7976_v21 = vcombine.high %v20262_v17, %v20262_v17 }
 0x329   :  { %v14819_v41 = vpop.permute.xlu1 %8293  ;;  %v14821_v46 = vpop.permute.xlu0 %8307 }
 0x32a   :  { %20255 = vst [vmem:[#allocation30_spill] sm:$0xff] %v14819_v41  ;;  %20256 = vst [vmem:[#allocation130_spill] sm:$0xff] %v14821_v46  ;;  %v20265_v46 = vld [vmem:[#allocation176_spill] sm:$0xff] }
 0x32b   :  { %8537 = vrot.lane.b32.xlu1 %v3315_v7, %s10638_s17  ;;  %8551 = vrot.lane.b32.xlu0 %v4875_v52, %s10638_s17  ;;  %v3523_v19 = vcombine.low %v20266_v4, %v20265_v46  ;;  %v20282_v7 = vld [vmem:[#allocation491_spill] sm:$0xff] }
 0x32c   :  { %v8016_v52 = vcombine.high %v20282_v7, %v20281_v53  ;;  %v20293_v53 = vld [vmem:[#allocation274_spill] sm:$0xff] }
 0x32d   :  { %v14833_v42 = vpop.permute.xlu1 %8297  ;;  %v14835_v41 = vpop.permute.xlu0 %8311 }
 0x32e   :  { %20263 = vst [vmem:[#allocation132_spill] sm:$0xff] %v14833_v42  ;;  %20264 = vst [vmem:[#allocation56_spill] sm:$0xff] %v14835_v41  ;;  %v20273_v42 = vld [vmem:[#allocation207_spill] sm:$0xff] }
 0x32f   :  { %8541 = vrot.lane.b32.xlu1 %v3523_v19, %s10638_s17  ;;  %8555 = vrot.lane.b32.xlu0 %v5083_v47, %s10638_s17  ;;  %v4147_v41 = vcombine.low %v20274_v36, %v20273_v42  ;;  %v14857_v19 = vrot.slane %v7976_v21, %v10748_v0  ;;  %v20279_v47 = vld [vmem:[#allocation485_spill] sm:$0xff] }
 0x330   :  { %v8000_v43 = vcombine.high %v20280_v55, %v20279_v47  ;;  %v20286_v21 = vld [vmem:[#allocation241_spill] sm:$0xff]  ;;  %v5915_v55 = vcombine.low %v20288_v22, %v20287_v59 }
 0x331   :  { %v14845_v18 = vpop.permute.xlu1 %8301  ;;  %v14847_v17 = vpop.permute.xlu0 %8315  ;;  %20278 = vst [vmem:[#allocation84_spill] sm:$0xff] %v14857_v19  ;;  %v4355_v32 = vcombine.low %v20286_v21, %v20285_v3 }
 0x332   :  { %20271 = vst [vmem:[#allocation58_spill] sm:$0xff] %v14845_v18  ;;  %20272 = vst [vmem:[#allocation161_spill] sm:$0xff] %v14847_v17  ;;  %v14876_v47 = vrot.slane %v8000_v43, %v20163_v57  ;;  %v20294_v17 = vld [vmem:[#allocation276_spill] sm:$0xff] }
 0x333   :  { %8545 = vrot.lane.b32.xlu1 %v4147_v41, %s10638_s17  ;;  %8559 = vrot.lane.b32.xlu0 %v5707_v5, %s10638_s17  ;;  %v14879_v41 = vrot.slane %v8016_v52, %v20163_v57 }
 0x334   :  { %20289 = vst [vmem:[#allocation193_spill] sm:$0xff] %v14876_v47  ;;  %v8047_v43 = vcombine.low %v14876_v47, %v14876_v47  ;;  %v20315_v47 = vld [vmem:[#allocation378_spill] sm:$0xff] }
 0x335   :  { %v14867_v18 = vpop.permute.xlu1 %8305  ;;  %v14869_v31 = vpop.permute.xlu0 %8319  ;;  %20290 = vst [vmem:[#allocation114_spill] sm:$0xff] %v14879_v41  ;;  %v8079_v57 = vcombine.low %v14879_v41, %v14879_v41 }
 0x336   :  { %20283 = vst [vmem:[#allocation86_spill] sm:$0xff] %v14867_v18  ;;  %20284 = vst [vmem:[#allocation191_spill] sm:$0xff] %v14869_v31  ;;  %v4979_v31 = vcombine.low %v20294_v17, %v20293_v53  ;;  %v20295_v18 = vld [vmem:[#allocation398_spill] sm:$0xff]  ;;  %v14908_v41 = vrot.slane %v8047_v43, %v10748_v0 }
 0x337   :  { %8549 = vrot.lane.b32.xlu1 %v4355_v32, %s10638_s17  ;;  %8563 = vrot.lane.b32.xlu0 %v5915_v55, %s10638_s17  ;;  %v6539_v19 = vcombine.low %v20296_v35, %v20295_v18  ;;  %v20299_v55 = vld [vmem:[#allocation310_spill] sm:$0xff] }
 0x338   :  { %20303 = vst [vmem:[#allocation148_spill] sm:$0xff] %v14908_v41 }
 0x339   :  { %v14883_v5 = vpop.permute.xlu1 %8309  ;;  %v14885_v7 = vpop.permute.xlu0 %8323 }
 0x33a   :  { %20291 = vst [vmem:[#allocation116_spill] sm:$0xff] %v14883_v5  ;;  %20292 = vst [vmem:[#allocation223_spill] sm:$0xff] %v14885_v7  ;;  %v20300_v7 = vld [vmem:[#allocation312_spill] sm:$0xff] }
 0x33b   :  { %8553 = vrot.lane.b32.xlu1 %v4979_v31, %s10638_s17  ;;  %8567 = vrot.lane.b32.xlu0 %v6539_v19, %s10638_s17  ;;  %v5187_v5 = vcombine.low %v20300_v7, %v20299_v55  ;;  %v14911_v31 = vrot.slane %v8079_v57, %v10748_v0 }
 0x33d   :  { %v14897_v32 = vpop.permute.xlu1 %8313  ;;  %v14899_v52 = vpop.permute.xlu0 %8391  ;;  %20304 = vst [vmem:[#allocation258_spill] sm:$0xff] %v14911_v31  ;;  %v20327_v31 = vld [vmem:[#allocation444_spill] sm:$0xff] }
 0x33e   :  { %20297 = vst [vmem:[#allocation225_spill] sm:$0xff] %v14897_v32  ;;  %20298 = vst [vmem:[#allocation146_spill] sm:$0xff] %v14899_v52  ;;  %v20317_v32 = vld [vmem:[#allocation488_spill] sm:$0xff] }
 0x33f   :  { %8557 = vrot.lane.b32.xlu1 %v5187_v5, %s10638_s17  ;;  %8571 = vrot.lane.b32.xlu0 %v6747_v23, %s10638_s17  ;;  %v20312_v5 = vld [vmem:[#allocation457_spill] sm:$0xff]  ;;  %v20322_v23 = vld [vmem:[#allocation410_spill] sm:$0xff] }
 0x340   :  { %v7371_v16 = vcombine.low %v20312_v5, %v20311_v38  ;;  %v20321_v38 = vld [vmem:[#allocation409_spill] sm:$0xff] }
 0x341   :  { %v14915_v52 = vpop.permute.xlu1 %8317  ;;  %v14917_v30 = vpop.permute.xlu0 %8395  ;;  %v6643_v41 = vcombine.low %v20322_v23, %v20321_v38 }
 0x342   :  { %20307 = vst [vmem:[#allocation260_spill] sm:$0xff] %v14915_v52  ;;  %20308 = vst [vmem:[#allocation281_spill] sm:$0xff] %v14917_v30  ;;  %v20316_v52 = vld [vmem:[#allocation380_spill] sm:$0xff]  ;;  %v20318_v30 = vld [vmem:[#allocation487_spill] sm:$0xff] }
 0x343   :  { %8561 = vrot.lane.b32.xlu1 %v5811_v40, %s10638_s17  ;;  %8575 = vrot.lane.b32.xlu0 %v7371_v16, %s10638_s17  ;;  %v6019_v19 = vcombine.low %v20316_v52, %v20315_v47  ;;  %v7579_v0 = vcombine.low %v20318_v30, %v20317_v32 }
 0x345   :  { %v14927_v43 = vpop.permute.xlu1 %8321  ;;  %v14929_v57 = vpop.permute.xlu0 %8399 }
 0x346   :  { %20313 = vst [vmem:[#allocation481_spill] sm:$0xff] %v14927_v43  ;;  %20314 = vst [vmem:[#allocation176_spill] sm:$0xff] %v14929_v57  ;;  %v20323_v43 = vcombine.high %v20198_v13, %v20197_v62  ;;  %v20333_v13 = vld [vmem:[#allocation471_spill] sm:$0xff] }
 0x347   :  { %8565 = vrot.lane.b32.xlu1 %v6019_v19, %s10638_s17  ;;  %8579 = vrot.lane.b32.xlu0 %v7579_v0, %s10638_s17  ;;  %v20326_v0 = vld [vmem:[#allocation443_spill] sm:$0xff] }
 0x349   :  { %v14937_v40 = vpop.permute.xlu1 %8325  ;;  %v14939_v16 = vpop.permute.xlu0 %8403 }
 0x34a   :  { %20319 = vst [vmem:[#allocation178_spill] sm:$0xff] %v14937_v40  ;;  %20320 = vst [vmem:[#allocation291_spill] sm:$0xff] %v14939_v16  ;;  %v6851_v40 = vcombine.low %v20327_v31, %v20326_v0  ;;  %v20328_v16 = vcombine.high %v20205_v51, %v20204_v27  ;;  %v20338_v27 = vld [vmem:[#allocation69_spill] sm:$0xff] }
 0x34b   :  { %8569 = vrot.lane.b32.xlu1 %v6643_v41, %s10638_s17  ;;  %8647 = vrot.lane.b32.xlu0 %v20323_v43, %s10644_s22  ;;  %v20334_v43 = vld [vmem:[#allocation470_spill] sm:$0xff]  ;;  %v20340_v41 = vcombine.high %v20223_v54, %v20222_v34  ;;  %v20347_v54 = vcombine.high %v20236_v12, %v20235_v11  ;;  %v20348_v34 = vcombine.high %v20238_v6, %v20237_v50 }
 0x34c   :  { %v20354_v11 = vcombine.high %v20248_v25, %v20247_v9  ;;  %v20357_v50 = vcombine.high %v20252_v44, %v20251_v24  ;;  %v20361_v9 = vcombine.high %v20258_v60, %v20257_v56  ;;  %v20362_v25 = vcombine.high %v20260_v29, %v20259_v39  ;;  %v20449_v60 = vld [vmem:[#allocation195_spill] sm:$0xff] }
 0x34d   :  { %v14948_v57 = vpop.permute.xlu1 %8393  ;;  %v14950_v19 = vpop.permute.xlu0 %8407  ;;  %v20371_v39 = vcombine.high %v20274_v36, %v20273_v42 }
 0x34e   :  { %20324 = vst [vmem:[#allocation294_spill] sm:$0xff] %v14948_v57  ;;  %20325 = vst [vmem:[#allocation207_spill] sm:$0xff] %v14950_v19  ;;  %v7475_v19 = vcombine.low %v20334_v43, %v20333_v13 }
 0x34f   :  { %8573 = vrot.lane.b32.xlu1 %v6851_v40, %s10638_s17  ;;  %8651 = vrot.lane.b32.xlu0 %v20328_v16, %s10644_s22  ;;  %v20335_v40 = vcombine.high %v20212_v48, %v20211_v61  ;;  %v20339_v16 = vld [vmem:[#allocation13_spill] sm:$0xff]  ;;  %v20343_v48 = vcombine.high %v20230_v26, %v20229_v10  ;;  %v20344_v61 = vcombine.high %v20232_v15, %v20231_v1  ;;  %v20454_v10 = vld [vmem:[#allocation118_spill] sm:$0xff] }
 0x350   :  { %v7683_v23 = vcombine.low %v20339_v16, %v20338_v27  ;;  %v20353_v15 = vcombine.high %v20246_v45, %v20245_v2 }
 0x351   :  { %v14961_v32 = vpop.permute.xlu1 %8397  ;;  %v14963_v62 = vpop.permute.xlu0 %8411 }
 0x352   :  { %20331 = vst [vmem:[#allocation209_spill] sm:$0xff] %v14961_v32  ;;  %20332 = vst [vmem:[#allocation327_spill] sm:$0xff] %v14963_v62 }
 0x353   :  { %8577 = vrot.lane.b32.xlu1 %v7475_v19, %s10638_s17  ;;  %8655 = vrot.lane.b32.xlu0 %v20335_v40, %s10644_s22 }
 0x355   :  { %v14972_v57 = vpop.permute.xlu1 %8401  ;;  %v14974_v51 = vpop.permute.xlu0 %8415 }
 0x356   :  { %20336 = vst [vmem:[#allocation329_spill] sm:$0xff] %v14972_v57  ;;  %20337 = vst [vmem:[#allocation485_spill] sm:$0xff] %v14974_v51  ;;  %v20521_v51 = vld [vmem:[#allocation459_spill] sm:$0xff] }
 0x357   :  { %8581 = vrot.lane.b32.xlu1 %v7683_v23, %s10638_s17  ;;  %8659 = vrot.lane.b32.xlu0 %v20340_v41, %s10644_s22  ;;  %v20431_v41 = vld [vmem:[#allocation134_spill] sm:$0xff] }
 0x359   :  { %v14983_v19 = vpop.permute.xlu1 %8405  ;;  %v14985_v38 = vpop.permute.xlu0 %8419 }
 0x35a   :  { %20341 = vst [vmem:[#allocation480_spill] sm:$0xff] %v14983_v19  ;;  %20342 = vst [vmem:[#allocation301_spill] sm:$0xff] %v14985_v38  ;;  %v20518_v38 = vld [vmem:[#allocation347_spill] sm:$0xff] }
 0x35b   :  { %8649 = vrot.lane.b32.xlu1 %v20343_v48, %s10644_s22  ;;  %8663 = vrot.lane.b32.xlu0 %v20344_v61, %s10644_s22  ;;  %v20358_v61 = vcombine.high %v20254_v33, %v20253_v63  ;;  %v20365_v63 = vcombine.high %v20266_v4, %v20265_v46  ;;  %v20366_v33 = vcombine.high %v20268_v14, %v20267_v49 }
 0x35c   :  { %v20372_v4 = vcombine.high %v20276_v37, %v20275_v28  ;;  %v20375_v14 = vcombine.high %v20286_v21, %v20285_v3  ;;  %v20379_v37 = vcombine.high %v20294_v17, %v20293_v53  ;;  %v20380_v28 = vcombine.high %v20296_v35, %v20295_v18 }
 0x35d   :  { %v14995_v23 = vpop.permute.xlu1 %8409  ;;  %v14997_v40 = vpop.permute.xlu0 %8423  ;;  %v20390_v35 = vcombine.high %v20310_v8, %v20309_v58 }
 0x35e   :  { %20345 = vst [vmem:[#allocation491_spill] sm:$0xff] %v14995_v23  ;;  %20346 = vst [vmem:[#allocation239_spill] sm:$0xff] %v14997_v40 }
 0x35f   :  { %8653 = vrot.lane.b32.xlu1 %v20347_v54, %s10644_s22  ;;  %8667 = vrot.lane.b32.xlu0 %v20348_v34, %s10644_s22 }
 0x361   :  { %v15009_v48 = vpop.permute.xlu1 %8413  ;;  %v15011_v1 = vpop.permute.xlu0 %8427 }
 0x362   :  { %20351 = vst [vmem:[#allocation241_spill] sm:$0xff] %v15009_v48  ;;  %20352 = vst [vmem:[#allocation364_spill] sm:$0xff] %v15011_v1  ;;  %v20511_v48 = vld [vmem:[#allocation436_spill] sm:$0xff] }
 0x363   :  { %8657 = vrot.lane.b32.xlu1 %v20353_v15, %s10644_s22  ;;  %8671 = vrot.lane.b32.xlu0 %v20354_v11, %s10644_s22  ;;  %v20376_v15 = vcombine.high %v20288_v22, %v20287_v59  ;;  %v20383_v59 = vcombine.high %v20300_v7, %v20299_v55  ;;  %v20384_v22 = vld [vmem:[#allocation429_spill] sm:$0xff]  ;;  %v20391_v7 = vld [vmem:[#allocation456_spill] sm:$0xff] }
 0x364   :  { %v20385_v11 = vcombine.high %v20302_v20, %v20384_v22  ;;  %v20392_v55 = vcombine.high %v20312_v5, %v20391_v7  ;;  %v20400_v5 = vld [vmem:[#allocation410_spill] sm:$0xff]  ;;  %v20432_v7 = vld [vmem:[#allocation133_spill] sm:$0xff] }
 0x365   :  { %v15021_v12 = vpop.permute.xlu1 %8417  ;;  %v15023_v6 = vpop.permute.xlu0 %8431  ;;  %v20433_v54 = vcombine.low %v20431_v41, %v20432_v7 }
 0x366   :  { %20355 = vst [vmem:[#allocation366_spill] sm:$0xff] %v15021_v12  ;;  %20356 = vst [vmem:[#allocation274_spill] sm:$0xff] %v15023_v6 }
 0x367   :  { %8661 = vrot.lane.b32.xlu1 %v20357_v50, %s10644_s22  ;;  %8675 = vrot.lane.b32.xlu0 %v20358_v61, %s10644_s22 }
 0x369   :  { %v15033_v45 = vpop.permute.xlu1 %8421  ;;  %v15035_v2 = vpop.permute.xlu0 %8435 }
 0x36a   :  { %20359 = vst [vmem:[#allocation276_spill] sm:$0xff] %v15033_v45  ;;  %20360 = vst [vmem:[#allocation398_spill] sm:$0xff] %v15035_v2  ;;  %v20502_v45 = vld [vmem:[#allocation402_spill] sm:$0xff] }
 0x36b   :  { %8665 = vrot.lane.b32.xlu1 %v20361_v9, %s10644_s22  ;;  %8679 = vrot.lane.b32.xlu0 %v20362_v25, %s10644_s22  ;;  %v20395_v25 = vcombine.high %v20316_v52, %v20315_v47 }
 0x36d   :  { %v15045_v24 = vpop.permute.xlu1 %8425  ;;  %v15047_v44 = vpop.permute.xlu0 %8439 }
 0x36e   :  { %20363 = vst [vmem:[#allocation400_spill] sm:$0xff] %v15045_v24  ;;  %20364 = vst [vmem:[#allocation310_spill] sm:$0xff] %v15047_v44  ;;  %v20498_v44 = vld [vmem:[#allocation111_spill] sm:$0xff]  ;;  %v20499_v24 = vld [vmem:[#allocation277_spill] sm:$0xff] }
 0x36f   :  { %8669 = vrot.lane.b32.xlu1 %v20365_v63, %s10644_s22  ;;  %8683 = vrot.lane.b32.xlu0 %v20366_v33, %s10644_s22  ;;  %v20396_v63 = vld [vmem:[#allocation488_spill] sm:$0xff]  ;;  %v20500_v2 = vcombine.low %v20498_v44, %v20499_v24 }
 0x370   :  { %v20397_v33 = vcombine.high %v20318_v30, %v20396_v63  ;;  %v20408_v30 = vcombine.high %v20327_v31, %v20326_v0  ;;  %v20416_v63 = vcombine.high %v20334_v43, %v20333_v13  ;;  %v20417_v31 = vld [vmem:[#allocation73_spill] sm:$0xff]  ;;  %v20418_v0 = vld [vmem:[#allocation71_spill] sm:$0xff] }
 0x371   :  { %v15059_v34 = vpop.permute.xlu1 %8429  ;;  %v15061_v29 = vpop.permute.xlu0 %8443 }
 0x372   :  { %20369 = vst [vmem:[#allocation312_spill] sm:$0xff] %v15059_v34  ;;  %20370 = vst [vmem:[#allocation432_spill] sm:$0xff] %v15061_v29  ;;  %v20496_v34 = vld [vmem:[#allocation424_spill] sm:$0xff] }
 0x373   :  { %8673 = vrot.lane.b32.xlu1 %v20371_v39, %s10644_s22  ;;  %8687 = vrot.lane.b32.xlu0 %v20372_v4, %s10644_s22  ;;  %v20401_v39 = vld [vmem:[#allocation409_spill] sm:$0xff] }
 0x374   :  { %v20402_v4 = vcombine.high %v20400_v5, %v20401_v39 }
 0x375   :  { %v15071_v46 = vpop.permute.xlu1 %8433  ;;  %v15073_v49 = vpop.permute.xlu0 %8447 }
 0x376   :  { %20373 = vst [vmem:[#allocation344_spill] sm:$0xff] %v15071_v46  ;;  %20374 = vst [vmem:[#allocation346_spill] sm:$0xff] %v15073_v49 }
 0x377   :  { %8677 = vrot.lane.b32.xlu1 %v20375_v14, %s10644_s22  ;;  %8691 = vrot.lane.b32.xlu0 %v20376_v15, %s10644_s22  ;;  %v20403_v14 = vld [vmem:[#allocation17_spill] sm:$0xff]  ;;  %v20404_v15 = vld [vmem:[#allocation15_spill] sm:$0xff] }
 0x378   :  { %v20405_v47 = vcombine.low %v20403_v14, %v20404_v15 }
 0x379   :  { %v15083_v36 = vpop.permute.xlu1 %8437  ;;  %v15085_v42 = vpop.permute.xlu0 %8451 }
 0x37a   :  { %20377 = vst [vmem:[#allocation457_spill] sm:$0xff] %v15083_v36  ;;  %20378 = vst [vmem:[#allocation378_spill] sm:$0xff] %v15085_v42  ;;  %v20483_v42 = vld [vmem:[#allocation333_spill] sm:$0xff] }
 0x37b   :  { %8681 = vrot.lane.b32.xlu1 %v20379_v37, %s10644_s22  ;;  %8695 = vrot.lane.b32.xlu0 %v20380_v28, %s10644_s22  ;;  %v20409_v28 = vld [vmem:[#allocation45_spill] sm:$0xff] }
 0x37d   :  { %v15095_v3 = vpop.permute.xlu1 %8441  ;;  %v15097_v21 = vpop.permute.xlu0 %8519 }
 0x37e   :  { %20381 = vst [vmem:[#allocation380_spill] sm:$0xff] %v15095_v3  ;;  %20382 = vst [vmem:[#allocation487_spill] sm:$0xff] %v15097_v21  ;;  %v20440_v3 = vld [vmem:[#allocation164_spill] sm:$0xff] }
 0x37f   :  { %8685 = vrot.lane.b32.xlu1 %v20383_v59, %s10644_s22  ;;  %8699 = vrot.lane.b32.xlu0 %v20385_v11, %s10644_s22  ;;  %v20410_v59 = vld [vmem:[#allocation43_spill] sm:$0xff] }
 0x380   :  { %v20411_v22 = vcombine.low %v20409_v28, %v20410_v59  ;;  %v20446_v11 = vld [vmem:[#allocation87_spill] sm:$0xff] }
 0x381   :  { %v15109_v61 = vpop.permute.xlu1 %8445  ;;  %v15111_v18 = vpop.permute.xlu0 %8523 }
 0x382   :  { %20388 = vst [vmem:[#allocation443_spill] sm:$0xff] %v15109_v61  ;;  %20389 = vst [vmem:[#allocation444_spill] sm:$0xff] %v15111_v18  ;;  %v20439_v61 = vld [vmem:[#allocation165_spill] sm:$0xff] }
 0x383   :  { %8689 = vrot.lane.b32.xlu1 %v20390_v35, %s10644_s22  ;;  %8703 = vrot.lane.b32.xlu0 %v20392_v55, %s10644_s22  ;;  %v20441_v17 = vcombine.low %v20439_v61, %v20440_v3  ;;  %v20447_v35 = vld [vmem:[#allocation85_spill] sm:$0xff] }
 0x384   :  { %v20448_v56 = vcombine.low %v20446_v11, %v20447_v35 }
 0x385   :  { %v15121_v9 = vpop.permute.xlu1 %8449  ;;  %v15123_v20 = vpop.permute.xlu0 %8527 }
 0x386   :  { %20393 = vst [vmem:[#allocation471_spill] sm:$0xff] %v15121_v9  ;;  %20394 = vst [vmem:[#allocation470_spill] sm:$0xff] %v15123_v20  ;;  %v20488_v20 = vld [vmem:[#allocation243_spill] sm:$0xff] }
 0x387   :  { %8693 = vrot.lane.b32.xlu1 %v20395_v25, %s10644_s22  ;;  %8707 = vrot.lane.b32.xlu0 %v20397_v33, %s10644_s22  ;;  %v20419_v33 = vcombine.low %v20417_v31, %v20418_v0 }
 0x389   :  { %v15133_v58 = vpop.permute.xlu1 %8453  ;;  %v15135_v8 = vpop.permute.xlu0 %8531 }
 0x38a   :  { %20398 = vst [vmem:[#allocation69_spill] sm:$0xff] %v15133_v58  ;;  %20399 = vst [vmem:[#allocation13_spill] sm:$0xff] %v15135_v8 }
 0x38b   :  { %8697 = vrot.lane.b32.xlu1 %v20402_v4, %s10644_s22  ;;  %8775 = vrot.lane.b32.xlu0 %v20405_v47, %s10645_s23  ;;  %v20422_v4 = vcombine.high %v20339_v16, %v20338_v27  ;;  %v20423_v47 = vld [vmem:[#allocation102_spill] sm:$0xff] }
 0x38d   :  { %v15145_v52 = vpop.permute.xlu1 %8521  ;;  %v15147_v37 = vpop.permute.xlu0 %8535 }
 0x38e   :  { %20406 = vst [vmem:[#allocation429_spill] sm:$0xff] %v15145_v52  ;;  %20407 = vst [vmem:[#allocation456_spill] sm:$0xff] %v15147_v37  ;;  %v20471_v37 = vld [vmem:[#allocation179_spill] sm:$0xff]  ;;  %v20474_v52 = vld [vmem:[#allocation296_spill] sm:$0xff] }
 0x38f   :  { %8701 = vrot.lane.b32.xlu1 %v20408_v30, %s10644_s22  ;;  %8779 = vrot.lane.b32.xlu0 %v20411_v22, %s10645_s23  ;;  %v20424_v30 = vld [vmem:[#allocation100_spill] sm:$0xff] }
 0x390   :  { %v20425_v22 = vcombine.low %v20423_v47, %v20424_v30 }
 0x391   :  { %v15159_v55 = vpop.permute.xlu1 %8525  ;;  %v15161_v25 = vpop.permute.xlu0 %8539 }
 0x392   :  { %20414 = vst [vmem:[#allocation488_spill] sm:$0xff] %v15159_v55  ;;  %20415 = vst [vmem:[#allocation410_spill] sm:$0xff] %v15161_v25 }
 0x393   :  { %8705 = vrot.lane.b32.xlu1 %v20416_v63, %s10644_s22  ;;  %8783 = vrot.lane.b32.xlu0 %v20419_v33, %s10645_s23  ;;  %v20428_v63 = vld [vmem:[#allocation31_spill] sm:$0xff]  ;;  %v20429_v33 = vld [vmem:[#allocation29_spill] sm:$0xff] }
 0x394   :  { %v20430_v50 = vcombine.low %v20428_v63, %v20429_v33 }
 0x395   :  { %v15171_v5 = vpop.permute.xlu1 %8529  ;;  %v15173_v39 = vpop.permute.xlu0 %8543 }
 0x396   :  { %20420 = vst [vmem:[#allocation409_spill] sm:$0xff] %v15171_v5  ;;  %20421 = vst [vmem:[#allocation17_spill] sm:$0xff] %v15173_v39  ;;  %v20463_v39 = vld [vmem:[#allocation149_spill] sm:$0xff]  ;;  %v20466_v5 = vld [vmem:[#allocation262_spill] sm:$0xff] }
 0x397   :  { %8709 = vrot.lane.b32.xlu1 %v20422_v4, %s10644_s22  ;;  %8787 = vrot.lane.b32.xlu0 %v20425_v22, %s10645_s23  ;;  %v20436_v4 = vld [vmem:[#allocation59_spill] sm:$0xff]  ;;  %v20437_v22 = vld [vmem:[#allocation57_spill] sm:$0xff] }
 0x398   :  { %v20438_v9 = vcombine.low %v20436_v4, %v20437_v22 }
 0x399   :  { %v15183_v13 = vpop.permute.xlu1 %8533  ;;  %v15185_v43 = vpop.permute.xlu0 %8547 }
 0x39a   :  { %20426 = vst [vmem:[#allocation15_spill] sm:$0xff] %v15183_v13  ;;  %20427 = vst [vmem:[#allocation45_spill] sm:$0xff] %v15185_v43 }
 0x39b   :  { %8777 = vrot.lane.b32.xlu1 %v20430_v50, %s10645_s23  ;;  %8791 = vrot.lane.b32.xlu0 %v20433_v54, %s10645_s23  ;;  %v20455_v50 = vld [vmem:[#allocation117_spill] sm:$0xff] }
 0x39c   :  { %v20456_v53 = vcombine.low %v20454_v10, %v20455_v50 }
 0x39d   :  { %v15195_v27 = vpop.permute.xlu1 %8537  ;;  %v15197_v16 = vpop.permute.xlu0 %8551 }
 0x39e   :  { %20434 = vst [vmem:[#allocation43_spill] sm:$0xff] %v15195_v27  ;;  %20435 = vst [vmem:[#allocation73_spill] sm:$0xff] %v15197_v16 }
 0x39f   :  { %8781 = vrot.lane.b32.xlu1 %v20438_v9, %s10645_s23  ;;  %8795 = vrot.lane.b32.xlu0 %v20441_v17, %s10645_s23  ;;  %v20450_v9 = vld [vmem:[#allocation194_spill] sm:$0xff] }
 0x3a0   :  { %v20451_v16 = vcombine.low %v20449_v60, %v20450_v9 }
 0x3a1   :  { %v15209_v26 = vpop.permute.xlu1 %8541  ;;  %v15211_v54 = vpop.permute.xlu0 %8555 }
 0x3a2   :  { %20444 = vst [vmem:[#allocation71_spill] sm:$0xff] %v15209_v26  ;;  %20445 = vst [vmem:[#allocation102_spill] sm:$0xff] %v15211_v54  ;;  %v20457_v54 = vld [vmem:[#allocation227_spill] sm:$0xff]  ;;  %v20458_v26 = vld [vmem:[#allocation226_spill] sm:$0xff] }
 0x3a3   :  { %8785 = vrot.lane.b32.xlu1 %v20448_v56, %s10645_s23  ;;  %8799 = vrot.lane.b32.xlu0 %v20451_v16, %s10645_s23  ;;  %v20459_v43 = vcombine.low %v20457_v54, %v20458_v26  ;;  %v20462_v16 = vld [vmem:[#allocation150_spill] sm:$0xff] }
 0x3a5   :  { %v15221_v27 = vpop.permute.xlu1 %8545  ;;  %v15223_v17 = vpop.permute.xlu0 %8559 }
 0x3a6   :  { %20452 = vst [vmem:[#allocation100_spill] sm:$0xff] %v15221_v27  ;;  %20453 = vst [vmem:[#allocation31_spill] sm:$0xff] %v15223_v17  ;;  %v20464_v27 = vcombine.low %v20462_v16, %v20463_v39  ;;  %v20465_v17 = vld [vmem:[#allocation94_spill] sm:$0xff] }
 0x3a7   :  { %8789 = vrot.lane.b32.xlu1 %v20456_v53, %s10645_s23  ;;  %8803 = vrot.lane.b32.xlu0 %v20459_v43, %s10645_s23  ;;  %v20467_v25 = vcombine.low %v20465_v17, %v20466_v5  ;;  %v20470_v43 = vld [vmem:[#allocation180_spill] sm:$0xff] }
 0x3a9   :  { %v15233_v56 = vpop.permute.xlu1 %8549  ;;  %v15235_v13 = vpop.permute.xlu0 %8563 }
 0x3aa   :  { %20460 = vst [vmem:[#allocation29_spill] sm:$0xff] %v15233_v56  ;;  %20461 = vst [vmem:[#allocation134_spill] sm:$0xff] %v15235_v13  ;;  %v20472_v56 = vcombine.low %v20470_v43, %v20471_v37  ;;  %v20473_v13 = vld [vmem:[#allocation125_spill] sm:$0xff] }
 0x3ab   :  { %8793 = vrot.lane.b32.xlu1 %v20464_v27, %s10645_s23  ;;  %8807 = vrot.lane.b32.xlu0 %v20467_v25, %s10645_s23  ;;  %v20475_v8 = vcombine.low %v20473_v13, %v20474_v52  ;;  %v20489_v27 = vld [vmem:[#allocation242_spill] sm:$0xff] }
 0x3ac   :  { %v20490_v58 = vcombine.low %v20488_v20, %v20489_v27 }
 0x3ad   :  { %v15245_v53 = vpop.permute.xlu1 %8553  ;;  %v15247_v55 = vpop.permute.xlu0 %8567 }
 0x3ae   :  { %20468 = vst [vmem:[#allocation133_spill] sm:$0xff] %v15245_v53  ;;  %20469 = vst [vmem:[#allocation59_spill] sm:$0xff] %v15247_v55  ;;  %v20480_v53 = vld [vmem:[#allocation211_spill] sm:$0xff]  ;;  %v20481_v55 = vld [vmem:[#allocation210_spill] sm:$0xff] }
 0x3af   :  { %8797 = vrot.lane.b32.xlu1 %v20472_v56, %s10645_s23  ;;  %8811 = vrot.lane.b32.xlu0 %v20475_v8, %s10645_s23  ;;  %v20482_v21 = vcombine.low %v20480_v53, %v20481_v55  ;;  %v20484_v56 = vld [vmem:[#allocation331_spill] sm:$0xff] }
 0x3b0   :  { %v20485_v36 = vcombine.low %v20483_v42, %v20484_v56 }
 0x3b1   :  { %v15259_v18 = vpop.permute.xlu1 %8557  ;;  %v15261_v25 = vpop.permute.xlu0 %8571 }
 0x3b2   :  { %20478 = vst [vmem:[#allocation57_spill] sm:$0xff] %v15259_v18  ;;  %20479 = vst [vmem:[#allocation165_spill] sm:$0xff] %v15261_v25  ;;  %v20491_v25 = vld [vmem:[#allocation143_spill] sm:$0xff]  ;;  %v20492_v18 = vld [vmem:[#allocation368_spill] sm:$0xff] }
 0x3b3   :  { %8801 = vrot.lane.b32.xlu1 %v20482_v21, %s10645_s23  ;;  %8815 = vrot.lane.b32.xlu0 %v20485_v36, %s10645_s23  ;;  %v20493_v46 = vcombine.low %v20491_v25, %v20492_v18  ;;  %v7216_v36 = vcombine.high %v20496_v34, %v20496_v34  ;;  %v20508_v34 = vld [vmem:[#allocation127_spill] sm:$0xff] }
 0x3b5   :  { %v15271_v49 = vpop.permute.xlu1 %8561  ;;  %v15273_v8 = vpop.permute.xlu0 %8575 }
 0x3b6   :  { %20486 = vst [vmem:[#allocation164_spill] sm:$0xff] %v15271_v49  ;;  %20487 = vst [vmem:[#allocation87_spill] sm:$0xff] %v15273_v8  ;;  %v20497_v49 = vld [vmem:[#allocation289_spill] sm:$0xff] }
 0x3b7   :  { %8805 = vrot.lane.b32.xlu1 %v20490_v58, %s10645_s23  ;;  %8819 = vrot.lane.b32.xlu0 %v20493_v46, %s10645_s23  ;;  %v7248_v8 = vcombine.high %v20497_v49, %v20497_v49  ;;  %v20501_v58 = vld [vmem:[#allocation218_spill] sm:$0xff]  ;;  %v20509_v49 = vld [vmem:[#allocation313_spill] sm:$0xff] }
 0x3b8   :  { %v20503_v6 = vcombine.low %v20501_v58, %v20502_v45  ;;  %v20510_v1 = vcombine.low %v20508_v34, %v20509_v49 }
 0x3b9   :  { %v15283_v21 = vpop.permute.xlu1 %8565  ;;  %v15285_v29 = vpop.permute.xlu0 %8579 }
 0x3ba   :  { %20494 = vst [vmem:[#allocation85_spill] sm:$0xff] %v15283_v21  ;;  %20495 = vst [vmem:[#allocation195_spill] sm:$0xff] %v15285_v29  ;;  %v20506_v29 = vld [vmem:[#allocation9_spill] sm:$0xff] }
 0x3bb   :  { %8809 = vrot.lane.b32.xlu1 %v20500_v2, %s10645_s23  ;;  %8823 = vrot.lane.b32.xlu0 %v20503_v6, %s10645_s23  ;;  %v15304_v12 = vrot.slane %v7216_v36, %v20506_v29  ;;  %v20512_v2 = vld [vmem:[#allocation434_spill] sm:$0xff]  ;;  %v15315_v23 = vrot.slane %v7248_v8, %v20506_v29  ;;  %v20526_v36 = vld [vmem:[#allocation381_spill] sm:$0xff] }
 0x3bc   :  { %v20513_v40 = vcombine.low %v20511_v48, %v20512_v2 }
 0x3bd   :  { %v15299_v46 = vpop.permute.xlu1 %8569  ;;  %v15301_v21 = vpop.permute.xlu0 %8647  ;;  %20507 = vst [vmem:[#allocation117_spill] sm:$0xff] %v15304_v12  ;;  %20514 = vst [vmem:[#allocation227_spill] sm:$0xff] %v15315_v23  ;;  %v20529_v23 = vld [vmem:[#allocation490_spill] sm:$0xff] }
 0x3be   :  { %20504 = vst [vmem:[#allocation194_spill] sm:$0xff] %v15299_v46  ;;  %20505 = vst [vmem:[#allocation118_spill] sm:$0xff] %v15301_v21  ;;  %v20528_v21 = vld [vmem:[#allocation492_spill] sm:$0xff] }
 0x3bf   :  { %8813 = vrot.lane.b32.xlu1 %v20510_v1, %s10645_s23  ;;  %8827 = vrot.lane.b32.xlu0 %v20513_v40, %s10645_s23  ;;  %v20517_v1 = vld [vmem:[#allocation348_spill] sm:$0xff]  ;;  %v20520_v40 = vld [vmem:[#allocation462_spill] sm:$0xff]  ;;  %v20530_v12 = vcombine.low %v20528_v21, %v20529_v23 }
 0x3c0   :  { %v20519_v19 = vcombine.low %v20517_v1, %v20518_v38  ;;  %v20522_v8 = vcombine.low %v20520_v40, %v20521_v51  ;;  %v20534_v51 = vld [vmem:[#allocation411_spill] sm:$0xff] }
 0x3c1   :  { %v15317_v6 = vpop.permute.xlu1 %8573  ;;  %v15319_v46 = vpop.permute.xlu0 %8651 }
 0x3c2   :  { %20515 = vst [vmem:[#allocation226_spill] sm:$0xff] %v15317_v6  ;;  %20516 = vst [vmem:[#allocation150_spill] sm:$0xff] %v15319_v46  ;;  %v20525_v46 = vld [vmem:[#allocation382_spill] sm:$0xff] }
 0x3c3   :  { %8817 = vrot.lane.b32.xlu1 %v20519_v19, %s10645_s23  ;;  %8831 = vrot.lane.b32.xlu0 %v20522_v8, %s10645_s23  ;;  %v20527_v62 = vcombine.low %v20525_v46, %v20526_v36  ;;  %v20533_v8 = vld [vmem:[#allocation412_spill] sm:$0xff] }
 0x3c5   :  { %v15333_v57 = vpop.permute.xlu1 %8577  ;;  %v15335_v6 = vpop.permute.xlu0 %8655 }
 0x3c6   :  { %20523 = vst [vmem:[#allocation149_spill] sm:$0xff] %v15333_v57  ;;  %20524 = vst [vmem:[#allocation94_spill] sm:$0xff] %v15335_v6  ;;  %v20535_v57 = vcombine.low %v20533_v8, %v20534_v51  ;;  %v20536_v6 = vcombine.high %v20403_v14, %v20404_v15  ;;  %v20547_v15 = vld [vmem:[#allocation473_spill] sm:$0xff] }
 0x3c7   :  { %8821 = vrot.lane.b32.xlu1 %v20527_v62, %s10645_s23  ;;  %8835 = vrot.lane.b32.xlu0 %v20530_v12, %s10645_s23  ;;  %v20539_v12 = vld [vmem:[#allocation248_spill] sm:$0xff] }
 0x3c9   :  { %v15345_v19 = vpop.permute.xlu1 %8581  ;;  %v15347_v32 = vpop.permute.xlu0 %8659 }
 0x3ca   :  { %20531 = vst [vmem:[#allocation262_spill] sm:$0xff] %v15345_v19  ;;  %20532 = vst [vmem:[#allocation180_spill] sm:$0xff] %v15347_v32  ;;  %v20540_v19 = vld [vmem:[#allocation204_spill] sm:$0xff]  ;;  %v20542_v32 = vcombine.high %v20409_v28, %v20410_v59  ;;  %v20553_v28 = vld [vmem:[#allocation322_spill] sm:$0xff] }
 0x3cb   :  { %8825 = vrot.lane.b32.xlu1 %v20535_v57, %s10645_s23  ;;  %8903 = vrot.lane.b32.xlu0 %v20536_v6, %s10646_s24  ;;  %v20541_v23 = vcombine.low %v20539_v12, %v20540_v19  ;;  %v20548_v6 = vld [vmem:[#allocation472_spill] sm:$0xff]  ;;  %v20554_v59 = vld [vmem:[#allocation495_spill] sm:$0xff]  ;;  %v20556_v57 = vcombine.high %v20423_v47, %v20424_v30  ;;  %v20562_v47 = vcombine.high %v20431_v41, %v20432_v7 }
 0x3cc   :  { %v20555_v8 = vcombine.low %v20553_v28, %v20554_v59  ;;  %v20568_v41 = vcombine.high %v20439_v61, %v20440_v3  ;;  %v20572_v3 = vcombine.high %v20449_v60, %v20450_v9  ;;  %v20579_v60 = vcombine.high %v20462_v16, %v20463_v39 }
 0x3cd   :  { %v15357_v62 = vpop.permute.xlu1 %8649  ;;  %v15359_v36 = vpop.permute.xlu0 %8663  ;;  %v20580_v9 = vcombine.high %v20465_v17, %v20466_v5  ;;  %v20589_v17 = vcombine.high %v20480_v53, %v20481_v55 }
 0x3ce   :  { %20537 = vst [vmem:[#allocation179_spill] sm:$0xff] %v15357_v62  ;;  %20538 = vst [vmem:[#allocation125_spill] sm:$0xff] %v15359_v36  ;;  %v20549_v36 = vcombine.low %v20547_v15, %v20548_v6 }
 0x3cf   :  { %8829 = vrot.lane.b32.xlu1 %v20541_v23, %s10645_s23  ;;  %8907 = vrot.lane.b32.xlu0 %v20542_v32, %s10646_s24  ;;  %v20550_v23 = vcombine.high %v20417_v31, %v20418_v0  ;;  %v20559_v31 = vld [vmem:[#allocation452_spill] sm:$0xff] }
 0x3d0   :  { %v7840_v0 = vcombine.high %v20559_v31, %v20559_v31 }
 0x3d1   :  { %v15371_v21 = vpop.permute.xlu1 %8653  ;;  %v15373_v14 = vpop.permute.xlu0 %8667 }
 0x3d2   :  { %20545 = vst [vmem:[#allocation296_spill] sm:$0xff] %v15371_v21  ;;  %20546 = vst [vmem:[#allocation211_spill] sm:$0xff] %v15373_v14 }
 0x3d3   :  { %8833 = vrot.lane.b32.xlu1 %v20549_v36, %s10645_s23  ;;  %8911 = vrot.lane.b32.xlu0 %v20550_v23, %s10646_s24  ;;  %v20560_v23 = vld [vmem:[#allocation42_spill] sm:$0xff] }
 0x3d5   :  { %v15383_v62 = vpop.permute.xlu1 %8657  ;;  %v15385_v32 = vpop.permute.xlu0 %8671 }
 0x3d6   :  { %20551 = vst [vmem:[#allocation210_spill] sm:$0xff] %v15383_v62  ;;  %20552 = vst [vmem:[#allocation333_spill] sm:$0xff] %v15385_v32  ;;  %v7872_v32 = vcombine.high %v20560_v23, %v20560_v23  ;;  %v20561_v62 = vcombine.high %v20428_v63, %v20429_v33  ;;  %v20567_v63 = vcombine.high %v20436_v4, %v20437_v22 }
 0x3d7   :  { %8837 = vrot.lane.b32.xlu1 %v20555_v8, %s10645_s23  ;;  %8915 = vrot.lane.b32.xlu0 %v20556_v57, %s10646_s24  ;;  %v15416_v57 = vrot.slane %v7840_v0, %v20506_v29  ;;  %v20571_v4 = vcombine.high %v20446_v11, %v20447_v35  ;;  %v20575_v0 = vcombine.high %v20454_v10, %v20455_v50 }
 0x3d8   :  { %v15419_v31 = vrot.slane %v7872_v32, %v20506_v29  ;;  %v20576_v23 = vcombine.high %v20457_v54, %v20458_v26  ;;  %v20583_v26 = vcombine.high %v20470_v43, %v20471_v37  ;;  %v20584_v54 = vcombine.high %v20473_v13, %v20474_v52 }
 0x3d9   :  { %v15395_v36 = vpop.permute.xlu1 %8661  ;;  %v15397_v51 = vpop.permute.xlu0 %8675  ;;  %20565 = vst [vmem:[#allocation368_spill] sm:$0xff] %v15416_v57  ;;  %v20590_v37 = vcombine.high %v20483_v42, %v20484_v56  ;;  %v20593_v13 = vcombine.high %v20488_v20, %v20489_v27  ;;  %v20597_v42 = vld [vmem:[#allocation193_spill] sm:$0xff]  ;;  %v20599_v20 = vcombine.high %v20498_v44, %v20499_v24  ;;  %v20605_v24 = vcombine.high %v20511_v48, %v20512_v2  ;;  %v20610_v48 = vld [vmem:[#allocation459_spill] sm:$0xff] }
 0x3da   :  { %20557 = vst [vmem:[#allocation331_spill] sm:$0xff] %v15395_v36  ;;  %20558 = vst [vmem:[#allocation243_spill] sm:$0xff] %v15397_v51  ;;  %v8048_v56 = vcombine.high %v20597_v42, %v20597_v42 }
 0x3db   :  { %8905 = vrot.lane.b32.xlu1 %v20561_v62, %s10646_s24  ;;  %8919 = vrot.lane.b32.xlu0 %v20562_v47, %s10646_s24  ;;  %20566 = vst [vmem:[#allocation424_spill] sm:$0xff] %v15419_v31  ;;  %v20651_v47 = vld [vmem:[#allocation167_spill] sm:$0xff] }
 0x3dd   :  { %v15411_v30 = vpop.permute.xlu1 %8665  ;;  %v15413_v8 = vpop.permute.xlu0 %8679 }
 0x3de   :  { %20563 = vst [vmem:[#allocation242_spill] sm:$0xff] %v15411_v30  ;;  %20564 = vst [vmem:[#allocation143_spill] sm:$0xff] %v15413_v8  ;;  %v20706_v30 = vld [vmem:[#allocation451_spill] sm:$0xff] }
 0x3df   :  { %8909 = vrot.lane.b32.xlu1 %v20567_v63, %s10646_s24  ;;  %8923 = vrot.lane.b32.xlu0 %v20568_v41, %s10646_s24  ;;  %v20594_v41 = vcombine.high %v20491_v25, %v20492_v18  ;;  %v20600_v18 = vcombine.high %v20501_v58, %v20502_v45 }
 0x3e1   :  { %v15433_v62 = vpop.permute.xlu1 %8669  ;;  %v15435_v32 = vpop.permute.xlu0 %8683 }
 0x3e2   :  { %20569 = vst [vmem:[#allocation289_spill] sm:$0xff] %v15433_v62  ;;  %20570 = vst [vmem:[#allocation111_spill] sm:$0xff] %v15435_v32 }
 0x3e3   :  { %8913 = vrot.lane.b32.xlu1 %v20571_v4, %s10646_s24  ;;  %8927 = vrot.lane.b32.xlu0 %v20572_v3, %s10646_s24  ;;  %v20598_v4 = vld [vmem:[#allocation114_spill] sm:$0xff] }
 0x3e4   :  { %v8080_v3 = vcombine.high %v20598_v4, %v20598_v4  ;;  %v20624_v4 = vld [vmem:[#allocation411_spill] sm:$0xff] }
 0x3e5   :  { %v15445_v61 = vpop.permute.xlu1 %8673  ;;  %v15447_v22 = vpop.permute.xlu0 %8687 }
 0x3e6   :  { %20573 = vst [vmem:[#allocation277_spill] sm:$0xff] %v15445_v61  ;;  %20574 = vst [vmem:[#allocation218_spill] sm:$0xff] %v15447_v22  ;;  %v15539_v45 = vrot.slane %v8080_v3, %v20506_v29 }
 0x3e7   :  { %8917 = vrot.lane.b32.xlu1 %v20575_v0, %s10646_s24  ;;  %8931 = vrot.lane.b32.xlu0 %v20576_v23, %s10646_s24  ;;  %v15528_v0 = vrot.slane %v8048_v56, %v20506_v29  ;;  %v20604_v23 = vcombine.high %v20508_v34, %v20509_v49  ;;  %v20609_v34 = vcombine.high %v20517_v1, %v20518_v38  ;;  %v20623_v56 = vld [vmem:[#allocation412_spill] sm:$0xff] }
 0x3e8   :  { %20606 = vst [vmem:[#allocation472_spill] sm:$0xff] %v15539_v45  ;;  %v20611_v29 = vcombine.high %v20520_v40, %v20610_v48  ;;  %v20621_v40 = vld [vmem:[#allocation18_spill] sm:$0xff]  ;;  %v20625_v3 = vcombine.high %v20623_v56, %v20624_v4  ;;  %v20640_v4 = vcombine.high %v20553_v28, %v20554_v59  ;;  %v20657_v45 = vld [vmem:[#allocation197_spill] sm:$0xff] }
 0x3e9   :  { %v15457_v11 = vpop.permute.xlu1 %8677  ;;  %v15459_v35 = vpop.permute.xlu0 %8691  ;;  %20603 = vst [vmem:[#allocation473_spill] sm:$0xff] %v15528_v0  ;;  %v20649_v59 = vld [vmem:[#allocation62_spill] sm:$0xff]  ;;  %v20658_v0 = vld [vmem:[#allocation196_spill] sm:$0xff] }
 0x3ea   :  { %20577 = vst [vmem:[#allocation402_spill] sm:$0xff] %v15457_v11  ;;  %20578 = vst [vmem:[#allocation9_spill] sm:$0xff] %v15459_v35  ;;  %v4455_v31 = vcombine.low %v20658_v0, %v20657_v45 }
 0x3eb   :  { %8921 = vrot.lane.b32.xlu1 %v20579_v60, %s10646_s24  ;;  %8935 = vrot.lane.b32.xlu0 %v20580_v9, %s10646_s24  ;;  %v20652_v60 = vld [vmem:[#allocation166_spill] sm:$0xff] }
 0x3ec   :  { %v3831_v7 = vcombine.low %v20652_v60, %v20651_v47 }
 0x3ed   :  { %v15469_v10 = vpop.permute.xlu1 %8681  ;;  %v15471_v50 = vpop.permute.xlu0 %8695 }
 0x3ee   :  { %20581 = vst [vmem:[#allocation127_spill] sm:$0xff] %v15469_v10  ;;  %20582 = vst [vmem:[#allocation313_spill] sm:$0xff] %v15471_v50  ;;  %v20694_v10 = vld [vmem:[#allocation392_spill] sm:$0xff] }
 0x3ef   :  { %8925 = vrot.lane.b32.xlu1 %v20583_v26, %s10646_s24  ;;  %8939 = vrot.lane.b32.xlu0 %v20584_v54, %s10646_s24  ;;  %v20614_v26 = vld [vmem:[#allocation381_spill] sm:$0xff] }
 0x3f0   :  { %v20615_v54 = vcombine.high %v20525_v46, %v20614_v26  ;;  %v20633_v26 = vld [vmem:[#allocation76_spill] sm:$0xff] }
 0x3f1   :  { %v15483_v63 = vpop.permute.xlu1 %8685  ;;  %v15485_v5 = vpop.permute.xlu0 %8699 }
 0x3f2   :  { %20587 = vst [vmem:[#allocation436_spill] sm:$0xff] %v15483_v63  ;;  %20588 = vst [vmem:[#allocation434_spill] sm:$0xff] %v15485_v5  ;;  %v20688_v5 = vld [vmem:[#allocation358_spill] sm:$0xff] }
 0x3f3   :  { %8929 = vrot.lane.b32.xlu1 %v20589_v17, %s10646_s24  ;;  %8943 = vrot.lane.b32.xlu0 %v20590_v37, %s10646_s24  ;;  %v20616_v17 = vld [vmem:[#allocation492_spill] sm:$0xff]  ;;  %v20617_v37 = vld [vmem:[#allocation490_spill] sm:$0xff] }
 0x3f5   :  { %v15495_v43 = vpop.permute.xlu1 %8689  ;;  %v15497_v52 = vpop.permute.xlu0 %8703 }
 0x3f6   :  { %20591 = vst [vmem:[#allocation348_spill] sm:$0xff] %v15495_v43  ;;  %20592 = vst [vmem:[#allocation347_spill] sm:$0xff] %v15497_v52 }
 0x3f7   :  { %8933 = vrot.lane.b32.xlu1 %v20593_v13, %s10646_s24  ;;  %8947 = vrot.lane.b32.xlu0 %v20594_v41, %s10646_s24  ;;  %v20618_v13 = vcombine.high %v20616_v17, %v20617_v37  ;;  %v20622_v41 = vld [vmem:[#allocation20_spill] sm:$0xff]  ;;  %v20635_v37 = vcombine.high %v20547_v15, %v20548_v6  ;;  %v20643_v6 = vld [vmem:[#allocation34_spill] sm:$0xff] }
 0x3f8   :  { %v1959_v42 = vcombine.low %v20622_v41, %v20621_v40 }
 0x3f9   :  { %v15507_v55 = vpop.permute.xlu1 %8693  ;;  %v15509_v53 = vpop.permute.xlu0 %8707 }
 0x3fa   :  { %20595 = vst [vmem:[#allocation462_spill] sm:$0xff] %v15507_v55  ;;  %20596 = vst [vmem:[#allocation382_spill] sm:$0xff] %v15509_v53  ;;  %v20712_v53 = vld [vmem:[#allocation478_spill] sm:$0xff] }
 0x3fb   :  { %8937 = vrot.lane.b32.xlu1 %v20599_v20, %s10646_s24  ;;  %8951 = vrot.lane.b32.xlu0 %v20600_v18, %s10646_s24  ;;  %v20628_v18 = vld [vmem:[#allocation48_spill] sm:$0xff] }
 0x3fd   :  { %v15523_v27 = vpop.permute.xlu1 %8697  ;;  %v15525_v25 = vpop.permute.xlu0 %8775 }
 0x3fe   :  { %20601 = vst [vmem:[#allocation248_spill] sm:$0xff] %v15523_v27  ;;  %20602 = vst [vmem:[#allocation204_spill] sm:$0xff] %v15525_v25  ;;  %v20700_v25 = vld [vmem:[#allocation425_spill] sm:$0xff] }
 0x3ff   :  { %8941 = vrot.lane.b32.xlu1 %v20604_v23, %s10646_s24  ;;  %8955 = vrot.lane.b32.xlu0 %v20605_v24, %s10646_s24  ;;  %v20629_v23 = vld [vmem:[#allocation46_spill] sm:$0xff] }
 0x400   :  { %v2167_v24 = vcombine.low %v20629_v23, %v20628_v18 }
 0x401   :  { %v15541_v44 = vpop.permute.xlu1 %8701  ;;  %v15543_v58 = vpop.permute.xlu0 %8779 }
 0x402   :  { %20607 = vst [vmem:[#allocation322_spill] sm:$0xff] %v15541_v44  ;;  %20608 = vst [vmem:[#allocation495_spill] sm:$0xff] %v15543_v58 }
 0x403   :  { %8945 = vrot.lane.b32.xlu1 %v20609_v34, %s10646_s24  ;;  %8959 = vrot.lane.b32.xlu0 %v20611_v29, %s10646_s24  ;;  %v20630_v34 = vcombine.high %v20539_v12, %v20540_v19  ;;  %v20638_v12 = vld [vmem:[#allocation104_spill] sm:$0xff] }
 0x405   :  { %v15557_v49 = vpop.permute.xlu1 %8705  ;;  %v15559_v2 = vpop.permute.xlu0 %8783 }
 0x406   :  { %20612 = vst [vmem:[#allocation452_spill] sm:$0xff] %v15557_v49  ;;  %20613 = vst [vmem:[#allocation42_spill] sm:$0xff] %v15559_v2  ;;  %v20682_v2 = vld [vmem:[#allocation321_spill] sm:$0xff] }
 0x407   :  { %8949 = vrot.lane.b32.xlu1 %v20615_v54, %s10646_s24  ;;  %8963 = vrot.lane.b32.xlu0 %v20618_v13, %s10646_s24  ;;  %v20634_v54 = vld [vmem:[#allocation74_spill] sm:$0xff] }
 0x408   :  { %v2791_v17 = vcombine.low %v20634_v54, %v20633_v26 }
 0x409   :  { %v15569_v38 = vpop.permute.xlu1 %8709  ;;  %v15571_v1 = vpop.permute.xlu0 %8787 }
 0x40a   :  { %20619 = vst [vmem:[#allocation193_spill] sm:$0xff] %v15569_v38  ;;  %20620 = vst [vmem:[#allocation114_spill] sm:$0xff] %v15571_v1 }
 0x40b   :  { %8953 = vrot.lane.b32.xlu1 %v20625_v3, %s10646_s24  ;;  %9031 = vrot.lane.b32.xlu0 %v1959_v42, %s10647_s25  ;;  %v20639_v42 = vld [vmem:[#allocation103_spill] sm:$0xff] }
 0x40c   :  { %v2999_v56 = vcombine.low %v20639_v42, %v20638_v12 }
 0x40d   :  { %v15580_v46 = vpop.permute.xlu1 %8777  ;;  %v15582_v20 = vpop.permute.xlu0 %8791 }
 0x40e   :  { %20626 = vst [vmem:[#allocation459_spill] sm:$0xff] %v15580_v46  ;;  %20627 = vst [vmem:[#allocation381_spill] sm:$0xff] %v15582_v20  ;;  %v20676_v20 = vld [vmem:[#allocation286_spill] sm:$0xff] }
 0x40f   :  { %8957 = vrot.lane.b32.xlu1 %v20630_v34, %s10646_s24  ;;  %9035 = vrot.lane.b32.xlu0 %v2167_v24, %s10647_s25  ;;  %v20644_v24 = vld [vmem:[#allocation32_spill] sm:$0xff] }
 0x410   :  { %v2063_v34 = vcombine.low %v20644_v24, %v20643_v6 }
 0x411   :  { %v15591_v48 = vpop.permute.xlu1 %8781  ;;  %v15593_v29 = vpop.permute.xlu0 %8795 }
 0x412   :  { %20631 = vst [vmem:[#allocation492_spill] sm:$0xff] %v15591_v48  ;;  %20632 = vst [vmem:[#allocation490_spill] sm:$0xff] %v15593_v29 }
 0x413   :  { %8961 = vrot.lane.b32.xlu1 %v20635_v37, %s10646_s24  ;;  %9039 = vrot.lane.b32.xlu0 %v2791_v17, %s10647_s25  ;;  %v20645_v17 = vld [vmem:[#allocation136_spill] sm:$0xff]  ;;  %v20646_v37 = vld [vmem:[#allocation135_spill] sm:$0xff] }
 0x414   :  { %v3623_v9 = vcombine.low %v20646_v37, %v20645_v17 }
 0x415   :  { %v15602_v13 = vpop.permute.xlu1 %8785  ;;  %v15604_v19 = vpop.permute.xlu0 %8799 }
 0x416   :  { %20636 = vst [vmem:[#allocation18_spill] sm:$0xff] %v15602_v13  ;;  %20637 = vst [vmem:[#allocation20_spill] sm:$0xff] %v15604_v19  ;;  %v20670_v19 = vld [vmem:[#allocation252_spill] sm:$0xff] }
 0x417   :  { %8965 = vrot.lane.b32.xlu1 %v20640_v4, %s10646_s24  ;;  %9043 = vrot.lane.b32.xlu0 %v2999_v56, %s10647_s25  ;;  %v20650_v56 = vld [vmem:[#allocation60_spill] sm:$0xff] }
 0x418   :  { %v2271_v4 = vcombine.low %v20650_v56, %v20649_v59 }
 0x419   :  { %v15613_v3 = vpop.permute.xlu1 %8789  ;;  %v15615_v15 = vpop.permute.xlu0 %8803 }
 0x41a   :  { %20641 = vst [vmem:[#allocation412_spill] sm:$0xff] %v15613_v3  ;;  %20642 = vst [vmem:[#allocation411_spill] sm:$0xff] %v15615_v15 }
 0x41b   :  { %9033 = vrot.lane.b32.xlu1 %v2063_v34, %s10647_s25  ;;  %9047 = vrot.lane.b32.xlu0 %v3623_v9, %s10647_s25  ;;  %v20655_v34 = vld [vmem:[#allocation89_spill] sm:$0xff]  ;;  %v20656_v9 = vld [vmem:[#allocation88_spill] sm:$0xff] }
 0x41c   :  { %v2895_v27 = vcombine.low %v20656_v9, %v20655_v34 }
 0x41d   :  { %v15623_v33 = vpop.permute.xlu1 %8793  ;;  %v15625_v28 = vpop.permute.xlu0 %8807 }
 0x41e   :  { %20647 = vst [vmem:[#allocation48_spill] sm:$0xff] %v15623_v33  ;;  %20648 = vst [vmem:[#allocation46_spill] sm:$0xff] %v15625_v28  ;;  %v20664_v28 = vld [vmem:[#allocation228_spill] sm:$0xff] }
 0x41f   :  { %9037 = vrot.lane.b32.xlu1 %v2271_v4, %s10647_s25  ;;  %9051 = vrot.lane.b32.xlu0 %v3831_v7, %s10647_s25  ;;  %v20661_v4 = vld [vmem:[#allocation120_spill] sm:$0xff]  ;;  %v20662_v7 = vld [vmem:[#allocation119_spill] sm:$0xff] }
 0x420   :  { %v3103_v16 = vcombine.low %v20662_v7, %v20661_v4 }
 0x421   :  { %v15633_v49 = vpop.permute.xlu1 %8797  ;;  %v15635_v44 = vpop.permute.xlu0 %8811 }
 0x422   :  { %20653 = vst [vmem:[#allocation76_spill] sm:$0xff] %v15633_v49  ;;  %20654 = vst [vmem:[#allocation74_spill] sm:$0xff] %v15635_v44  ;;  %v20663_v49 = vld [vmem:[#allocation229_spill] sm:$0xff] }
 0x423   :  { %9041 = vrot.lane.b32.xlu1 %v2895_v27, %s10647_s25  ;;  %9055 = vrot.lane.b32.xlu0 %v4455_v31, %s10647_s25  ;;  %v4663_v44 = vcombine.low %v20664_v28, %v20663_v49  ;;  %v20667_v27 = vld [vmem:[#allocation152_spill] sm:$0xff]  ;;  %v20668_v31 = vld [vmem:[#allocation151_spill] sm:$0xff] }
 0x424   :  { %v3727_v3 = vcombine.low %v20668_v31, %v20667_v27 }
 0x425   :  { %v15643_v57 = vpop.permute.xlu1 %8801  ;;  %v15645_v39 = vpop.permute.xlu0 %8815 }
 0x426   :  { %20659 = vst [vmem:[#allocation104_spill] sm:$0xff] %v15643_v57  ;;  %20660 = vst [vmem:[#allocation103_spill] sm:$0xff] %v15645_v39  ;;  %v20669_v57 = vld [vmem:[#allocation254_spill] sm:$0xff] }
 0x427   :  { %9045 = vrot.lane.b32.xlu1 %v3103_v16, %s10647_s25  ;;  %9059 = vrot.lane.b32.xlu0 %v4663_v44, %s10647_s25  ;;  %v5287_v39 = vcombine.low %v20670_v19, %v20669_v57  ;;  %v20673_v16 = vld [vmem:[#allocation182_spill] sm:$0xff]  ;;  %v20674_v44 = vld [vmem:[#allocation181_spill] sm:$0xff] }
 0x428   :  { %v3935_v48 = vcombine.low %v20674_v44, %v20673_v16 }
 0x429   :  { %v15653_v33 = vpop.permute.xlu1 %8805  ;;  %v15655_v15 = vpop.permute.xlu0 %8819 }
 0x42a   :  { %20665 = vst [vmem:[#allocation34_spill] sm:$0xff] %v15653_v33  ;;  %20666 = vst [vmem:[#allocation32_spill] sm:$0xff] %v15655_v15  ;;  %v20675_v33 = vld [vmem:[#allocation287_spill] sm:$0xff] }
 0x42b   :  { %9049 = vrot.lane.b32.xlu1 %v3727_v3, %s10647_s25  ;;  %9063 = vrot.lane.b32.xlu0 %v5287_v39, %s10647_s25  ;;  %v5495_v15 = vcombine.low %v20676_v20, %v20675_v33  ;;  %v20679_v3 = vld [vmem:[#allocation213_spill] sm:$0xff]  ;;  %v20680_v39 = vld [vmem:[#allocation212_spill] sm:$0xff] }
 0x42c   :  { %v4559_v38 = vcombine.low %v20680_v39, %v20679_v3 }
 0x42d   :  { %v15663_v13 = vpop.permute.xlu1 %8809  ;;  %v15665_v29 = vpop.permute.xlu0 %8823 }
 0x42e   :  { %20671 = vst [vmem:[#allocation136_spill] sm:$0xff] %v15663_v13  ;;  %20672 = vst [vmem:[#allocation135_spill] sm:$0xff] %v15665_v29  ;;  %v20681_v13 = vld [vmem:[#allocation323_spill] sm:$0xff] }
 0x42f   :  { %9053 = vrot.lane.b32.xlu1 %v3935_v48, %s10647_s25  ;;  %9067 = vrot.lane.b32.xlu0 %v5495_v15, %s10647_s25  ;;  %v6119_v29 = vcombine.low %v20682_v2, %v20681_v13  ;;  %v20685_v48 = vld [vmem:[#allocation245_spill] sm:$0xff]  ;;  %v20686_v15 = vld [vmem:[#allocation244_spill] sm:$0xff] }
 0x430   :  { %v4767_v43 = vcombine.low %v20686_v15, %v20685_v48 }
 0x431   :  { %v15673_v46 = vpop.permute.xlu1 %8813  ;;  %v15675_v1 = vpop.permute.xlu0 %8827 }
 0x432   :  { %20677 = vst [vmem:[#allocation62_spill] sm:$0xff] %v15673_v46  ;;  %20678 = vst [vmem:[#allocation60_spill] sm:$0xff] %v15675_v1  ;;  %v20687_v46 = vld [vmem:[#allocation360_spill] sm:$0xff] }
 0x433   :  { %9057 = vrot.lane.b32.xlu1 %v4559_v38, %s10647_s25  ;;  %9071 = vrot.lane.b32.xlu0 %v6119_v29, %s10647_s25  ;;  %v6327_v1 = vcombine.low %v20688_v5, %v20687_v46  ;;  %v20691_v38 = vld [vmem:[#allocation270_spill] sm:$0xff]  ;;  %v20692_v29 = vld [vmem:[#allocation268_spill] sm:$0xff] }
 0x434   :  { %v5391_v50 = vcombine.low %v20692_v29, %v20691_v38 }
 0x435   :  { %v15683_v55 = vpop.permute.xlu1 %8817  ;;  %v15685_v52 = vpop.permute.xlu0 %8831 }
 0x436   :  { %20683 = vst [vmem:[#allocation167_spill] sm:$0xff] %v15683_v55  ;;  %20684 = vst [vmem:[#allocation166_spill] sm:$0xff] %v15685_v52  ;;  %v20693_v55 = vld [vmem:[#allocation394_spill] sm:$0xff] }
 0x437   :  { %9061 = vrot.lane.b32.xlu1 %v4767_v43, %s10647_s25  ;;  %9075 = vrot.lane.b32.xlu0 %v6327_v1, %s10647_s25  ;;  %v6951_v52 = vcombine.low %v20694_v10, %v20693_v55  ;;  %v20697_v43 = vld [vmem:[#allocation306_spill] sm:$0xff]  ;;  %v20698_v1 = vld [vmem:[#allocation304_spill] sm:$0xff] }
 0x438   :  { %v5599_v22 = vcombine.low %v20698_v1, %v20697_v43 }
 0x439   :  { %v15693_v63 = vpop.permute.xlu1 %8821  ;;  %v15695_v58 = vpop.permute.xlu0 %8835 }
 0x43a   :  { %20689 = vst [vmem:[#allocation89_spill] sm:$0xff] %v15693_v63  ;;  %20690 = vst [vmem:[#allocation88_spill] sm:$0xff] %v15695_v58  ;;  %v20699_v63 = vld [vmem:[#allocation426_spill] sm:$0xff] }
 0x43b   :  { %9065 = vrot.lane.b32.xlu1 %v5391_v50, %s10647_s25  ;;  %9079 = vrot.lane.b32.xlu0 %v6951_v52, %s10647_s25  ;;  %v7159_v61 = vcombine.low %v20700_v25, %v20699_v63  ;;  %v20703_v50 = vld [vmem:[#allocation340_spill] sm:$0xff]  ;;  %v20704_v52 = vld [vmem:[#allocation338_spill] sm:$0xff] }
 0x43c   :  { %v6223_v8 = vcombine.low %v20704_v52, %v20703_v50 }
 0x43d   :  { %v15703_v35 = vpop.permute.xlu1 %8825  ;;  %v15705_v11 = vpop.permute.xlu0 %8903 }
 0x43e   :  { %20695 = vst [vmem:[#allocation197_spill] sm:$0xff] %v15703_v35  ;;  %20696 = vst [vmem:[#allocation196_spill] sm:$0xff] %v15705_v11  ;;  %v20705_v35 = vld [vmem:[#allocation453_spill] sm:$0xff] }
 0x43f   :  { %9069 = vrot.lane.b32.xlu1 %v5599_v22, %s10647_s25  ;;  %9083 = vrot.lane.b32.xlu0 %v7159_v61, %s10647_s25  ;;  %v7783_v11 = vcombine.low %v20706_v30, %v20705_v35  ;;  %v20709_v22 = vld [vmem:[#allocation374_spill] sm:$0xff]  ;;  %v20710_v61 = vld [vmem:[#allocation372_spill] sm:$0xff] }
 0x440   :  { %v6431_v36 = vcombine.low %v20710_v61, %v20709_v22 }
 0x441   :  { %v15713_v32 = vpop.permute.xlu1 %8829  ;;  %v15715_v62 = vpop.permute.xlu0 %8907 }
 0x442   :  { %20701 = vst [vmem:[#allocation120_spill] sm:$0xff] %v15713_v32  ;;  %20702 = vst [vmem:[#allocation119_spill] sm:$0xff] %v15715_v62  ;;  %v20711_v32 = vld [vmem:[#allocation484_spill] sm:$0xff] }
 0x443   :  { %9073 = vrot.lane.b32.xlu1 %v6223_v8, %s10647_s25  ;;  %9087 = vrot.lane.b32.xlu0 %v7783_v11, %s10647_s25  ;;  %v7991_v62 = vcombine.low %v20712_v53, %v20711_v32  ;;  %v20715_v8 = vld [vmem:[#allocation406_spill] sm:$0xff]  ;;  %v20716_v11 = vld [vmem:[#allocation405_spill] sm:$0xff] }
 0x444   :  { %v7055_v35 = vcombine.low %v20716_v11, %v20715_v8  ;;  %v20721_v32 = vld [vmem:[#allocation202_spill] sm:$0xff] }
 0x445   :  { %v15723_v58 = vpop.permute.xlu1 %8833  ;;  %v15725_v51 = vpop.permute.xlu0 %8911 }
 0x446   :  { %20707 = vst [vmem:[#allocation229_spill] sm:$0xff] %v15723_v58  ;;  %20708 = vst [vmem:[#allocation228_spill] sm:$0xff] %v15725_v51  ;;  %v20717_v58 = vcombine.high %v20622_v41, %v20621_v40  ;;  %v20725_v40 = vld [vmem:[#allocation468_spill] sm:$0xff] }
 0x447   :  { %9077 = vrot.lane.b32.xlu1 %v6431_v36, %s10647_s25  ;;  %9091 = vrot.lane.b32.xlu0 %v7991_v62, %s10647_s25  ;;  %v20720_v62 = vld [vmem:[#allocation441_spill] sm:$0xff] }
 0x449   :  { %v15733_v14 = vpop.permute.xlu1 %8837  ;;  %v15735_v21 = vpop.permute.xlu0 %8915 }
 0x44a   :  { %20713 = vst [vmem:[#allocation152_spill] sm:$0xff] %v15733_v14  ;;  %20714 = vst [vmem:[#allocation151_spill] sm:$0xff] %v15735_v21  ;;  %v7263_v14 = vcombine.low %v20721_v32, %v20720_v62  ;;  %v20722_v21 = vcombine.high %v20629_v23, %v20628_v18  ;;  %v20730_v18 = vld [vmem:[#allocation39_spill] sm:$0xff] }
 0x44b   :  { %9081 = vrot.lane.b32.xlu1 %v7055_v35, %s10647_s25  ;;  %9159 = vrot.lane.b32.xlu0 %v20717_v58, %s10648_s26  ;;  %v20726_v58 = vld [vmem:[#allocation265_spill] sm:$0xff] }
 0x44c   :  { %v7887_v41 = vcombine.low %v20726_v58, %v20725_v40 }
 0x44d   :  { %v15744_v51 = vpop.permute.xlu1 %8905  ;;  %v15746_v36 = vpop.permute.xlu0 %8919 }
 0x44e   :  { %20718 = vst [vmem:[#allocation254_spill] sm:$0xff] %v15744_v51  ;;  %20719 = vst [vmem:[#allocation252_spill] sm:$0xff] %v15746_v36  ;;  %v20727_v36 = vcombine.high %v20634_v54, %v20633_v26  ;;  %v20735_v26 = vcombine.high %v20644_v24, %v20643_v6  ;;  %v20736_v54 = vcombine.high %v20646_v37, %v20645_v17 }
 0x44f   :  { %9085 = vrot.lane.b32.xlu1 %v7263_v14, %s10647_s25  ;;  %9163 = vrot.lane.b32.xlu0 %v20722_v21, %s10648_s26  ;;  %v20731_v21 = vld [vmem:[#allocation305_spill] sm:$0xff]  ;;  %v20743_v17 = vcombine.high %v20656_v9, %v20655_v34  ;;  %v20744_v37 = vcombine.high %v20658_v0, %v20657_v45  ;;  %v20751_v0 = vcombine.high %v20668_v31, %v20667_v27 }
 0x450   :  { %v8095_v23 = vcombine.low %v20731_v21, %v20730_v18  ;;  %v20752_v45 = vcombine.high %v20670_v19, %v20669_v57  ;;  %v20759_v57 = vcombine.high %v20680_v39, %v20679_v3  ;;  %v20760_v19 = vcombine.high %v20682_v2, %v20681_v13 }
 0x451   :  { %v15755_v35 = vpop.permute.xlu1 %8909  ;;  %v15757_v8 = vpop.permute.xlu0 %8923  ;;  %v20767_v2 = vcombine.high %v20692_v29, %v20691_v38  ;;  %v20768_v13 = vcombine.high %v20694_v10, %v20693_v55  ;;  %v20775_v10 = vcombine.high %v20704_v52, %v20703_v50  ;;  %v20776_v55 = vld [vmem:[#allocation453_spill] sm:$0xff] }
 0x452   :  { %20723 = vst [vmem:[#allocation182_spill] sm:$0xff] %v15755_v35  ;;  %20724 = vst [vmem:[#allocation181_spill] sm:$0xff] %v15757_v8  ;;  %v20732_v8 = vcombine.high %v20639_v42, %v20638_v12  ;;  %v20739_v12 = vcombine.high %v20650_v56, %v20649_v59  ;;  %v20740_v42 = vcombine.high %v20652_v60, %v20651_v47 }
 0x453   :  { %9089 = vrot.lane.b32.xlu1 %v7887_v41, %s10647_s25  ;;  %9167 = vrot.lane.b32.xlu0 %v20727_v36, %s10648_s26  ;;  %v20747_v47 = vcombine.high %v20662_v7, %v20661_v4  ;;  %v20748_v60 = vcombine.high %v20664_v28, %v20663_v49  ;;  %v20755_v49 = vcombine.high %v20674_v44, %v20673_v16 }
 0x454   :  { %v20756_v28 = vcombine.high %v20676_v20, %v20675_v33  ;;  %v20763_v33 = vcombine.high %v20686_v15, %v20685_v48  ;;  %v20764_v20 = vcombine.high %v20688_v5, %v20687_v46  ;;  %v20771_v5 = vcombine.high %v20698_v1, %v20697_v43 }
 0x455   :  { %v15766_v14 = vpop.permute.xlu1 %8913  ;;  %v15768_v51 = vpop.permute.xlu0 %8927  ;;  %v20772_v46 = vcombine.high %v20700_v25, %v20699_v63  ;;  %v20780_v63 = vcombine.high %v20710_v61, %v20709_v22  ;;  %v20781_v25 = vld [vmem:[#allocation484_spill] sm:$0xff] }
 0x456   :  { %20728 = vst [vmem:[#allocation287_spill] sm:$0xff] %v15766_v14  ;;  %20729 = vst [vmem:[#allocation286_spill] sm:$0xff] %v15768_v51  ;;  %v20885_v51 = vld [vmem:[#allocation431_spill] sm:$0xff]  ;;  %v20886_v14 = vld [vmem:[#allocation433_spill] sm:$0xff] }
 0x457   :  { %9093 = vrot.lane.b32.xlu1 %v8095_v23, %s10647_s25  ;;  %9171 = vrot.lane.b32.xlu0 %v20732_v8, %s10648_s26  ;;  %v20777_v8 = vcombine.high %v20706_v30, %v20776_v55  ;;  %v20785_v30 = vld [vmem:[#allocation406_spill] sm:$0xff] }
 0x458   :  { %v20814_v55 = vld [vmem:[#allocation138_spill] sm:$0xff] }
 0x459   :  { %v15777_v41 = vpop.permute.xlu1 %8917  ;;  %v15779_v35 = vpop.permute.xlu0 %8931 }
 0x45a   :  { %20733 = vst [vmem:[#allocation213_spill] sm:$0xff] %v15777_v41  ;;  %20734 = vst [vmem:[#allocation212_spill] sm:$0xff] %v15779_v35  ;;  %v20878_v35 = vld [vmem:[#allocation403_spill] sm:$0xff] }
 0x45b   :  { %9161 = vrot.lane.b32.xlu1 %v20735_v26, %s10648_s26  ;;  %9175 = vrot.lane.b32.xlu0 %v20736_v54, %s10648_s26  ;;  %v20782_v26 = vcombine.high %v20712_v53, %v20781_v25  ;;  %v20786_v54 = vcombine.high %v20716_v11, %v20785_v30  ;;  %v20792_v53 = vcombine.high %v20721_v32, %v20720_v62  ;;  %v20819_v25 = vld [vmem:[#allocation63_spill] sm:$0xff]  ;;  %v20821_v30 = vld [vmem:[#allocation168_spill] sm:$0xff] }
 0x45d   :  { %v15789_v36 = vpop.permute.xlu1 %8921  ;;  %v15791_v23 = vpop.permute.xlu0 %8935 }
 0x45e   :  { %20737 = vst [vmem:[#allocation323_spill] sm:$0xff] %v15789_v36  ;;  %20738 = vst [vmem:[#allocation321_spill] sm:$0xff] %v15791_v23  ;;  %v20870_v23 = vld [vmem:[#allocation369_spill] sm:$0xff] }
 0x45f   :  { %9165 = vrot.lane.b32.xlu1 %v20739_v12, %s10648_s26  ;;  %9179 = vrot.lane.b32.xlu0 %v20740_v42, %s10648_s26  ;;  %v20787_v12 = vld [vmem:[#allocation21_spill] sm:$0xff]  ;;  %v20788_v42 = vld [vmem:[#allocation19_spill] sm:$0xff] }
 0x460   :  { %v20789_v22 = vcombine.low %v20787_v12, %v20788_v42 }
 0x461   :  { %v15801_v6 = vpop.permute.xlu1 %8925  ;;  %v15803_v24 = vpop.permute.xlu0 %8939 }
 0x462   :  { %20741 = vst [vmem:[#allocation245_spill] sm:$0xff] %v15801_v6  ;;  %20742 = vst [vmem:[#allocation244_spill] sm:$0xff] %v15803_v24  ;;  %v20862_v24 = vld [vmem:[#allocation332_spill] sm:$0xff] }
 0x463   :  { %9169 = vrot.lane.b32.xlu1 %v20743_v17, %s10648_s26  ;;  %9183 = vrot.lane.b32.xlu0 %v20744_v37, %s10648_s26  ;;  %v20793_v37 = vld [vmem:[#allocation47_spill] sm:$0xff] }
 0x465   :  { %v15813_v59 = vpop.permute.xlu1 %8929  ;;  %v15815_v56 = vpop.permute.xlu0 %8943 }
 0x466   :  { %20745 = vst [vmem:[#allocation360_spill] sm:$0xff] %v15813_v59  ;;  %20746 = vst [vmem:[#allocation358_spill] sm:$0xff] %v15815_v56  ;;  %v20854_v56 = vld [vmem:[#allocation295_spill] sm:$0xff] }
 0x467   :  { %9173 = vrot.lane.b32.xlu1 %v20747_v47, %s10648_s26  ;;  %9187 = vrot.lane.b32.xlu0 %v20748_v60, %s10648_s26  ;;  %v20794_v47 = vld [vmem:[#allocation49_spill] sm:$0xff] }
 0x468   :  { %v20795_v11 = vcombine.low %v20793_v37, %v20794_v47 }
 0x469   :  { %v15825_v34 = vpop.permute.xlu1 %8933  ;;  %v15827_v9 = vpop.permute.xlu0 %8947 }
 0x46a   :  { %20749 = vst [vmem:[#allocation270_spill] sm:$0xff] %v15825_v34  ;;  %20750 = vst [vmem:[#allocation268_spill] sm:$0xff] %v15827_v9  ;;  %v20846_v9 = vld [vmem:[#allocation263_spill] sm:$0xff] }
 0x46b   :  { %9177 = vrot.lane.b32.xlu1 %v20751_v0, %s10648_s26  ;;  %9191 = vrot.lane.b32.xlu0 %v20752_v45, %s10648_s26  ;;  %v20798_v45 = vcombine.high %v20726_v58, %v20725_v40 }
 0x46d   :  { %v15837_v4 = vpop.permute.xlu1 %8937  ;;  %v15839_v7 = vpop.permute.xlu0 %8951 }
 0x46e   :  { %20753 = vst [vmem:[#allocation394_spill] sm:$0xff] %v15837_v4  ;;  %20754 = vst [vmem:[#allocation392_spill] sm:$0xff] %v15839_v7  ;;  %v20845_v4 = vld [vmem:[#allocation261_spill] sm:$0xff] }
 0x46f   :  { %9181 = vrot.lane.b32.xlu1 %v20755_v49, %s10648_s26  ;;  %9195 = vrot.lane.b32.xlu0 %v20756_v28, %s10648_s26  ;;  %v20799_v49 = vld [vmem:[#allocation75_spill] sm:$0xff]  ;;  %v20800_v28 = vld [vmem:[#allocation77_spill] sm:$0xff]  ;;  %v20847_v34 = vcombine.low %v20845_v4, %v20846_v9 }
 0x471   :  { %v15849_v27 = vpop.permute.xlu1 %8941  ;;  %v15851_v31 = vpop.permute.xlu0 %8955 }
 0x472   :  { %20757 = vst [vmem:[#allocation306_spill] sm:$0xff] %v15849_v27  ;;  %20758 = vst [vmem:[#allocation304_spill] sm:$0xff] %v15851_v31  ;;  %v20843_v27 = vld [vmem:[#allocation154_spill] sm:$0xff] }
 0x473   :  { %9185 = vrot.lane.b32.xlu1 %v20759_v57, %s10648_s26  ;;  %9199 = vrot.lane.b32.xlu0 %v20760_v19, %s10648_s26  ;;  %v20801_v57 = vcombine.low %v20799_v49, %v20800_v28  ;;  %v20804_v19 = vcombine.high %v20731_v21, %v20730_v18 }
 0x475   :  { %v15861_v16 = vpop.permute.xlu1 %8945  ;;  %v15863_v44 = vpop.permute.xlu0 %8959 }
 0x476   :  { %20761 = vst [vmem:[#allocation426_spill] sm:$0xff] %v15861_v16  ;;  %20762 = vst [vmem:[#allocation425_spill] sm:$0xff] %v15863_v44  ;;  %v20838_v44 = vld [vmem:[#allocation231_spill] sm:$0xff] }
 0x477   :  { %9189 = vrot.lane.b32.xlu1 %v20763_v33, %s10648_s26  ;;  %9203 = vrot.lane.b32.xlu0 %v20764_v20, %s10648_s26  ;;  %v20805_v33 = vld [vmem:[#allocation105_spill] sm:$0xff]  ;;  %v20806_v20 = vld [vmem:[#allocation106_spill] sm:$0xff] }
 0x479   :  { %v15873_v3 = vpop.permute.xlu1 %8949  ;;  %v15875_v39 = vpop.permute.xlu0 %8963 }
 0x47a   :  { %20765 = vst [vmem:[#allocation340_spill] sm:$0xff] %v15873_v3  ;;  %20766 = vst [vmem:[#allocation338_spill] sm:$0xff] %v15875_v39  ;;  %v20837_v3 = vld [vmem:[#allocation230_spill] sm:$0xff] }
 0x47b   :  { %9193 = vrot.lane.b32.xlu1 %v20767_v2, %s10648_s26  ;;  %9207 = vrot.lane.b32.xlu0 %v20768_v13, %s10648_s26  ;;  %v20807_v2 = vcombine.low %v20805_v33, %v20806_v20  ;;  %v20810_v13 = vld [vmem:[#allocation33_spill] sm:$0xff]  ;;  %v20839_v16 = vcombine.low %v20837_v3, %v20838_v44  ;;  %v20907_v39 = vld [vmem:[#allocation414_spill] sm:$0xff] }
 0x47d   :  { %v15885_v48 = vpop.permute.xlu1 %8953  ;;  %v15887_v15 = vpop.permute.xlu0 %9031 }
 0x47e   :  { %20769 = vst [vmem:[#allocation451_spill] sm:$0xff] %v15885_v48  ;;  %20770 = vst [vmem:[#allocation374_spill] sm:$0xff] %v15887_v15 }
 0x47f   :  { %9197 = vrot.lane.b32.xlu1 %v20771_v5, %s10648_s26  ;;  %9211 = vrot.lane.b32.xlu0 %v20772_v46, %s10648_s26  ;;  %v20811_v5 = vld [vmem:[#allocation35_spill] sm:$0xff] }
 0x480   :  { %v20812_v46 = vcombine.low %v20810_v13, %v20811_v5 }
 0x481   :  { %v15897_v38 = vpop.permute.xlu1 %8957  ;;  %v15899_v29 = vpop.permute.xlu0 %9035 }
 0x482   :  { %20773 = vst [vmem:[#allocation372_spill] sm:$0xff] %v15897_v38  ;;  %20774 = vst [vmem:[#allocation478_spill] sm:$0xff] %v15899_v29  ;;  %v20835_v38 = vld [vmem:[#allocation122_spill] sm:$0xff]  ;;  %v20899_v29 = vld [vmem:[#allocation384_spill] sm:$0xff] }
 0x483   :  { %9201 = vrot.lane.b32.xlu1 %v20775_v10, %s10648_s26  ;;  %9215 = vrot.lane.b32.xlu0 %v20777_v8, %s10648_s26  ;;  %v20813_v10 = vld [vmem:[#allocation137_spill] sm:$0xff] }
 0x484   :  { %v20815_v8 = vcombine.low %v20813_v10, %v20814_v55 }
 0x485   :  { %v15909_v43 = vpop.permute.xlu1 %8961  ;;  %v15911_v1 = vpop.permute.xlu0 %9039 }
 0x486   :  { %20778 = vst [vmem:[#allocation405_spill] sm:$0xff] %v15909_v43  ;;  %20779 = vst [vmem:[#allocation441_spill] sm:$0xff] %v15911_v1 }
 0x487   :  { %9205 = vrot.lane.b32.xlu1 %v20780_v63, %s10648_s26  ;;  %9219 = vrot.lane.b32.xlu0 %v20782_v26, %s10648_s26  ;;  %v20818_v63 = vld [vmem:[#allocation61_spill] sm:$0xff] }
 0x488   :  { %v20820_v26 = vcombine.low %v20818_v63, %v20819_v25 }
 0x489   :  { %v15921_v50 = vpop.permute.xlu1 %8965  ;;  %v15923_v52 = vpop.permute.xlu0 %9043 }
 0x48a   :  { %20783 = vst [vmem:[#allocation202_spill] sm:$0xff] %v15921_v50  ;;  %20784 = vst [vmem:[#allocation468_spill] sm:$0xff] %v15923_v52  ;;  %v20894_v52 = vld [vmem:[#allocation460_spill] sm:$0xff] }
 0x48b   :  { %9209 = vrot.lane.b32.xlu1 %v20786_v54, %s10648_s26  ;;  %9287 = vrot.lane.b32.xlu0 %v20789_v22, %s10649_s27  ;;  %v20822_v54 = vld [vmem:[#allocation169_spill] sm:$0xff] }
 0x48c   :  { %v20823_v22 = vcombine.low %v20821_v30, %v20822_v54 }
 0x48d   :  { %v15933_v61 = vpop.permute.xlu1 %9033  ;;  %v15935_v17 = vpop.permute.xlu0 %9047 }
 0x48e   :  { %20790 = vst [vmem:[#allocation265_spill] sm:$0xff] %v15933_v61  ;;  %20791 = vst [vmem:[#allocation39_spill] sm:$0xff] %v15935_v17  ;;  %v20891_v17 = vld [vmem:[#allocation350_spill] sm:$0xff] }
 0x48f   :  { %9213 = vrot.lane.b32.xlu1 %v20792_v53, %s10648_s26  ;;  %9291 = vrot.lane.b32.xlu0 %v20795_v11, %s10649_s27  ;;  %v20893_v61 = vld [vmem:[#allocation458_spill] sm:$0xff] }
 0x490   :  { %v20895_v50 = vcombine.low %v20893_v61, %v20894_v52 }
 0x491   :  { %v15945_v60 = vpop.permute.xlu1 %9037  ;;  %v15947_v0 = vpop.permute.xlu0 %9051 }
 0x492   :  { %20796 = vst [vmem:[#allocation305_spill] sm:$0xff] %v15945_v60  ;;  %20797 = vst [vmem:[#allocation453_spill] sm:$0xff] %v15947_v0  ;;  %v20887_v0 = vcombine.low %v20885_v51, %v20886_v14 }
 0x493   :  { %9217 = vrot.lane.b32.xlu1 %v20798_v45, %s10648_s26  ;;  %9295 = vrot.lane.b32.xlu0 %v20801_v57, %s10649_s27  ;;  %v20826_v45 = vld [vmem:[#allocation90_spill] sm:$0xff]  ;;  %v20827_v57 = vld [vmem:[#allocation91_spill] sm:$0xff] }
 0x495   :  { %v15957_v32 = vpop.permute.xlu1 %9041  ;;  %v15959_v62 = vpop.permute.xlu0 %9055 }
 0x496   :  { %20802 = vst [vmem:[#allocation484_spill] sm:$0xff] %v15957_v32  ;;  %20803 = vst [vmem:[#allocation406_spill] sm:$0xff] %v15959_v62  ;;  %v20883_v32 = vld [vmem:[#allocation315_spill] sm:$0xff] }
 0x497   :  { %9221 = vrot.lane.b32.xlu1 %v20804_v19, %s10648_s26  ;;  %9299 = vrot.lane.b32.xlu0 %v20807_v2, %s10649_s27  ;;  %v20828_v19 = vcombine.low %v20826_v45, %v20827_v57  ;;  %v20829_v2 = vld [vmem:[#allocation198_spill] sm:$0xff] }
 0x499   :  { %v15969_v40 = vpop.permute.xlu1 %9045  ;;  %v15971_v58 = vpop.permute.xlu0 %9059 }
 0x49a   :  { %20808 = vst [vmem:[#allocation21_spill] sm:$0xff] %v15969_v40  ;;  %20809 = vst [vmem:[#allocation19_spill] sm:$0xff] %v15971_v58  ;;  %v20875_v40 = vld [vmem:[#allocation279_spill] sm:$0xff] }
 0x49b   :  { %9289 = vrot.lane.b32.xlu1 %v20812_v46, %s10649_s27  ;;  %9303 = vrot.lane.b32.xlu0 %v20815_v8, %s10649_s27  ;;  %v20830_v46 = vld [vmem:[#allocation199_spill] sm:$0xff] }
 0x49c   :  { %v20831_v8 = vcombine.low %v20829_v2, %v20830_v46 }
 0x49d   :  { %v15981_v18 = vpop.permute.xlu1 %9049  ;;  %v15983_v21 = vpop.permute.xlu0 %9063 }
 0x49e   :  { %20816 = vst [vmem:[#allocation47_spill] sm:$0xff] %v15981_v18  ;;  %20817 = vst [vmem:[#allocation49_spill] sm:$0xff] %v15983_v21  ;;  %v20867_v18 = vld [vmem:[#allocation247_spill] sm:$0xff] }
 0x49f   :  { %9293 = vrot.lane.b32.xlu1 %v20820_v26, %s10649_s27  ;;  %9307 = vrot.lane.b32.xlu0 %v20823_v22, %s10649_s27  ;;  %v20834_v22 = vld [vmem:[#allocation121_spill] sm:$0xff] }
 0x4a0   :  { %v20836_v48 = vcombine.low %v20834_v22, %v20835_v38 }
 0x4a1   :  { %v15993_v53 = vpop.permute.xlu1 %9053  ;;  %v15995_v11 = vpop.permute.xlu0 %9067 }
 0x4a2   :  { %20824 = vst [vmem:[#allocation75_spill] sm:$0xff] %v15993_v53  ;;  %20825 = vst [vmem:[#allocation77_spill] sm:$0xff] %v15995_v11  ;;  %v20859_v53 = vld [vmem:[#allocation215_spill] sm:$0xff] }
 0x4a3   :  { %9297 = vrot.lane.b32.xlu1 %v20828_v19, %s10649_s27  ;;  %9311 = vrot.lane.b32.xlu0 %v20831_v8, %s10649_s27  ;;  %v20842_v8 = vld [vmem:[#allocation153_spill] sm:$0xff] }
 0x4a4   :  { %v20844_v7 = vcombine.low %v20842_v8, %v20843_v27 }
 0x4a5   :  { %v16005_v26 = vpop.permute.xlu1 %9057  ;;  %v16007_v43 = vpop.permute.xlu0 %9071 }
 0x4a6   :  { %20832 = vst [vmem:[#allocation105_spill] sm:$0xff] %v16005_v26  ;;  %20833 = vst [vmem:[#allocation106_spill] sm:$0xff] %v16007_v43  ;;  %v20851_v26 = vld [vmem:[#allocation184_spill] sm:$0xff] }
 0x4a7   :  { %9301 = vrot.lane.b32.xlu1 %v20836_v48, %s10649_s27  ;;  %9315 = vrot.lane.b32.xlu0 %v20839_v16, %s10649_s27  ;;  %v20850_v16 = vld [vmem:[#allocation183_spill] sm:$0xff] }
 0x4a9   :  { %v16017_v19 = vpop.permute.xlu1 %9061  ;;  %v16019_v31 = vpop.permute.xlu0 %9075 }
 0x4aa   :  { %20840 = vst [vmem:[#allocation33_spill] sm:$0xff] %v16017_v19  ;;  %20841 = vst [vmem:[#allocation35_spill] sm:$0xff] %v16019_v31  ;;  %v20852_v19 = vcombine.low %v20850_v16, %v20851_v26  ;;  %v20853_v31 = vld [vmem:[#allocation293_spill] sm:$0xff] }
 0x4ab   :  { %9305 = vrot.lane.b32.xlu1 %v20844_v7, %s10649_s27  ;;  %9319 = vrot.lane.b32.xlu0 %v20847_v34, %s10649_s27  ;;  %v20855_v59 = vcombine.low %v20853_v31, %v20854_v56  ;;  %v20858_v34 = vld [vmem:[#allocation214_spill] sm:$0xff] }
 0x4ad   :  { %v16029_v48 = vpop.permute.xlu1 %9065  ;;  %v16031_v43 = vpop.permute.xlu0 %9079 }
 0x4ae   :  { %20848 = vst [vmem:[#allocation137_spill] sm:$0xff] %v16029_v48  ;;  %20849 = vst [vmem:[#allocation138_spill] sm:$0xff] %v16031_v43  ;;  %v20860_v48 = vcombine.low %v20858_v34, %v20859_v53  ;;  %v20861_v43 = vld [vmem:[#allocation330_spill] sm:$0xff] }
 0x4af   :  { %9309 = vrot.lane.b32.xlu1 %v20852_v19, %s10649_s27  ;;  %9323 = vrot.lane.b32.xlu0 %v20855_v59, %s10649_s27  ;;  %v20863_v6 = vcombine.low %v20861_v43, %v20862_v24  ;;  %v20866_v59 = vld [vmem:[#allocation246_spill] sm:$0xff] }
 0x4b1   :  { %v16041_v7 = vpop.permute.xlu1 %9069  ;;  %v16043_v11 = vpop.permute.xlu0 %9083 }
 0x4b2   :  { %20856 = vst [vmem:[#allocation61_spill] sm:$0xff] %v16041_v7  ;;  %20857 = vst [vmem:[#allocation63_spill] sm:$0xff] %v16043_v11  ;;  %v20868_v7 = vcombine.low %v20866_v59, %v20867_v18  ;;  %v20869_v11 = vld [vmem:[#allocation367_spill] sm:$0xff] }
 0x4b3   :  { %9313 = vrot.lane.b32.xlu1 %v20860_v48, %s10649_s27  ;;  %9327 = vrot.lane.b32.xlu0 %v20863_v6, %s10649_s27  ;;  %v20871_v36 = vcombine.low %v20869_v11, %v20870_v23  ;;  %v20874_v6 = vld [vmem:[#allocation278_spill] sm:$0xff] }
 0x4b5   :  { %v16053_v19 = vpop.permute.xlu1 %9073  ;;  %v16055_v21 = vpop.permute.xlu0 %9087 }
 0x4b6   :  { %20864 = vst [vmem:[#allocation168_spill] sm:$0xff] %v16053_v19  ;;  %20865 = vst [vmem:[#allocation169_spill] sm:$0xff] %v16055_v21  ;;  %v20876_v19 = vcombine.low %v20874_v6, %v20875_v40  ;;  %v20877_v21 = vld [vmem:[#allocation401_spill] sm:$0xff] }
 0x4b7   :  { %9317 = vrot.lane.b32.xlu1 %v20868_v7, %s10649_s27  ;;  %9331 = vrot.lane.b32.xlu0 %v20871_v36, %s10649_s27  ;;  %v20879_v41 = vcombine.low %v20877_v21, %v20878_v35  ;;  %v20882_v36 = vld [vmem:[#allocation314_spill] sm:$0xff] }
 0x4b9   :  { %v16065_v48 = vpop.permute.xlu1 %9077  ;;  %v16067_v58 = vpop.permute.xlu0 %9091 }
 0x4ba   :  { %20872 = vst [vmem:[#allocation90_spill] sm:$0xff] %v16065_v48  ;;  %20873 = vst [vmem:[#allocation91_spill] sm:$0xff] %v16067_v58  ;;  %v20884_v48 = vcombine.low %v20882_v36, %v20883_v32 }
 0x4bb   :  { %9321 = vrot.lane.b32.xlu1 %v20876_v19, %s10649_s27  ;;  %9335 = vrot.lane.b32.xlu0 %v20879_v41, %s10649_s27  ;;  %v20890_v41 = vld [vmem:[#allocation349_spill] sm:$0xff] }
 0x4bd   :  { %v16077_v7 = vpop.permute.xlu1 %9081  ;;  %v16079_v62 = vpop.permute.xlu0 %9159 }
 0x4be   :  { %20880 = vst [vmem:[#allocation198_spill] sm:$0xff] %v16077_v7  ;;  %20881 = vst [vmem:[#allocation199_spill] sm:$0xff] %v16079_v62  ;;  %v20892_v7 = vcombine.low %v20890_v41, %v20891_v17  ;;  %v20902_v62 = vld [vmem:[#allocation489_spill] sm:$0xff] }
 0x4bf   :  { %9325 = vrot.lane.b32.xlu1 %v20884_v48, %s10649_s27  ;;  %9339 = vrot.lane.b32.xlu0 %v20887_v0, %s10649_s27  ;;  %v20898_v0 = vld [vmem:[#allocation383_spill] sm:$0xff] }
 0x4c1   :  { %v16089_v19 = vpop.permute.xlu1 %9085  ;;  %v16091_v60 = vpop.permute.xlu0 %9163 }
 0x4c2   :  { %20888 = vst [vmem:[#allocation121_spill] sm:$0xff] %v16089_v19  ;;  %20889 = vst [vmem:[#allocation122_spill] sm:$0xff] %v16091_v60  ;;  %v20900_v19 = vcombine.low %v20898_v0, %v20899_v29  ;;  %v20901_v60 = vld [vmem:[#allocation482_spill] sm:$0xff] }
 0x4c3   :  { %9329 = vrot.lane.b32.xlu1 %v20892_v7, %s10649_s27  ;;  %9343 = vrot.lane.b32.xlu0 %v20895_v50, %s10649_s27  ;;  %v20903_v15 = vcombine.low %v20901_v60, %v20902_v62  ;;  %v20906_v50 = vld [vmem:[#allocation413_spill] sm:$0xff] }
 0x4c5   :  { %v16101_v48 = vpop.permute.xlu1 %9089  ;;  %v16103_v1 = vpop.permute.xlu0 %9167 }
 0x4c6   :  { %20896 = vst [vmem:[#allocation230_spill] sm:$0xff] %v16101_v48  ;;  %20897 = vst [vmem:[#allocation231_spill] sm:$0xff] %v16103_v1  ;;  %v20908_v48 = vcombine.low %v20906_v50, %v20907_v39  ;;  %v20909_v1 = vcombine.high %v20787_v12, %v20788_v42  ;;  %v20919_v12 = vld [vmem:[#allocation475_spill] sm:$0xff] }
 0x4c7   :  { %9333 = vrot.lane.b32.xlu1 %v20900_v19, %s10649_s27  ;;  %9347 = vrot.lane.b32.xlu0 %v20903_v15, %s10649_s27  ;;  %v20912_v15 = vld [vmem:[#allocation445_spill] sm:$0xff] }
 0x4c9   :  { %v16113_v7 = vpop.permute.xlu1 %9093  ;;  %v16115_v58 = vpop.permute.xlu0 %9171 }
 0x4ca   :  { %20904 = vst [vmem:[#allocation153_spill] sm:$0xff] %v16113_v7  ;;  %20905 = vst [vmem:[#allocation154_spill] sm:$0xff] %v16115_v58  ;;  %v20913_v7 = vld [vmem:[#allocation446_spill] sm:$0xff]  ;;  %v20915_v58 = vcombine.high %v20793_v37, %v20794_v47  ;;  %v20924_v37 = vld [vmem:[#allocation11_spill] sm:$0xff] }
 0x4cb   :  { %9337 = vrot.lane.b32.xlu1 %v20908_v48, %s10649_s27  ;;  %9415 = vrot.lane.b32.xlu0 %v20909_v1, %s10650_s28  ;;  %v20914_v62 = vcombine.low %v20912_v15, %v20913_v7  ;;  %v20918_v1 = vld [vmem:[#allocation474_spill] sm:$0xff]  ;;  %v20925_v47 = vld [vmem:[#allocation41_spill] sm:$0xff] }
 0x4cc   :  { %v20920_v42 = vcombine.low %v20918_v1, %v20919_v12 }
 0x4cd   :  { %v16125_v19 = vpop.permute.xlu1 %9161  ;;  %v16127_v29 = vpop.permute.xlu0 %9175 }
 0x4ce   :  { %20910 = vst [vmem:[#allocation261_spill] sm:$0xff] %v16125_v19  ;;  %20911 = vst [vmem:[#allocation263_spill] sm:$0xff] %v16127_v29  ;;  %v20921_v29 = vcombine.high %v20799_v49, %v20800_v28  ;;  %v20931_v49 = vcombine.high %v20813_v10, %v20814_v55  ;;  %v20939_v10 = vcombine.high %v20829_v2, %v20830_v46 }
 0x4cf   :  { %9341 = vrot.lane.b32.xlu1 %v20914_v62, %s10649_s27  ;;  %9419 = vrot.lane.b32.xlu0 %v20915_v58, %s10650_s28  ;;  %v20926_v58 = vcombine.low %v20924_v37, %v20925_v47  ;;  %v20947_v2 = vcombine.high %v20845_v4, %v20846_v9  ;;  %v20954_v9 = vcombine.high %v20858_v34, %v20859_v53 }
 0x4d0   :  { %v20955_v4 = vcombine.high %v20861_v43, %v20862_v24  ;;  %v20962_v24 = vcombine.high %v20874_v6, %v20875_v40  ;;  %v20963_v43 = vcombine.high %v20877_v21, %v20878_v35  ;;  %v20970_v35 = vcombine.high %v20890_v41, %v20891_v17 }
 0x4d1   :  { %v16137_v48 = vpop.permute.xlu1 %9165  ;;  %v16139_v39 = vpop.permute.xlu0 %9179  ;;  %v20971_v21 = vcombine.high %v20893_v61, %v20894_v52  ;;  %v20980_v52 = vld [vmem:[#allocation23_spill] sm:$0xff]  ;;  %v20981_v61 = vld [vmem:[#allocation22_spill] sm:$0xff] }
 0x4d2   :  { %20916 = vst [vmem:[#allocation183_spill] sm:$0xff] %v16137_v48  ;;  %20917 = vst [vmem:[#allocation184_spill] sm:$0xff] %v16139_v39  ;;  %v20927_v39 = vcombine.high %v20805_v33, %v20806_v20  ;;  %v20935_v33 = vcombine.high %v20821_v30, %v20822_v54  ;;  %v20943_v30 = vcombine.high %v20837_v3, %v20838_v44 }
 0x4d3   :  { %9345 = vrot.lane.b32.xlu1 %v20920_v42, %s10649_s27  ;;  %9423 = vrot.lane.b32.xlu0 %v20921_v29, %s10650_s28  ;;  %v20930_v29 = vcombine.high %v20810_v13, %v20811_v5  ;;  %v20938_v5 = vcombine.high %v20826_v45, %v20827_v57  ;;  %v20946_v57 = vcombine.high %v20842_v8, %v20843_v27 }
 0x4d4   :  { %v20950_v44 = vcombine.high %v20850_v16, %v20851_v26  ;;  %v20951_v3 = vcombine.high %v20853_v31, %v20854_v56  ;;  %v20958_v56 = vcombine.high %v20866_v59, %v20867_v18  ;;  %v20959_v31 = vcombine.high %v20869_v11, %v20870_v23 }
 0x4d5   :  { %v16149_v62 = vpop.permute.xlu1 %9169  ;;  %v16151_v19 = vpop.permute.xlu0 %9183  ;;  %v20966_v23 = vcombine.high %v20882_v36, %v20883_v32  ;;  %v20967_v11 = vcombine.high %v20885_v51, %v20886_v14  ;;  %v20974_v51 = vld [vmem:[#allocation384_spill] sm:$0xff]  ;;  %v20976_v36 = vld [vmem:[#allocation489_spill] sm:$0xff] }
 0x4d6   :  { %20922 = vst [vmem:[#allocation293_spill] sm:$0xff] %v16149_v62  ;;  %20923 = vst [vmem:[#allocation295_spill] sm:$0xff] %v16151_v19  ;;  %v20975_v14 = vcombine.high %v20898_v0, %v20974_v51  ;;  %v21058_v62 = vld [vmem:[#allocation437_spill] sm:$0xff] }
 0x4d7   :  { %9349 = vrot.lane.b32.xlu1 %v20926_v58, %s10649_s27  ;;  %9427 = vrot.lane.b32.xlu0 %v20927_v39, %s10650_s28  ;;  %v20934_v39 = vcombine.high %v20818_v63, %v20819_v25  ;;  %v20942_v25 = vcombine.high %v20834_v22, %v20835_v38 }
 0x4d9   :  { %v16161_v42 = vpop.permute.xlu1 %9173  ;;  %v16163_v48 = vpop.permute.xlu0 %9187 }
 0x4da   :  { %20928 = vst [vmem:[#allocation214_spill] sm:$0xff] %v16161_v42  ;;  %20929 = vst [vmem:[#allocation215_spill] sm:$0xff] %v16163_v48  ;;  %v21052_v42 = vld [vmem:[#allocation220_spill] sm:$0xff] }
 0x4db   :  { %9417 = vrot.lane.b32.xlu1 %v20930_v29, %s10650_s28  ;;  %9431 = vrot.lane.b32.xlu0 %v20931_v49, %s10650_s28  ;;  %v20977_v29 = vcombine.high %v20901_v60, %v20976_v36  ;;  %v1963_v49 = vcombine.low %v20981_v61, %v20980_v52  ;;  %v20986_v60 = vld [vmem:[#allocation51_spill] sm:$0xff]  ;;  %v21008_v36 = vld [vmem:[#allocation64_spill] sm:$0xff] }
 0x4dd   :  { %v16173_v28 = vpop.permute.xlu1 %9177  ;;  %v16175_v58 = vpop.permute.xlu0 %9191 }
 0x4de   :  { %20932 = vst [vmem:[#allocation330_spill] sm:$0xff] %v16173_v28  ;;  %20933 = vst [vmem:[#allocation332_spill] sm:$0xff] %v16175_v58  ;;  %v21046_v28 = vld [vmem:[#allocation370_spill] sm:$0xff] }
 0x4df   :  { %9421 = vrot.lane.b32.xlu1 %v20934_v39, %s10650_s28  ;;  %9435 = vrot.lane.b32.xlu0 %v20935_v33, %s10650_s28  ;;  %v20982_v39 = vld [vmem:[#allocation414_spill] sm:$0xff] }
 0x4e0   :  { %v20983_v33 = vcombine.high %v20906_v50, %v20982_v39  ;;  %v21010_v39 = vld [vmem:[#allocation170_spill] sm:$0xff] }
 0x4e1   :  { %v16185_v20 = vpop.permute.xlu1 %9181  ;;  %v16187_v13 = vpop.permute.xlu0 %9195 }
 0x4e2   :  { %20936 = vst [vmem:[#allocation246_spill] sm:$0xff] %v16185_v20  ;;  %20937 = vst [vmem:[#allocation247_spill] sm:$0xff] %v16187_v13  ;;  %v21040_v20 = vld [vmem:[#allocation158_spill] sm:$0xff] }
 0x4e3   :  { %9425 = vrot.lane.b32.xlu1 %v20938_v5, %s10650_s28  ;;  %9439 = vrot.lane.b32.xlu0 %v20939_v10, %s10650_s28  ;;  %v20987_v10 = vld [vmem:[#allocation50_spill] sm:$0xff] }
 0x4e5   :  { %v16197_v55 = vpop.permute.xlu1 %9185  ;;  %v16199_v63 = vpop.permute.xlu0 %9199 }
 0x4e6   :  { %20940 = vst [vmem:[#allocation367_spill] sm:$0xff] %v16197_v55  ;;  %20941 = vst [vmem:[#allocation369_spill] sm:$0xff] %v16199_v63  ;;  %v21034_v55 = vld [vmem:[#allocation297_spill] sm:$0xff] }
 0x4e7   :  { %9429 = vrot.lane.b32.xlu1 %v20942_v25, %s10650_s28  ;;  %9443 = vrot.lane.b32.xlu0 %v20943_v30, %s10650_s28  ;;  %v2171_v25 = vcombine.low %v20987_v10, %v20986_v60  ;;  %v20988_v30 = vcombine.high %v20912_v15, %v20913_v7  ;;  %v20996_v15 = vld [vmem:[#allocation108_spill] sm:$0xff] }
 0x4e9   :  { %v16209_v54 = vpop.permute.xlu1 %9189  ;;  %v16211_v45 = vpop.permute.xlu0 %9203 }
 0x4ea   :  { %20944 = vst [vmem:[#allocation278_spill] sm:$0xff] %v16209_v54  ;;  %20945 = vst [vmem:[#allocation279_spill] sm:$0xff] %v16211_v45  ;;  %v21028_v45 = vld [vmem:[#allocation109_spill] sm:$0xff] }
 0x4eb   :  { %9433 = vrot.lane.b32.xlu1 %v20946_v57, %s10650_s28  ;;  %9447 = vrot.lane.b32.xlu0 %v20947_v2, %s10650_s28  ;;  %v20991_v2 = vld [vmem:[#allocation79_spill] sm:$0xff] }
 0x4ed   :  { %v16221_v38 = vpop.permute.xlu1 %9193  ;;  %v16223_v46 = vpop.permute.xlu0 %9207 }
 0x4ee   :  { %20948 = vst [vmem:[#allocation401_spill] sm:$0xff] %v16221_v38  ;;  %20949 = vst [vmem:[#allocation403_spill] sm:$0xff] %v16223_v46  ;;  %v21027_v38 = vld [vmem:[#allocation264_spill] sm:$0xff] }
 0x4ef   :  { %9437 = vrot.lane.b32.xlu1 %v20950_v44, %s10650_s28  ;;  %9451 = vrot.lane.b32.xlu0 %v20951_v3, %s10650_s28  ;;  %v20992_v44 = vld [vmem:[#allocation78_spill] sm:$0xff]  ;;  %v5291_v54 = vcombine.low %v21028_v45, %v21027_v38 }
 0x4f0   :  { %v2795_v3 = vcombine.low %v20992_v44, %v20991_v2 }
 0x4f1   :  { %v16233_v27 = vpop.permute.xlu1 %9197  ;;  %v16235_v22 = vpop.permute.xlu0 %9211 }
 0x4f2   :  { %20952 = vst [vmem:[#allocation314_spill] sm:$0xff] %v16233_v27  ;;  %20953 = vst [vmem:[#allocation315_spill] sm:$0xff] %v16235_v22 }
 0x4f3   :  { %9441 = vrot.lane.b32.xlu1 %v20954_v9, %s10650_s28  ;;  %9455 = vrot.lane.b32.xlu0 %v20955_v4, %s10650_s28  ;;  %v20993_v9 = vcombine.high %v20918_v1, %v20919_v12  ;;  %v21001_v12 = vld [vmem:[#allocation37_spill] sm:$0xff] }
 0x4f5   :  { %v16245_v26 = vpop.permute.xlu1 %9201  ;;  %v16247_v8 = vpop.permute.xlu0 %9215 }
 0x4f6   :  { %20956 = vst [vmem:[#allocation431_spill] sm:$0xff] %v16245_v26  ;;  %20957 = vst [vmem:[#allocation433_spill] sm:$0xff] %v16247_v8  ;;  %v21022_v8 = vld [vmem:[#allocation232_spill] sm:$0xff] }
 0x4f7   :  { %9445 = vrot.lane.b32.xlu1 %v20958_v56, %s10650_s28  ;;  %9459 = vrot.lane.b32.xlu0 %v20959_v31, %s10650_s28  ;;  %v20997_v56 = vld [vmem:[#allocation107_spill] sm:$0xff] }
 0x4f8   :  { %v3003_v31 = vcombine.low %v20997_v56, %v20996_v15 }
 0x4f9   :  { %v16257_v53 = vpop.permute.xlu1 %9205  ;;  %v16259_v16 = vpop.permute.xlu0 %9219 }
 0x4fa   :  { %20960 = vst [vmem:[#allocation349_spill] sm:$0xff] %v16257_v53  ;;  %20961 = vst [vmem:[#allocation350_spill] sm:$0xff] %v16259_v16  ;;  %v21021_v53 = vld [vmem:[#allocation233_spill] sm:$0xff] }
 0x4fb   :  { %9449 = vrot.lane.b32.xlu1 %v20962_v24, %s10650_s28  ;;  %9463 = vrot.lane.b32.xlu0 %v20963_v43, %s10650_s28  ;;  %v20998_v24 = vcombine.high %v20924_v37, %v20925_v47  ;;  %v21007_v47 = vld [vmem:[#allocation65_spill] sm:$0xff]  ;;  %v4667_v26 = vcombine.low %v21022_v8, %v21021_v53 }
 0x4fd   :  { %v16269_v18 = vpop.permute.xlu1 %9209  ;;  %v16271_v34 = vpop.permute.xlu0 %9287 }
 0x4fe   :  { %20964 = vst [vmem:[#allocation458_spill] sm:$0xff] %v16269_v18  ;;  %20965 = vst [vmem:[#allocation460_spill] sm:$0xff] %v16271_v34  ;;  %v21070_v34 = vld [vmem:[#allocation493_spill] sm:$0xff] }
 0x4ff   :  { %9453 = vrot.lane.b32.xlu1 %v20966_v23, %s10650_s28  ;;  %9467 = vrot.lane.b32.xlu0 %v20967_v11, %s10650_s28  ;;  %v21002_v23 = vld [vmem:[#allocation36_spill] sm:$0xff] }
 0x500   :  { %v2067_v11 = vcombine.low %v21002_v23, %v21001_v12 }
 0x501   :  { %v16281_v40 = vpop.permute.xlu1 %9213  ;;  %v16283_v59 = vpop.permute.xlu0 %9291 }
 0x502   :  { %20968 = vst [vmem:[#allocation383_spill] sm:$0xff] %v16281_v40  ;;  %20969 = vst [vmem:[#allocation482_spill] sm:$0xff] %v16283_v59 }
 0x503   :  { %9457 = vrot.lane.b32.xlu1 %v20970_v35, %s10650_s28  ;;  %9471 = vrot.lane.b32.xlu0 %v20971_v21, %s10650_s28  ;;  %v21003_v35 = vld [vmem:[#allocation140_spill] sm:$0xff]  ;;  %v21004_v21 = vld [vmem:[#allocation139_spill] sm:$0xff] }
 0x504   :  { %v3627_v51 = vcombine.low %v21004_v21, %v21003_v35 }
 0x505   :  { %v16293_v32 = vpop.permute.xlu1 %9217  ;;  %v16295_v6 = vpop.permute.xlu0 %9295 }
 0x506   :  { %20972 = vst [vmem:[#allocation413_spill] sm:$0xff] %v16293_v32  ;;  %20973 = vst [vmem:[#allocation445_spill] sm:$0xff] %v16295_v6 }
 0x507   :  { %9461 = vrot.lane.b32.xlu1 %v20975_v14, %s10650_s28  ;;  %9475 = vrot.lane.b32.xlu0 %v20977_v29, %s10650_s28  ;;  %v2275_v29 = vcombine.low %v21008_v36, %v21007_v47 }
 0x509   :  { %v16305_v17 = vpop.permute.xlu1 %9221  ;;  %v16307_v41 = vpop.permute.xlu0 %9299 }
 0x50a   :  { %20978 = vst [vmem:[#allocation446_spill] sm:$0xff] %v16305_v17  ;;  %20979 = vst [vmem:[#allocation474_spill] sm:$0xff] %v16307_v41  ;;  %v21064_v41 = vld [vmem:[#allocation463_spill] sm:$0xff] }
 0x50b   :  { %9465 = vrot.lane.b32.xlu1 %v20983_v33, %s10650_s28  ;;  %9543 = vrot.lane.b32.xlu0 %v1963_v49, %s10651_s29  ;;  %v21009_v49 = vld [vmem:[#allocation171_spill] sm:$0xff] }
 0x50c   :  { %v3835_v33 = vcombine.low %v21010_v39, %v21009_v49 }
 0x50d   :  { %v16316_v0 = vpop.permute.xlu1 %9289  ;;  %v16318_v5 = vpop.permute.xlu0 %9303 }
 0x50e   :  { %20984 = vst [vmem:[#allocation475_spill] sm:$0xff] %v16316_v0  ;;  %20985 = vst [vmem:[#allocation11_spill] sm:$0xff] %v16318_v5 }
 0x50f   :  { %9469 = vrot.lane.b32.xlu1 %v20988_v30, %s10650_s28  ;;  %9547 = vrot.lane.b32.xlu0 %v2171_v25, %s10651_s29 }
 0x511   :  { %v16327_v57 = vpop.permute.xlu1 %9293  ;;  %v16329_v50 = vpop.permute.xlu0 %9307 }
 0x512   :  { %20989 = vst [vmem:[#allocation41_spill] sm:$0xff] %v16327_v57  ;;  %20990 = vst [vmem:[#allocation384_spill] sm:$0xff] %v16329_v50 }
 0x513   :  { %9473 = vrot.lane.b32.xlu1 %v20993_v9, %s10650_s28  ;;  %9551 = vrot.lane.b32.xlu0 %v2795_v3, %s10651_s29  ;;  %v21013_v3 = vld [vmem:[#allocation93_spill] sm:$0xff]  ;;  %v21014_v9 = vld [vmem:[#allocation92_spill] sm:$0xff] }
 0x515   :  { %v16338_v4 = vpop.permute.xlu1 %9297  ;;  %v16340_v7 = vpop.permute.xlu0 %9311 }
 0x516   :  { %20994 = vst [vmem:[#allocation489_spill] sm:$0xff] %v16338_v4  ;;  %20995 = vst [vmem:[#allocation23_spill] sm:$0xff] %v16340_v7 }
 0x517   :  { %9477 = vrot.lane.b32.xlu1 %v20998_v24, %s10650_s28  ;;  %9555 = vrot.lane.b32.xlu0 %v3003_v31, %s10651_s29  ;;  %v2899_v31 = vcombine.low %v21014_v9, %v21013_v3  ;;  %v21015_v24 = vld [vmem:[#allocation201_spill] sm:$0xff] }
 0x519   :  { %v16349_v43 = vpop.permute.xlu1 %9301  ;;  %v16351_v1 = vpop.permute.xlu0 %9315 }
 0x51a   :  { %20999 = vst [vmem:[#allocation22_spill] sm:$0xff] %v16349_v43  ;;  %21000 = vst [vmem:[#allocation414_spill] sm:$0xff] %v16351_v1 }
 0x51b   :  { %9545 = vrot.lane.b32.xlu1 %v2067_v11, %s10651_s29  ;;  %9559 = vrot.lane.b32.xlu0 %v3627_v51, %s10651_s29  ;;  %v21016_v11 = vld [vmem:[#allocation200_spill] sm:$0xff] }
 0x51c   :  { %v4459_v51 = vcombine.low %v21016_v11, %v21015_v24 }
 0x51d   :  { %v16359_v14 = vpop.permute.xlu1 %9305  ;;  %v16361_v37 = vpop.permute.xlu0 %9319 }
 0x51e   :  { %21005 = vst [vmem:[#allocation51_spill] sm:$0xff] %v16359_v14  ;;  %21006 = vst [vmem:[#allocation50_spill] sm:$0xff] %v16361_v37 }
 0x51f   :  { %9549 = vrot.lane.b32.xlu1 %v2275_v29, %s10651_s29  ;;  %9563 = vrot.lane.b32.xlu0 %v3835_v33, %s10651_s29  ;;  %v21019_v29 = vld [vmem:[#allocation124_spill] sm:$0xff]  ;;  %v21020_v33 = vld [vmem:[#allocation123_spill] sm:$0xff] }
 0x520   :  { %v3107_v18 = vcombine.low %v21020_v33, %v21019_v29 }
 0x521   :  { %v16369_v25 = vpop.permute.xlu1 %9309  ;;  %v16371_v30 = vpop.permute.xlu0 %9323 }
 0x522   :  { %21011 = vst [vmem:[#allocation79_spill] sm:$0xff] %v16369_v25  ;;  %21012 = vst [vmem:[#allocation78_spill] sm:$0xff] %v16371_v30 }
 0x523   :  { %9553 = vrot.lane.b32.xlu1 %v2899_v31, %s10651_s29  ;;  %9567 = vrot.lane.b32.xlu0 %v4459_v51, %s10651_s29  ;;  %v21025_v31 = vld [vmem:[#allocation156_spill] sm:$0xff]  ;;  %v21026_v51 = vld [vmem:[#allocation155_spill] sm:$0xff] }
 0x524   :  { %v3731_v46 = vcombine.low %v21026_v51, %v21025_v31 }
 0x525   :  { %v16379_v32 = vpop.permute.xlu1 %9313  ;;  %v16381_v40 = vpop.permute.xlu0 %9327 }
 0x526   :  { %21017 = vst [vmem:[#allocation108_spill] sm:$0xff] %v16379_v32  ;;  %21018 = vst [vmem:[#allocation107_spill] sm:$0xff] %v16381_v40 }
 0x527   :  { %9557 = vrot.lane.b32.xlu1 %v3107_v18, %s10651_s29  ;;  %9571 = vrot.lane.b32.xlu0 %v4667_v26, %s10651_s29  ;;  %v21031_v18 = vld [vmem:[#allocation186_spill] sm:$0xff]  ;;  %v21032_v26 = vld [vmem:[#allocation185_spill] sm:$0xff] }
 0x528   :  { %v3939_v63 = vcombine.low %v21032_v26, %v21031_v18 }
 0x529   :  { %v16389_v22 = vpop.permute.xlu1 %9317  ;;  %v16391_v27 = vpop.permute.xlu0 %9331 }
 0x52a   :  { %21023 = vst [vmem:[#allocation37_spill] sm:$0xff] %v16389_v22  ;;  %21024 = vst [vmem:[#allocation36_spill] sm:$0xff] %v16391_v27  ;;  %v21033_v22 = vld [vmem:[#allocation298_spill] sm:$0xff] }
 0x52b   :  { %9561 = vrot.lane.b32.xlu1 %v3731_v46, %s10651_s29  ;;  %9575 = vrot.lane.b32.xlu0 %v5291_v54, %s10651_s29  ;;  %v5499_v27 = vcombine.low %v21034_v55, %v21033_v22  ;;  %v21037_v46 = vld [vmem:[#allocation217_spill] sm:$0xff]  ;;  %v21038_v54 = vld [vmem:[#allocation216_spill] sm:$0xff] }
 0x52c   :  { %v4563_v13 = vcombine.low %v21038_v54, %v21037_v46 }
 0x52d   :  { %v16399_v40 = vpop.permute.xlu1 %9321  ;;  %v16401_v32 = vpop.permute.xlu0 %9335 }
 0x52e   :  { %21029 = vst [vmem:[#allocation140_spill] sm:$0xff] %v16399_v40  ;;  %21030 = vst [vmem:[#allocation139_spill] sm:$0xff] %v16401_v32  ;;  %v21039_v40 = vld [vmem:[#allocation334_spill] sm:$0xff] }
 0x52f   :  { %9565 = vrot.lane.b32.xlu1 %v3939_v63, %s10651_s29  ;;  %9579 = vrot.lane.b32.xlu0 %v5499_v27, %s10651_s29  ;;  %v6123_v32 = vcombine.low %v21040_v20, %v21039_v40  ;;  %v21043_v63 = vld [vmem:[#allocation250_spill] sm:$0xff]  ;;  %v21044_v27 = vld [vmem:[#allocation249_spill] sm:$0xff] }
 0x530   :  { %v4771_v58 = vcombine.low %v21044_v27, %v21043_v63 }
 0x531   :  { %v16409_v30 = vpop.permute.xlu1 %9325  ;;  %v16411_v25 = vpop.permute.xlu0 %9339 }
 0x532   :  { %21035 = vst [vmem:[#allocation65_spill] sm:$0xff] %v16409_v30  ;;  %21036 = vst [vmem:[#allocation64_spill] sm:$0xff] %v16411_v25  ;;  %v21045_v30 = vld [vmem:[#allocation371_spill] sm:$0xff] }
 0x533   :  { %9569 = vrot.lane.b32.xlu1 %v4563_v13, %s10651_s29  ;;  %9583 = vrot.lane.b32.xlu0 %v6123_v32, %s10651_s29  ;;  %v6331_v25 = vcombine.low %v21046_v28, %v21045_v30  ;;  %v21049_v13 = vld [vmem:[#allocation282_spill] sm:$0xff]  ;;  %v21050_v32 = vld [vmem:[#allocation280_spill] sm:$0xff] }
 0x534   :  { %v5395_v48 = vcombine.low %v21050_v32, %v21049_v13 }
 0x535   :  { %v16419_v37 = vpop.permute.xlu1 %9329  ;;  %v16421_v14 = vpop.permute.xlu0 %9343 }
 0x536   :  { %21041 = vst [vmem:[#allocation171_spill] sm:$0xff] %v16419_v37  ;;  %21042 = vst [vmem:[#allocation170_spill] sm:$0xff] %v16421_v14  ;;  %v21051_v37 = vld [vmem:[#allocation404_spill] sm:$0xff] }
 0x537   :  { %9573 = vrot.lane.b32.xlu1 %v4771_v58, %s10651_s29  ;;  %9587 = vrot.lane.b32.xlu0 %v6331_v25, %s10651_s29  ;;  %v6955_v14 = vcombine.low %v21052_v42, %v21051_v37  ;;  %v21055_v58 = vld [vmem:[#allocation318_spill] sm:$0xff]  ;;  %v21056_v25 = vld [vmem:[#allocation316_spill] sm:$0xff] }
 0x538   :  { %v5603_v19 = vcombine.low %v21056_v25, %v21055_v58 }
 0x539   :  { %v16429_v1 = vpop.permute.xlu1 %9333  ;;  %v16431_v43 = vpop.permute.xlu0 %9347 }
 0x53a   :  { %21047 = vst [vmem:[#allocation93_spill] sm:$0xff] %v16429_v1  ;;  %21048 = vst [vmem:[#allocation92_spill] sm:$0xff] %v16431_v43  ;;  %v21057_v1 = vld [vmem:[#allocation438_spill] sm:$0xff] }
 0x53b   :  { %9577 = vrot.lane.b32.xlu1 %v5395_v48, %s10651_s29  ;;  %9591 = vrot.lane.b32.xlu0 %v6955_v14, %s10651_s29  ;;  %v7163_v50 = vcombine.low %v21058_v62, %v21057_v1  ;;  %v21061_v48 = vld [vmem:[#allocation353_spill] sm:$0xff]  ;;  %v21062_v14 = vld [vmem:[#allocation352_spill] sm:$0xff] }
 0x53c   :  { %v6227_v0 = vcombine.low %v21062_v14, %v21061_v48 }
 0x53d   :  { %v16439_v7 = vpop.permute.xlu1 %9337  ;;  %v16441_v4 = vpop.permute.xlu0 %9415 }
 0x53e   :  { %21053 = vst [vmem:[#allocation201_spill] sm:$0xff] %v16439_v7  ;;  %21054 = vst [vmem:[#allocation200_spill] sm:$0xff] %v16441_v4  ;;  %v21063_v7 = vld [vmem:[#allocation466_spill] sm:$0xff] }
 0x53f   :  { %9581 = vrot.lane.b32.xlu1 %v5603_v19, %s10651_s29  ;;  %9595 = vrot.lane.b32.xlu0 %v7163_v50, %s10651_s29  ;;  %v7787_v17 = vcombine.low %v21064_v41, %v21063_v7  ;;  %v21067_v19 = vld [vmem:[#allocation387_spill] sm:$0xff]  ;;  %v21068_v50 = vld [vmem:[#allocation386_spill] sm:$0xff] }
 0x540   :  { %v6435_v4 = vcombine.low %v21068_v50, %v21067_v19 }
 0x541   :  { %v16449_v57 = vpop.permute.xlu1 %9341  ;;  %v16451_v5 = vpop.permute.xlu0 %9419 }
 0x542   :  { %21059 = vst [vmem:[#allocation124_spill] sm:$0xff] %v16449_v57  ;;  %21060 = vst [vmem:[#allocation123_spill] sm:$0xff] %v16451_v5  ;;  %v21069_v57 = vld [vmem:[#allocation494_spill] sm:$0xff] }
 0x543   :  { %9585 = vrot.lane.b32.xlu1 %v6227_v0, %s10651_s29  ;;  %9599 = vrot.lane.b32.xlu0 %v7787_v17, %s10651_s29  ;;  %v7995_v5 = vcombine.low %v21070_v34, %v21069_v57  ;;  %v21073_v0 = vld [vmem:[#allocation419_spill] sm:$0xff] }
 0x544   :  { %v21074_v17 = vld [vmem:[#allocation415_spill] sm:$0xff] }
 0x545   :  { %v16459_v6 = vpop.permute.xlu1 %9345  ;;  %v16461_v59 = vpop.permute.xlu0 %9423  ;;  %v7059_v7 = vcombine.low %v21074_v17, %v21073_v0  ;;  %v21079_v57 = vld [vmem:[#allocation439_spill] sm:$0xff] }
 0x546   :  { %21065 = vst [vmem:[#allocation233_spill] sm:$0xff] %v16459_v6  ;;  %21066 = vst [vmem:[#allocation232_spill] sm:$0xff] %v16461_v59  ;;  %v21075_v6 = vcombine.high %v20981_v61, %v20980_v52  ;;  %v21083_v52 = vld [vmem:[#allocation467_spill] sm:$0xff] }
 0x547   :  { %9589 = vrot.lane.b32.xlu1 %v6435_v4, %s10651_s29  ;;  %9603 = vrot.lane.b32.xlu0 %v7995_v5, %s10651_s29  ;;  %v21078_v5 = vld [vmem:[#allocation435_spill] sm:$0xff] }
 0x549   :  { %v16469_v43 = vpop.permute.xlu1 %9349  ;;  %v16471_v16 = vpop.permute.xlu0 %9427 }
 0x54a   :  { %21071 = vst [vmem:[#allocation156_spill] sm:$0xff] %v16469_v43  ;;  %21072 = vst [vmem:[#allocation155_spill] sm:$0xff] %v16471_v16  ;;  %v7267_v43 = vcombine.low %v21079_v57, %v21078_v5  ;;  %v21080_v16 = vcombine.high %v20987_v10, %v20986_v60  ;;  %v21086_v60 = vld [vmem:[#allocation258_spill] sm:$0xff] }
 0x54b   :  { %9593 = vrot.lane.b32.xlu1 %v7059_v7, %s10651_s29  ;;  %9671 = vrot.lane.b32.xlu0 %v21075_v6, %s10652_s30  ;;  %v21084_v6 = vld [vmem:[#allocation449_spill] sm:$0xff] }
 0x54c   :  { %v7891_v61 = vcombine.low %v21084_v6, %v21083_v52 }
 0x54d   :  { %v16480_v59 = vpop.permute.xlu1 %9417  ;;  %v16482_v4 = vpop.permute.xlu0 %9431 }
 0x54e   :  { %21076 = vst [vmem:[#allocation264_spill] sm:$0xff] %v16480_v59  ;;  %21077 = vst [vmem:[#allocation109_spill] sm:$0xff] %v16482_v4  ;;  %v21085_v4 = vcombine.high %v20992_v44, %v20991_v2  ;;  %v21091_v2 = vcombine.high %v21002_v23, %v21001_v12  ;;  %v21092_v44 = vcombine.high %v21004_v21, %v21003_v35 }
 0x54f   :  { %9597 = vrot.lane.b32.xlu1 %v7267_v43, %s10651_s29  ;;  %9675 = vrot.lane.b32.xlu0 %v21080_v16, %s10652_s30  ;;  %v21087_v16 = vld [vmem:[#allocation148_spill] sm:$0xff]  ;;  %v21099_v35 = vcombine.high %v21014_v9, %v21013_v3  ;;  %v21100_v21 = vcombine.high %v21016_v11, %v21015_v24  ;;  %v21107_v24 = vcombine.high %v21026_v51, %v21025_v31 }
 0x550   :  { %v8099_v10 = vcombine.low %v21087_v16, %v21086_v60  ;;  %v21108_v11 = vcombine.high %v21028_v45, %v21027_v38  ;;  %v21115_v45 = vcombine.high %v21038_v54, %v21037_v46  ;;  %v21116_v38 = vcombine.high %v21040_v20, %v21039_v40 }
 0x551   :  { %v16491_v7 = vpop.permute.xlu1 %9421  ;;  %v16493_v0 = vpop.permute.xlu0 %9435  ;;  %v21122_v20 = vcombine.high %v21050_v32, %v21049_v13  ;;  %v21123_v40 = vcombine.high %v21052_v42, %v21051_v37  ;;  %v21128_v42 = vcombine.high %v21062_v14, %v21061_v48  ;;  %v21129_v37 = vld [vmem:[#allocation466_spill] sm:$0xff] }
 0x552   :  { %21081 = vst [vmem:[#allocation186_spill] sm:$0xff] %v16491_v7  ;;  %21082 = vst [vmem:[#allocation185_spill] sm:$0xff] %v16493_v0  ;;  %v21088_v0 = vcombine.high %v20997_v56, %v20996_v15  ;;  %v21095_v15 = vcombine.high %v21008_v36, %v21007_v47  ;;  %v21096_v56 = vcombine.high %v21010_v39, %v21009_v49 }
 0x553   :  { %9601 = vrot.lane.b32.xlu1 %v7891_v61, %s10651_s29  ;;  %9679 = vrot.lane.b32.xlu0 %v21085_v4, %s10652_s30  ;;  %v21103_v49 = vcombine.high %v21020_v33, %v21019_v29  ;;  %v21104_v39 = vcombine.high %v21022_v8, %v21021_v53  ;;  %v21111_v8 = vcombine.high %v21032_v26, %v21031_v18 }
 0x554   :  { %v21112_v53 = vcombine.high %v21034_v55, %v21033_v22  ;;  %v21119_v55 = vcombine.high %v21044_v27, %v21043_v63  ;;  %v21120_v22 = vcombine.high %v21046_v28, %v21045_v30  ;;  %v21125_v28 = vcombine.high %v21056_v25, %v21055_v58 }
 0x555   :  { %v16502_v43 = vpop.permute.xlu1 %9425  ;;  %v16504_v59 = vpop.permute.xlu0 %9439  ;;  %v21126_v30 = vcombine.high %v21058_v62, %v21057_v1  ;;  %v21132_v62 = vcombine.high %v21068_v50, %v21067_v19  ;;  %v21133_v1 = vld [vmem:[#allocation494_spill] sm:$0xff] }
 0x557   :  { %9605 = vrot.lane.b32.xlu1 %v8099_v10, %s10651_s29  ;;  %9683 = vrot.lane.b32.xlu0 %v21088_v0, %s10652_s30  ;;  %v21130_v0 = vcombine.high %v21064_v41, %v21129_v37  ;;  %v21135_v41 = vld [vmem:[#allocation419_spill] sm:$0xff] }
 0x559   :  { %v16513_v61 = vpop.permute.xlu1 %9429  ;;  %v16515_v7 = vpop.permute.xlu0 %9443 }
 0x55a   :  { %21089 = vst [vmem:[#allocation298_spill] sm:$0xff] %v16513_v61  ;;  %21090 = vst [vmem:[#allocation297_spill] sm:$0xff] %v16515_v7  ;;  %v21261_v7 = vld [vmem:[#allocation325_spill] sm:$0xff]  ;;  %v21263_v61 = vld [vmem:[#allocation442_spill] sm:$0xff] }
 0x55b   :  { %9673 = vrot.lane.b32.xlu1 %v21091_v2, %s10652_s30  ;;  %9687 = vrot.lane.b32.xlu0 %v21092_v44, %s10652_s30  ;;  %v21134_v2 = vcombine.high %v21070_v34, %v21133_v1  ;;  %v21136_v44 = vcombine.high %v21074_v17, %v21135_v41  ;;  %v21140_v34 = vcombine.high %v21079_v57, %v21078_v5  ;;  %v21142_v17 = vld [vmem:[#allocation267_spill] sm:$0xff]  ;;  %v21158_v1 = vld [vmem:[#allocation40_spill] sm:$0xff] }
 0x55c   :  { %v21152_v5 = vld [vmem:[#allocation55_spill] sm:$0xff] }
 0x55d   :  { %v16525_v4 = vpop.permute.xlu1 %9433  ;;  %v16527_v10 = vpop.permute.xlu0 %9447 }
 0x55e   :  { %21093 = vst [vmem:[#allocation217_spill] sm:$0xff] %v16525_v4  ;;  %21094 = vst [vmem:[#allocation216_spill] sm:$0xff] %v16527_v10 }
 0x55f   :  { %9677 = vrot.lane.b32.xlu1 %v21095_v15, %s10652_s30  ;;  %9691 = vrot.lane.b32.xlu0 %v21096_v56, %s10652_s30  ;;  %v21137_v15 = vld [vmem:[#allocation187_spill] sm:$0xff] }
 0x560   :  { %v21138_v56 = vld [vmem:[#allocation251_spill] sm:$0xff] }
 0x561   :  { %v16537_v12 = vpop.permute.xlu1 %9437  ;;  %v16539_v23 = vpop.permute.xlu0 %9451  ;;  %v21139_v19 = vcombine.low %v21137_v15, %v21138_v56 }
 0x562   :  { %21097 = vst [vmem:[#allocation334_spill] sm:$0xff] %v16537_v12  ;;  %21098 = vst [vmem:[#allocation158_spill] sm:$0xff] %v16539_v23 }
 0x563   :  { %9681 = vrot.lane.b32.xlu1 %v21099_v35, %s10652_s30  ;;  %9695 = vrot.lane.b32.xlu0 %v21100_v21, %s10652_s30  ;;  %v21141_v21 = vld [vmem:[#allocation266_spill] sm:$0xff] }
 0x565   :  { %v16549_v47 = vpop.permute.xlu1 %9441  ;;  %v16551_v36 = vpop.permute.xlu0 %9455 }
 0x566   :  { %21101 = vst [vmem:[#allocation250_spill] sm:$0xff] %v16549_v47  ;;  %21102 = vst [vmem:[#allocation249_spill] sm:$0xff] %v16551_v36  ;;  %v21231_v36 = vld [vmem:[#allocation342_spill] sm:$0xff] }
 0x567   :  { %9685 = vrot.lane.b32.xlu1 %v21103_v49, %s10652_s30  ;;  %9699 = vrot.lane.b32.xlu0 %v21104_v39, %s10652_s30  ;;  %v21143_v49 = vcombine.low %v21141_v21, %v21142_v17  ;;  %v21144_v39 = vld [vmem:[#allocation160_spill] sm:$0xff] }
 0x569   :  { %v16561_v3 = vpop.permute.xlu1 %9445  ;;  %v16563_v9 = vpop.permute.xlu0 %9459 }
 0x56a   :  { %21105 = vst [vmem:[#allocation371_spill] sm:$0xff] %v16561_v3  ;;  %21106 = vst [vmem:[#allocation370_spill] sm:$0xff] %v16563_v9  ;;  %v21229_v9 = vld [vmem:[#allocation377_spill] sm:$0xff] }
 0x56b   :  { %9689 = vrot.lane.b32.xlu1 %v21107_v24, %s10652_s30  ;;  %9703 = vrot.lane.b32.xlu0 %v21108_v11, %s10652_s30  ;;  %v21145_v24 = vld [vmem:[#allocation24_spill] sm:$0xff]  ;;  %v21146_v11 = vld [vmem:[#allocation26_spill] sm:$0xff]  ;;  %v21230_v3 = vld [vmem:[#allocation341_spill] sm:$0xff] }
 0x56c   :  { %v21232_v47 = vcombine.low %v21230_v3, %v21231_v36  ;;  %v21246_v3 = vld [vmem:[#allocation299_spill] sm:$0xff] }
 0x56d   :  { %v16573_v29 = vpop.permute.xlu1 %9449  ;;  %v16575_v33 = vpop.permute.xlu0 %9463 }
 0x56e   :  { %21109 = vst [vmem:[#allocation282_spill] sm:$0xff] %v16573_v29  ;;  %21110 = vst [vmem:[#allocation280_spill] sm:$0xff] %v16575_v33  ;;  %v21221_v33 = vld [vmem:[#allocation343_spill] sm:$0xff]  ;;  %v21225_v29 = vld [vmem:[#allocation208_spill] sm:$0xff] }
 0x56f   :  { %9693 = vrot.lane.b32.xlu1 %v21111_v8, %s10652_s30  ;;  %9707 = vrot.lane.b32.xlu0 %v21112_v53, %s10652_s30  ;;  %v21147_v8 = vcombine.low %v21145_v24, %v21146_v11  ;;  %v21164_v24 = vld [vmem:[#allocation335_spill] sm:$0xff]  ;;  %v21165_v11 = vld [vmem:[#allocation66_spill] sm:$0xff] }
 0x571   :  { %v16585_v31 = vpop.permute.xlu1 %9453  ;;  %v16587_v51 = vpop.permute.xlu0 %9467  ;;  %v10025_v53 = vsel %vm10023_vm0, %v21147_v8, %v21144_v39  ;;  %v21166_v8 = vld [vmem:[#allocation68_spill] sm:$0xff] }
 0x572   :  { %21113 = vst [vmem:[#allocation404_spill] sm:$0xff] %v16585_v31  ;;  %21114 = vst [vmem:[#allocation220_spill] sm:$0xff] %v16587_v51 }
 0x573   :  { %9697 = vrot.lane.b32.xlu1 %v21115_v45, %s10652_s30  ;;  %9711 = vrot.lane.b32.xlu0 %v21116_v38, %s10652_s30  ;;  %v21148_v45 = vld [vmem:[#allocation25_spill] sm:$0xff]  ;;  %v21149_v38 = vld [vmem:[#allocation10_spill] sm:$0xff] }
 0x575   :  { %v16597_v18 = vpop.permute.xlu1 %9457  ;;  %v16599_v26 = vpop.permute.xlu0 %9471 }
 0x576   :  { %21117 = vst [vmem:[#allocation318_spill] sm:$0xff] %v16597_v18  ;;  %21118 = vst [vmem:[#allocation316_spill] sm:$0xff] %v16599_v26 }
 0x577   :  { %9701 = vrot.lane.b32.xlu1 %v21119_v55, %s10652_s30  ;;  %9715 = vrot.lane.b32.xlu0 %v21120_v22, %s10652_s30  ;;  %v21150_v55 = vld [vmem:[#allocation12_spill] sm:$0xff] }
 0x578   :  { %v21151_v22 = vcombine.low %v21149_v38, %v21150_v55  ;;  %v21168_v55 = vld [vmem:[#allocation222_spill] sm:$0xff] }
 0x579   :  { %v16609_v46 = vpop.permute.xlu1 %9461  ;;  %v16611_v54 = vpop.permute.xlu0 %9475 }
 0x57a   :  { %21121 = vst [vmem:[#allocation438_spill] sm:$0xff] %v16609_v46 }
 0x57b   :  { %9705 = vrot.lane.b32.xlu1 %v21122_v20, %s10652_s30  ;;  %9719 = vrot.lane.b32.xlu0 %v21123_v40, %s10652_s30  ;;  %v10024_v20 = vsel %vm10023_vm0, %v21151_v22, %v21148_v45  ;;  %v21167_v45 = vcombine.low %v21165_v11, %v21166_v8  ;;  %v21169_v22 = vld [vmem:[#allocation110_spill] sm:$0xff]  ;;  %v21181_v8 = vld [vmem:[#allocation283_spill] sm:$0xff] }
 0x57d   :  { %v16621_v63 = vpop.permute.xlu1 %9465  ;;  %v16623_v27 = vpop.permute.xlu0 %9543  ;;  %v10028_v38 = vsel %vm10023_vm0, %v21167_v45, %v21164_v24  ;;  %v21180_v24 = vcombine.high %v21084_v6, %v21083_v52  ;;  %v21182_v45 = vld [vmem:[#allocation284_spill] sm:$0xff]  ;;  %v21193_v52 = vld [vmem:[#allocation162_spill] sm:$0xff]  ;;  %v21194_v6 = vld [vmem:[#allocation159_spill] sm:$0xff] }
 0x57e   :  { %21124 = vst [vmem:[#allocation437_spill] sm:$0xff] %v16621_v63  ;;  %v21198_v63 = vld [vmem:[#allocation205_spill] sm:$0xff] }
 0x57f   :  { %9709 = vrot.lane.b32.xlu1 %v21125_v28, %s10652_s30  ;;  %9723 = vrot.lane.b32.xlu0 %v21126_v30, %s10652_s30  ;;  %v21153_v28 = vld [vmem:[#allocation52_spill] sm:$0xff]  ;;  %v21154_v30 = vld [vmem:[#allocation54_spill] sm:$0xff] }
 0x581   :  { %v16633_v13 = vpop.permute.xlu1 %9469  ;;  %v16635_v32 = vpop.permute.xlu0 %9547 }
 0x582   :  { %21127 = vst [vmem:[#allocation353_spill] sm:$0xff] %v16633_v13  ;;  %v21196_v13 = vld [vmem:[#allocation177_spill] sm:$0xff] }
 0x583   :  { %9713 = vrot.lane.b32.xlu1 %v21128_v42, %s10652_s30  ;;  %9727 = vrot.lane.b32.xlu0 %v21130_v0, %s10652_s30  ;;  %v21155_v42 = vcombine.low %v21153_v28, %v21154_v30  ;;  %v21156_v0 = vld [vmem:[#allocation27_spill] sm:$0xff] }
 0x585   :  { %v16645_v58 = vpop.permute.xlu1 %9473  ;;  %v16647_v25 = vpop.permute.xlu0 %9551  ;;  %v10027_v37 = vsel %vm10023_vm0, %v21155_v42, %v21152_v5  ;;  %v21170_v5 = vld [vmem:[#allocation112_spill] sm:$0xff]  ;;  %v21172_v42 = vld [vmem:[#allocation53_spill] sm:$0xff] }
 0x586   :  { %21131 = vst [vmem:[#allocation352_spill] sm:$0xff] %v16645_v58  ;;  %v21171_v28 = vcombine.low %v21169_v22, %v21170_v5  ;;  %v21184_v22 = vld [vmem:[#allocation188_spill] sm:$0xff]  ;;  %v21185_v5 = vld [vmem:[#allocation131_spill] sm:$0xff] }
 0x587   :  { %9717 = vrot.lane.b32.xlu1 %v21132_v62, %s10652_s30  ;;  %9731 = vrot.lane.b32.xlu0 %v21134_v2, %s10652_s30  ;;  %v21157_v62 = vld [vmem:[#allocation38_spill] sm:$0xff] }
 0x588   :  { %v21159_v2 = vcombine.low %v21157_v62, %v21158_v1  ;;  %v10031_v30 = vsel %vm10023_vm0, %v21171_v28, %v21168_v55  ;;  %v21174_v62 = vld [vmem:[#allocation97_spill] sm:$0xff]  ;;  %v21183_v55 = vcombine.low %v21181_v8, %v21182_v45  ;;  %v21186_v28 = vld [vmem:[#allocation128_spill] sm:$0xff] }
 0x589   :  { %v16657_v48 = vpop.permute.xlu1 %9477  ;;  %v16659_v14 = vpop.permute.xlu0 %9555 }
 0x58a   :  { %v10026_v41 = vsel %vm10023_vm0, %v21159_v2, %v21156_v0  ;;  %v21173_v0 = vld [vmem:[#allocation95_spill] sm:$0xff] }
 0x58b   :  { %9721 = vrot.lane.b32.xlu1 %v21136_v44, %s10652_s30  ;;  %9799 = vrot.lane.b32.xlu0 %v21139_v19, %s10653_s2  ;;  %v21160_v44 = vld [vmem:[#allocation190_spill] sm:$0xff]  ;;  %v21161_v19 = vld [vmem:[#allocation80_spill] sm:$0xff]  ;;  %v21175_v1 = vcombine.low %v21173_v0, %v21174_v62  ;;  %v21188_v62 = vld [vmem:[#allocation351_spill] sm:$0xff] }
 0x58d   :  { %v16669_v50 = vpop.permute.xlu1 %9545  ;;  %v16671_v35 = vpop.permute.xlu0 %9559  ;;  %v10030_v2 = vsel %vm10023_vm0, %v21175_v1, %v21172_v42  ;;  %v21187_v42 = vcombine.low %v21185_v5, %v21186_v28  ;;  %v21189_v1 = vld [vmem:[#allocation172_spill] sm:$0xff]  ;;  %v21200_v28 = vld [vmem:[#allocation115_spill] sm:$0xff] }
 0x58f   :  { %9725 = vrot.lane.b32.xlu1 %v21140_v34, %s10652_s30  ;;  %9803 = vrot.lane.b32.xlu0 %v21143_v49, %s10653_s2  ;;  %v21162_v34 = vld [vmem:[#allocation82_spill] sm:$0xff]  ;;  %v10032_v0 = vsel %vm10023_vm0, %v21187_v42, %v21184_v22  ;;  %v21201_v22 = vld [vmem:[#allocation192_spill] sm:$0xff]  ;;  %v21202_v42 = vld [vmem:[#allocation189_spill] sm:$0xff] }
 0x590   :  { %v21163_v49 = vcombine.low %v21161_v19, %v21162_v34  ;;  %v21176_v19 = vld [vmem:[#allocation113_spill] sm:$0xff]  ;;  %v21178_v34 = vld [vmem:[#allocation144_spill] sm:$0xff]  ;;  %v21203_v26 = vcombine.low %v21201_v22, %v21202_v42 }
 0x591   :  { %v16691_v40 = vpop.permute.xlu1 %9549  ;;  %v16693_v57 = vpop.permute.xlu0 %9563 }
 0x592   :  { %v10029_v39 = vsel %vm10023_vm0, %v21163_v49, %v21160_v44  ;;  %v21177_v44 = vld [vmem:[#allocation142_spill] sm:$0xff] }
 0x593   :  { %v21179_v49 = vcombine.low %v21177_v44, %v21178_v34  ;;  %9729 = vrot.lane.b32.xlu1 %v21180_v24, %s10652_s30  ;;  %9807 = vrot.lane.b32.xlu0 %v21183_v55, %s10653_s2  ;;  %v21195_v24 = vcombine.low %v21193_v52, %v21194_v6  ;;  %v21197_v55 = vld [vmem:[#allocation203_spill] sm:$0xff]  ;;  %v21208_v6 = vld [vmem:[#allocation256_spill] sm:$0xff] }
 0x594   :  { %v21199_v46 = vcombine.low %v21197_v55, %v21198_v63  ;;  %v21212_v55 = vld [vmem:[#allocation373_spill] sm:$0xff] }
 0x595   :  { %v10033_v11 = vsel %vm10023_vm0, %v21179_v49, %v21176_v19  ;;  %v21190_v19 = vld [vmem:[#allocation174_spill] sm:$0xff]  ;;  %v21192_v49 = vld [vmem:[#allocation81_spill] sm:$0xff]  ;;  %v16778_v42 = vpop.permute.xlu1 %9553 }
 0x596   :  { %v21191_v44 = vcombine.low %v21189_v1, %v21190_v19  ;;  %v10034_v58 = vsel %vm10023_vm0, %v21195_v24, %v21192_v49  ;;  %v10037_v5 = vsel %vm10023_vm0, %v21199_v46, %v21196_v13  ;;  %v10036_v1 = vsel %vm10023_vm0, %v21203_v26, %v21200_v28  ;;  %v21204_v19 = vld [vmem:[#allocation240_spill] sm:$0xff]  ;;  %v21210_v24 = vld [vmem:[#allocation221_spill] sm:$0xff]  ;;  %v21213_v46 = vld [vmem:[#allocation271_spill] sm:$0xff]  ;;  %v16780_v26 = vpop.permute.xlu0 %9567 }
 0x597   :  { %v21209_v49 = vld [vmem:[#allocation224_spill] sm:$0xff]  ;;  %21216 = vst [vmem:[#allocation463_spill] sm:$0xff] %v16780_v26  ;;  %v21217_v28 = vld [vmem:[#allocation359_spill] sm:$0xff] }
 0x598   :  { %v10035_v34 = vsel %vm10023_vm0, %v21191_v44, %v21188_v62  ;;  %v21205_v62 = vld [vmem:[#allocation235_spill] sm:$0xff]  ;;  %v21206_v44 = vld [vmem:[#allocation237_spill] sm:$0xff]  ;;  %v21211_v51 = vcombine.low %v21209_v49, %v21210_v24  ;;  %v21214_v13 = vld [vmem:[#allocation272_spill] sm:$0xff] }
 0x599   :  { %v21207_v18 = vcombine.low %v21205_v62, %v21206_v44  ;;  %v21215_v31 = vcombine.low %v21213_v46, %v21214_v13  ;;  %v21218_v62 = vld [vmem:[#allocation259_spill] sm:$0xff]  ;;  %v21223_v24 = vld [vmem:[#allocation308_spill] sm:$0xff] }
 0x59a   :  { %v10038_v63 = vsel %vm10023_vm0, %v21211_v51, %v21208_v6  ;;  %v21219_v44 = vld [vmem:[#allocation255_spill] sm:$0xff]  ;;  %v21226_v46 = vld [vmem:[#allocation292_spill] sm:$0xff] }
 0x59b   :  { %v10039_v52 = vsel %vm10023_vm0, %v21207_v18, %v21204_v19  ;;  %v10041_v22 = vsel %vm10023_vm0, %v21215_v31, %v21212_v55  ;;  %v21220_v18 = vcombine.low %v21218_v62, %v21219_v44  ;;  %v21222_v49 = vld [vmem:[#allocation307_spill] sm:$0xff]  ;;  %v21227_v13 = vld [vmem:[#allocation288_spill] sm:$0xff]  ;;  %v10045_v62 = vsel %vm10023_vm0, %v21232_v47, %v21229_v9  ;;  %v21233_v44 = vld [vmem:[#allocation238_spill] sm:$0xff] }
 0x59c   :  { %v21224_v51 = vcombine.low %v21222_v49, %v21223_v24  ;;  %v21228_v31 = vcombine.low %v21226_v46, %v21227_v13  ;;  %v21237_v24 = vld [vmem:[#allocation290_spill] sm:$0xff]  ;;  %v21241_v13 = vld [vmem:[#allocation345_spill] sm:$0xff]  ;;  %v21245_v47 = vcombine.high %v21087_v16, %v21086_v60  ;;  %v21259_v16 = vld [vmem:[#allocation428_spill] sm:$0xff] }
 0x59d   :  { %v10040_v19 = vsel %vm10023_vm0, %v21220_v18, %v21217_v28  ;;  %v21234_v28 = vld [vmem:[#allocation328_spill] sm:$0xff]  ;;  %v21258_v60 = vld [vmem:[#allocation430_spill] sm:$0xff] }
 0x59e   :  { %v10043_v6 = vsel %vm10023_vm0, %v21224_v51, %v21221_v33  ;;  %v10042_v55 = vsel %vm10023_vm0, %v21228_v31, %v21225_v29  ;;  %v21235_v18 = vld [vmem:[#allocation324_spill] sm:$0xff]  ;;  %v21238_v33 = vld [vmem:[#allocation375_spill] sm:$0xff]  ;;  %v21242_v29 = vld [vmem:[#allocation365_spill] sm:$0xff]  ;;  %9733 = vrot.lane.b32.xlu1 %v21245_v47, %s10652_s30  ;;  %v21260_v47 = vcombine.low %v21258_v60, %v21259_v16 }
 0x59f   :  { %v21236_v23 = vcombine.low %v21234_v28, %v21235_v18  ;;  %v21239_v51 = vld [vmem:[#allocation376_spill] sm:$0xff]  ;;  %v21243_v31 = vld [vmem:[#allocation361_spill] sm:$0xff]  ;;  %v21250_v28 = vld [vmem:[#allocation407_spill] sm:$0xff] }
 0x5a0   :  { %v21240_v12 = vcombine.low %v21238_v33, %v21239_v51  ;;  %v21244_v10 = vcombine.low %v21242_v29, %v21243_v31  ;;  %v21251_v18 = vld [vmem:[#allocation408_spill] sm:$0xff]  ;;  %v21253_v33 = vld [vmem:[#allocation379_spill] sm:$0xff]  ;;  %v21257_v31 = vld [vmem:[#allocation385_spill] sm:$0xff] }
 0x5a1   :  { %v10044_v49 = vsel %vm10023_vm0, %v21236_v23, %v21233_v44  ;;  %v21247_v23 = vld [vmem:[#allocation300_spill] sm:$0xff]  ;;  %v21249_v44 = vld [vmem:[#allocation427_spill] sm:$0xff]  ;;  %v10050_v4 = vsel %vm10023_vm0, %v21260_v47, %v21257_v31  ;;  %v21275_v47 = vld [vmem:[#allocation326_spill] sm:$0xff] }
 0x5a2   :  { %v10047_v46 = vsel %vm10023_vm0, %v21240_v12, %v21237_v24  ;;  %v10046_v36 = vsel %vm10023_vm0, %v21244_v10, %v21241_v13  ;;  %v21248_v9 = vcombine.low %v21246_v3, %v21247_v23  ;;  %v21252_v12 = vcombine.low %v21250_v28, %v21251_v18  ;;  %v21254_v51 = vld [vmem:[#allocation399_spill] sm:$0xff]  ;;  %v21267_v18 = vld [vmem:[#allocation450_spill] sm:$0xff] }
 0x5a3   :  { %v21255_v29 = vld [vmem:[#allocation395_spill] sm:$0xff] }
 0x5a4   :  { %9811 = vrot.lane.b32.xlu0 %v21248_v9, %s10653_s2  ;;  %v10049_v24 = vsel %vm10023_vm0, %v21252_v12, %v21249_v44  ;;  %v21256_v10 = vcombine.low %v21254_v51, %v21255_v29  ;;  %v21262_v9 = vld [vmem:[#allocation440_spill] sm:$0xff]  ;;  %v21268_v12 = vld [vmem:[#allocation455_spill] sm:$0xff] }
 0x5a5   :  { %v21264_v23 = vcombine.low %v21262_v9, %v21263_v61  ;;  %v21266_v44 = vld [vmem:[#allocation416_spill] sm:$0xff]  ;;  %v21269_v3 = vcombine.low %v21267_v18, %v21268_v12  ;;  %v21271_v29 = vld [vmem:[#allocation483_spill] sm:$0xff]  ;;  %v10059_v61 = vsel %vm10056_vm1, %v10026_v41, %v21275_v47  ;;  %v21286_v47 = vld [vmem:[#allocation273_spill] sm:$0xff] }
 0x5a6   :  { %v10048_v13 = vsel %vm10023_vm0, %v21256_v10, %v21253_v33  ;;  %v21270_v33 = vld [vmem:[#allocation175_spill] sm:$0xff]  ;;  %v21272_v10 = vld [vmem:[#allocation486_spill] sm:$0xff]  ;;  %v21278_v9 = vld [vmem:[#allocation8_spill] sm:$0xff] }
 0x5a7   :  { %v16845_v28 = vsel %vm10023_vm0, %v21264_v23, %v21261_v7  ;;  %v10052_v51 = vsel %vm10023_vm0, %v21269_v3, %v21266_v44  ;;  %v21273_v26 = vcombine.low %v21271_v29, %v21272_v10  ;;  %v21274_v31 = vld [vmem:[#allocation423_spill] sm:$0xff]  ;;  %v16861_v7 = vpop.permute.xlu1 %9557  ;;  %v16863_v23 = vpop.permute.xlu0 %9571  ;;  %v10061_v18 = vsel %vm10056_vm1, %v10028_v38, %v21278_v9  ;;  %v21279_v3 = vld [vmem:[#allocation362_spill] sm:$0xff]  ;;  %v21280_v44 = vld [vmem:[#allocation317_spill] sm:$0xff] }
 0x5a8   :  { %21265 = vst [vmem:[#allocation387_spill] sm:$0xff] %v16845_v28  ;;  %v10057_v16 = vsel %vm10056_vm1, %v10024_v20, %v21274_v31  ;;  %21276 = vst [vmem:[#allocation386_spill] sm:$0xff] %v16861_v7  ;;  %v21281_v12 = vld [vmem:[#allocation67_spill] sm:$0xff]  ;;  %v21284_v20 = vld [vmem:[#allocation397_spill] sm:$0xff] }
 0x5a9   :  { %v10054_v60 = vsel %vm10023_vm0, %v21273_v26, %v21270_v33  ;;  %21277 = vst [vmem:[#allocation493_spill] sm:$0xff] %v16863_v23  ;;  %v21282_v28 = vcombine.low %v21280_v44, %v21281_v12  ;;  %v21283_v26 = vld [vmem:[#allocation363_spill] sm:$0xff]  ;;  %v10058_v10 = vsel %vm10056_vm1, %v10025_v53, %v21284_v20  ;;  %v10060_v23 = vsel %vm10056_vm1, %v10027_v37, %v21286_v47  ;;  %v21288_v9 = vld [vmem:[#allocation302_spill] sm:$0xff]  ;;  %v21294_v53 = vld [vmem:[#allocation16_spill] sm:$0xff] }
 0x5aa   :  { %v10063_v33 = vsel %vm10056_vm1, %v10030_v2, %v21283_v26  ;;  %v21285_v41 = vld [vmem:[#allocation275_spill] sm:$0xff]  ;;  %v21295_v26 = vld [vmem:[#allocation234_spill] sm:$0xff]  ;;  %v21296_v20 = vld [vmem:[#allocation44_spill] sm:$0xff] }
 0x5ab   :  { %v10055_v29 = vsel %vm10023_vm0, %v21282_v28, %v21279_v3  ;;  %v10065_v31 = vsel %vm10056_vm1, %v10032_v0, %v21285_v41  ;;  %v21287_v7 = vld [vmem:[#allocation311_spill] sm:$0xff]  ;;  %v21292_v3 = vld [vmem:[#allocation320_spill] sm:$0xff]  ;;  %v10062_v0 = vsel %vm10056_vm1, %v10029_v39, %v21294_v53  ;;  %v10069_v37 = vsel %vm10056_vm1, %v10036_v1, %v21295_v26  ;;  %v16906_v53 = vpop.permute.xlu1 %9561  ;;  %v16908_v1 = vpop.permute.xlu0 %9575 }
 0x5ac   :  { %v10067_v38 = vsel %vm10056_vm1, %v10034_v58, %v21287_v7  ;;  %v21289_v44 = vld [vmem:[#allocation303_spill] sm:$0xff]  ;;  %v10064_v58 = vsel %vm10056_vm1, %v10031_v30, %v21296_v20  ;;  %v21297_v7 = vld [vmem:[#allocation70_spill] sm:$0xff]  ;;  %v21298_v47 = vld [vmem:[#allocation72_spill] sm:$0xff]  ;;  %21302 = vst [vmem:[#allocation415_spill] sm:$0xff] %v16906_v53 }
 0x5ad   :  { %v21290_v28 = vcombine.low %v21288_v9, %v21289_v44  ;;  %v21291_v2 = vld [vmem:[#allocation319_spill] sm:$0xff]  ;;  %v10071_v41 = vsel %vm10056_vm1, %v10038_v63, %v21297_v7  ;;  %v21299_v44 = vld [vmem:[#allocation454_spill] sm:$0xff]  ;;  %21303 = vst [vmem:[#allocation435_spill] sm:$0xff] %v16908_v1  ;;  %v21304_v30 = vld [vmem:[#allocation101_spill] sm:$0xff] }
 0x5ae   :  { %v21293_v12 = vcombine.low %v21291_v2, %v21292_v3  ;;  %v10073_v9 = vsel %vm10056_vm1, %v10040_v19, %v21299_v44  ;;  %v21300_v3 = vld [vmem:[#allocation461_spill] sm:$0xff]  ;;  %v21301_v2 = vld [vmem:[#allocation99_spill] sm:$0xff]  ;;  %v10070_v26 = vsel %vm10056_vm1, %v10037_v5, %v21304_v30  ;;  %v21305_v63 = vld [vmem:[#allocation28_spill] sm:$0xff] }
 0x5af   :  { %9801 = vrot.lane.b32.xlu1 %v21290_v28, %s10653_s2  ;;  %v10066_v28 = vsel %vm10056_vm1, %v10033_v11, %v21298_v47  ;;  %v10075_v39 = vsel %vm10056_vm1, %v10042_v55, %v21301_v2  ;;  %v10077_v20 = vsel %vm10056_vm1, %v10044_v49, %v21305_v63  ;;  %v21306_v11 = vld [vmem:[#allocation30_spill] sm:$0xff]  ;;  %v21309_v55 = vld [vmem:[#allocation56_spill] sm:$0xff]  ;;  %v21312_v30 = vld [vmem:[#allocation337_spill] sm:$0xff] }
 0x5b0   :  { %9815 = vrot.lane.b32.xlu0 %v21293_v12, %s10653_s2  ;;  %v10068_v12 = vsel %vm10056_vm1, %v10035_v34, %v21300_v3  ;;  %v10072_v7 = vsel %vm10056_vm1, %v10039_v52, %v21306_v11  ;;  %v21307_v19 = vld [vmem:[#allocation130_spill] sm:$0xff]  ;;  %v21308_v34 = vld [vmem:[#allocation132_spill] sm:$0xff]  ;;  %v10081_v2 = vsel %vm10056_vm1, %v10048_v13, %v21309_v55  ;;  %v21315_v52 = vld [vmem:[#allocation357_spill] sm:$0xff] }
 0x5b1   :  { %v10079_v44 = vsel %vm10056_vm1, %v10046_v36, %v21307_v19  ;;  %v10074_v3 = vsel %vm10056_vm1, %v10041_v22, %v21308_v34  ;;  %v21310_v47 = vld [vmem:[#allocation58_spill] sm:$0xff]  ;;  %v21311_v5 = vld [vmem:[#allocation336_spill] sm:$0xff]  ;;  %v21317_v36 = vld [vmem:[#allocation161_spill] sm:$0xff] }
 0x5b2   :  { %v10076_v1 = vsel %vm10056_vm1, %v10043_v6, %v21310_v47  ;;  %v21313_v53 = vcombine.low %v21311_v5, %v21312_v30  ;;  %v21314_v49 = vld [vmem:[#allocation356_spill] sm:$0xff]  ;;  %v10083_v11 = vsel %vm10056_vm1, %v10050_v4, %v21317_v36  ;;  %v21318_v22 = vld [vmem:[#allocation86_spill] sm:$0xff]  ;;  %v21319_v13 = vld [vmem:[#allocation191_spill] sm:$0xff] }
 0x5b3   :  { %v21316_v63 = vcombine.low %v21314_v49, %v21315_v52  ;;  %v10078_v19 = vsel %vm10056_vm1, %v10045_v62, %v21318_v22  ;;  %v10085_v34 = vsel %vm10056_vm1, %v10052_v51, %v21319_v13  ;;  %v21320_v6 = vld [vmem:[#allocation116_spill] sm:$0xff]  ;;  %v21321_v47 = vld [vmem:[#allocation223_spill] sm:$0xff]  ;;  %v21322_v30 = vld [vmem:[#allocation225_spill] sm:$0xff]  ;;  %v16950_v62 = vpop.permute.xlu1 %9565  ;;  %v16952_v22 = vpop.permute.xlu0 %9579 }
 0x5b4   :  { %9805 = vrot.lane.b32.xlu1 %v21313_v53, %s10653_s2  ;;  %v10080_v55 = vsel %vm10056_vm1, %v10047_v46, %v21320_v6  ;;  %v10087_v53 = vsel %vm10056_vm1, %v10054_v60, %v21321_v47  ;;  %v16944_v5 = vsel %vm10056_vm1, %v10049_v24, %v21322_v30  ;;  %v21325_v4 = vld [vmem:[#allocation281_spill] sm:$0xff]  ;;  %21326 = vst [vmem:[#allocation467_spill] sm:$0xff] %v16950_v62  ;;  %21327 = vst [vmem:[#allocation449_spill] sm:$0xff] %v16952_v22  ;;  %v21328_v51 = vld [vmem:[#allocation176_spill] sm:$0xff] }
 0x5b5   :  { %9819 = vrot.lane.b32.xlu0 %v21316_v63, %s10653_s2  ;;  %21323 = vst [vmem:[#allocation439_spill] sm:$0xff] %v16944_v5  ;;  %v21324_v63 = vld [vmem:[#allocation146_spill] sm:$0xff]  ;;  %v10092_v36 = vsel %vm10089_vm2, %v10059_v61, %v21325_v4  ;;  %v10094_v46 = vsel %vm10089_vm2, %v10061_v18, %v21328_v51  ;;  %v21330_v6 = vld [vmem:[#allocation291_spill] sm:$0xff]  ;;  %v21333_v61 = vld [vmem:[#allocation209_spill] sm:$0xff] }
 0x5b6   :  { %v10090_v52 = vsel %vm10089_vm2, %v10057_v16, %v21324_v63  ;;  %v21329_v13 = vld [vmem:[#allocation178_spill] sm:$0xff]  ;;  %v10096_v24 = vsel %vm10089_vm2, %v10063_v33, %v21330_v6  ;;  %v21332_v16 = vld [vmem:[#allocation207_spill] sm:$0xff]  ;;  %v10093_v4 = vsel %vm10089_vm2, %v10060_v23, %v21333_v61 }
 0x5b7   :  { %v10088_v60 = vsel %vm10056_vm1, %v10055_v29, %v21329_v13  ;;  %v21331_v30 = vld [vmem:[#allocation294_spill] sm:$0xff]  ;;  %v10098_v63 = vsel %vm10089_vm2, %v10065_v31, %v21332_v16  ;;  %v21334_v5 = vld [vmem:[#allocation327_spill] sm:$0xff]  ;;  %v21343_v16 = vld [vmem:[#allocation480_spill] sm:$0xff] }
 0x5b8   :  { %v10091_v47 = vsel %vm10089_vm2, %v10058_v10, %v21331_v30  ;;  %v10100_v22 = vsel %vm10089_vm2, %v10067_v38, %v21334_v5  ;;  %v21335_v18 = vld [vmem:[#allocation354_spill] sm:$0xff]  ;;  %v21336_v51 = vld [vmem:[#allocation355_spill] sm:$0xff]  ;;  %v21341_v10 = vld [vmem:[#allocation329_spill] sm:$0xff]  ;;  %v10097_v38 = vsel %vm10089_vm2, %v10064_v58, %v21343_v16 }
 0x5b9   :  { %v21337_v29 = vcombine.low %v21335_v18, %v21336_v51  ;;  %v21338_v33 = vld [vmem:[#allocation390_spill] sm:$0xff]  ;;  %v21339_v13 = vld [vmem:[#allocation391_spill] sm:$0xff]  ;;  %v10095_v31 = vsel %vm10089_vm2, %v10062_v0, %v21341_v10  ;;  %v21342_v30 = vld [vmem:[#allocation485_spill] sm:$0xff]  ;;  %v16992_v10 = vpop.permute.xlu1 %9569 }
 0x5ba   :  { %v21340_v6 = vcombine.low %v21338_v33, %v21339_v13  ;;  %v10102_v23 = vsel %vm10089_vm2, %v10069_v37, %v21342_v30  ;;  %v21344_v5 = vld [vmem:[#allocation301_spill] sm:$0xff]  ;;  %v21345_v62 = vld [vmem:[#allocation491_spill] sm:$0xff]  ;;  %v21348_v33 = vld [vmem:[#allocation364_spill] sm:$0xff]  ;;  %21349 = vst [vmem:[#allocation258_spill] sm:$0xff] %v16992_v10  ;;  %v16994_v37 = vpop.permute.xlu0 %9583 }
 0x5bb   :  { %9809 = vrot.lane.b32.xlu1 %v21337_v29, %s10653_s2  ;;  %v10104_v61 = vsel %vm10089_vm2, %v10071_v41, %v21344_v5  ;;  %v10099_v29 = vsel %vm10089_vm2, %v10066_v28, %v21345_v62  ;;  %v21346_v51 = vld [vmem:[#allocation239_spill] sm:$0xff]  ;;  %v21347_v13 = vld [vmem:[#allocation241_spill] sm:$0xff]  ;;  %v10108_v0 = vsel %vm10089_vm2, %v10075_v39, %v21348_v33  ;;  %21350 = vst [vmem:[#allocation148_spill] sm:$0xff] %v16994_v37  ;;  %v21351_v58 = vld [vmem:[#allocation366_spill] sm:$0xff] }
 0x5bc   :  { %9823 = vrot.lane.b32.xlu0 %v21340_v6, %s10653_s2  ;;  %v10106_v18 = vsel %vm10089_vm2, %v10073_v9, %v21346_v51  ;;  %v10101_v6 = vsel %vm10089_vm2, %v10068_v12, %v21347_v13  ;;  %v10103_v30 = vsel %vm10089_vm2, %v10070_v26, %v21351_v58  ;;  %v21352_v41 = vld [vmem:[#allocation274_spill] sm:$0xff]  ;;  %v21353_v28 = vld [vmem:[#allocation276_spill] sm:$0xff]  ;;  %v21359_v58 = vld [vmem:[#allocation389_spill] sm:$0xff] }
 0x5bd   :  { %v10110_v16 = vsel %vm10089_vm2, %v10077_v20, %v21352_v41  ;;  %v10105_v62 = vsel %vm10089_vm2, %v10072_v7, %v21353_v28  ;;  %v21354_v9 = vld [vmem:[#allocation398_spill] sm:$0xff]  ;;  %v21355_v12 = vld [vmem:[#allocation400_spill] sm:$0xff]  ;;  %v21361_v20 = vld [vmem:[#allocation421_spill] sm:$0xff] }
 0x5be   :  { %v10112_v51 = vsel %vm10089_vm2, %v10079_v44, %v21354_v9  ;;  %v10107_v13 = vsel %vm10089_vm2, %v10074_v3, %v21355_v12  ;;  %v21356_v39 = vld [vmem:[#allocation310_spill] sm:$0xff]  ;;  %v21357_v5 = vld [vmem:[#allocation312_spill] sm:$0xff] }
 0x5bf   :  { %v10114_v33 = vsel %vm10089_vm2, %v10081_v2, %v21356_v39  ;;  %v10109_v37 = vsel %vm10089_vm2, %v10076_v1, %v21357_v5  ;;  %v21358_v26 = vld [vmem:[#allocation388_spill] sm:$0xff]  ;;  %v21362_v7 = vld [vmem:[#allocation422_spill] sm:$0xff]  ;;  %v21367_v1 = vld [vmem:[#allocation457_spill] sm:$0xff] }
 0x5c0   :  { %v21360_v10 = vcombine.low %v21358_v26, %v21359_v58  ;;  %v21363_v41 = vcombine.low %v21361_v20, %v21362_v7  ;;  %v21364_v44 = vld [vmem:[#allocation432_spill] sm:$0xff]  ;;  %v21366_v2 = vld [vmem:[#allocation346_spill] sm:$0xff]  ;;  %v10113_v39 = vsel %vm10089_vm2, %v10080_v55, %v21367_v1  ;;  %v21369_v58 = vld [vmem:[#allocation487_spill] sm:$0xff] }
 0x5c1   :  { %v10116_v28 = vsel %vm10089_vm2, %v10083_v11, %v21364_v44  ;;  %v21365_v3 = vld [vmem:[#allocation344_spill] sm:$0xff]  ;;  %v10118_v12 = vsel %vm10089_vm2, %v10085_v34, %v21366_v2  ;;  %v21368_v5 = vld [vmem:[#allocation378_spill] sm:$0xff]  ;;  %v10123_v26 = vsel %vm10122_vm3, %v10090_v52, %v21369_v58  ;;  %v17034_v44 = vpop.permute.xlu1 %9573  ;;  %v21374_v34 = vld [vmem:[#allocation69_spill] sm:$0xff] }
 0x5c2   :  { %9813 = vrot.lane.b32.xlu1 %v21360_v10, %s10653_s2  ;;  %9827 = vrot.lane.b32.xlu0 %v21363_v41, %s10653_s2  ;;  %v10111_v9 = vsel %vm10089_vm2, %v10078_v19, %v21365_v3  ;;  %v10120_v10 = vsel %vm10089_vm2, %v10087_v53, %v21368_v5  ;;  %v21370_v7 = vld [vmem:[#allocation444_spill] sm:$0xff]  ;;  %v21371_v20 = vld [vmem:[#allocation470_spill] sm:$0xff]  ;;  %21372 = vst [vmem:[#allocation466_spill] sm:$0xff] %v17034_v44  ;;  %v17036_v19 = vpop.permute.xlu0 %9587  ;;  %v21375_v55 = vld [vmem:[#allocation13_spill] sm:$0xff] }
 0x5c3   :  { %v10125_v41 = vsel %vm10122_vm3, %v10092_v36, %v21370_v7  ;;  %v10127_v11 = vsel %vm10122_vm3, %v10094_v46, %v21371_v20  ;;  %21373 = vst [vmem:[#allocation494_spill] sm:$0xff] %v17036_v19  ;;  %v10121_v3 = vsel %vm10089_vm2, %v10088_v60, %v21374_v34  ;;  %v10129_v2 = vsel %vm10122_vm3, %v10096_v24, %v21375_v55  ;;  %v21376_v53 = vld [vmem:[#allocation429_spill] sm:$0xff]  ;;  %v21377_v52 = vld [vmem:[#allocation456_spill] sm:$0xff]  ;;  %v21379_v46 = vld [vmem:[#allocation410_spill] sm:$0xff] }
 0x5c4   :  { %v10124_v1 = vsel %vm10122_vm3, %v10091_v47, %v21376_v53  ;;  %v10131_v58 = vsel %vm10122_vm3, %v10098_v63, %v21377_v52  ;;  %v21378_v36 = vld [vmem:[#allocation488_spill] sm:$0xff]  ;;  %v10133_v20 = vsel %vm10122_vm3, %v10100_v22, %v21379_v46  ;;  %v21380_v5 = vld [vmem:[#allocation409_spill] sm:$0xff]  ;;  %v21384_v47 = vld [vmem:[#allocation447_spill] sm:$0xff] }
 0x5c5   :  { %v10126_v7 = vsel %vm10122_vm3, %v10093_v4, %v21378_v36  ;;  %v10128_v19 = vsel %vm10122_vm3, %v10095_v31, %v21380_v5  ;;  %v21381_v60 = vld [vmem:[#allocation141_spill] sm:$0xff]  ;;  %v21385_v55 = vld [vmem:[#allocation448_spill] sm:$0xff]  ;;  %v21388_v52 = vld [vmem:[#allocation15_spill] sm:$0xff] }
 0x5c6   :  { %v21382_v34 = vld [vmem:[#allocation417_spill] sm:$0xff]  ;;  %v21386_v53 = vcombine.low %v21384_v47, %v21385_v55  ;;  %v10130_v22 = vsel %vm10122_vm3, %v10097_v38, %v21388_v52  ;;  %v21390_v46 = vld [vmem:[#allocation43_spill] sm:$0xff]  ;;  %v21393_v55 = vld [vmem:[#allocation102_spill] sm:$0xff]  ;;  %v17078_v38 = vpop.permute.xlu0 %9591 }
 0x5c7   :  { %v21383_v24 = vcombine.low %v21381_v60, %v21382_v34  ;;  %v21387_v63 = vld [vmem:[#allocation17_spill] sm:$0xff]  ;;  %v10132_v5 = vsel %vm10122_vm3, %v10099_v29, %v21390_v46  ;;  %v21392_v34 = vld [vmem:[#allocation71_spill] sm:$0xff]  ;;  %v21394_v47 = vld [vmem:[#allocation100_spill] sm:$0xff]  ;;  %21395 = vst [vmem:[#allocation419_spill] sm:$0xff] %v17078_v38 }
 0x5c8   :  { %9831 = vrot.lane.b32.xlu0 %v21386_v53, %s10653_s2  ;;  %v10135_v4 = vsel %vm10122_vm3, %v10102_v23, %v21387_v63  ;;  %v21389_v36 = vld [vmem:[#allocation45_spill] sm:$0xff]  ;;  %v10134_v60 = vsel %vm10122_vm3, %v10101_v6, %v21392_v34  ;;  %v10141_v53 = vsel %vm10122_vm3, %v10108_v0, %v21393_v55  ;;  %v10136_v23 = vsel %vm10122_vm3, %v10103_v30, %v21394_v47  ;;  %v17076_v63 = vpop.permute.xlu1 %9577  ;;  %v21400_v0 = vld [vmem:[#allocation59_spill] sm:$0xff] }
 0x5c9   :  { %9817 = vrot.lane.b32.xlu1 %v21383_v24, %s10653_s2  ;;  %v10137_v31 = vsel %vm10122_vm3, %v10104_v61, %v21389_v36  ;;  %v21391_v44 = vld [vmem:[#allocation73_spill] sm:$0xff]  ;;  %v21396_v61 = vld [vmem:[#allocation31_spill] sm:$0xff]  ;;  %v10147_v55 = vsel %vm10122_vm3, %v10114_v33, %v21400_v0  ;;  %v21409_v33 = vld [vmem:[#allocation164_spill] sm:$0xff] }
 0x5ca   :  { %v10139_v24 = vsel %vm10122_vm3, %v10106_v18, %v21391_v44  ;;  %v10143_v52 = vsel %vm10122_vm3, %v10110_v16, %v21396_v61  ;;  %v21397_v29 = vld [vmem:[#allocation29_spill] sm:$0xff]  ;;  %v21398_v18 = vld [vmem:[#allocation134_spill] sm:$0xff] }
 0x5cb   :  { %v10138_v36 = vsel %vm10122_vm3, %v10105_v62, %v21397_v29  ;;  %v10145_v44 = vsel %vm10122_vm3, %v10112_v51, %v21398_v18  ;;  %v21399_v6 = vld [vmem:[#allocation133_spill] sm:$0xff]  ;;  %v21403_v16 = vld [vmem:[#allocation418_spill] sm:$0xff]  ;;  %v21404_v62 = vld [vmem:[#allocation420_spill] sm:$0xff]  ;;  %v17108_v18 = vsel %vm10122_vm3, %v10111_v9, %v21409_v33 }
 0x5cc   :  { %v10140_v34 = vsel %vm10122_vm3, %v10107_v13, %v21399_v6  ;;  %v21401_v30 = vld [vmem:[#allocation57_spill] sm:$0xff]  ;;  %v21405_v61 = vcombine.low %v21403_v16, %v21404_v62  ;;  %v21407_v13 = vld [vmem:[#allocation479_spill] sm:$0xff]  ;;  %v21416_v33 = vld [vmem:[#allocation262_spill] sm:$0xff] }
 0x5cd   :  { %v17092_v47 = vsel %vm10122_vm3, %v10109_v37, %v21401_v30  ;;  %v21402_v46 = vld [vmem:[#allocation165_spill] sm:$0xff]  ;;  %v21410_v37 = vld [vmem:[#allocation87_spill] sm:$0xff] }
 0x5ce   :  { %v17096_v38 = vsel %vm10122_vm3, %v10116_v28, %v21402_v46  ;;  %9821 = vrot.lane.b32.xlu1 %v21405_v61, %s10653_s2  ;;  %v21406_v51 = vld [vmem:[#allocation477_spill] sm:$0xff]  ;;  %v17112_v6 = vsel %vm10122_vm3, %v10118_v12, %v21410_v37  ;;  %v21412_v30 = vld [vmem:[#allocation195_spill] sm:$0xff]  ;;  %v21413_v61 = vld [vmem:[#allocation118_spill] sm:$0xff]  ;;  %v17130_v12 = vsel %vm10122_vm3, %v10121_v3, %v21416_v33  ;;  %v17132_v37 = vpop.permute.xlu1 %9581 }
 0x5cf   :  { %v21408_v29 = vcombine.low %v21406_v51, %v21407_v13  ;;  %v21411_v28 = vld [vmem:[#allocation85_spill] sm:$0xff]  ;;  %v10153_v46 = vsel %vm10122_vm3, %v10120_v10, %v21412_v30  ;;  %v10156_v62 = vsel %vm10155_vm4, %v10123_v26, %v21413_v61  ;;  %v21414_v13 = vld [vmem:[#allocation150_spill] sm:$0xff]  ;;  %21417 = vst [vmem:[#allocation187_spill] sm:$0xff] %v17132_v37  ;;  %v21420_v26 = vld [vmem:[#allocation179_spill] sm:$0xff] }
 0x5d0   :  { %v17116_v0 = vsel %vm10122_vm3, %v10113_v39, %v21411_v28  ;;  %v21415_v51 = vld [vmem:[#allocation94_spill] sm:$0xff]  ;;  %v17134_v39 = vpop.permute.xlu0 %9595  ;;  %v21419_v28 = vld [vmem:[#allocation180_spill] sm:$0xff]  ;;  %v17142_v30 = vsel %vm10155_vm4, %v10124_v1, %v21420_v26 }
 0x5d1   :  { %9835 = vrot.lane.b32.xlu0 %v21408_v29, %s10653_s2  ;;  %v10158_v29 = vsel %vm10155_vm4, %v10125_v41, %v21414_v13  ;;  %v17126_v9 = vsel %vm10155_vm4, %v10127_v11, %v21415_v51  ;;  %21418 = vst [vmem:[#allocation251_spill] sm:$0xff] %v17134_v39  ;;  %v17138_v10 = vsel %vm10155_vm4, %v10129_v2, %v21419_v28  ;;  %v21421_v41 = vld [vmem:[#allocation125_spill] sm:$0xff]  ;;  %v21422_v51 = vld [vmem:[#allocation296_spill] sm:$0xff]  ;;  %v21423_v13 = vld [vmem:[#allocation211_spill] sm:$0xff] }
 0x5d2   :  { %v17146_v11 = vsel %vm10155_vm4, %v10131_v58, %v21421_v41  ;;  %v17150_v3 = vsel %vm10155_vm4, %v10126_v7, %v21422_v51  ;;  %v17154_v61 = vsel %vm10155_vm4, %v10133_v20, %v21423_v13  ;;  %v21424_v33 = vld [vmem:[#allocation210_spill] sm:$0xff]  ;;  %v21426_v26 = vld [vmem:[#allocation236_spill] sm:$0xff]  ;;  %v21427_v58 = vld [vmem:[#allocation253_spill] sm:$0xff] }
 0x5d3   :  { %v17158_v2 = vsel %vm10155_vm4, %v10128_v19, %v21424_v33  ;;  %v21425_v28 = vld [vmem:[#allocation382_spill] sm:$0xff]  ;;  %v21428_v41 = vcombine.low %v21426_v26, %v21427_v58  ;;  %v21429_v7 = vld [vmem:[#allocation96_spill] sm:$0xff]  ;;  %v21432_v20 = vld [vmem:[#allocation333_spill] sm:$0xff] }
 0x5d4   :  { %v10186_v1 = vsel %vm10155_vm4, %v10153_v46, %v21425_v28  ;;  %v21430_v51 = vld [vmem:[#allocation98_spill] sm:$0xff]  ;;  %v17172_v13 = vsel %vm10155_vm4, %v10135_v4, %v21432_v20  ;;  %v21433_v19 = vld [vmem:[#allocation331_spill] sm:$0xff]  ;;  %v21435_v37 = vld [vmem:[#allocation88_spill] sm:$0xff] }
 0x5d5   :  { %9825 = vrot.lane.b32.xlu1 %v21428_v41, %s10653_s2  ;;  %v21431_v39 = vcombine.low %v21429_v7, %v21430_v51  ;;  %v17176_v33 = vsel %vm10155_vm4, %v10130_v22, %v21433_v19  ;;  %v21434_v46 = vld [vmem:[#allocation243_spill] sm:$0xff]  ;;  %v10219_v41 = vsel %vm10188_vm5, %v10186_v1, %v21435_v37  ;;  %v21436_v58 = vld [vmem:[#allocation242_spill] sm:$0xff]  ;;  %v17194_v22 = vpop.permute.xlu1 %9585  ;;  %v17196_v19 = vpop.permute.xlu0 %9599 }
 0x5d6   :  { %v17180_v28 = vsel %vm10155_vm4, %v10137_v31, %v21434_v46  ;;  %v17186_v26 = vsel %vm10155_vm4, %v10132_v5, %v21436_v58  ;;  %v21438_v4 = vld [vmem:[#allocation338_spill] sm:$0xff]  ;;  %21439 = vst [vmem:[#allocation266_spill] sm:$0xff] %v17194_v22  ;;  %21440 = vst [vmem:[#allocation267_spill] sm:$0xff] %v17196_v19  ;;  %v21441_v31 = vld [vmem:[#allocation289_spill] sm:$0xff] }
 0x5d7   :  { %9839 = vrot.lane.b32.xlu0 %v21431_v39, %s10653_s2  ;;  %v21437_v39 = vld [vmem:[#allocation143_spill] sm:$0xff]  ;;  %v10252_v20 = vsel %vm10221_vm6, %v10219_v41, %v21438_v4  ;;  %v17200_v46 = vsel %vm10155_vm4, %v10134_v60, %v21441_v31  ;;  %v21444_v58 = vld [vmem:[#allocation277_spill] sm:$0xff]  ;;  %v21446_v19 = vld [vmem:[#allocation350_spill] sm:$0xff] }
 0x5d8   :  { %v17190_v51 = vsel %vm10155_vm4, %v10139_v24, %v21437_v39  ;;  %v21442_v37 = vld [vmem:[#allocation111_spill] sm:$0xff]  ;;  %v17210_v41 = vsel %vm10155_vm4, %v10136_v23, %v21444_v58  ;;  %v21445_v39 = vld [vmem:[#allocation204_spill] sm:$0xff]  ;;  %v21448_v31 = vld [vmem:[#allocation465_spill] sm:$0xff] }
 0x5d9   :  { %v17204_v5 = vsel %vm10155_vm4, %v10141_v53, %v21442_v37  ;;  %v21443_v1 = vld [vmem:[#allocation91_spill] sm:$0xff]  ;;  %v10189_v4 = vsel %vm10188_vm5, %v10156_v62, %v21445_v39  ;;  %v21447_v60 = vld [vmem:[#allocation464_spill] sm:$0xff]  ;;  %v21453_v7 = vld [vmem:[#allocation218_spill] sm:$0xff] }
 0x5da   :  { %v10285_v24 = vsel %vm10254_vm7, %v10252_v20, %v21443_v1  ;;  %v21449_v53 = vcombine.low %v21447_v60, %v21448_v31  ;;  %v21450_v37 = vld [vmem:[#allocation339_spill] sm:$0xff]  ;;  %v21451_v20 = vld [vmem:[#allocation157_spill] sm:$0xff]  ;;  %v17226_v23 = vsel %vm10155_vm4, %v10143_v52, %v21453_v7  ;;  %v21454_v58 = vld [vmem:[#allocation196_spill] sm:$0xff]  ;;  %v17240_v52 = vpop.permute.xlu1 %9589  ;;  %v9604_v7 = vpop.permute.xlu0 %9603 }
 0x5db   :  { %v10318_v22 = vsel %vm10287_vm8, %v10285_v24, %v21446_v19  ;;  %v21452_v1 = vcombine.low %v21450_v37, %v21451_v20  ;;  %v10222_v62 = vsel %vm10221_vm6, %v10189_v4, %v21454_v58  ;;  %v21455_v39 = vld [vmem:[#allocation92_spill] sm:$0xff]  ;;  %v21456_v24 = vld [vmem:[#allocation402_spill] sm:$0xff]  ;;  %21458 = vst [vmem:[#allocation160_spill] sm:$0xff] %v17240_v52  ;;  %v21459_v20 = vld [vmem:[#allocation9_spill] sm:$0xff] }
 0x5dc   :  { %9829 = vrot.lane.b32.xlu1 %v21449_v53, %s10653_s2  ;;  %v10351_v19 = vsel %vm10320_vm9, %v10318_v22, %v21455_v39  ;;  %v17234_v31 = vsel %vm10155_vm4, %v10138_v36, %v21456_v24  ;;  %v21457_v53 = vld [vmem:[#allocation374_spill] sm:$0xff]  ;;  %v17244_v4 = vsel %vm10155_vm4, %v10145_v44, %v21459_v20  ;;  %v21460_v22 = vld [vmem:[#allocation127_spill] sm:$0xff]  ;;  %v21462_v24 = vld [vmem:[#allocation313_spill] sm:$0xff] }
 0x5dd   :  { %9843 = vrot.lane.b32.xlu0 %v21452_v1, %s10653_s2  ;;  %v10255_v60 = vsel %vm10254_vm7, %v10222_v62, %v21457_v53  ;;  %v10384_v1 = vsel %vm10353_vm10, %v10351_v19, %v16611_v54  ;;  %v17248_v58 = vsel %vm10155_vm4, %v10140_v34, %v21460_v22  ;;  %v21461_v36 = vld [vmem:[#allocation199_spill] sm:$0xff]  ;;  %v17257_v54 = vsel %vm10155_vm4, %v10147_v55, %v21462_v24  ;;  %v21464_v52 = vld [vmem:[#allocation460_spill] sm:$0xff]  ;;  %v21465_v20 = vld [vmem:[#allocation285_spill] sm:$0xff] }
 0x5de   :  { %v10288_v39 = vsel %vm10287_vm8, %v10255_v60, %v21461_v36  ;;  %v17253_v62 = vsel %vm10386_vm11, %v10384_v1, %v9604_v7  ;;  %v21463_v19 = vld [vmem:[#allocation495_spill] sm:$0xff]  ;;  %v21466_v34 = vld [vmem:[#allocation476_spill] sm:$0xff]  ;;  %v21468_v60 = vld [vmem:[#allocation257_spill] sm:$0xff] }
 0x5df   :  { %v10191_v53 = vsel %vm10188_vm5, %v10158_v29, %v21463_v19  ;;  %v10321_v44 = vsel %vm10320_vm9, %v10288_v39, %v21464_v52  ;;  %v21467_v22 = vcombine.low %v21465_v20, %v21466_v34  ;;  %v21469_v36 = vld [vmem:[#allocation147_spill] sm:$0xff]  ;;  %v21471_v7 = vld [vmem:[#allocation436_spill] sm:$0xff]  ;;  %v21472_v29 = vld [vmem:[#allocation434_spill] sm:$0xff] }
 0x5e0   :  { %v21470_v1 = vcombine.low %v21468_v60, %v21469_v36  ;;  %v17274_v55 = vsel %vm10155_vm4, %v17092_v47, %v21471_v7  ;;  %v17279_v52 = vsel %vm10155_vm4, %v17096_v38, %v21472_v29  ;;  %v21473_v39 = vld [vmem:[#allocation119_spill] sm:$0xff]  ;;  %v21474_v19 = vld [vmem:[#allocation200_spill] sm:$0xff]  ;;  %v21477_v7 = vld [vmem:[#allocation478_spill] sm:$0xff] }
 0x5e1   :  { %9833 = vrot.lane.b32.xlu1 %v21467_v22, %s10653_s2  ;;  %v10224_v24 = vsel %vm10221_vm6, %v10191_v53, %v21473_v39  ;;  %v10354_v22 = vsel %vm10353_vm10, %v10321_v44, %v21474_v19  ;;  %v21475_v34 = vld [vmem:[#allocation348_spill] sm:$0xff]  ;;  %v21476_v36 = vld [vmem:[#allocation347_spill] sm:$0xff]  ;;  %v17299_v53 = vpop.permute.xlu1 %9593  ;;  %v9672_v39 = vpop.permute.xlu0 %9671  ;;  %v21479_v44 = vld [vmem:[#allocation462_spill] sm:$0xff] }
 0x5e2   :  { %9847 = vrot.lane.b32.xlu0 %v21470_v1, %s10653_s2  ;;  %v17288_v1 = vsel %vm10155_vm4, %v17108_v18, %v21475_v34  ;;  %v17293_v47 = vsel %vm10155_vm4, %v17112_v6, %v21476_v36  ;;  %v10257_v38 = vsel %vm10254_vm7, %v10224_v24, %v21477_v7  ;;  %v10387_v29 = vsel %vm10386_vm11, %v10354_v22, %v16623_v27  ;;  %v21480_v18 = vld [vmem:[#allocation42_spill] sm:$0xff]  ;;  %v21483_v7 = vld [vmem:[#allocation193_spill] sm:$0xff]  ;;  %v21486_v60 = vld [vmem:[#allocation496_spill] sm:$0xff] }
 0x5e3   :  { %21478 = vst [vmem:[#allocation24_spill] sm:$0xff] %v17299_v53  ;;  %v17304_v19 = vsel %vm10155_vm4, %v17116_v0, %v21479_v44  ;;  %v10193_v34 = vsel %vm10188_vm5, %v17126_v9, %v21480_v18  ;;  %v21481_v6 = vld [vmem:[#allocation122_spill] sm:$0xff]  ;;  %v17312_v24 = vsel %vm10419_vm12, %v10387_v29, %v9672_v39  ;;  %v10187_v27 = vsel %vm10155_vm4, %v17130_v12, %v21483_v7  ;;  %v21487_v9 = vld [vmem:[#allocation497_spill] sm:$0xff] }
 0x5e4   :  { %v10290_v36 = vsel %vm10287_vm8, %v10257_v38, %v21481_v6  ;;  %21482 = vst [vmem:[#allocation26_spill] sm:$0xff] %v17312_v24  ;;  %v21484_v22 = vld [vmem:[#allocation114_spill] sm:$0xff]  ;;  %v21488_v18 = vcombine.low %v21486_v60, %v21487_v9  ;;  %v21489_v38 = vld [vmem:[#allocation393_spill] sm:$0xff]  ;;  %v21492_v6 = vld [vmem:[#allocation459_spill] sm:$0xff] }
 0x5e5   :  { %v10195_v53 = vsel %vm10188_vm5, %v17138_v10, %v21484_v22  ;;  %v21485_v0 = vld [vmem:[#allocation482_spill] sm:$0xff]  ;;  %v21490_v29 = vld [vmem:[#allocation145_spill] sm:$0xff]  ;;  %v10190_v12 = vsel %vm10188_vm5, %v17142_v30, %v21492_v6  ;;  %v21494_v22 = vld [vmem:[#allocation228_spill] sm:$0xff]  ;;  %v17350_v6 = vpop.permute.xlu1 %9597 }
 0x5e6   :  { %v10323_v44 = vsel %vm10320_vm9, %v10290_v36, %v21485_v0  ;;  %9837 = vrot.lane.b32.xlu1 %v21488_v18, %s10653_s2  ;;  %v21491_v39 = vcombine.low %v21489_v38, %v21490_v29  ;;  %v21493_v7 = vld [vmem:[#allocation381_spill] sm:$0xff]  ;;  %v10226_v36 = vsel %vm10221_vm6, %v10193_v34, %v21494_v22  ;;  %v21495_v0 = vld [vmem:[#allocation123_spill] sm:$0xff]  ;;  %v21496_v18 = vld [vmem:[#allocation492_spill] sm:$0xff]  ;;  %v9676_v34 = vpop.permute.xlu0 %9675 }
 0x5e7   :  { %v10197_v10 = vsel %vm10188_vm5, %v17146_v11, %v21493_v7  ;;  %v10356_v24 = vsel %vm10353_vm10, %v10323_v44, %v21495_v0  ;;  %v10192_v9 = vsel %vm10188_vm5, %v17150_v3, %v21496_v18  ;;  %v21497_v29 = vld [vmem:[#allocation490_spill] sm:$0xff]  ;;  %v21498_v38 = vld [vmem:[#allocation441_spill] sm:$0xff]  ;;  %v21500_v22 = vld [vmem:[#allocation20_spill] sm:$0xff] }
 0x5e8   :  { %9851 = vrot.lane.b32.xlu0 %v21491_v39, %s10653_s2  ;;  %v10199_v39 = vsel %vm10188_vm5, %v17154_v61, %v21497_v29  ;;  %v10259_v30 = vsel %vm10254_vm7, %v10226_v36, %v21498_v38  ;;  %v10389_v11 = vsel %vm10386_vm11, %v10356_v24, %v16635_v32  ;;  %v21499_v7 = vld [vmem:[#allocation18_spill] sm:$0xff]  ;;  %v17360_v3 = vsel %vm10188_vm5, %v17172_v13, %v21500_v22  ;;  %v21501_v61 = vld [vmem:[#allocation231_spill] sm:$0xff]  ;;  %v21503_v32 = vld [vmem:[#allocation412_spill] sm:$0xff] }
 0x5e9   :  { %v17355_v44 = vsel %vm10188_vm5, %v17158_v2, %v21499_v7  ;;  %v10292_v29 = vsel %vm10287_vm8, %v10259_v30, %v21501_v61  ;;  %v17365_v38 = vsel %vm10419_vm12, %v10389_v11, %v9676_v34  ;;  %v17370_v24 = vsel %vm10188_vm5, %v17176_v33, %v21503_v32  ;;  %v21504_v36 = vld [vmem:[#allocation411_spill] sm:$0xff]  ;;  %v21505_v0 = vld [vmem:[#allocation445_spill] sm:$0xff]  ;;  %v21506_v18 = vld [vmem:[#allocation126_spill] sm:$0xff] }
 0x5ea   :  { %21502 = vst [vmem:[#allocation25_spill] sm:$0xff] %v17365_v38  ;;  %v17375_v2 = vsel %vm10188_vm5, %v17180_v28, %v21504_v36  ;;  %v10325_v13 = vsel %vm10320_vm9, %v10292_v29, %v21505_v0  ;;  %v21507_v7 = vld [vmem:[#allocation129_spill] sm:$0xff]  ;;  %v21510_v34 = vld [vmem:[#allocation14_spill] sm:$0xff]  ;;  %v21512_v33 = vld [vmem:[#allocation48_spill] sm:$0xff] }
 0x5eb   :  { %v21508_v30 = vcombine.low %v21506_v18, %v21507_v7  ;;  %v21509_v11 = vld [vmem:[#allocation309_spill] sm:$0xff]  ;;  %v17390_v61 = vsel %vm10188_vm5, %v17186_v26, %v21512_v33  ;;  %v21513_v28 = vld [vmem:[#allocation152_spill] sm:$0xff]  ;;  %v21514_v36 = vld [vmem:[#allocation151_spill] sm:$0xff]  ;;  %v17409_v33 = vpop.permute.xlu1 %9601 }
 0x5ec   :  { %v21511_v22 = vcombine.low %v21509_v11, %v21510_v34  ;;  %v10220_v32 = vsel %vm10188_vm5, %v10187_v27, %v21513_v28  ;;  %v10228_v29 = vsel %vm10221_vm6, %v10195_v53, %v21514_v36  ;;  %v21515_v0 = vld [vmem:[#allocation232_spill] sm:$0xff]  ;;  %21519 = vst [vmem:[#allocation10_spill] sm:$0xff] %v17409_v33  ;;  %v9680_v53 = vpop.permute.xlu0 %9679  ;;  %v21521_v36 = vld [vmem:[#allocation153_spill] sm:$0xff] }
 0x5ed   :  { %9841 = vrot.lane.b32.xlu1 %v21508_v30, %s10653_s2  ;;  %v10358_v38 = vsel %vm10353_vm10, %v10325_v13, %v21515_v0  ;;  %v21516_v30 = vld [vmem:[#allocation46_spill] sm:$0xff]  ;;  %v21518_v11 = vld [vmem:[#allocation468_spill] sm:$0xff]  ;;  %v21537_v33 = vld [vmem:[#allocation265_spill] sm:$0xff] }
 0x5ee   :  { %9855 = vrot.lane.b32.xlu0 %v21511_v22, %s10653_s2  ;;  %v17401_v7 = vsel %vm10188_vm5, %v17190_v51, %v21516_v30  ;;  %v21517_v22 = vld [vmem:[#allocation202_spill] sm:$0xff]  ;;  %v10261_v26 = vsel %vm10254_vm7, %v10228_v29, %v21518_v11  ;;  %v10391_v27 = vsel %vm10386_vm11, %v10358_v38, %v16647_v25  ;;  %v21520_v28 = vld [vmem:[#allocation76_spill] sm:$0xff] }
 0x5ef   :  { %v10253_v34 = vsel %vm10221_vm6, %v10220_v32, %v21517_v22  ;;  %v17414_v13 = vsel %vm10188_vm5, %v17200_v46, %v21520_v28  ;;  %v21522_v0 = vld [vmem:[#allocation154_spill] sm:$0xff]  ;;  %v17421_v30 = vsel %vm10419_vm12, %v10391_v27, %v9680_v53  ;;  %v21527_v28 = vld [vmem:[#allocation83_spill] sm:$0xff]  ;;  %v21531_v27 = vld [vmem:[#allocation84_spill] sm:$0xff] }
 0x5f0   :  { %v10286_v51 = vsel %vm10254_vm7, %v10253_v34, %v21521_v36  ;;  %v10294_v32 = vsel %vm10287_vm8, %v10261_v26, %v21522_v0  ;;  %21523 = vst [vmem:[#allocation12_spill] sm:$0xff] %v17421_v30  ;;  %v21524_v11 = vld [vmem:[#allocation74_spill] sm:$0xff]  ;;  %v21528_v34 = vld [vmem:[#allocation219_spill] sm:$0xff] }
 0x5f1   :  { %v17426_v25 = vsel %vm10188_vm5, %v17204_v5, %v21524_v11  ;;  %v21525_v38 = vld [vmem:[#allocation446_spill] sm:$0xff]  ;;  %v21529_v36 = vcombine.low %v21527_v28, %v21528_v34  ;;  %v21530_v26 = vld [vmem:[#allocation163_spill] sm:$0xff]  ;;  %v21534_v11 = vld [vmem:[#allocation252_spill] sm:$0xff] }
 0x5f2   :  { %v10319_v29 = vsel %vm10287_vm8, %v10286_v51, %v21525_v38  ;;  %v21526_v22 = vld [vmem:[#allocation474_spill] sm:$0xff]  ;;  %v21532_v53 = vcombine.low %v21530_v26, %v21531_v27  ;;  %v10230_v30 = vsel %vm10221_vm6, %v10197_v10, %v21534_v11  ;;  %v21535_v51 = vld [vmem:[#allocation156_spill] sm:$0xff]  ;;  %v21538_v34 = vld [vmem:[#allocation39_spill] sm:$0xff]  ;;  %v9684_v10 = vpop.permute.xlu0 %9683 }
 0x5f3   :  { %v10327_v46 = vsel %vm10320_vm9, %v10294_v32, %v21526_v22  ;;  %9845 = vrot.lane.b32.xlu1 %v21529_v36, %s10653_s2  ;;  %v21533_v0 = vld [vmem:[#allocation254_spill] sm:$0xff]  ;;  %v10352_v38 = vsel %vm10320_vm9, %v10319_v29, %v21535_v51  ;;  %v21536_v32 = vld [vmem:[#allocation155_spill] sm:$0xff]  ;;  %v10263_v28 = vsel %vm10254_vm7, %v10230_v30, %v21538_v34  ;;  %v21539_v11 = vld [vmem:[#allocation261_spill] sm:$0xff] }
 0x5f4   :  { %9859 = vrot.lane.b32.xlu0 %v21532_v53, %s10653_s2  ;;  %v10223_v5 = vsel %vm10221_vm6, %v10190_v12, %v21533_v0  ;;  %v10360_v22 = vsel %vm10353_vm10, %v10327_v46, %v21536_v32  ;;  %v10385_v53 = vsel %vm10353_vm10, %v10352_v38, %v16657_v48  ;;  %v9606_v0 = vpop.permute.xlu1 %9605  ;;  %v21540_v51 = vld [vmem:[#allocation263_spill] sm:$0xff]  ;;  %v21541_v30 = vld [vmem:[#allocation104_spill] sm:$0xff] }
 0x5f5   :  { %v10256_v36 = vsel %vm10254_vm7, %v10223_v5, %v21537_v33  ;;  %v10393_v12 = vsel %vm10386_vm11, %v10360_v22, %v16659_v14  ;;  %v10296_v46 = vsel %vm10287_vm8, %v10263_v28, %v21540_v51  ;;  %v17461_v32 = vsel %vm10386_vm11, %v10385_v53, %v9606_v0  ;;  %v21542_v14 = vld [vmem:[#allocation475_spill] sm:$0xff]  ;;  %v21544_v22 = vld [vmem:[#allocation396_spill] sm:$0xff]  ;;  %v21545_v28 = vld [vmem:[#allocation173_spill] sm:$0xff] }
 0x5f6   :  { %v10289_v29 = vsel %vm10287_vm8, %v10256_v36, %v21539_v11  ;;  %v17464_v33 = vsel %vm10419_vm12, %v10393_v12, %v9684_v10  ;;  %v17469_v48 = vsel %vm10188_vm5, %v17210_v41, %v21541_v30  ;;  %v21543_v5 = vld [vmem:[#allocation11_spill] sm:$0xff]  ;;  %v21546_v36 = vcombine.low %v21544_v22, %v21545_v28  ;;  %v21548_v12 = vld [vmem:[#allocation182_spill] sm:$0xff]  ;;  %v21549_v0 = vld [vmem:[#allocation181_spill] sm:$0xff] }
 0x5f7   :  { %v10322_v34 = vsel %vm10320_vm9, %v10289_v29, %v21542_v14  ;;  %v10329_v38 = vsel %vm10320_vm9, %v10296_v46, %v21543_v5  ;;  %v21547_v53 = vcombine.high %v21137_v15, %v21138_v56  ;;  %v10225_v41 = vsel %vm10221_vm6, %v10192_v9, %v21548_v12  ;;  %v21550_v11 = vld [vmem:[#allocation264_spill] sm:$0xff]  ;;  %v21551_v51 = vld [vmem:[#allocation109_spill] sm:$0xff] }
 0x5f8   :  { %9849 = vrot.lane.b32.xlu1 %v21546_v36, %s10653_s2  ;;  %v10232_v10 = vsel %vm10221_vm6, %v10199_v39, %v21549_v0  ;;  %v10355_v29 = vsel %vm10353_vm10, %v10322_v34, %v21550_v11  ;;  %v10362_v46 = vsel %vm10353_vm10, %v10329_v38, %v21551_v51  ;;  %v21552_v30 = vld [vmem:[#allocation305_spill] sm:$0xff]  ;;  %v9674_v9 = vpop.permute.xlu1 %9673  ;;  %v9688_v39 = vpop.permute.xlu0 %9687  ;;  %v21555_v12 = vld [vmem:[#allocation184_spill] sm:$0xff] }
 0x5f9   :  { %9927 = vrot.lane.b32.xlu0 %v21547_v53, %s10654_s3  ;;  %v10258_v14 = vsel %vm10254_vm7, %v10225_v41, %v21552_v30  ;;  %v21553_v5 = vld [vmem:[#allocation453_spill] sm:$0xff]  ;;  %v10388_v15 = vsel %vm10386_vm11, %v10355_v29, %v16669_v50  ;;  %v10395_v56 = vsel %vm10386_vm11, %v10362_v46, %v16671_v35  ;;  %v21554_v53 = vld [vmem:[#allocation183_spill] sm:$0xff]  ;;  %v21558_v29 = vld [vmem:[#allocation384_spill] sm:$0xff] }
 0x5fa   :  { %v10265_v36 = vsel %vm10254_vm7, %v10232_v10, %v21553_v5  ;;  %v10291_v34 = vsel %vm10287_vm8, %v10258_v14, %v21554_v53  ;;  %v17504_v0 = vsel %vm10419_vm12, %v10388_v15, %v9674_v9  ;;  %v17507_v41 = vsel %vm10419_vm12, %v10395_v56, %v9688_v39  ;;  %v21556_v10 = vld [vmem:[#allocation103_spill] sm:$0xff]  ;;  %v21557_v35 = vld [vmem:[#allocation41_spill] sm:$0xff]  ;;  %v21564_v15 = vld [vmem:[#allocation286_spill] sm:$0xff] }
 0x5fb   :  { %v10298_v38 = vsel %vm10287_vm8, %v10265_v36, %v21555_v12  ;;  %v17512_v50 = vsel %vm10188_vm5, %v17226_v23, %v21556_v10  ;;  %v10324_v11 = vsel %vm10320_vm9, %v10291_v34, %v21557_v35  ;;  %v21559_v46 = vld [vmem:[#allocation117_spill] sm:$0xff]  ;;  %v21560_v30 = vld [vmem:[#allocation227_spill] sm:$0xff]  ;;  %v21562_v5 = vcombine.high %v21141_v21, %v21142_v17  ;;  %v21565_v9 = vld [vmem:[#allocation186_spill] sm:$0xff] }
 0x5fc   :  { %v10331_v51 = vsel %vm10320_vm9, %v10298_v38, %v21558_v29  ;;  %v21561_v14 = vcombine.low %v21559_v46, %v21560_v30  ;;  %v21563_v36 = vld [vmem:[#allocation287_spill] sm:$0xff]  ;;  %v10234_v56 = vsel %vm10221_vm6, %v17360_v3, %v21564_v15  ;;  %v10357_v39 = vsel %vm10353_vm10, %v10324_v11, %v21565_v9  ;;  %v21566_v53 = vld [vmem:[#allocation185_spill] sm:$0xff]  ;;  %v21567_v12 = vld [vmem:[#allocation484_spill] sm:$0xff]  ;;  %v9678_v35 = vpop.permute.xlu1 %9677  ;;  %v9692_v3 = vpop.permute.xlu0 %9691 }
 0x5fd   :  { %9931 = vrot.lane.b32.xlu0 %v21562_v5, %s10654_s3  ;;  %v10227_v23 = vsel %vm10221_vm6, %v17355_v44, %v21563_v36  ;;  %v10364_v34 = vsel %vm10353_vm10, %v10331_v51, %v21566_v53  ;;  %v21568_v10 = vld [vmem:[#allocation406_spill] sm:$0xff]  ;;  %v10390_v17 = vsel %vm10386_vm11, %v10357_v39, %v16691_v40  ;;  %v21569_v29 = vld [vmem:[#allocation293_spill] sm:$0xff]  ;;  %v21574_v39 = vld [vmem:[#allocation368_spill] sm:$0xff] }
 0x5fe   :  { %9853 = vrot.lane.b32.xlu1 %v21561_v14, %s10653_s2  ;;  %v10260_v38 = vsel %vm10254_vm7, %v10227_v23, %v21567_v12  ;;  %v10267_v21 = vsel %vm10254_vm7, %v10234_v56, %v21568_v10  ;;  %v10397_v44 = vsel %vm10386_vm11, %v10364_v34, %v16693_v57  ;;  %v21570_v14 = vld [vmem:[#allocation295_spill] sm:$0xff]  ;;  %v17549_v5 = vsel %vm10419_vm12, %v10390_v17, %v9678_v35  ;;  %v21571_v23 = vld [vmem:[#allocation34_spill] sm:$0xff]  ;;  %v21572_v57 = vld [vmem:[#allocation489_spill] sm:$0xff] }
 0x5ff   :  { %v10293_v11 = vsel %vm10287_vm8, %v10260_v38, %v21569_v29  ;;  %v10300_v51 = vsel %vm10287_vm8, %v10267_v21, %v21570_v14  ;;  %v17552_v36 = vsel %vm10419_vm12, %v10397_v44, %v9692_v3  ;;  %v17557_v40 = vsel %vm10188_vm5, %v17234_v31, %v21571_v23  ;;  %v21573_v56 = vld [vmem:[#allocation23_spill] sm:$0xff]  ;;  %v21575_v53 = vld [vmem:[#allocation424_spill] sm:$0xff]  ;;  %v21578_v38 = vld [vmem:[#allocation213_spill] sm:$0xff] }
 0x600   :  { %v10326_v15 = vsel %vm10320_vm9, %v10293_v11, %v21572_v57  ;;  %v10333_v9 = vsel %vm10320_vm9, %v10300_v51, %v21573_v56  ;;  %v21576_v34 = vcombine.low %v21574_v39, %v21575_v53  ;;  %v21577_v12 = vcombine.high %v21181_v8, %v21182_v45  ;;  %v21579_v10 = vld [vmem:[#allocation212_spill] sm:$0xff]  ;;  %v21580_v35 = vld [vmem:[#allocation21_spill] sm:$0xff]  ;;  %v21581_v29 = vld [vmem:[#allocation19_spill] sm:$0xff]  ;;  %v9682_v14 = vpop.permute.xlu1 %9681 }
 0x601   :  { %v10229_v31 = vsel %vm10221_vm6, %v17370_v24, %v21578_v38  ;;  %v10236_v21 = vsel %vm10221_vm6, %v17375_v2, %v21579_v10  ;;  %v10359_v17 = vsel %vm10353_vm10, %v10326_v15, %v16502_v43  ;;  %v10366_v44 = vsel %vm10353_vm10, %v10333_v9, %v16504_v59  ;;  %v21582_v24 = vld [vmem:[#allocation463_spill] sm:$0xff]  ;;  %v9696_v2 = vpop.permute.xlu0 %9695  ;;  %v21583_v51 = vld [vmem:[#allocation214_spill] sm:$0xff]  ;;  %v21585_v56 = vld [vmem:[#allocation32_spill] sm:$0xff] }
 0x602   :  { %9857 = vrot.lane.b32.xlu1 %v21576_v34, %s10653_s2  ;;  %9935 = vrot.lane.b32.xlu0 %v21577_v12, %s10654_s3  ;;  %v10262_v3 = vsel %vm10254_vm7, %v10229_v31, %v21580_v35  ;;  %v10269_v8 = vsel %vm10254_vm7, %v10236_v21, %v21581_v29  ;;  %v10392_v45 = vsel %vm10386_vm11, %v10359_v17, %v16778_v42  ;;  %v21584_v23 = vld [vmem:[#allocation215_spill] sm:$0xff]  ;;  %v21586_v9 = vld [vmem:[#allocation22_spill] sm:$0xff]  ;;  %v21588_v31 = vld [vmem:[#allocation473_spill] sm:$0xff] }
 0x603   :  { %v10399_v11 = vsel %vm10386_vm11, %v10366_v44, %v21582_v24  ;;  %v10295_v43 = vsel %vm10287_vm8, %v10262_v3, %v21583_v51  ;;  %v10302_v59 = vsel %vm10287_vm8, %v10269_v8, %v21584_v23  ;;  %v17594_v57 = vsel %vm10419_vm12, %v10392_v45, %v9682_v14  ;;  %v21587_v12 = vld [vmem:[#allocation414_spill] sm:$0xff]  ;;  %v21589_v10 = vld [vmem:[#allocation472_spill] sm:$0xff]  ;;  %v21591_v17 = vld [vmem:[#allocation299_spill] sm:$0xff] }
 0x604   :  { %v17597_v15 = vsel %vm10419_vm12, %v10399_v11, %v9696_v2  ;;  %v17602_v42 = vsel %vm10188_vm5, %v17244_v4, %v21585_v56  ;;  %v10328_v34 = vsel %vm10320_vm9, %v10295_v43, %v21586_v9  ;;  %v10335_v38 = vsel %vm10320_vm9, %v10302_v59, %v21587_v12  ;;  %v21592_v44 = vld [vmem:[#allocation300_spill] sm:$0xff]  ;;  %v21594_v3 = vld [vmem:[#allocation323_spill] sm:$0xff]  ;;  %v21595_v29 = vld [vmem:[#allocation321_spill] sm:$0xff]  ;;  %v9686_v12 = vpop.permute.xlu1 %9685 }
 0x605   :  { %v21590_v21 = vcombine.low %v21588_v31, %v21589_v10  ;;  %v21593_v35 = vcombine.high %v21591_v17, %v21592_v44  ;;  %v10231_v4 = vsel %vm10221_vm6, %v17390_v61, %v21594_v3  ;;  %v10238_v8 = vsel %vm10221_vm6, %v17401_v7, %v21595_v29  ;;  %v21596_v45 = vld [vmem:[#allocation298_spill] sm:$0xff]  ;;  %v21597_v11 = vld [vmem:[#allocation297_spill] sm:$0xff]  ;;  %v21598_v2 = vld [vmem:[#allocation47_spill] sm:$0xff]  ;;  %v9700_v7 = vpop.permute.xlu0 %9699 }
 0x606   :  { %v10361_v24 = vsel %vm10353_vm10, %v10328_v34, %v21596_v45  ;;  %v10368_v14 = vsel %vm10353_vm10, %v10335_v38, %v21597_v11  ;;  %v10264_v51 = vsel %vm10254_vm7, %v10231_v4, %v21598_v2  ;;  %v21599_v43 = vld [vmem:[#allocation49_spill] sm:$0xff]  ;;  %v21600_v59 = vld [vmem:[#allocation386_spill] sm:$0xff]  ;;  %v21603_v17 = vld [vmem:[#allocation332_spill] sm:$0xff] }
 0x607   :  { %9861 = vrot.lane.b32.xlu1 %v21590_v21, %s10653_s2  ;;  %9939 = vrot.lane.b32.xlu0 %v21593_v35, %s10654_s3  ;;  %v10271_v23 = vsel %vm10254_vm7, %v10238_v8, %v21599_v43  ;;  %v10394_v56 = vsel %vm10386_vm11, %v10361_v24, %v21600_v59  ;;  %v21601_v61 = vld [vmem:[#allocation493_spill] sm:$0xff]  ;;  %v21602_v21 = vld [vmem:[#allocation330_spill] sm:$0xff]  ;;  %v21604_v3 = vld [vmem:[#allocation136_spill] sm:$0xff] }
 0x608   :  { %v10401_v9 = vsel %vm10386_vm11, %v10368_v14, %v21601_v61  ;;  %v10297_v34 = vsel %vm10287_vm8, %v10264_v51, %v21602_v21  ;;  %v10304_v38 = vsel %vm10287_vm8, %v10271_v23, %v21603_v17  ;;  %v17639_v44 = vsel %vm10419_vm12, %v10394_v56, %v9686_v12  ;;  %v21605_v29 = vld [vmem:[#allocation51_spill] sm:$0xff]  ;;  %v21606_v45 = vld [vmem:[#allocation50_spill] sm:$0xff]  ;;  %v21611_v43 = vld [vmem:[#allocation320_spill] sm:$0xff] }
 0x609   :  { %v17642_v35 = vsel %vm10419_vm12, %v10401_v9, %v9700_v7  ;;  %v17647_v4 = vsel %vm10188_vm5, %v17248_v58, %v21604_v3  ;;  %v10330_v8 = vsel %vm10320_vm9, %v10297_v34, %v21605_v29  ;;  %v10337_v24 = vsel %vm10320_vm9, %v10304_v38, %v21606_v45  ;;  %v21607_v11 = vld [vmem:[#allocation302_spill] sm:$0xff]  ;;  %v21608_v14 = vld [vmem:[#allocation303_spill] sm:$0xff]  ;;  %v21613_v59 = vld [vmem:[#allocation245_spill] sm:$0xff] }
 0x60a   :  { %v21609_v2 = vcombine.high %v21607_v11, %v21608_v14  ;;  %v21610_v51 = vld [vmem:[#allocation319_spill] sm:$0xff]  ;;  %v10233_v58 = vsel %vm10221_vm6, %v17414_v13, %v21613_v59  ;;  %v21614_v56 = vld [vmem:[#allocation244_spill] sm:$0xff]  ;;  %v21615_v9 = vld [vmem:[#allocation217_spill] sm:$0xff]  ;;  %v9690_v14 = vpop.permute.xlu1 %9689 }
 0x60b   :  { %v21612_v23 = vcombine.high %v21610_v51, %v21611_v43  ;;  %v10240_v61 = vsel %vm10221_vm6, %v17426_v25, %v21614_v56  ;;  %v10363_v12 = vsel %vm10353_vm10, %v10330_v8, %v21615_v9  ;;  %v21616_v7 = vld [vmem:[#allocation216_spill] sm:$0xff]  ;;  %v21617_v34 = vld [vmem:[#allocation75_spill] sm:$0xff]  ;;  %v21618_v38 = vld [vmem:[#allocation77_spill] sm:$0xff]  ;;  %v9704_v25 = vpop.permute.xlu0 %9703 }
 0x60c   :  { %9929 = vrot.lane.b32.xlu1 %v21609_v2, %s10654_s3  ;;  %v10370_v21 = vsel %vm10353_vm10, %v10337_v24, %v21616_v7  ;;  %v10266_v17 = vsel %vm10254_vm7, %v10233_v58, %v21617_v34  ;;  %v10273_v3 = vsel %vm10254_vm7, %v10240_v61, %v21618_v38  ;;  %v21619_v29 = vld [vmem:[#allocation415_spill] sm:$0xff]  ;;  %v21621_v2 = vld [vmem:[#allocation246_spill] sm:$0xff]  ;;  %v21626_v7 = vld [vmem:[#allocation336_spill] sm:$0xff] }
 0x60d   :  { %9943 = vrot.lane.b32.xlu0 %v21612_v23, %s10654_s3  ;;  %v10396_v45 = vsel %vm10386_vm11, %v10363_v12, %v21619_v29  ;;  %v21620_v13 = vld [vmem:[#allocation435_spill] sm:$0xff]  ;;  %v10299_v8 = vsel %vm10287_vm8, %v10266_v17, %v21621_v2  ;;  %v21625_v9 = vld [vmem:[#allocation78_spill] sm:$0xff]  ;;  %v21629_v17 = vld [vmem:[#allocation357_spill] sm:$0xff] }
 0x60e   :  { %v10403_v11 = vsel %vm10386_vm11, %v10370_v21, %v21620_v13  ;;  %v21622_v51 = vld [vmem:[#allocation247_spill] sm:$0xff]  ;;  %v17684_v43 = vsel %vm10419_vm12, %v10396_v45, %v9690_v14  ;;  %v21627_v21 = vld [vmem:[#allocation337_spill] sm:$0xff]  ;;  %v21630_v38 = vcombine.high %v21314_v49, %v21629_v17  ;;  %v21632_v29 = vld [vmem:[#allocation358_spill] sm:$0xff] }
 0x60f   :  { %v10306_v24 = vsel %vm10287_vm8, %v10273_v3, %v21622_v51  ;;  %v17687_v23 = vsel %vm10419_vm12, %v10403_v11, %v9704_v25  ;;  %v21623_v59 = vld [vmem:[#allocation135_spill] sm:$0xff]  ;;  %v21628_v34 = vcombine.high %v21626_v7, %v21627_v21  ;;  %v21631_v3 = vld [vmem:[#allocation360_spill] sm:$0xff]  ;;  %v10242_v45 = vsel %vm10221_vm6, %v17512_v50, %v21632_v29  ;;  %v21633_v13 = vld [vmem:[#allocation334_spill] sm:$0xff]  ;;  %v9708_v50 = vpop.permute.xlu0 %9707 }
 0x610   :  { %v10213_v58 = vsel %vm10188_vm5, %v17257_v54, %v21623_v59  ;;  %v21624_v56 = vld [vmem:[#allocation79_spill] sm:$0xff]  ;;  %v10339_v12 = vsel %vm10320_vm9, %v10306_v24, %v21625_v9  ;;  %v10235_v54 = vsel %vm10221_vm6, %v17469_v48, %v21631_v3  ;;  %v21634_v14 = vld [vmem:[#allocation158_spill] sm:$0xff]  ;;  %v21635_v2 = vld [vmem:[#allocation105_spill] sm:$0xff]  ;;  %v9694_v9 = vpop.permute.xlu1 %9693 }
 0x611   :  { %v10332_v61 = vsel %vm10320_vm9, %v10299_v8, %v21624_v56  ;;  %9933 = vrot.lane.b32.xlu1 %v21628_v34, %s10654_s3  ;;  %9947 = vrot.lane.b32.xlu0 %v21630_v38, %s10654_s3  ;;  %v10372_v25 = vsel %vm10353_vm10, %v10339_v12, %v21634_v14  ;;  %v10268_v8 = vsel %vm10254_vm7, %v10235_v54, %v21635_v2  ;;  %v21636_v51 = vld [vmem:[#allocation106_spill] sm:$0xff]  ;;  %v21637_v24 = vld [vmem:[#allocation467_spill] sm:$0xff]  ;;  %v21638_v48 = vld [vmem:[#allocation449_spill] sm:$0xff] }
 0x612   :  { %v10365_v11 = vsel %vm10353_vm10, %v10332_v61, %v21633_v13  ;;  %v10275_v49 = vsel %vm10254_vm7, %v10242_v45, %v21636_v51  ;;  %v10405_v56 = vsel %vm10386_vm11, %v10372_v25, %v21638_v48  ;;  %v21639_v7 = vld [vmem:[#allocation367_spill] sm:$0xff]  ;;  %v21640_v21 = vld [vmem:[#allocation369_spill] sm:$0xff]  ;;  %v21641_v38 = vld [vmem:[#allocation62_spill] sm:$0xff] }
 0x613   :  { %v10398_v59 = vsel %vm10386_vm11, %v10365_v11, %v21637_v24  ;;  %v10301_v61 = vsel %vm10287_vm8, %v10268_v8, %v21639_v7  ;;  %v10308_v12 = vsel %vm10287_vm8, %v10275_v49, %v21640_v21  ;;  %v17730_v17 = vsel %vm10419_vm12, %v10405_v56, %v9708_v50  ;;  %v21642_v54 = vld [vmem:[#allocation108_spill] sm:$0xff]  ;;  %v21643_v45 = vld [vmem:[#allocation107_spill] sm:$0xff]  ;;  %v21644_v11 = vld [vmem:[#allocation354_spill] sm:$0xff] }
 0x614   :  { %v17727_v34 = vsel %vm10419_vm12, %v10398_v59, %v9694_v9  ;;  %v10208_v3 = vsel %vm10188_vm5, %v17274_v55, %v21641_v38  ;;  %v10334_v29 = vsel %vm10320_vm9, %v10301_v61, %v21642_v54  ;;  %v10341_v13 = vsel %vm10320_vm9, %v10308_v12, %v21643_v45  ;;  %v21645_v14 = vld [vmem:[#allocation355_spill] sm:$0xff]  ;;  %v21647_v2 = vld [vmem:[#allocation390_spill] sm:$0xff]  ;;  %v21651_v24 = vld [vmem:[#allocation268_spill] sm:$0xff] }
 0x615   :  { %v21646_v25 = vcombine.high %v21644_v11, %v21645_v14  ;;  %v21648_v8 = vld [vmem:[#allocation391_spill] sm:$0xff]  ;;  %v21650_v49 = vld [vmem:[#allocation270_spill] sm:$0xff]  ;;  %v10244_v59 = vsel %vm10221_vm6, %v17602_v42, %v21651_v24  ;;  %v21653_v9 = vld [vmem:[#allocation249_spill] sm:$0xff]  ;;  %v9698_v11 = vpop.permute.xlu1 %9697  ;;  %v9712_v42 = vpop.permute.xlu0 %9711 }
 0x616   :  { %v21649_v51 = vcombine.high %v21647_v2, %v21648_v8  ;;  %v10237_v55 = vsel %vm10221_vm6, %v17557_v40, %v21650_v49  ;;  %v21652_v48 = vld [vmem:[#allocation250_spill] sm:$0xff]  ;;  %v10374_v50 = vsel %vm10353_vm10, %v10341_v13, %v21653_v9  ;;  %v21654_v7 = vld [vmem:[#allocation33_spill] sm:$0xff]  ;;  %v21655_v21 = vld [vmem:[#allocation35_spill] sm:$0xff] }
 0x617   :  { %9937 = vrot.lane.b32.xlu1 %v21646_v25, %s10654_s3  ;;  %v10367_v56 = vsel %vm10353_vm10, %v10334_v29, %v21652_v48  ;;  %v10270_v61 = vsel %vm10254_vm7, %v10237_v55, %v21654_v7  ;;  %v10277_v12 = vsel %vm10254_vm7, %v10244_v59, %v21655_v21  ;;  %v21656_v38 = vld [vmem:[#allocation258_spill] sm:$0xff]  ;;  %v21657_v40 = vld [vmem:[#allocation148_spill] sm:$0xff]  ;;  %v21659_v25 = vld [vmem:[#allocation279_spill] sm:$0xff] }
 0x618   :  { %9951 = vrot.lane.b32.xlu0 %v21649_v51, %s10654_s3  ;;  %v10400_v54 = vsel %vm10386_vm11, %v10367_v56, %v21656_v38  ;;  %v10407_v45 = vsel %vm10386_vm11, %v10374_v50, %v21657_v40  ;;  %v21658_v14 = vld [vmem:[#allocation278_spill] sm:$0xff]  ;;  %v10310_v13 = vsel %vm10287_vm8, %v10277_v12, %v21659_v25  ;;  %v21660_v51 = vld [vmem:[#allocation60_spill] sm:$0xff]  ;;  %v21661_v55 = vld [vmem:[#allocation37_spill] sm:$0xff] }
 0x619   :  { %v10303_v29 = vsel %vm10287_vm8, %v10270_v61, %v21658_v14  ;;  %v17770_v2 = vsel %vm10419_vm12, %v10400_v54, %v9698_v11  ;;  %v17773_v8 = vsel %vm10419_vm12, %v10407_v45, %v9712_v42  ;;  %v10215_v49 = vsel %vm10188_vm5, %v17279_v52, %v21660_v51  ;;  %v21662_v59 = vld [vmem:[#allocation36_spill] sm:$0xff]  ;;  %v21664_v9 = vld [vmem:[#allocation389_spill] sm:$0xff]  ;;  %v21667_v61 = vld [vmem:[#allocation422_spill] sm:$0xff] }
 0x61a   :  { %v10336_v24 = vsel %vm10320_vm9, %v10303_v29, %v21661_v55  ;;  %v10343_v48 = vsel %vm10320_vm9, %v10310_v13, %v21662_v59  ;;  %v21663_v56 = vld [vmem:[#allocation388_spill] sm:$0xff]  ;;  %v21666_v7 = vld [vmem:[#allocation421_spill] sm:$0xff]  ;;  %v21669_v12 = vld [vmem:[#allocation394_spill] sm:$0xff] }
 0x61b   :  { %v21665_v50 = vcombine.high %v21663_v56, %v21664_v9  ;;  %v21668_v21 = vcombine.high %v21666_v7, %v21667_v61  ;;  %v10239_v52 = vsel %vm10221_vm6, %v17647_v4, %v21669_v12  ;;  %v21670_v38 = vld [vmem:[#allocation392_spill] sm:$0xff]  ;;  %v21671_v40 = vld [vmem:[#allocation371_spill] sm:$0xff]  ;;  %v21672_v11 = vld [vmem:[#allocation370_spill] sm:$0xff]  ;;  %v9702_v56 = vpop.permute.xlu1 %9701 }
 0x61c   :  { %v10246_v54 = vsel %vm10221_vm6, %v10213_v58, %v21670_v38  ;;  %v10369_v45 = vsel %vm10353_vm10, %v10336_v24, %v21671_v40  ;;  %v10376_v42 = vsel %vm10353_vm10, %v10343_v48, %v21672_v11  ;;  %v21673_v14 = vld [vmem:[#allocation137_spill] sm:$0xff]  ;;  %v21674_v25 = vld [vmem:[#allocation138_spill] sm:$0xff]  ;;  %v9716_v58 = vpop.permute.xlu0 %9715 }
 0x61d   :  { %9941 = vrot.lane.b32.xlu1 %v21665_v50, %s10654_s3  ;;  %9955 = vrot.lane.b32.xlu0 %v21668_v21, %s10654_s3  ;;  %v10272_v29 = vsel %vm10254_vm7, %v10239_v52, %v21673_v14  ;;  %v10279_v13 = vsel %vm10254_vm7, %v10246_v54, %v21674_v25  ;;  %v21675_v51 = vld [vmem:[#allocation466_spill] sm:$0xff]  ;;  %v21677_v9 = vld [vmem:[#allocation401_spill] sm:$0xff]  ;;  %v21678_v50 = vld [vmem:[#allocation403_spill] sm:$0xff] }
 0x61e   :  { %v10402_v55 = vsel %vm10386_vm11, %v10369_v45, %v21675_v51  ;;  %v21676_v59 = vld [vmem:[#allocation494_spill] sm:$0xff]  ;;  %v10305_v24 = vsel %vm10287_vm8, %v10272_v29, %v21677_v9  ;;  %v10312_v48 = vsel %vm10287_vm8, %v10279_v13, %v21678_v50  ;;  %v21679_v21 = vld [vmem:[#allocation167_spill] sm:$0xff]  ;;  %v21680_v52 = vld [vmem:[#allocation140_spill] sm:$0xff] }
 0x61f   :  { %v10409_v4 = vsel %vm10386_vm11, %v10376_v42, %v21676_v59  ;;  %v17812_v7 = vsel %vm10419_vm12, %v10402_v55, %v9702_v56  ;;  %v10210_v12 = vsel %vm10188_vm5, %v17288_v1, %v21679_v21  ;;  %v10338_v38 = vsel %vm10320_vm9, %v10305_v24, %v21680_v52  ;;  %v21681_v54 = vld [vmem:[#allocation139_spill] sm:$0xff]  ;;  %v21682_v45 = vld [vmem:[#allocation141_spill] sm:$0xff]  ;;  %v21686_v29 = vld [vmem:[#allocation448_spill] sm:$0xff] }
 0x620   :  { %v17815_v61 = vsel %vm10419_vm12, %v10409_v4, %v9716_v58  ;;  %v10345_v40 = vsel %vm10320_vm9, %v10312_v48, %v21681_v54  ;;  %v21683_v11 = vld [vmem:[#allocation417_spill] sm:$0xff]  ;;  %v21685_v14 = vld [vmem:[#allocation447_spill] sm:$0xff]  ;;  %v21688_v13 = vld [vmem:[#allocation306_spill] sm:$0xff]  ;;  %v9706_v54 = vpop.permute.xlu1 %9705 }
 0x621   :  { %v21684_v42 = vcombine.high %v21682_v45, %v21683_v11  ;;  %v21687_v25 = vcombine.high %v21685_v14, %v21686_v29  ;;  %v10241_v51 = vsel %vm10221_vm6, %v10208_v3, %v21688_v13  ;;  %v21689_v1 = vld [vmem:[#allocation304_spill] sm:$0xff]  ;;  %v21690_v59 = vld [vmem:[#allocation282_spill] sm:$0xff]  ;;  %v21692_v9 = vld [vmem:[#allocation61_spill] sm:$0xff] }
 0x622   :  { %v10248_v55 = vsel %vm10221_vm6, %v10215_v49, %v21689_v1  ;;  %v10371_v4 = vsel %vm10353_vm10, %v10338_v38, %v21690_v59  ;;  %v21691_v56 = vld [vmem:[#allocation280_spill] sm:$0xff]  ;;  %v10274_v24 = vsel %vm10254_vm7, %v10241_v51, %v21692_v9  ;;  %v21693_v50 = vld [vmem:[#allocation63_spill] sm:$0xff]  ;;  %v9720_v49 = vpop.permute.xlu0 %9719  ;;  %v21695_v45 = vld [vmem:[#allocation314_spill] sm:$0xff] }
 0x623   :  { %9945 = vrot.lane.b32.xlu1 %v21684_v42, %s10654_s3  ;;  %9959 = vrot.lane.b32.xlu0 %v21687_v25, %s10654_s3  ;;  %v10378_v58 = vsel %vm10353_vm10, %v10345_v40, %v21691_v56  ;;  %v10281_v48 = vsel %vm10254_vm7, %v10248_v55, %v21693_v50  ;;  %v10404_v21 = vsel %vm10386_vm11, %v10371_v4, %v17076_v63  ;;  %v21694_v52 = vld [vmem:[#allocation419_spill] sm:$0xff]  ;;  %v21697_v29 = vld [vmem:[#allocation166_spill] sm:$0xff]  ;;  %v21698_v25 = vld [vmem:[#allocation65_spill] sm:$0xff] }
 0x624   :  { %v10411_v3 = vsel %vm10386_vm11, %v10378_v58, %v21694_v52  ;;  %v10307_v38 = vsel %vm10287_vm8, %v10274_v24, %v21695_v45  ;;  %v21696_v11 = vld [vmem:[#allocation315_spill] sm:$0xff]  ;;  %v17853_v42 = vsel %vm10419_vm12, %v10404_v21, %v9706_v54  ;;  %v10217_v63 = vsel %vm10188_vm5, %v17293_v47, %v21697_v29  ;;  %v21699_v51 = vld [vmem:[#allocation64_spill] sm:$0xff]  ;;  %v21702_v4 = vld [vmem:[#allocation477_spill] sm:$0xff]  ;;  %v9710_v29 = vpop.permute.xlu1 %9709 }
 0x625   :  { %v10314_v40 = vsel %vm10287_vm8, %v10281_v48, %v21696_v11  ;;  %v17856_v14 = vsel %vm10419_vm12, %v10411_v3, %v9720_v49  ;;  %v10340_v13 = vsel %vm10320_vm9, %v10307_v38, %v21698_v25  ;;  %v21700_v55 = vld [vmem:[#allocation420_spill] sm:$0xff]  ;;  %v21703_v56 = vld [vmem:[#allocation479_spill] sm:$0xff]  ;;  %v21705_v9 = vld [vmem:[#allocation426_spill] sm:$0xff] }
 0x626   :  { %v10347_v1 = vsel %vm10320_vm9, %v10314_v40, %v21699_v51  ;;  %v21701_v59 = vcombine.high %v21403_v16, %v21700_v55  ;;  %v21704_v58 = vcombine.high %v21702_v4, %v21703_v56  ;;  %v10243_v24 = vsel %vm10221_vm6, %v10210_v12, %v21705_v9  ;;  %v21706_v47 = vld [vmem:[#allocation425_spill] sm:$0xff]  ;;  %v21707_v48 = vld [vmem:[#allocation404_spill] sm:$0xff]  ;;  %v21711_v38 = vld [vmem:[#allocation187_spill] sm:$0xff] }
 0x627   :  { %v10250_v50 = vsel %vm10221_vm6, %v10217_v63, %v21706_v47  ;;  %v10373_v21 = vsel %vm10353_vm10, %v10340_v13, %v21707_v48  ;;  %v21708_v52 = vld [vmem:[#allocation220_spill] sm:$0xff]  ;;  %v21710_v49 = vld [vmem:[#allocation169_spill] sm:$0xff]  ;;  %v21712_v40 = vld [vmem:[#allocation251_spill] sm:$0xff]  ;;  %v9724_v63 = vpop.permute.xlu0 %9723 }
 0x628   :  { %9949 = vrot.lane.b32.xlu1 %v21701_v59, %s10654_s3  ;;  %9963 = vrot.lane.b32.xlu0 %v21704_v58, %s10654_s3  ;;  %v10380_v3 = vsel %vm10353_vm10, %v10347_v1, %v21708_v52  ;;  %v21709_v54 = vld [vmem:[#allocation168_spill] sm:$0xff]  ;;  %v10283_v45 = vsel %vm10254_vm7, %v10250_v50, %v21710_v49  ;;  %v10406_v11 = vsel %vm10386_vm11, %v10373_v21, %v21711_v38  ;;  %v21713_v25 = vld [vmem:[#allocation431_spill] sm:$0xff]  ;;  %v21714_v51 = vld [vmem:[#allocation433_spill] sm:$0xff] }
 0x629   :  { %v10276_v16 = vsel %vm10254_vm7, %v10243_v24, %v21709_v54  ;;  %v10413_v12 = vsel %vm10386_vm11, %v10380_v3, %v21712_v40  ;;  %v10316_v1 = vsel %vm10287_vm8, %v10283_v45, %v21714_v51  ;;  %v17894_v55 = vsel %vm10419_vm12, %v10406_v11, %v9710_v29  ;;  %v21715_v4 = vld [vmem:[#allocation89_spill] sm:$0xff]  ;;  %v21716_v58 = vld [vmem:[#allocation171_spill] sm:$0xff]  ;;  %v21717_v24 = vld [vmem:[#allocation170_spill] sm:$0xff] }
 0x62a   :  { %v10309_v13 = vsel %vm10287_vm8, %v10276_v16, %v21713_v25  ;;  %v17897_v59 = vsel %vm10419_vm12, %v10413_v12, %v9724_v63  ;;  %v10212_v56 = vsel %vm10188_vm5, %v17304_v19, %v21715_v4  ;;  %v10349_v47 = vsel %vm10320_vm9, %v10316_v1, %v21717_v24  ;;  %v21718_v50 = vld [vmem:[#allocation236_spill] sm:$0xff]  ;;  %v21719_v48 = vld [vmem:[#allocation253_spill] sm:$0xff]  ;;  %v21722_v3 = vld [vmem:[#allocation98_spill] sm:$0xff] }
 0x62b   :  { %v10342_v9 = vsel %vm10320_vm9, %v10309_v13, %v21716_v58  ;;  %v21720_v21 = vcombine.high %v21718_v50, %v21719_v48  ;;  %v21721_v52 = vld [vmem:[#allocation96_spill] sm:$0xff]  ;;  %v21725_v49 = vld [vmem:[#allocation439_spill] sm:$0xff]  ;;  %v21727_v11 = vld [vmem:[#allocation318_spill] sm:$0xff]  ;;  %v9714_v50 = vpop.permute.xlu1 %9713 }
 0x62c   :  { %v21723_v54 = vcombine.high %v21721_v52, %v21722_v3  ;;  %v21724_v16 = vld [vmem:[#allocation380_spill] sm:$0xff]  ;;  %v10375_v40 = vsel %vm10353_vm10, %v10342_v9, %v21727_v11  ;;  %v21729_v63 = vld [vmem:[#allocation194_spill] sm:$0xff]  ;;  %v21732_v58 = vld [vmem:[#allocation267_spill] sm:$0xff] }
 0x62d   :  { %9953 = vrot.lane.b32.xlu1 %v21720_v21, %s10654_s3  ;;  %v10115_v19 = vsel %vm10089_vm2, %v21725_v49, %v21724_v16  ;;  %v21726_v45 = vld [vmem:[#allocation340_spill] sm:$0xff]  ;;  %v21730_v13 = vld [vmem:[#allocation90_spill] sm:$0xff]  ;;  %v21734_v21 = vld [vmem:[#allocation349_spill] sm:$0xff] }
 0x62e   :  { %9967 = vrot.lane.b32.xlu0 %v21723_v54, %s10654_s3  ;;  %v10245_v38 = vsel %vm10221_vm6, %v10212_v56, %v21726_v45  ;;  %v21728_v12 = vld [vmem:[#allocation316_spill] sm:$0xff]  ;;  %v10148_v25 = vsel %vm10122_vm3, %v10115_v19, %v21729_v63  ;;  %v21731_v1 = vld [vmem:[#allocation266_spill] sm:$0xff]  ;;  %v9728_v56 = vpop.permute.xlu0 %9727  ;;  %v21736_v16 = vld [vmem:[#allocation387_spill] sm:$0xff] }
 0x62f   :  { %v10382_v29 = vsel %vm10353_vm10, %v10349_v47, %v21728_v12  ;;  %v10278_v51 = vsel %vm10254_vm7, %v10245_v38, %v21730_v13  ;;  %v10408_v4 = vsel %vm10386_vm11, %v10375_v40, %v21731_v1  ;;  %v21733_v48 = vld [vmem:[#allocation248_spill] sm:$0xff]  ;;  %v21737_v19 = vld [vmem:[#allocation197_spill] sm:$0xff]  ;;  %v21744_v13 = vld [vmem:[#allocation443_spill] sm:$0xff] }
 0x630   :  { %v10415_v24 = vsel %vm10386_vm11, %v10382_v29, %v21732_v58  ;;  %v10181_v9 = vsel %vm10155_vm4, %v10148_v25, %v21733_v48  ;;  %v10311_v47 = vsel %vm10287_vm8, %v10278_v51, %v21734_v21  ;;  %v17936_v52 = vsel %vm10419_vm12, %v10408_v4, %v9714_v50  ;;  %v21735_v54 = vld [vmem:[#allocation260_spill] sm:$0xff]  ;;  %v21738_v38 = vld [vmem:[#allocation93_spill] sm:$0xff]  ;;  %v21745_v1 = vld [vmem:[#allocation451_spill] sm:$0xff] }
 0x631   :  { %v17939_v3 = vsel %vm10419_vm12, %v10415_v24, %v9728_v56  ;;  %v10084_v49 = vsel %vm10056_vm1, %v21736_v16, %v21735_v54  ;;  %v10214_v45 = vsel %vm10188_vm5, %v10181_v9, %v21737_v19  ;;  %v10344_v11 = vsel %vm10320_vm9, %v10311_v47, %v21738_v38  ;;  %v21739_v40 = vld [vmem:[#allocation464_spill] sm:$0xff]  ;;  %v21740_v12 = vld [vmem:[#allocation465_spill] sm:$0xff]  ;;  %v21746_v58 = vld [vmem:[#allocation438_spill] sm:$0xff]  ;;  %v9718_v38 = vpop.permute.xlu1 %9717 }
 0x632   :  { %v21741_v29 = vcombine.high %v21739_v40, %v21740_v12  ;;  %v21742_v63 = vld [vmem:[#allocation157_spill] sm:$0xff]  ;;  %v10117_v51 = vsel %vm10089_vm2, %v10084_v49, %v21744_v13  ;;  %v10247_v4 = vsel %vm10221_vm6, %v10214_v45, %v21745_v1  ;;  %v10377_v24 = vsel %vm10353_vm10, %v10344_v11, %v21746_v58  ;;  %v21747_v50 = vld [vmem:[#allocation206_spill] sm:$0xff]  ;;  %v21753_v19 = vld [vmem:[#allocation160_spill] sm:$0xff]  ;;  %v9732_v45 = vpop.permute.xlu0 %9731 }
 0x633   :  { %v21743_v25 = vcombine.high %v21450_v37, %v21742_v63  ;;  %v21748_v56 = vld [vmem:[#allocation269_spill] sm:$0xff]  ;;  %v21751_v47 = vld [vmem:[#allocation226_spill] sm:$0xff]  ;;  %v10410_v49 = vsel %vm10386_vm11, %v10377_v24, %v21753_v19  ;;  %v21757_v1 = vld [vmem:[#allocation120_spill] sm:$0xff] }
 0x634   :  { %9957 = vrot.lane.b32.xlu1 %v21741_v29, %s10654_s3  ;;  %v21749_v48 = vld [vmem:[#allocation469_spill] sm:$0xff]  ;;  %v10150_v54 = vsel %vm10122_vm3, %v10117_v51, %v21751_v47  ;;  %v21752_v37 = vld [vmem:[#allocation198_spill] sm:$0xff]  ;;  %v17978_v63 = vsel %vm10419_vm12, %v10410_v49, %v9718_v38 }
 0x635   :  { %9971 = vrot.lane.b32.xlu0 %v21743_v25, %s10654_s3  ;;  %v21750_v9 = vcombine.low %v21748_v56, %v21749_v48  ;;  %v10280_v16 = vsel %vm10254_vm7, %v10247_v4, %v21752_v37  ;;  %v21754_v40 = vld [vmem:[#allocation322_spill] sm:$0xff]  ;;  %v17982_v25 = vsel %vm10419_vm12, %v17253_v62, %v9732_v45  ;;  %v21756_v13 = vld [vmem:[#allocation481_spill] sm:$0xff]  ;;  %v21764_v62 = vld [vmem:[#allocation471_spill] sm:$0xff] }
 0x636   :  { %v10183_v11 = vsel %vm10155_vm4, %v10150_v54, %v21754_v40  ;;  %v21755_v12 = vld [vmem:[#allocation458_spill] sm:$0xff]  ;;  %v21758_v58 = vld [vmem:[#allocation201_spill] sm:$0xff]  ;;  %v21769_v40 = vld [vmem:[#allocation24_spill] sm:$0xff] }
 0x637   :  { %v10053_v21 = vsel %vm10023_vm0, %v21750_v9, %v21747_v50  ;;  %v10313_v29 = vsel %vm10287_vm8, %v10280_v16, %v21755_v12  ;;  %v10216_v4 = vsel %vm10188_vm5, %v10183_v11, %v21757_v1  ;;  %v21759_v50 = vld [vmem:[#allocation476_spill] sm:$0xff]  ;;  %v21761_v48 = vld [vmem:[#allocation257_spill] sm:$0xff]  ;;  %v21762_v9 = vld [vmem:[#allocation147_spill] sm:$0xff]  ;;  %v9722_v12 = vpop.permute.xlu1 %9721 }
 0x638   :  { %v10086_v51 = vsel %vm10056_vm1, %v10053_v21, %v21756_v13  ;;  %v10346_v24 = vsel %vm10320_vm9, %v10313_v29, %v21758_v58  ;;  %v21760_v56 = vcombine.high %v21465_v20, %v21759_v50  ;;  %v21763_v47 = vcombine.high %v21761_v48, %v21762_v9  ;;  %v21765_v21 = vld [vmem:[#allocation372_spill] sm:$0xff]  ;;  %v21766_v16 = vld [vmem:[#allocation437_spill] sm:$0xff]  ;;  %v9800_v29 = vpop.permute.xlu0 %9799  ;;  %v21771_v1 = vld [vmem:[#allocation383_spill] sm:$0xff] }
 0x639   :  { %v10119_v54 = vsel %vm10089_vm2, %v10086_v51, %v21764_v62  ;;  %v10249_v37 = vsel %vm10221_vm6, %v10216_v4, %v21765_v21  ;;  %v10379_v19 = vsel %vm10353_vm10, %v10346_v24, %v21766_v16  ;;  %v21767_v49 = vld [vmem:[#allocation149_spill] sm:$0xff]  ;;  %v21770_v13 = vld [vmem:[#allocation452_spill] sm:$0xff] }
 0x63a   :  { %9961 = vrot.lane.b32.xlu1 %v21760_v56, %s10654_s3  ;;  %9975 = vrot.lane.b32.xlu0 %v21763_v47, %s10654_s3  ;;  %v10152_v38 = vsel %vm10122_vm3, %v10119_v54, %v21767_v49  ;;  %v21768_v45 = vld [vmem:[#allocation121_spill] sm:$0xff]  ;;  %v10412_v11 = vsel %vm10386_vm11, %v10379_v19, %v21769_v40  ;;  %v21774_v56 = vld [vmem:[#allocation124_spill] sm:$0xff] }
 0x63b   :  { %v10282_v20 = vsel %vm10254_vm7, %v10249_v37, %v21768_v45  ;;  %v10185_v51 = vsel %vm10155_vm4, %v10152_v38, %v21770_v13  ;;  %v18015_v58 = vsel %vm10419_vm12, %v10412_v11, %v9722_v12  ;;  %v21773_v24 = vld [vmem:[#allocation229_spill] sm:$0xff]  ;;  %v21782_v38 = vld [vmem:[#allocation230_spill] sm:$0xff]  ;;  %v9726_v40 = vpop.permute.xlu1 %9725 }
 0x63c   :  { %v10315_v4 = vsel %vm10287_vm8, %v10282_v20, %v21771_v1  ;;  %21772 = vst [vmem:[#allocation55_spill] sm:$0xff] %v18015_v58  ;;  %v10218_v50 = vsel %vm10188_vm5, %v10185_v51, %v21773_v24  ;;  %v21775_v9 = vld [vmem:[#allocation497_spill] sm:$0xff]  ;;  %v21806_v58 = vld [vmem:[#allocation12_spill] sm:$0xff] }
 0x63d   :  { %v10348_v48 = vsel %vm10320_vm9, %v10315_v4, %v21774_v56  ;;  %v21776_v47 = vcombine.high %v21486_v60, %v21775_v9  ;;  %v21777_v62 = vld [vmem:[#allocation393_spill] sm:$0xff]  ;;  %v9804_v60 = vpop.permute.xlu0 %9803  ;;  %v21789_v56 = vld [vmem:[#allocation14_spill] sm:$0xff] }
 0x63e   :  { %v21778_v54 = vld [vmem:[#allocation145_spill] sm:$0xff] }
 0x63f   :  { %9965 = vrot.lane.b32.xlu1 %v21776_v47, %s10654_s3  ;;  %v21779_v21 = vcombine.high %v21777_v62, %v21778_v54  ;;  %v21780_v37 = vld [vmem:[#allocation405_spill] sm:$0xff]  ;;  %v21792_v47 = vld [vmem:[#allocation10_spill] sm:$0xff]  ;;  %v9730_v54 = vpop.permute.xlu1 %9729 }
 0x640   :  { %v10251_v16 = vsel %vm10221_vm6, %v10218_v50, %v21780_v37  ;;  %v21781_v19 = vld [vmem:[#allocation353_spill] sm:$0xff] }
 0x641   :  { %9979 = vrot.lane.b32.xlu0 %v21779_v21, %s10654_s3  ;;  %v10381_v49 = vsel %vm10353_vm10, %v10348_v48, %v21781_v19  ;;  %v10284_v45 = vsel %vm10254_vm7, %v10251_v16, %v21782_v38  ;;  %v21783_v11 = vld [vmem:[#allocation413_spill] sm:$0xff]  ;;  %v21791_v48 = vld [vmem:[#allocation352_spill] sm:$0xff]  ;;  %v9808_v21 = vpop.permute.xlu0 %9807  ;;  %v21794_v16 = vld [vmem:[#allocation83_spill] sm:$0xff] }
 0x642   :  { %v10414_v20 = vsel %vm10386_vm11, %v10381_v49, %v17350_v6  ;;  %v10317_v12 = vsel %vm10287_vm8, %v10284_v45, %v21783_v11  ;;  %v21785_v51 = vld [vmem:[#allocation233_spill] sm:$0xff]  ;;  %v21797_v49 = vcombine.high %v21530_v26, %v21531_v27 }
 0x643   :  { %v18040_v13 = vsel %vm10419_vm12, %v10414_v20, %v9726_v40  ;;  %v10350_v1 = vsel %vm10320_vm9, %v10317_v12, %v21785_v51  ;;  %v21786_v4 = vld [vmem:[#allocation129_spill] sm:$0xff]  ;;  %v9734_v38 = vpop.permute.xlu1 %9733  ;;  %v21799_v40 = vcombine.high %v21544_v22, %v21545_v28  ;;  %v21800_v51 = vcombine.high %v21559_v46, %v21560_v30 }
 0x644   :  { %21784 = vst [vmem:[#allocation52_spill] sm:$0xff] %v18040_v13  ;;  %v21787_v24 = vcombine.high %v21506_v18, %v21786_v4  ;;  %v21788_v50 = vld [vmem:[#allocation309_spill] sm:$0xff]  ;;  %v10383_v9 = vsel %vm10353_vm10, %v10350_v1, %v21791_v48  ;;  %v21795_v18 = vld [vmem:[#allocation219_spill] sm:$0xff]  ;;  %v18069_v20 = vsel %vm10419_vm12, %v17461_v32, %v9734_v38  ;;  %v21801_v1 = vcombine.high %v21574_v39, %v21575_v53 }
 0x645   :  { %v21790_v6 = vcombine.high %v21788_v50, %v21789_v56  ;;  %v10416_v62 = vsel %vm10386_vm11, %v10383_v9, %v21792_v47  ;;  %v21796_v19 = vcombine.high %v21794_v16, %v21795_v18  ;;  %v9812_v45 = vpop.permute.xlu0 %9811  ;;  %21798 = vst [vmem:[#allocation27_spill] sm:$0xff] %v18069_v20  ;;  %v21802_v22 = vcombine.high %v21588_v31, %v21589_v10 }
 0x646   :  { %9969 = vrot.lane.b32.xlu1 %v21787_v24, %s10654_s3  ;;  %v18057_v37 = vsel %vm10419_vm12, %v10416_v62, %v9730_v54 }
 0x647   :  { %9983 = vrot.lane.b32.xlu0 %v21790_v6, %s10654_s3  ;;  %21793 = vst [vmem:[#allocation54_spill] sm:$0xff] %v18057_v37  ;;  %v9802_v11 = vpop.permute.xlu1 %9801 }
 0x649   :  { %v9816_v12 = vpop.permute.xlu0 %9815 }
 0x64a   :  { %9973 = vrot.lane.b32.xlu1 %v21796_v19, %s10654_s3  ;;  %v21803_v19 = vld [vmem:[#allocation26_spill] sm:$0xff] }
 0x64b   :  { %9987 = vrot.lane.b32.xlu0 %v21797_v49, %s10654_s3  ;;  %v9806_v26 = vpop.permute.xlu1 %9805  ;;  %v10453_v49 = vsel %vm10452_vm13, %v21803_v19, %v9800_v29  ;;  %v10457_v29 = vsel %vm10452_vm13, %v21806_v58, %v9808_v21  ;;  %v10454_v58 = vsel %vm10452_vm13, %v17504_v0, %v9802_v11 }
 0x64d   :  { %v9820_v27 = vpop.permute.xlu0 %9819 }
 0x64e   :  { %9977 = vrot.lane.b32.xlu1 %v21799_v40, %s10654_s3 }
 0x64f   :  { %v9810_v32 = vpop.permute.xlu1 %9809 }
 0x651   :  { %v9824_v4 = vpop.permute.xlu0 %9823 }
 0x652   :  { %9981 = vrot.lane.b32.xlu1 %v21800_v51, %s10654_s3 }
 0x653   :  { %v18087_v28 = vpop.permute.xlu1 %9813 }
 0x655   :  { %v18089_v24 = vpop.permute.xlu0 %9827 }
 0x656   :  { %9985 = vrot.lane.b32.xlu1 %v21801_v1, %s10654_s3  ;;  %v21805_v1 = vld [vmem:[#allocation25_spill] sm:$0xff] }
 0x657   :  { %v18091_v46 = vpop.permute.xlu1 %9817 }
 0x659   :  { %v18093_v30 = vpop.permute.xlu0 %9831 }
 0x65a   :  { %9989 = vrot.lane.b32.xlu1 %v21802_v22, %s10654_s3  ;;  %v10455_v22 = vsel %vm10452_vm13, %v21805_v1, %v9804_v60  ;;  %v10459_v60 = vsel %vm10452_vm13, %v17464_v33, %v9812_v45  ;;  %v10456_v33 = vsel %vm10452_vm13, %v17549_v5, %v9806_v26  ;;  %v10463_v45 = vsel %vm10452_vm13, %v17552_v36, %v9820_v27 }
 0x65b   :  { %v18095_v50 = vpop.permute.xlu1 %9821 }
 0x65d   :  { %v18097_v56 = vpop.permute.xlu0 %9835 }
 0x65f   :  { %v18099_v39 = vpop.permute.xlu1 %9825 }
 0x661   :  { %v18101_v53 = vpop.permute.xlu0 %9839 }
 0x663   :  { %v18103_v6 = vpop.permute.xlu1 %9829 }
 0x665   :  { %v18105_v31 = vpop.permute.xlu0 %9843 }
 0x667   :  { %v18107_v10 = vpop.permute.xlu1 %9833 }
 0x669   :  { %v18109_v48 = vpop.permute.xlu0 %9847 }
 0x66b   :  { %v18111_v9 = vpop.permute.xlu1 %9837 }
 0x66d   :  { %v18113_v47 = vpop.permute.xlu0 %9851 }
 0x66f   :  { %v18115_v62 = vpop.permute.xlu1 %9841 }
 0x671   :  { %v18117_v54 = vpop.permute.xlu0 %9855 }
 0x673   :  { %v18119_v16 = vpop.permute.xlu1 %9845 }
 0x675   :  { %v18121_v18 = vpop.permute.xlu0 %9859 }
 0x677   :  { %v18125_v38 = vpop.permute.xlu1 %9849 }
 0x678   :  { %21804 = vst [vmem:[#allocation38_spill] sm:$0xff] %v18125_v38 }
 0x679   :  { %v9928_v40 = vpop.permute.xlu0 %9927 }
 0x67a   :  { %v10486_v51 = vsel %vm10485_vm14, %v10453_v49, %v9928_v40 }
 0x67b   :  { %10519 = vst.msk [vmem:[#allocation5] sm:$0xff] %vm10518_vm15, %v10486_v51  ;;  %v18131_v20 = vpop.permute.xlu1 %9853 }
 0x67d   :  { %v9932_v37 = vpop.permute.xlu0 %9931 }
 0x67e   :  { %v10488_v13 = vsel %vm10485_vm14, %v10455_v22, %v9932_v37 }
 0x67f   :  { %10521 = vst.msk [vmem:[#allocation5 + $0x10] sm:$0xff] %vm10518_vm15, %v10488_v13  ;;  %v18137_v19 = vpop.permute.xlu1 %9857  ;;  %v10461_v13 = vsel %vm10452_vm13, %v17507_v41, %v9816_v12 }
 0x681   :  { %v9936_v38 = vpop.permute.xlu0 %9935 }
 0x682   :  { %v10490_v49 = vsel %vm10485_vm14, %v10457_v29, %v9936_v38  ;;  %v10458_v29 = vsel %vm10452_vm13, %v17594_v57, %v9810_v32  ;;  %v10467_v57 = vsel %vm10452_vm13, %v17642_v35, %v18089_v24 }
 0x683   :  { %10523 = vst.msk [vmem:[#allocation5 + $0x20] sm:$0xff] %vm10518_vm15, %v10490_v49  ;;  %v18143_v40 = vpop.permute.xlu1 %9861  ;;  %v10465_v49 = vsel %vm10452_vm13, %v17597_v15, %v9824_v4 }
 0x685   :  { %v9940_v51 = vpop.permute.xlu0 %9939 }
 0x686   :  { %v10492_v37 = vsel %vm10485_vm14, %v10459_v60, %v9940_v51  ;;  %v10460_v60 = vsel %vm10452_vm13, %v17639_v44, %v18087_v28  ;;  %v10469_v44 = vsel %vm10452_vm13, %v17687_v23, %v18093_v30 }
 0x687   :  { %10525 = vst.msk [vmem:[#allocation5 + $0x30] sm:$0xff] %vm10518_vm15, %v10492_v37  ;;  %v9930_v21 = vpop.permute.xlu1 %9929  ;;  %v10462_v37 = vsel %vm10452_vm13, %v17684_v43, %v18091_v46  ;;  %v10471_v43 = vsel %vm10452_vm13, %v17730_v17, %v18097_v56 }
 0x688   :  { %v10487_v1 = vsel %vm10485_vm14, %v10454_v58, %v9930_v21 }
 0x689   :  { %v9944_v38 = vpop.permute.xlu0 %9943  ;;  %10520 = vst.msk [vmem:[#allocation5 + $0x8] sm:$0xff] %vm10518_vm15, %v10487_v1 }
 0x68a   :  { %v10494_v22 = vsel %vm10485_vm14, %v10461_v13, %v9944_v38  ;;  %v10464_v13 = vsel %vm10452_vm13, %v17727_v34, %v18095_v50  ;;  %v10466_v38 = vsel %vm10452_vm13, %v17770_v2, %v18099_v39  ;;  %v10473_v34 = vsel %vm10452_vm13, %v17773_v8, %v18101_v53 }
 0x68b   :  { %10527 = vst.msk [vmem:[#allocation5 + $0x40] sm:$0xff] %vm10518_vm15, %v10494_v22  ;;  %v9934_v0 = vpop.permute.xlu1 %9933  ;;  %v10468_v22 = vsel %vm10452_vm13, %v17812_v7, %v18103_v6  ;;  %v10475_v2 = vsel %vm10452_vm13, %v17815_v61, %v18105_v31  ;;  %v10477_v7 = vsel %vm10452_vm13, %v17856_v14, %v18109_v48 }
 0x68c   :  { %v10489_v41 = vsel %vm10485_vm14, %v10456_v33, %v9934_v0 }
 0x68d   :  { %v9948_v11 = vpop.permute.xlu0 %9947  ;;  %10522 = vst.msk [vmem:[#allocation5 + $0x18] sm:$0xff] %vm10518_vm15, %v10489_v41 }
 0x68e   :  { %v10496_v12 = vsel %vm10485_vm14, %v10463_v45, %v9948_v11  ;;  %v10470_v45 = vsel %vm10452_vm13, %v17853_v42, %v18107_v10  ;;  %v10472_v11 = vsel %vm10452_vm13, %v17894_v55, %v18111_v9  ;;  %v10479_v42 = vsel %vm10452_vm13, %v17897_v59, %v18113_v47 }
 0x68f   :  { %10529 = vst.msk [vmem:[#allocation5 + $0x50] sm:$0xff] %vm10518_vm15, %v10496_v12  ;;  %v9938_v5 = vpop.permute.xlu1 %9937  ;;  %v10474_v12 = vsel %vm10452_vm13, %v17936_v52, %v18115_v62  ;;  %v10481_v55 = vsel %vm10452_vm13, %v17939_v3, %v18117_v54  ;;  %v10483_v52 = vsel %vm10452_vm13, %v17982_v25, %v18121_v18  ;;  %v21809_v25 = vld [vmem:[#allocation52_spill] sm:$0xff] }
 0x690   :  { %v10491_v36 = vsel %vm10485_vm14, %v10458_v29, %v9938_v5 }
 0x691   :  { %v9952_v26 = vpop.permute.xlu0 %9951  ;;  %10524 = vst.msk [vmem:[#allocation5 + $0x28] sm:$0xff] %vm10518_vm15, %v10491_v36  ;;  %v21808_v36 = vld [vmem:[#allocation55_spill] sm:$0xff] }
 0x692   :  { %v10498_v27 = vsel %vm10485_vm14, %v10465_v49, %v9952_v26  ;;  %v10476_v49 = vsel %vm10452_vm13, %v17978_v63, %v18119_v16  ;;  %v21807_v26 = vld [vmem:[#allocation38_spill] sm:$0xff]  ;;  %v10480_v16 = vsel %vm10452_vm13, %v21809_v25, %v18131_v20 }
 0x693   :  { %10531 = vst.msk [vmem:[#allocation5 + $0x60] sm:$0xff] %vm10518_vm15, %v10498_v27  ;;  %v9942_v32 = vpop.permute.xlu1 %9941  ;;  %v10478_v27 = vsel %vm10452_vm13, %v21808_v36, %v21807_v26 }
 0x694   :  { %v10493_v4 = vsel %vm10485_vm14, %v10460_v60, %v9942_v32  ;;  %v21810_v32 = vld [vmem:[#allocation54_spill] sm:$0xff] }
 0x695   :  { %v9956_v15 = vpop.permute.xlu0 %9955  ;;  %10526 = vst.msk [vmem:[#allocation5 + $0x38] sm:$0xff] %vm10518_vm15, %v10493_v4 }
 0x696   :  { %v10500_v51 = vsel %vm10485_vm14, %v10467_v57, %v9956_v15  ;;  %v10482_v15 = vsel %vm10452_vm13, %v21810_v32, %v18137_v19 }
 0x697   :  { %10533 = vst.msk [vmem:[#allocation5 + $0x70] sm:$0xff] %vm10518_vm15, %v10500_v51  ;;  %v9946_v28 = vpop.permute.xlu1 %9945 }
 0x698   :  { %v10495_v24 = vsel %vm10485_vm14, %v10462_v37, %v9946_v28  ;;  %v21811_v37 = vld [vmem:[#allocation27_spill] sm:$0xff] }
 0x699   :  { %v9960_v35 = vpop.permute.xlu0 %9959  ;;  %10528 = vst.msk [vmem:[#allocation5 + $0x48] sm:$0xff] %vm10518_vm15, %v10495_v24  ;;  %v10484_v20 = vsel %vm10452_vm13, %v21811_v37, %v18143_v40 }
 0x69a   :  { %v10502_v58 = vsel %vm10485_vm14, %v10469_v44, %v9960_v35 }
 0x69b   :  { %10535 = vst.msk [vmem:[#allocation5 + $0x80] sm:$0xff] %vm10518_vm15, %v10502_v58  ;;  %v9950_v46 = vpop.permute.xlu1 %9949 }
 0x69c   :  { %v10497_v30 = vsel %vm10485_vm14, %v10464_v13, %v9950_v46 }
 0x69d   :  { %v9964_v23 = vpop.permute.xlu0 %9963  ;;  %10530 = vst.msk [vmem:[#allocation5 + $0x58] sm:$0xff] %vm10518_vm15, %v10497_v30 }
 0x69e   :  { %v10504_v21 = vsel %vm10485_vm14, %v10471_v43, %v9964_v23 }
 0x69f   :  { %10537 = vst.msk [vmem:[#allocation5 + $0x90] sm:$0xff] %vm10518_vm15, %v10504_v21  ;;  %v9954_v50 = vpop.permute.xlu1 %9953 }
 0x6a0   :  { %v10499_v56 = vsel %vm10485_vm14, %v10466_v38, %v9954_v50 }
 0x6a1   :  { %v9968_v17 = vpop.permute.xlu0 %9967  ;;  %10532 = vst.msk [vmem:[#allocation5 + $0x68] sm:$0xff] %vm10518_vm15, %v10499_v56 }
 0x6a2   :  { %v10506_v1 = vsel %vm10485_vm14, %v10473_v34, %v9968_v17 }
 0x6a3   :  { %10539 = vst.msk [vmem:[#allocation5 + $0xa0] sm:$0xff] %vm10518_vm15, %v10506_v1 }
 0x6a6   :  { %v9958_v39 = vpop.permute.xlu1 %9957 }
 0x6a7   :  { %v9972_v8 = vpop.permute.xlu0 %9971  ;;  %v10501_v53 = vsel %vm10485_vm14, %v10468_v22, %v9958_v39 }
 0x6a8   :  { %v10508_v33 = vsel %vm10485_vm14, %v10475_v2, %v9972_v8  ;;  %10534 = vst.msk [vmem:[#allocation5 + $0x78] sm:$0xff] %vm10518_vm15, %v10501_v53 }
 0x6a9   :  { %10541 = vst.msk [vmem:[#allocation5 + $0xb0] sm:$0xff] %vm10518_vm15, %v10508_v33 }
 0x6ac   :  { %v9962_v6 = vpop.permute.xlu1 %9961  ;;  %v9976_v61 = vpop.permute.xlu0 %9975 }
 0x6ad   :  { %v10503_v31 = vsel %vm10485_vm14, %v10470_v45, %v9962_v6  ;;  %v10510_v0 = vsel %vm10485_vm14, %v10477_v7, %v9976_v61 }
 0x6ae   :  { %10536 = vst.msk [vmem:[#allocation5 + $0x88] sm:$0xff] %vm10518_vm15, %v10503_v31  ;;  %10543 = vst.msk [vmem:[#allocation5 + $0xc0] sm:$0xff] %vm10518_vm15, %v10510_v0 }
 0x6b1   :  { %v9966_v10 = vpop.permute.xlu1 %9965 }
 0x6b2   :  { %v10505_v48 = vsel %vm10485_vm14, %v10472_v11, %v9966_v10 }
 0x6b3   :  { %v9980_v14 = vpop.permute.xlu0 %9979  ;;  %10538 = vst.msk [vmem:[#allocation5 + $0x98] sm:$0xff] %vm10518_vm15, %v10505_v48 }
 0x6b4   :  { %v10512_v41 = vsel %vm10485_vm14, %v10479_v42, %v9980_v14 }
 0x6b5   :  { %10545 = vst.msk [vmem:[#allocation5 + $0xd0] sm:$0xff] %vm10518_vm15, %v10512_v41 }
 0x6b8   :  { %v9970_v9 = vpop.permute.xlu1 %9969 }
 0x6b9   :  { %v9984_v59 = vpop.permute.xlu0 %9983  ;;  %v10507_v47 = vsel %vm10485_vm14, %v10474_v12, %v9970_v9 }
 0x6ba   :  { %v10514_v29 = vsel %vm10485_vm14, %v10481_v55, %v9984_v59  ;;  %10540 = vst.msk [vmem:[#allocation5 + $0xa8] sm:$0xff] %vm10518_vm15, %v10507_v47 }
 0x6bb   :  { %10547 = vst.msk [vmem:[#allocation5 + $0xe0] sm:$0xff] %vm10518_vm15, %v10514_v29 }
 0x6bc   :  { %v9974_v62 = vpop.permute.xlu1 %9973 }
 0x6bd   :  { %v9988_v3 = vpop.permute.xlu0 %9987  ;;  %v10509_v54 = vsel %vm10485_vm14, %v10476_v49, %v9974_v62 }
 0x6be   :  { %v10516_v5 = vsel %vm10485_vm14, %v10483_v52, %v9988_v3  ;;  %10542 = vst.msk [vmem:[#allocation5 + $0xb8] sm:$0xff] %vm10518_vm15, %v10509_v54 }
 0x6bf   :  { %10549 = vst.msk [vmem:[#allocation5 + $0xf0] sm:$0xff] %vm10518_vm15, %v10516_v5 }
 0x6c0   :  { %v9978_v60 = vpop.permute.xlu1 %9977 }
 0x6c1   :  { %v10511_v63 = vsel %vm10485_vm14, %v10478_v27, %v9978_v60 }
 0x6c2   :  { %10544 = vst.msk [vmem:[#allocation5 + $0xc8] sm:$0xff] %vm10518_vm15, %v10511_v63 }
 0x6c4   :  { %v9982_v18 = vpop.permute.xlu1 %9981 }
 0x6c5   :  { %v10513_v57 = vsel %vm10485_vm14, %v10480_v16, %v9982_v18 }
 0x6c6   :  { %10546 = vst.msk [vmem:[#allocation5 + $0xd8] sm:$0xff] %vm10518_vm15, %v10513_v57 }
 0x6c8   :  { %v9986_v4 = vpop.permute.xlu1 %9985 }
 0x6c9   :  { %v10515_v51 = vsel %vm10485_vm14, %v10482_v15, %v9986_v4 }
 0x6ca   :  { %10548 = vst.msk [vmem:[#allocation5 + $0xe8] sm:$0xff] %vm10518_vm15, %v10515_v51 }
 0x6cc   :  { %v9990_v44 = vpop.permute.xlu1 %9989 }
 0x6cd   :  { %v10517_v28 = vsel %vm10485_vm14, %v10484_v20, %v9990_v44 }
 0x6ce   :  { %10550 = vst.msk [vmem:[#allocation5 + $0xf8] sm:$0xff] %vm10518_vm15, %v10517_v28 }
 0x6cf   :  { %10621 = shalt.err (!%p10618_p12)
}
 0x6d0   :  { %s10622_s9 = scalar_lea.hbm %s18297_s1, 4096 }
 0x6d1   :  { %p10623_p13 = scmp.ne.s32.totalorder %s18297_s1, %s10622_s9  ;;  %p10626_p0 = scmp.lt.u32.totalorder %s10622_s9, %s18297_s1 }
 0x6d3   :  { %p10628_p1 = pnand %p10626_p0, %p10623_p13 }
 0x6d5   :  { %10631 = shalt.err (!%p10628_p1)
}
 0x6d6   :  { %10562 = dma.vmem_to_hbm [thread:$0]  %s10557_s5, 4096, %s18297_s1, [#allocation4], %s10637_s16, %s10637_s16, %s10638_s17  }
 0x6d7   :  { %10634 = dma.done.wait [#allocation4], 4096  }
 0x6d8   :  { %10635 = vsyncadd [#allocation4], 4294963200 }
 0x6d9   :  { %10566 = vsyncpa [#allocation3], 1 }
 0x6da   :  { %10567 = vsyncpa [#allocation4], 1 }

// kernel: tpu_custom_call.1
= control target key start
LH: loop header
LB: loop body
LE: loop exit
PB: predicated region body
PF: predicated region fallthrough
CT: control target
= control target key end

     0   :  { %6 = vsyncpa [#allocation3], 0  ;;  %s2597_s0 = inlined_call_operand.hbm [shape: f32[8,16,16], index: 0, kind: input, shape index: {}]   ;;  %s2598_s1 = inlined_call_operand.hbm [shape: f32[8,32,32], index: 1, kind: output, shape index: {}]  }
   0x1   :  { %8 = vsyncpa [#allocation3 + $0x1], 0 }
   0x2   :  { %9 = vsyncpa [#allocation4], 0 }
   0x3   :  { %11 = vsyncpa [#allocation4 + $0x1], 0  ;;  %s1764_s6 = smov 0   ;;  %s1766_s7 = smov 0  }
   0x4   :  { %s1768_s8 = smov 0   ;;  %s1770_s9 = smov 0  }
   0x5 LB: > { %s1785_s10 = sadd.s32 4294967295, %s1730_s9   ;;  %s1552_s11 = sadd.s32 4294967294, %s1730_s9   ;;  %s1730_s9 = sphi %s1770_s9, %s2687_s9   ;;  %s1726_s8 = sphi %s1768_s8, %s2686_s8   ;;  %s1722_s7 = sphi %s1766_s7, %s2685_s7   ;;  %s1718_s6 = sphi %s1764_s6, %s2684_s6  }
   0x6   : > { %s1789_s12 = sadd.s32 1, %s1730_s9   ;;  %s24_s13 = sadd.s32 1, %s1726_s8 }
   0x7   : > { %s21_s14 = ssub.s32 %s1730_s9, %s1789_s12  ;;  %p31_p0 = scmp.ne.s32.totalorder %s1726_s8, %s1722_s7 }
   0x8   : > { %p22_p1 = scmp.eq.s32.totalorder %s21_s14, 0  ;;  %p32_p2 = scmp.eq.s32.totalorder %s1730_s9, 0 }
   0x9   : > { %p37_p3 = scmp.ne.s32.totalorder %s1722_s7, %s1718_s6  ;;  %p38_p4 = scmp.eq.s32.totalorder %s1785_s10, 0 }
   0xa   : > { %s1801_s15 = scalar_select %p22_p1, %s1726_s8, %s24_s13  }
   0xb   : > { %p1803_p5 = por %p32_p2, %p31_p0  ;;  %p1807_p6 = por %p38_p4, %p37_p3 }
   0xc   : > { %p61_p7 = scmp.eq.s32.totalorder %s1785_s10, 7  ;;  %p67_p8 = scmp.eq.s32.totalorder %s1552_s11, 7 }
   0xd   : > { %p1580_p9 = scmp.lt.s32.totalorder %s1730_s9, 8  ;;  %s87_s20 = sand.u32 1, %s1726_s8  }
   0xe   : > { %p1813_p10 = por %p61_p7, %p31_p0  ;;  %p1817_p11 = por %p67_p8, %p37_p3 }
   0xf   : > { %s1566_s21 = sshll.u32 %s1730_s9, 8  ;;  %s1555_s22 = sshll.u32 %s87_s20, 4 }
  0x10   : > { %s2618_s18 = scalar_select %p1813_p10, 1, 0 }
  0x11   : > { %s2619_s19 = scalar_select %p1817_p11, 1, 0 }
  0x12   : > { %s1826_s25 = scalar_lea.hbm %s2597_s0, %s1566_s21  ;;  %s91_s26 = scalar_lea.vmem [#allocation2], %s1555_s22 }
  0x13   : > { %s98_s27 = sshll.u32 %s91_s26, 4  ;;  %p1830_p12 = pnand %p1580_p9, %p1803_p5  ;;  %s1834_s27 = int_to_ptr.vmem [resolvable:$true] %s98_s27 }
  0x14   : > { %s1836_s29 = scalar_lea.sflag [#allocation3], %s87_s20  ;;  %s1634_s30 = scalar_lea.hbm %s1826_s25, 256 }
  0x15   : > { %p1635_p13 = scmp.ne.s32.totalorder %s1826_s25, %s1634_s30  ;;  %p1636_p0 = pneg %p1830_p12 }
  0x16   : > { %s1639_s4 = scalar_lea.hbm %s2597_s0, 2048  ;;  %p1640_p3 = scmp.lt.u32.totalorder %s1826_s25, %s2597_s0 }
  0x17   : > { %p1637_p1 = pnand %p1636_p0, %p1635_p13  ;;  %p1641_p4 = scmp.lt.u32.totalorder %s1639_s4, %s1634_s30 }
  0x18   : > { %p1643_p7 = scmp.lt.u32.totalorder %s1634_s30, %s1826_s25 }
  0x19   : > { %p1638_p2 = pneg %p1637_p1  ;;  %p1642_p5 = por %p1641_p4, %p1640_p3 }
  0x1b   : > { %p1644_p8 = por %p1643_p7, %p1642_p5 }
  0x1d   : > { %p1645_p9 = pnand %p1644_p8, %p1638_p2 }
  0x1f   : > { %1648 = shalt.err (!%p1645_p9)
}
  0x20   : > { %s1649_s13 = scalar_lea.vmem %s1834_s27, 256  ;;  %s1732_s14 = smov [#allocation2]  }
  0x21   : > { %p1650_p13 = scmp.ne.s32.totalorder %s1834_s27, %s1649_s13  ;;  %s1654_s16 = sshll.u32 %s1732_s14, 4  ;;  %s1655_s16 = int_to_ptr.vmem [resolvable:$false] %s1654_s16 }
  0x22   : > { %s1656_s20 = scalar_lea.vmem %s1655_s16, 512  ;;  %p1657_p10 = scmp.lt.s32.totalorder %s1834_s27, %s1655_s16 }
  0x23   : > { %p1652_p1 = pnand %p1650_p13, %p1636_p0  ;;  %p1658_p3 = scmp.lt.s32.totalorder %s1656_s20, %s1649_s13 }
  0x25   : > { %p1653_p11 = pneg %p1652_p1  ;;  %p1659_p4 = por %p1658_p3, %p1657_p10 }
  0x27   : > { %p1660_p5 = pnand %p1659_p4, %p1653_p11 }
  0x29   : > { %1663 = shalt.err (!%p1660_p5)
}
  0x2a   : > { %s1733_s21 = smov 128   ;;  %s1734_s22 = smov 8  }
  0x2b   : > { %1575 = dma.hbm_to_vmem [thread:$0]  (!%p1830_p12), %s1826_s25, 256, %s1834_s27, %s1836_s29, %s1733_s21, %s1733_s21, %s1734_s22  }
  0x2c   : > { %p1558_p0 = scmp.ge.s32.totalorder %s1730_s9, 1  ;;  %p106_p2 = scmp.lt.s32.totalorder %s1730_s9, 9 }
  0x2e   : > { %p107_p7 = pnand %p1558_p0, %p106_p2 }
  0x30   : > { %110 = sbr.rel (%p107_p7) target bundleno = 483 (0x1e3), region = 24 }
  0x37   : > { %s1867_s23 = sand.u32 1, %s1722_s7  }
  0x38   : > { %s1559_s24 = sshll.u32 %s1867_s23, 4  ;;  %s113_s26 = scalar_lea.sflag [#allocation3], %s1867_s23 }
  0x39   : > { %s1871_s30 = scalar_lea.vmem [#allocation2], %s1559_s24 }
  0x3a   : > { %1709 = dma.done.wait (%p1807_p6), %s113_s26, 256  }
  0x3b   : > { %1711 = vsyncadd (%p1807_p6), %s113_s26, 4294967040  ;;  %v137_v0 = vlaneseq  ;;  %v135_v4 = vld [vmem:[%s1871_s30] sm:$0xff]  ;;  %v136_v19 = vld [vmem:[%s1871_s30 + $0x8] sm:$0xff]  ;;  %v1735_v28 = vmov 1983009808   ;;  %s1737_s17 = smov 2  }
  0x3c   : > { %v316_v29 = vunpack.c.l.s4 %v1735_v28  ;;  %v1736_v31 = vmov 1934713408   ;;  %s1738_s25 = smov 4   ;;  %s1739_s27 = smov 6   ;;  %vm1385_vm0 = vcmask 15360   ;;  %vm1390_vm1 = vcmask 31744  }
  0x3d   : > { %v1877_v1 = vshrl.u32 %v137_v0, 7  ;;  %v348_v32 = vunpack.c.l.s4 %v1736_v31  ;;  %s1740_s28 = smov 8   ;;  %s1741_s29 = smov 10   ;;  %vm1395_vm2 = vcmask 48128   ;;  %vm1400_vm3 = vcmask 64512  }
  0x3e   : > { %v317_v30 = vunpack.c.0.s8 %v316_v29  ;;  %s1742_s2 = smov 12   ;;  %s1743_s3 = smov 14   ;;  %vm1405_vm4 = vcmask 80896   ;;  %vm1410_vm5 = vcmask 97280   ;;  %vm1415_vm6 = vcmask 113664  }
  0x3f   : > { %v150_v2 = vsub.s32 1, %v1877_v1  ;;  %v139_v3 = vsub.s32 0, %v1877_v1  ;;  %v161_v7 = vsub.s32 2, %v1877_v1  ;;  %v172_v9 = vsub.s32 3, %v1877_v1  ;;  %s1744_s4 = smov 16   ;;  %s1745_s5 = smov 18  }
  0x40   : > { %v183_v11 = vsub.s32 4, %v1877_v1  ;;  %v194_v13 = vsub.s32 5, %v1877_v1  ;;  %v205_v15 = vsub.s32 6, %v1877_v1  ;;  %v216_v17 = vsub.s32 7, %v1877_v1  ;;  %s1746_s11 = smov 20   ;;  %s1747_s13 = smov 22  }
  0x41   : > { %v151_v5 = vrot.slane %v135_v4, %v150_v2  ;;  %v140_v6 = vrot.slane %v135_v4, %v139_v3  ;;  %v162_v8 = vrot.slane %v135_v4, %v161_v7  ;;  %v173_v10 = vrot.slane %v135_v4, %v172_v9  ;;  %s1748_s14 = smov 24   ;;  %s1749_s16 = smov 26  }
  0x42   : > { %v184_v12 = vrot.slane %v135_v4, %v183_v11  ;;  %v195_v14 = vrot.slane %v135_v4, %v194_v13  ;;  %v206_v16 = vrot.slane %v135_v4, %v205_v15  ;;  %v217_v18 = vrot.slane %v135_v4, %v216_v17  ;;  %s1750_s20 = smov 28   ;;  %s1751_s21 = smov 30  }
  0x43   : > { %153 = vbcast.lane.b32.xlu1 %v151_v5, 256  ;;  %142 = vbcast.lane.b32.xlu0 %v140_v6, 256  ;;  %v228_v20 = vrot.slane %v136_v19, %v139_v3  ;;  %v239_v21 = vrot.slane %v136_v19, %v150_v2  ;;  %v261_v22 = vrot.slane %v136_v19, %v172_v9  ;;  %v349_v34 = vunpack.c.0.s8 %v348_v32  ;;  %s1560_s22 = sshll.u32 %s1867_s23, 5  ;;  %s1567_s30 = sshll.u32 %s1785_s10, 9 }
  0x44   : > { %v250_v23 = vrot.slane %v136_v19, %v161_v7  ;;  %v283_v24 = vrot.slane %v136_v19, %v194_v13  ;;  %v272_v25 = vrot.slane %v136_v19, %v183_v11  ;;  %v305_v26 = vrot.slane %v136_v19, %v216_v17  ;;  %s134_s24 = scalar_lea.vmem [#allocation5], %s1560_s22  ;;  %s1466_s10 = scalar_lea.sflag [#allocation4], %s1867_s23 }
  0x45   : > { %v294_v27 = vrot.slane %v136_v19, %v205_v15  ;;  %v1890_v33 = vsub.s32 %v317_v30, %v1877_v1  ;;  %v1893_v38 = vsub.s32 %v349_v34, %v1877_v1  ;;  %vm1420_vm7 = vcmask 130048   ;;  %s1479_s26 = sshll.u32 %s134_s24, 4  ;;  %p2682_p10 = scmp.ne.s32.totalorder %s2618_s18, 0  ;;  %s2545_s26 = int_to_ptr.vmem [resolvable:$true] %s1479_s26 }
  0x46   : > { %vm1425_vm8 = vcmask 146432   ;;  %vm1430_vm9 = vcmask 162816   ;;  %vm1435_vm10 = vcmask 179200   ;;  %vm1440_vm11 = vcmask 195584  }
  0x47   : > { %157 = vbcast.lane.b32.xlu1 %v151_v5, 264  ;;  %146 = vbcast.lane.b32.xlu0 %v140_v6, 264  ;;  %vm1445_vm12 = vcmask 211968   ;;  %vm1450_vm13 = vcmask 228352   ;;  %vm1455_vm14 = vcmask 244736   ;;  %vm1460_vm15 = vcmask 261120  }
  0x4b   : > { %168 = vbcast.lane.b32.xlu1 %v162_v8, 264  ;;  %164 = vbcast.lane.b32.xlu0 %v162_v8, 256 }
  0x4f   : > { %179 = vbcast.lane.b32.xlu1 %v173_v10, 264  ;;  %175 = vbcast.lane.b32.xlu0 %v173_v10, 256 }
  0x53   : > { %190 = vbcast.lane.b32.xlu1 %v184_v12, 264  ;;  %186 = vbcast.lane.b32.xlu0 %v184_v12, 256 }
  0x57   : > { %201 = vbcast.lane.b32.xlu1 %v195_v14, 264  ;;  %197 = vbcast.lane.b32.xlu0 %v195_v14, 256 }
  0x5b   : > { %212 = vbcast.lane.b32.xlu1 %v206_v16, 264  ;;  %208 = vbcast.lane.b32.xlu0 %v206_v16, 256 }
  0x5f   : > { %223 = vbcast.lane.b32.xlu1 %v217_v18, 264  ;;  %219 = vbcast.lane.b32.xlu0 %v217_v18, 256 }
  0x63   : > { %234 = vbcast.lane.b32.xlu1 %v228_v20, 264  ;;  %230 = vbcast.lane.b32.xlu0 %v228_v20, 256 }
  0x67   : > { %245 = vbcast.lane.b32.xlu1 %v239_v21, 264  ;;  %241 = vbcast.lane.b32.xlu0 %v239_v21, 256 }
  0x6b   : > { %263 = vbcast.lane.b32.xlu1 %v261_v22, 256  ;;  %252 = vbcast.lane.b32.xlu0 %v250_v23, 256 }
  0x6f   : > { %285 = vbcast.lane.b32.xlu1 %v283_v24, 256  ;;  %274 = vbcast.lane.b32.xlu0 %v272_v25, 256 }
  0x73   : > { %307 = vbcast.lane.b32.xlu1 %v305_v26, 256  ;;  %296 = vbcast.lane.b32.xlu0 %v294_v27, 256 }
  0x77   : > { %267 = vbcast.lane.b32.xlu1 %v261_v22, 264  ;;  %256 = vbcast.lane.b32.xlu0 %v250_v23, 264 }
  0x7b   : > { %289 = vbcast.lane.b32.xlu1 %v283_v24, 264  ;;  %278 = vbcast.lane.b32.xlu0 %v272_v25, 264 }
  0x7f   : > { %311 = vbcast.lane.b32.xlu1 %v305_v26, 264  ;;  %300 = vbcast.lane.b32.xlu0 %v294_v27, 264 }
  0xb5   : > { %v154_v35 = vpop.permute.xlu1 %153  ;;  %v143_v36 = vpop.permute.xlu0 %142 }
  0xb6   : > { %v314_v37 = vcombine.high %v143_v36, %v154_v35  ;;  %v313_v45 = vcombine.low %v143_v36, %v154_v35 }
  0xb8   : > { %v1896_v39 = vrot.slane %v314_v37, %v1890_v33  ;;  %v1906_v55 = vrot.slane %v313_v45, %v1890_v33 }
  0xb9   : > { %v158_v40 = vpop.permute.xlu1 %157  ;;  %v147_v41 = vpop.permute.xlu0 %146 }
  0xba   : > { %v362_v42 = vcombine.high %v1896_v39, %v1896_v39  ;;  %v729_v43 = vcombine.low %v147_v41, %v158_v40  ;;  %v730_v44 = vcombine.high %v147_v41, %v158_v40  ;;  %v345_v6 = vcombine.low %v1906_v55, %v1906_v55 }
  0xbc   : > { %v1901_v46 = vrot.slane %v362_v42, %v1893_v38  ;;  %v737_v47 = vrot.slane %v729_v43, %v1890_v33  ;;  %v744_v48 = vrot.slane %v730_v44, %v1890_v33  ;;  %v1947_v21 = vrot.slane %v345_v6, %v1893_v38 }
  0xbd   : > { %v169_v49 = vpop.permute.xlu1 %168  ;;  %v165_v50 = vpop.permute.xlu0 %164  ;;  %v346_v42 = vcombine.high %v1906_v55, %v1906_v55 }
  0xbe   : > { %v761_v51 = vcombine.low %v737_v47, %v737_v47  ;;  %v762_v52 = vcombine.high %v737_v47, %v737_v47  ;;  %v777_v53 = vcombine.low %v744_v48, %v744_v48  ;;  %v778_v54 = vcombine.high %v744_v48, %v744_v48  ;;  %2625 = vst [vmem:[#allocation12_spill] sm:$0xff] %v1947_v21 }
  0xc0   : > { %v1909_v58 = vrot.slane %v761_v51, %v1893_v38  ;;  %v1912_v59 = vrot.slane %v762_v52, %v1893_v38  ;;  %v1915_v60 = vrot.slane %v777_v53, %v1893_v38  ;;  %v1918_v61 = vrot.slane %v778_v54, %v1893_v38 }
  0xc1   : > { %v180_v56 = vpop.permute.xlu1 %179  ;;  %v176_v57 = vpop.permute.xlu0 %175 }
  0xc2   : > { %2621 = vst [vmem:[#allocation8_spill] sm:$0xff] %v1915_v60  ;;  %2622 = vst [vmem:[#allocation9_spill] sm:$0xff] %v1918_v61  ;;  %v745_v62 = vcombine.low %v169_v49, %v180_v56  ;;  %v746_v63 = vcombine.high %v169_v49, %v180_v56  ;;  %v329_v0 = vcombine.low %v165_v50, %v176_v57 }
  0xc3   : > { %v330_v1 = vcombine.high %v165_v50, %v176_v57 }
  0xc4   : > { %v753_v2 = vrot.slane %v745_v62, %v1890_v33  ;;  %v760_v3 = vrot.slane %v746_v63, %v1890_v33  ;;  %v1923_v4 = vrot.slane %v329_v0, %v1890_v33 }
  0xc5   : > { %v1926_v5 = vrot.slane %v330_v1, %v1890_v33  ;;  %v191_v7 = vpop.permute.xlu1 %190  ;;  %v187_v8 = vpop.permute.xlu0 %186 }
  0xc6   : > { %v793_v9 = vcombine.low %v753_v2, %v753_v2  ;;  %v794_v10 = vcombine.high %v753_v2, %v753_v2  ;;  %v809_v11 = vcombine.low %v760_v3, %v760_v3  ;;  %v810_v12 = vcombine.high %v760_v3, %v760_v3 }
  0xc7   : > { %v377_v13 = vcombine.low %v1923_v4, %v1923_v4  ;;  %v394_v14 = vcombine.high %v1926_v5, %v1926_v5  ;;  %v378_v43 = vcombine.high %v1923_v4, %v1923_v4 }
  0xc8   : > { %v1935_v15 = vrot.slane %v793_v9, %v1893_v38  ;;  %v1938_v16 = vrot.slane %v794_v10, %v1893_v38  ;;  %v1941_v17 = vrot.slane %v809_v11, %v1893_v38  ;;  %v1944_v18 = vrot.slane %v810_v12, %v1893_v38 }
  0xc9   : > { %v202_v19 = vpop.permute.xlu1 %201  ;;  %v198_v20 = vpop.permute.xlu0 %197  ;;  %v1950_v22 = vrot.slane %v377_v13, %v1893_v38  ;;  %v1953_v23 = vrot.slane %v394_v14, %v1893_v38 }
  0xca   : > { %2623 = vst [vmem:[#allocation10_spill] sm:$0xff] %v1941_v17  ;;  %2624 = vst [vmem:[#allocation11_spill] sm:$0xff] %v1944_v18  ;;  %v833_v24 = vcombine.low %v191_v7, %v202_v19  ;;  %v834_v25 = vcombine.high %v191_v7, %v202_v19  ;;  %v417_v26 = vcombine.low %v187_v8, %v198_v20 }
  0xcb   : > { %2626 = vst [vmem:[#allocation13_spill] sm:$0xff] %v1950_v22  ;;  %v418_v27 = vcombine.high %v187_v8, %v198_v20  ;;  %v410_v28 = vcombine.high %v1947_v21, %v1950_v22 }
  0xcc   : > { %v841_v29 = vrot.slane %v833_v24, %v1890_v33  ;;  %v848_v30 = vrot.slane %v834_v25, %v1890_v33  ;;  %v1963_v32 = vrot.slane %v417_v26, %v1890_v33 }
  0xcd   : > { %v1960_v31 = vrot.slane %v418_v27, %v1890_v33  ;;  %1149 = vrot.lane.b32.xlu0 %v410_v28, %s1737_s17  ;;  %v213_v34 = vpop.permute.xlu1 %212  ;;  %v209_v35 = vpop.permute.xlu0 %208  ;;  %v361_v27 = vcombine.low %v1896_v39, %v1896_v39  ;;  %v393_v28 = vcombine.low %v1926_v5, %v1926_v5 }
  0xce   : > { %v865_v41 = vcombine.low %v841_v29, %v841_v29  ;;  %v866_v44 = vcombine.high %v841_v29, %v841_v29  ;;  %v881_v51 = vcombine.low %v848_v30, %v848_v30  ;;  %v882_v52 = vcombine.high %v848_v30, %v848_v30 }
  0xcf   : > { %v466_v45 = vcombine.high %v1960_v31, %v1960_v31  ;;  %v449_v53 = vcombine.low %v1963_v32, %v1963_v32 }
  0xd0   : > { %v1979_v47 = vrot.slane %v865_v41, %v1893_v38  ;;  %v1993_v1 = vrot.slane %v866_v44, %v1893_v38  ;;  %v2010_v12 = vrot.slane %v881_v51, %v1893_v38  ;;  %v2017_v19 = vrot.slane %v882_v52, %v1893_v38 }
  0xd1   : > { %v224_v54 = vpop.permute.xlu1 %223  ;;  %v220_v55 = vpop.permute.xlu0 %219  ;;  %v1990_v56 = vrot.slane %v466_v45, %v1893_v38  ;;  %v2040_v45 = vrot.slane %v449_v53, %v1893_v38  ;;  %v2046_v52 = vrot.slane %v378_v43, %v1893_v38  ;;  %v2057_v53 = vrot.slane %v361_v27, %v1893_v38 }
  0xd2   : > { %v849_v57 = vcombine.low %v213_v34, %v224_v54  ;;  %v850_v62 = vcombine.high %v213_v34, %v224_v54  ;;  %v433_v63 = vcombine.low %v209_v35, %v220_v55  ;;  %v434_v0 = vcombine.high %v209_v35, %v220_v55  ;;  %2627 = vst [vmem:[#allocation14_spill] sm:$0xff] %v2010_v12 }
  0xd4   : > { %v857_v6 = vrot.slane %v849_v57, %v1890_v33  ;;  %v864_v7 = vrot.slane %v850_v62, %v1890_v33  ;;  %v2004_v8 = vrot.slane %v433_v63, %v1890_v33  ;;  %v2007_v9 = vrot.slane %v434_v0, %v1890_v33 }
  0xd5   : > { %v235_v10 = vpop.permute.xlu1 %234  ;;  %v231_v11 = vpop.permute.xlu0 %230 }
  0xd6   : > { %v897_v20 = vcombine.low %v857_v6, %v857_v6  ;;  %v898_v24 = vcombine.high %v857_v6, %v857_v6  ;;  %v913_v25 = vcombine.low %v864_v7, %v864_v7  ;;  %v914_v26 = vcombine.high %v864_v7, %v864_v7 }
  0xd7   : > { %v481_v29 = vcombine.low %v2004_v8, %v2004_v8  ;;  %v498_v30 = vcombine.high %v2007_v9, %v2007_v9  ;;  %v2054_v6 = vrot.slane %v346_v42, %v1893_v38  ;;  %v2060_v7 = vrot.slane %v393_v28, %v1893_v38 }
  0xd8   : > { %v2028_v34 = vrot.slane %v897_v20, %v1893_v38  ;;  %v2031_v35 = vrot.slane %v898_v24, %v1893_v38  ;;  %v2034_v41 = vrot.slane %v913_v25, %v1893_v38  ;;  %v2037_v39 = vrot.slane %v914_v26, %v1893_v38 }
  0xd9   : > { %v246_v44 = vpop.permute.xlu1 %245  ;;  %v242_v5 = vpop.permute.xlu0 %241  ;;  %v2043_v51 = vrot.slane %v481_v29, %v1893_v38  ;;  %v2049_v54 = vrot.slane %v498_v30, %v1893_v38  ;;  %v450_v42 = vcombine.high %v1963_v32, %v1963_v32  ;;  %v482_v29 = vcombine.high %v2004_v8, %v2004_v8 }
  0xda   : > { %2628 = vst [vmem:[#allocation15_spill] sm:$0xff] %v2031_v35  ;;  %2629 = vst [vmem:[#allocation16_spill] sm:$0xff] %v2034_v41  ;;  %v937_v55 = vcombine.low %v235_v10, %v246_v44  ;;  %v938_v57 = vcombine.high %v235_v10, %v246_v44  ;;  %v521_v62 = vcombine.low %v231_v11, %v242_v5 }
  0xdb   : > { %v522_v63 = vcombine.high %v231_v11, %v242_v5  ;;  %v514_v0 = vcombine.high %v2040_v45, %v2043_v51  ;;  %v2101_v3 = vrot.slane %v450_v42, %v1893_v38  ;;  %v2110_v49 = vrot.slane %v482_v29, %v1893_v38 }
  0xdc   : > { %v945_v43 = vrot.slane %v937_v55, %v1890_v33  ;;  %v2064_v20 = vrot.slane %v938_v57, %v1890_v33  ;;  %v2067_v10 = vrot.slane %v521_v62, %v1890_v33 }
  0xdd   : > { %v2070_v11 = vrot.slane %v522_v63, %v1890_v33  ;;  %1151 = vrot.lane.b32.xlu1 %v514_v0, %s1737_s17  ;;  %v264_v24 = vpop.permute.xlu1 %263  ;;  %v253_v25 = vpop.permute.xlu0 %252 }
  0xde   : > { %v969_v30 = vcombine.low %v945_v43, %v945_v43  ;;  %v970_v5 = vcombine.high %v945_v43, %v945_v43  ;;  %v985_v55 = vcombine.low %v2064_v20, %v2064_v20  ;;  %v553_v57 = vcombine.low %v2067_v10, %v2067_v10 }
  0xdf   : > { %v570_v62 = vcombine.high %v2070_v11, %v2070_v11  ;;  %v537_v63 = vcombine.low %v253_v25, %v264_v24  ;;  %v538_v0 = vcombine.high %v253_v25, %v264_v24 }
  0xe0   : > { %v2094_v8 = vrot.slane %v969_v30, %v1893_v38  ;;  %v2113_v14 = vrot.slane %v970_v5, %v1893_v38  ;;  %v2120_v28 = vrot.slane %v985_v55, %v1893_v38  ;;  %v2126_v29 = vrot.slane %v553_v57, %v1893_v38 }
  0xe1   : > { %v286_v13 = vpop.permute.xlu1 %285  ;;  %v275_v4 = vpop.permute.xlu0 %274  ;;  %v2106_v50 = vrot.slane %v570_v62, %v1893_v38  ;;  %v545_v24 = vrot.slane %v537_v63, %v1890_v33  ;;  %v554_v57 = vcombine.high %v2067_v10, %v2067_v10 }
  0xe2   : > { %v625_v25 = vcombine.low %v275_v4, %v286_v13  ;;  %v626_v30 = vcombine.high %v275_v4, %v286_v13  ;;  %v552_v4 = vrot.slane %v538_v0, %v1890_v33 }
  0xe3   : > { %v585_v13 = vcombine.low %v545_v24, %v545_v24  ;;  %v586_v27 = vcombine.high %v545_v24, %v545_v24 }
  0xe4   : > { %v633_v5 = vrot.slane %v625_v25, %v1890_v33  ;;  %v2130_v63 = vrot.slane %v626_v30, %v1890_v33  ;;  %v515_v30 = vcombine.low %v2101_v3, %v2110_v49  ;;  %v601_v62 = vcombine.low %v552_v4, %v552_v4 }
  0xe5   : > { %v308_v42 = vpop.permute.xlu1 %307  ;;  %v297_v40 = vpop.permute.xlu0 %296  ;;  %v2137_v26 = vrot.slane %v585_v13, %v1893_v38  ;;  %v602_v13 = vcombine.high %v552_v4, %v552_v4 }
  0xe6   : > { %v641_v37 = vcombine.low %v297_v40, %v308_v42  ;;  %v642_v0 = vcombine.high %v297_v40, %v308_v42  ;;  %v657_v25 = vcombine.low %v633_v5, %v633_v5  ;;  %v658_v55 = vcombine.high %v633_v5, %v633_v5 }
  0xe7   : > { %v618_v40 = vcombine.high %v2126_v29, %v2137_v26  ;;  %v674_v48 = vcombine.high %v2130_v63, %v2130_v63  ;;  %v2162_v42 = vrot.slane %v554_v57, %v1893_v38 }
  0xe8   : > { %v649_v43 = vrot.slane %v641_v37, %v1890_v33  ;;  %v2147_v24 = vrot.slane %v642_v0, %v1890_v33  ;;  %v2159_v0 = vrot.slane %v586_v27, %v1893_v38  ;;  %v2165_v10 = vrot.slane %v657_v25, %v1893_v38 }
  0xe9   : > { %v268_v2 = vpop.permute.xlu1 %267  ;;  %v257_v5 = vpop.permute.xlu0 %256  ;;  %1153 = vrot.lane.b32.xlu0 %v618_v40, %s1737_s17  ;;  %v2183_v25 = vrot.slane %v602_v13, %v1893_v38  ;;  %v2186_v61 = vrot.slane %v674_v48, %v1893_v38  ;;  %v2199_v13 = vrot.slane %v601_v62, %v1893_v38 }
  0xea   : > { %v689_v37 = vcombine.low %v649_v43, %v649_v43  ;;  %v690_v36 = vcombine.high %v649_v43, %v649_v43  ;;  %v953_v44 = vcombine.low %v257_v5, %v268_v2  ;;  %v954_v32 = vcombine.high %v257_v5, %v268_v2 }
  0xeb   : > { %v706_v18 = vcombine.high %v2147_v24, %v2147_v24  ;;  %v2173_v43 = vrot.slane %v658_v55, %v1893_v38  ;;  %v2630_v55 = vcombine.low %v2054_v6, %v2046_v52 }
  0xec   : > { %v2170_v4 = vrot.slane %v689_v37, %v1893_v38  ;;  %v2176_v27 = vrot.slane %v690_v36, %v1893_v38  ;;  %v961_v2 = vrot.slane %v953_v44, %v1890_v33  ;;  %v2180_v57 = vrot.slane %v954_v32, %v1890_v33 }
  0xed   : > { %v290_v40 = vpop.permute.xlu1 %289  ;;  %v279_v5 = vpop.permute.xlu0 %278  ;;  %1165 = vrot.lane.b32.xlu0 %v2630_v55, %s1738_s25  ;;  %v619_v36 = vcombine.low %v2162_v42, %v2159_v0  ;;  %v620_v44 = vcombine.high %v2162_v42, %v2159_v0 }
  0xee   : > { %v722_v32 = vcombine.high %v2165_v10, %v2170_v4  ;;  %v1001_v48 = vcombine.low %v961_v2, %v961_v2  ;;  %v1002_v37 = vcombine.high %v961_v2, %v961_v2  ;;  %v1017_v41 = vcombine.low %v2180_v57, %v2180_v57 }
  0xef   : > { %v723_v55 = vcombine.low %v2173_v43, %v2176_v27  ;;  %v1018_v12 = vcombine.high %v2180_v57, %v2180_v57  ;;  %v1041_v42 = vcombine.low %v279_v5, %v290_v40  ;;  %v1042_v0 = vcombine.high %v279_v5, %v290_v40 }
  0xf0   : > { %1155 = vrot.lane.b32.xlu1 %v722_v32, %s1737_s17  ;;  %v2213_v2 = vrot.slane %v706_v18, %v1893_v38  ;;  %v2216_v60 = vrot.slane %v1001_v48, %v1893_v38  ;;  %v2219_v57 = vrot.slane %v1002_v37, %v1893_v38  ;;  %v2631_v37 = vcombine.high %v2054_v6, %v2046_v52 }
  0xf1   : > { %v312_v21 = vpop.permute.xlu1 %311  ;;  %v301_v17 = vpop.permute.xlu0 %300  ;;  %1169 = vrot.lane.b32.xlu0 %v619_v36, %s1738_s25  ;;  %v1049_v32 = vrot.slane %v1041_v42, %v1890_v33  ;;  %v1056_v40 = vrot.slane %v1042_v0, %v1890_v33 }
  0xf2   : > { %v1057_v5 = vcombine.low %v301_v17, %v312_v21  ;;  %v1058_v22 = vcombine.high %v301_v17, %v312_v21  ;;  %v1033_v48 = vcombine.low %v2094_v8, %v2216_v60 }
  0xf3   : > { %v1073_v36 = vcombine.low %v1049_v32, %v1049_v32  ;;  %v1074_v42 = vcombine.high %v1049_v32, %v1049_v32  ;;  %v1089_v35 = vcombine.low %v1056_v40, %v1056_v40  ;;  %v1090_v0 = vcombine.high %v1056_v40, %v1056_v40 }
  0xf4   : > { %1167 = vrot.lane.b32.xlu1 %v515_v30, %s1738_s25  ;;  %v1065_v17 = vrot.slane %v1057_v5, %v1890_v33  ;;  %v1072_v21 = vrot.slane %v1058_v22, %v1890_v33  ;;  %v2250_v33 = vrot.slane %v1017_v41, %v1893_v38 }
  0xf5   : > { %1181 = vrot.lane.b32.xlu0 %v2631_v37, %s1739_s27  ;;  %v2244_v30 = vrot.slane %v1073_v36, %v1893_v38  ;;  %v2247_v32 = vrot.slane %v1074_v42, %v1893_v38  ;;  %v2253_v22 = vrot.slane %v1089_v35, %v1893_v38  ;;  %v2632_v35 = vcombine.high %v2064_v20, %v2064_v20 }
  0xf6   : > { %v1105_v40 = vcombine.low %v1065_v17, %v1065_v17  ;;  %v1106_v5 = vcombine.high %v1065_v17, %v1065_v17  ;;  %v1121_v62 = vcombine.low %v1072_v21, %v1072_v21  ;;  %v1122_v18 = vcombine.high %v1072_v21, %v1072_v21 }
  0xf7   : > { %v1037_v52 = vcombine.low %v2120_v28, %v2250_v33  ;;  %v1038_v6 = vcombine.high %v2120_v28, %v2250_v33  ;;  %v2266_v41 = vrot.slane %v2632_v35, %v1893_v38  ;;  %v2278_v17 = vrot.slane %v1018_v12, %v1893_v38 }
  0xf8   : > { %1171 = vrot.lane.b32.xlu1 %v723_v55, %s1738_s25  ;;  %v2269_v36 = vrot.slane %v1105_v40, %v1893_v38  ;;  %v2272_v55 = vrot.slane %v1106_v5, %v1893_v38  ;;  %v2275_v42 = vrot.slane %v1121_v62, %v1893_v38  ;;  %v2284_v20 = vrot.slane %v1090_v0, %v1893_v38 }
  0xf9   : > { %1185 = vrot.lane.b32.xlu0 %v620_v44, %s1739_s27  ;;  %v2287_v40 = vrot.slane %v1122_v18, %v1893_v38  ;;  %v2633_v18 = vcombine.high %v2101_v3, %v2110_v49  ;;  %v2634_v21 = vcombine.low %v2007_v9, %v2007_v9  ;;  %v705_v5 = vcombine.low %v2147_v24, %v2147_v24 }
  0xfa   : > { %v1137_v62 = vcombine.low %v2244_v30, %v2269_v36  ;;  %v1138_v12 = vcombine.high %v2244_v30, %v2269_v36  ;;  %v1139_v44 = vcombine.low %v2247_v32, %v2272_v55  ;;  %v1140_v35 = vcombine.high %v2247_v32, %v2272_v55  ;;  %v2670_v55 = vld [vmem:[#allocation11_spill] sm:$0xff] }
  0xfb   : > { %v1141_v0 = vcombine.low %v2253_v22, %v2275_v42  ;;  %v505_v37 = vrot.slane %v2634_v21, %v1893_v38  ;;  %v2635_v36 = vcombine.low %v2057_v53, %v2060_v7  ;;  %v2636_v9 = vcombine.low %v2070_v11, %v2070_v11 }
  0xfc   : > { %1183 = vrot.lane.b32.xlu1 %v2633_v18, %s1739_s27  ;;  %v724_v3 = vcombine.high %v2173_v43, %v2176_v27  ;;  %v721_v18 = vcombine.low %v2165_v10, %v2170_v4  ;;  %v673_v24 = vcombine.low %v2130_v63, %v2130_v63  ;;  %v713_v43 = vrot.slane %v705_v5, %v1893_v38 }
  0xfd   : > { %1197 = vrot.lane.b32.xlu0 %v2635_v36, %s1740_s28  ;;  %v577_v21 = vrot.slane %v2636_v9, %v1893_v38  ;;  %v2637_v36 = vcombine.low %v1960_v31, %v1960_v31  ;;  %v414_v27 = vcombine.high %v2057_v53, %v2060_v7  ;;  %v2638_v5 = vcombine.low %v1901_v46, %v1953_v23 }
  0xfe   : > { %v681_v63 = vrot.slane %v673_v24, %v1893_v38  ;;  %v2640_v7 = vcombine.low %v1990_v56, %v2049_v54  ;;  %v2662_v24 = vld [vmem:[#allocation13_spill] sm:$0xff]  ;;  %v2674_v28 = vcombine.low %v2266_v41, %v2278_v17  ;;  %v2675_v33 = vcombine.low %v2017_v19, %v2037_v39 }
  0xff   : > { %v621_v49 = vcombine.low %v577_v21, %v2199_v13  ;;  %v473_v30 = vrot.slane %v2637_v36, %v1893_v38  ;;  %v622_v9 = vcombine.high %v577_v21, %v2199_v13  ;;  %v2639_v38 = vcombine.low %v2106_v50, %v2183_v25 }
 0x100   : > { %1187 = vrot.lane.b32.xlu1 %v724_v3, %s1739_s27  ;;  %v725_v3 = vcombine.low %v681_v63, %v713_v43  ;;  %v726_v53 = vcombine.high %v681_v63, %v713_v43  ;;  %v2641_v13 = vcombine.high %v1901_v46, %v1953_v23  ;;  %v2645_v21 = vcombine.low %v1909_v58, %v1935_v15  ;;  %s2551_s27 = scalar_lea.hbm %s2598_s1, %s1567_s30 }
 0x101   : > { %1201 = vrot.lane.b32.xlu0 %v621_v49, %s1740_s28  ;;  %v517_v11 = vcombine.low %v473_v30, %v505_v37  ;;  %v518_v31 = vcombine.high %v473_v30, %v505_v37  ;;  %v2642_v37 = vcombine.low %v2186_v61, %v2213_v2  ;;  %v2643_v30 = vcombine.high %v2106_v50, %v2183_v25 }
 0x102   : > { %v2644_v49 = vcombine.high %v1990_v56, %v2049_v54  ;;  %v2646_v46 = vcombine.high %v2186_v61, %v2213_v2  ;;  %v2647_v23 = vcombine.low %v1979_v47, %v2028_v34  ;;  %v2648_v50 = vcombine.high %v1909_v58, %v1935_v15  ;;  %v2653_v58 = vld [vmem:[#allocation15_spill] sm:$0xff]  ;;  %v2659_v2 = vld [vmem:[#allocation10_spill] sm:$0xff] }
 0x103   : > { %v2649_v56 = vcombine.high %v2094_v8, %v2216_v60  ;;  %v2650_v61 = vcombine.high %v1979_v47, %v2028_v34  ;;  %v2651_v54 = vcombine.low %v1912_v59, %v1938_v16  ;;  %v2652_v25 = vcombine.low %v2113_v14, %v2219_v57  ;;  %v2658_v8 = vld [vmem:[#allocation8_spill] sm:$0xff] }
 0x104   : > { %1199 = vrot.lane.b32.xlu1 %v517_v11, %s1740_s28  ;;  %v2654_v15 = vcombine.low %v1993_v1, %v2653_v58  ;;  %v2655_v60 = vcombine.high %v1912_v59, %v1938_v16  ;;  %v2656_v47 = vcombine.high %v2113_v14, %v2219_v57  ;;  %v2657_v34 = vcombine.high %v1993_v1, %v2653_v58  ;;  %v2664_v1 = vld [vmem:[#allocation14_spill] sm:$0xff]  ;;  %v2665_v14 = vld [vmem:[#allocation16_spill] sm:$0xff] }
 0x105   : > { %1213 = vrot.lane.b32.xlu0 %v414_v27, %s1741_s29  ;;  %v2666_v57 = vcombine.low %v2664_v1, %v2665_v14  ;;  %v2668_v32 = vcombine.high %v2664_v1, %v2665_v14  ;;  %v2672_v11 = vcombine.low %v2040_v45, %v2043_v51  ;;  %v2677_v45 = vcombine.low %v2284_v20, %v2287_v40 }
 0x106   : > { %v2678_v51 = vcombine.high %v2266_v41, %v2278_v17  ;;  %v2680_v27 = vcombine.low %v2126_v29, %v2137_v26 }
 0x108   : > { %1203 = vrot.lane.b32.xlu1 %v725_v3, %s1740_s28 }
 0x109   : > { %1217 = vrot.lane.b32.xlu0 %v622_v9, %s1741_s29  ;;  %v2681_v9 = vcombine.high %v2284_v20, %v2287_v40 }
 0x10c   : > { %1215 = vrot.lane.b32.xlu1 %v518_v31, %s1741_s29 }
 0x10d   : > { %1229 = vrot.lane.b32.xlu0 %v2638_v5, %s1742_s2 }
 0x110   : > { %1219 = vrot.lane.b32.xlu1 %v726_v53, %s1741_s29  ;;  %s1664_s29 = scalar_lea.vmem %s2545_s26, 512 }
 0x111   : > { %1233 = vrot.lane.b32.xlu0 %v2639_v38, %s1742_s2  ;;  %p1665_p6 = scmp.ne.s32.totalorder %s2545_s26, %s1664_s29 }
 0x113   : > { %p1666_p11 = pnand %p1665_p6, %p2682_p10 }
 0x114   : > { %1231 = vrot.lane.b32.xlu1 %v2640_v7, %s1742_s2 }
 0x115   : > { %1245 = vrot.lane.b32.xlu0 %v2641_v13, %s1743_s3  ;;  %p1667_p12 = pneg %p1666_p11 }
 0x118   : > { %1235 = vrot.lane.b32.xlu1 %v2642_v37, %s1742_s2  ;;  %s1752_s2 = smov [#allocation5]  }
 0x119   : > { %1249 = vrot.lane.b32.xlu0 %v2643_v30, %s1743_s3 }
 0x11c   : > { %1247 = vrot.lane.b32.xlu1 %v2644_v49, %s1743_s3 }
 0x11d   : > { %1261 = vrot.lane.b32.xlu0 %v2645_v21, %s1744_s4 }
 0x120   : > { %1251 = vrot.lane.b32.xlu1 %v2646_v46, %s1743_s3  ;;  %s1668_s3 = sshll.u32 %s1752_s2, 4  ;;  %s1669_s3 = int_to_ptr.vmem [resolvable:$false] %s1668_s3 }
 0x121   : > { %1265 = vrot.lane.b32.xlu0 %v1033_v48, %s1744_s4  ;;  %v2660_v48 = vcombine.low %v2658_v8, %v2659_v2  ;;  %p1671_p8 = scmp.lt.s32.totalorder %s2545_s26, %s1669_s3 }
 0x124   : > { %1263 = vrot.lane.b32.xlu1 %v2647_v23, %s1744_s4 }
 0x125   : > { %1277 = vrot.lane.b32.xlu0 %v2648_v50, %s1745_s5 }
 0x128   : > { %1267 = vrot.lane.b32.xlu1 %v1137_v62, %s1744_s4  ;;  %s1670_s4 = scalar_lea.vmem %s1669_s3, 1024 }
 0x129   : > { %1281 = vrot.lane.b32.xlu0 %v2649_v56, %s1745_s5  ;;  %p1672_p9 = scmp.lt.s32.totalorder %s1670_s4, %s1664_s29 }
 0x12b   : > { %p1673_p13 = por %p1672_p9, %p1671_p8 }
 0x12c   : > { %1279 = vrot.lane.b32.xlu1 %v2650_v61, %s1745_s5 }
 0x12d   : > { %1293 = vrot.lane.b32.xlu0 %v2651_v54, %s1746_s11  ;;  %p1674_p1 = pnand %p1673_p13, %p1667_p12 }
 0x130   : > { %1283 = vrot.lane.b32.xlu1 %v1138_v12, %s1745_s5  ;;  %v2661_v12 = vld [vmem:[#allocation12_spill] sm:$0xff] }
 0x131   : > { %1297 = vrot.lane.b32.xlu0 %v2652_v25, %s1746_s11  ;;  %v2663_v59 = vcombine.low %v2661_v12, %v2662_v24 }
 0x134   : > { %1295 = vrot.lane.b32.xlu1 %v2654_v15, %s1746_s11 }
 0x135   : > { %1309 = vrot.lane.b32.xlu0 %v2655_v60, %s1747_s13 }
 0x138   : > { %1299 = vrot.lane.b32.xlu1 %v1139_v44, %s1746_s11  ;;  %v2667_v44 = vcombine.high %v2658_v8, %v2659_v2 }
 0x139   : > { %1313 = vrot.lane.b32.xlu0 %v2656_v47, %s1747_s13 }
 0x13c   : > { %1311 = vrot.lane.b32.xlu1 %v2657_v34, %s1747_s13 }
 0x13d   : > { %1325 = vrot.lane.b32.xlu0 %v2660_v48, %s1748_s14 }
 0x13f   : > { %v1150_v62 = vpop.permute.xlu0 %1149 }
 0x140   : > { %v1386_v16 = vsel %vm1385_vm0, %v2663_v59, %v1150_v62  ;;  %1315 = vrot.lane.b32.xlu1 %v1140_v35, %s1747_s13 }
 0x141   : > { %1329 = vrot.lane.b32.xlu0 %v1037_v52, %s1748_s14  ;;  %v2669_v52 = vld [vmem:[#allocation9_spill] sm:$0xff] }
 0x142   : > { %v2671_v35 = vcombine.low %v2669_v52, %v2670_v55 }
 0x144   : > { %1327 = vrot.lane.b32.xlu1 %v2666_v57, %s1748_s14 }
 0x145   : > { %1341 = vrot.lane.b32.xlu0 %v2667_v44, %s1749_s16 }
 0x148   : > { %1331 = vrot.lane.b32.xlu1 %v1141_v0, %s1748_s14  ;;  %v2673_v0 = vcombine.high %v2253_v22, %v2275_v42  ;;  %v2679_v42 = vcombine.high %v2017_v19, %v2037_v39 }
 0x149   : > { %1345 = vrot.lane.b32.xlu0 %v1038_v6, %s1749_s16  ;;  %v2676_v6 = vcombine.high %v2669_v52, %v2670_v55 }
 0x14c   : > { %1343 = vrot.lane.b32.xlu1 %v2668_v32, %s1749_s16 }
 0x14d   : > { %1357 = vrot.lane.b32.xlu0 %v2671_v35, %s1750_s20 }
 0x14f   : > { %v1152_v36 = vpop.permute.xlu1 %1151 }
 0x150   : > { %v1387_v43 = vsel %vm1385_vm0, %v2672_v11, %v1152_v36  ;;  %1347 = vrot.lane.b32.xlu1 %v2673_v0, %s1749_s16 }
 0x151   : > { %1361 = vrot.lane.b32.xlu0 %v2674_v28, %s1750_s20 }
 0x154   : > { %1359 = vrot.lane.b32.xlu1 %v2675_v33, %s1750_s20 }
 0x155   : > { %1373 = vrot.lane.b32.xlu0 %v2676_v6, %s1751_s21 }
 0x158   : > { %1363 = vrot.lane.b32.xlu1 %v2677_v45, %s1750_s20 }
 0x159   : > { %1377 = vrot.lane.b32.xlu0 %v2678_v51, %s1751_s21 }
 0x15b   : > { %v1154_v22 = vpop.permute.xlu0 %1153 }
 0x15c   : > { %1375 = vrot.lane.b32.xlu1 %v2679_v42, %s1751_s21  ;;  %v1388_v63 = vsel %vm1385_vm0, %v2680_v27, %v1154_v22 }
 0x15f   : > { %v1166_v3 = vpop.permute.xlu0 %1165 }
 0x160   : > { %1379 = vrot.lane.b32.xlu1 %v2681_v9, %s1751_s21  ;;  %v1391_v31 = vsel %vm1390_vm1, %v1386_v16, %v1166_v3 }
 0x162   : > { %v1156_v5 = vpop.permute.xlu1 %1155 }
 0x163   : > { %v1389_v41 = vsel %vm1385_vm0, %v721_v18, %v1156_v5  ;;  %v1170_v19 = vpop.permute.xlu0 %1169 }
 0x164   : > { %v1393_v39 = vsel %vm1390_vm1, %v1388_v63, %v1170_v19 }
 0x166   : > { %v1168_v17 = vpop.permute.xlu1 %1167 }
 0x167   : > { %v1392_v26 = vsel %vm1390_vm1, %v1387_v43, %v1168_v17  ;;  %v1182_v29 = vpop.permute.xlu0 %1181 }
 0x168   : > { %v1396_v53 = vsel %vm1395_vm2, %v1391_v31, %v1182_v29 }
 0x16a   : > { %v1172_v38 = vpop.permute.xlu1 %1171 }
 0x16b   : > { %v1394_v7 = vsel %vm1390_vm1, %v1389_v41, %v1172_v38  ;;  %v1186_v13 = vpop.permute.xlu0 %1185 }
 0x16c   : > { %v1398_v37 = vsel %vm1395_vm2, %v1393_v39, %v1186_v13 }
 0x16e   : > { %v1184_v20 = vpop.permute.xlu1 %1183 }
 0x16f   : > { %v1397_v40 = vsel %vm1395_vm2, %v1392_v26, %v1184_v20  ;;  %v1198_v30 = vpop.permute.xlu0 %1197 }
 0x170   : > { %v1401_v49 = vsel %vm1400_vm3, %v1396_v53, %v1198_v30 }
 0x172   : > { %v1188_v21 = vpop.permute.xlu1 %1187 }
 0x173   : > { %v1399_v10 = vsel %vm1395_vm2, %v1394_v7, %v1188_v21  ;;  %v1202_v4 = vpop.permute.xlu0 %1201 }
 0x174   : > { %v1403_v18 = vsel %vm1400_vm3, %v1398_v37, %v1202_v4 }
 0x176   : > { %v1200_v46 = vpop.permute.xlu1 %1199 }
 0x177   : > { %v1402_v23 = vsel %vm1400_vm3, %v1397_v40, %v1200_v46  ;;  %v1214_v50 = vpop.permute.xlu0 %1213 }
 0x178   : > { %v1406_v56 = vsel %vm1405_vm4, %v1401_v49, %v1214_v50 }
 0x17a   : > { %v1204_v61 = vpop.permute.xlu1 %1203 }
 0x17b   : > { %v1404_v54 = vsel %vm1400_vm3, %v1399_v10, %v1204_v61  ;;  %v1218_v25 = vpop.permute.xlu0 %1217 }
 0x17c   : > { %v1408_v58 = vsel %vm1405_vm4, %v1403_v18, %v1218_v25 }
 0x17e   : > { %v1216_v15 = vpop.permute.xlu1 %1215 }
 0x17f   : > { %v1407_v60 = vsel %vm1405_vm4, %v1402_v23, %v1216_v15  ;;  %v1230_v47 = vpop.permute.xlu0 %1229 }
 0x180   : > { %v1411_v31 = vsel %vm1410_vm5, %v1406_v56, %v1230_v47 }
 0x182   : > { %v1220_v34 = vpop.permute.xlu1 %1219 }
 0x183   : > { %v2478_v8 = vsel %vm1405_vm4, %v1404_v54, %v1220_v34  ;;  %v1234_v2 = vpop.permute.xlu0 %1233 }
 0x184   : > { %v1413_v26 = vsel %vm1410_vm5, %v1408_v58, %v1234_v2 }
 0x186   : > { %v1232_v48 = vpop.permute.xlu1 %1231 }
 0x187   : > { %v1246_v62 = vpop.permute.xlu0 %1245  ;;  %v1412_v13 = vsel %vm1410_vm5, %v1407_v60, %v1232_v48 }
 0x188   : > { %v1416_v41 = vsel %vm1415_vm6, %v1411_v31, %v1246_v62 }
 0x18a   : > { %v2480_v12 = vpop.permute.xlu1 %1235 }
 0x18b   : > { %v1250_v24 = vpop.permute.xlu0 %1249  ;;  %v1414_v61 = vsel %vm1410_vm5, %v2478_v8, %v2480_v12 }
 0x18c   : > { %v1418_v38 = vsel %vm1415_vm6, %v1413_v26, %v1250_v24 }
 0x18e   : > { %v1248_v59 = vpop.permute.xlu1 %1247 }
 0x18f   : > { %v1262_v16 = vpop.permute.xlu0 %1261  ;;  %v1417_v30 = vsel %vm1415_vm6, %v1412_v13, %v1248_v59 }
 0x190   : > { %v1421_v19 = vsel %vm1420_vm7, %v1416_v41, %v1262_v16 }
 0x192   : > { %v2482_v1 = vpop.permute.xlu1 %1251 }
 0x193   : > { %v1266_v14 = vpop.permute.xlu0 %1265  ;;  %v1419_v15 = vsel %vm1415_vm6, %v1414_v61, %v2482_v1 }
 0x194   : > { %v1423_v37 = vsel %vm1420_vm7, %v1418_v38, %v1266_v14 }
 0x196   : > { %v1264_v57 = vpop.permute.xlu1 %1263 }
 0x197   : > { %v1278_v44 = vpop.permute.xlu0 %1277  ;;  %v1422_v10 = vsel %vm1420_vm7, %v1417_v30, %v1264_v57 }
 0x198   : > { %v1426_v17 = vsel %vm1425_vm8, %v1421_v19, %v1278_v44 }
 0x19a   : > { %v2484_v32 = vpop.permute.xlu1 %1267 }
 0x19b   : > { %v1282_v52 = vpop.permute.xlu0 %1281  ;;  %v1424_v34 = vsel %vm1420_vm7, %v1419_v15, %v2484_v32 }
 0x19c   : > { %v1428_v49 = vsel %vm1425_vm8, %v1423_v37, %v1282_v52 }
 0x19e   : > { %v1280_v55 = vpop.permute.xlu1 %1279 }
 0x19f   : > { %v1294_v35 = vpop.permute.xlu0 %1293  ;;  %v1427_v23 = vsel %vm1425_vm8, %v1422_v10, %v1280_v55 }
 0x1a0   : > { %v1431_v29 = vsel %vm1430_vm9, %v1426_v17, %v1294_v35 }
 0x1a2   : > { %v2486_v36 = vpop.permute.xlu1 %1283 }
 0x1a3   : > { %v1298_v11 = vpop.permute.xlu0 %1297  ;;  %v1429_v62 = vsel %vm1425_vm8, %v1424_v34, %v2486_v36 }
 0x1a4   : > { %v1433_v4 = vsel %vm1430_vm9, %v1428_v49, %v1298_v11 }
 0x1a6   : > { %v1296_v43 = vpop.permute.xlu1 %1295 }
 0x1a7   : > { %v1310_v0 = vpop.permute.xlu0 %1309  ;;  %v1432_v54 = vsel %vm1430_vm9, %v1427_v23, %v1296_v43 }
 0x1a8   : > { %v1436_v7 = vsel %vm1435_vm10, %v1431_v29, %v1310_v0 }
 0x1aa   : > { %v2488_v28 = vpop.permute.xlu1 %1299 }
 0x1ab   : > { %v1314_v33 = vpop.permute.xlu0 %1313  ;;  %v1434_v59 = vsel %vm1430_vm9, %v1429_v62, %v2488_v28 }
 0x1ac   : > { %v1438_v50 = vsel %vm1435_vm10, %v1433_v4, %v1314_v33 }
 0x1ae   : > { %v1312_v6 = vpop.permute.xlu1 %1311 }
 0x1af   : > { %v1326_v45 = vpop.permute.xlu0 %1325  ;;  %v1437_v60 = vsel %vm1435_vm10, %v1432_v54, %v1312_v6 }
 0x1b0   : > { %v1441_v20 = vsel %vm1440_vm11, %v1436_v7, %v1326_v45 }
 0x1b2   : > { %v2490_v51 = vpop.permute.xlu1 %1315 }
 0x1b3   : > { %v1330_v22 = vpop.permute.xlu0 %1329  ;;  %v1439_v14 = vsel %vm1435_vm10, %v1434_v59, %v2490_v51 }
 0x1b4   : > { %v1443_v25 = vsel %vm1440_vm11, %v1438_v50, %v1330_v22 }
 0x1b6   : > { %v1328_v42 = vpop.permute.xlu1 %1327 }
 0x1b7   : > { %v1342_v27 = vpop.permute.xlu0 %1341  ;;  %v1442_v8 = vsel %vm1440_vm11, %v1437_v60, %v1328_v42 }
 0x1b8   : > { %v1446_v21 = vsel %vm1445_vm12, %v1441_v20, %v1342_v27 }
 0x1ba   : > { %v2492_v63 = vpop.permute.xlu1 %1331 }
 0x1bb   : > { %v1346_v3 = vpop.permute.xlu0 %1345  ;;  %v1444_v44 = vsel %vm1440_vm11, %v1439_v14, %v2492_v63 }
 0x1bc   : > { %v1448_v47 = vsel %vm1445_vm12, %v1443_v25, %v1346_v3 }
 0x1be   : > { %v1344_v9 = vpop.permute.xlu1 %1343 }
 0x1bf   : > { %v1358_v5 = vpop.permute.xlu0 %1357  ;;  %v1447_v12 = vsel %vm1445_vm12, %v1442_v8, %v1344_v9 }
 0x1c0   : > { %v1451_v18 = vsel %vm1450_vm13, %v1446_v21, %v1358_v5 }
 0x1c2   : > { %v1348_v39 = vpop.permute.xlu1 %1347 }
 0x1c3   : > { %v1362_v53 = vpop.permute.xlu0 %1361  ;;  %v1449_v32 = vsel %vm1445_vm12, %v1444_v44, %v1348_v39 }
 0x1c4   : > { %v1453_v2 = vsel %vm1450_vm13, %v1448_v47, %v1362_v53 }
 0x1c6   : > { %v1360_v40 = vpop.permute.xlu1 %1359 }
 0x1c7   : > { %v1374_v46 = vpop.permute.xlu0 %1373  ;;  %v1452_v16 = vsel %vm1450_vm13, %v1447_v12, %v1360_v40 }
 0x1c8   : > { %v1456_v56 = vsel %vm1455_vm14, %v1451_v18, %v1374_v46 }
 0x1c9   : > { %1461 = vst.msk [vmem:[%s134_s24] sm:$0xff] %vm1460_vm15, %v1456_v56 }
 0x1ca   : > { %v1364_v58 = vpop.permute.xlu1 %1363 }
 0x1cb   : > { %v1378_v48 = vpop.permute.xlu0 %1377  ;;  %v1454_v52 = vsel %vm1450_vm13, %v1449_v32, %v1364_v58 }
 0x1cc   : > { %v1458_v24 = vsel %vm1455_vm14, %v1453_v2, %v1378_v48 }
 0x1cd   : > { %1463 = vst.msk [vmem:[%s134_s24 + $0x10] sm:$0xff] %vm1460_vm15, %v1458_v24 }
 0x1ce   : > { %v1376_v1 = vpop.permute.xlu1 %1375 }
 0x1cf   : > { %v1457_v57 = vsel %vm1455_vm14, %v1452_v16, %v1376_v1 }
 0x1d0   : > { %1462 = vst.msk [vmem:[%s134_s24 + $0x8] sm:$0xff] %vm1460_vm15, %v1457_v57 }
 0x1d2   : > { %v1380_v55 = vpop.permute.xlu1 %1379 }
 0x1d3   : > { %v1459_v35 = vsel %vm1455_vm14, %v1454_v52, %v1380_v55 }
 0x1d4   : > { %1464 = vst.msk [vmem:[%s134_s24 + $0x18] sm:$0xff] %vm1460_vm15, %v1459_v35 }
 0x1d5   : > { %1677 = shalt.err (!%p1674_p1)
}
 0x1d6   : > { %s1678_s5 = scalar_lea.hbm %s2551_s27, 512  ;;  %s1682_s14 = scalar_lea.hbm %s2598_s1, 4096 }
 0x1d7   : > { %p1679_p3 = scmp.ne.s32.totalorder %s2551_s27, %s1678_s5  ;;  %p1683_p0 = scmp.lt.u32.totalorder %s2551_s27, %s2598_s1 }
 0x1d8   : > { %p1684_p2 = scmp.lt.u32.totalorder %s1682_s14, %s1678_s5  ;;  %p1686_p6 = scmp.lt.u32.totalorder %s1678_s5, %s2551_s27 }
 0x1d9   : > { %p1680_p4 = pnand %p1679_p3, %p2682_p10 }
 0x1da   : > { %p1685_p7 = por %p1684_p2, %p1683_p0 }
 0x1db   : > { %p1681_p5 = pneg %p1680_p4 }
 0x1dc   : > { %p1687_p11 = por %p1686_p6, %p1685_p7 }
 0x1de   : > { %p1688_p12 = pnand %p1687_p11, %p1681_p5 }
 0x1e0   : > { %1691 = shalt.err (!%p1688_p12)
}
 0x1e1   : > { %s1753_s21 = smov 128  }
 0x1e2   : > { %1570 = dma.vmem_to_hbm [thread:$0]  (%p2682_p10), %s2545_s26, 512, %s2551_s27, %s1466_s10, %s1753_s21, %s1753_s21, %s1740_s28  }
 0x1e3 PF: > { %p1581_p8 = scmp.ge.s32.totalorder %s1730_s9, 2  ;;  %s1494_s22 = sand.u32 1, %s1718_s6  }
 0x1e4   : > { %p2683_p9 = scmp.ne.s32.totalorder %s2619_s19, 0  ;;  %s1495_s24 = scalar_lea.sflag [#allocation4], %s1494_s22 }
 0x1e6   : > { %p1577_p13 = pnand %p1581_p8, %p2683_p9 }
 0x1e8   : > { %1713 = dma.done.wait (!%p1577_p13), %s1495_s24, 512  }
 0x1e9   : > { %1715 = vsyncadd (!%p1577_p13), %s1495_s24, 4294966784  ;;  %p14_p1 = scmp.ge.s32.totalorder %s1789_s12, 10   ;;  %s2684_s6 = smov %s1722_s7 }
 0x1ea   : > { %s2685_s7 = smov %s1726_s8  ;;  %s2686_s8 = smov %s1801_s15 }
 0x1eb   : > { %s2687_s9 = smov %s1789_s12  ;;  %16 = sbr.rel (!%p14_p1) target bundleno = 5 (0x5), region = 69 }
 0x1f2   :  { %1500 = vsyncpa [#allocation3], 1 }
 0x1f3   :  { %1502 = vsyncpa [#allocation3 + $0x1], 1 }
 0x1f4   :  { %1503 = vsyncpa [#allocation4], 1 }
 0x1f5   :  { %1505 = vsyncpa [#allocation4 + $0x1], 1 }

</bundles_post_ra>
